<compile_context>
chip_gen: v7x
topology: tpu7x:2x2x1
jax: 0.10.0
libtpu: 0.0.40
codegen_flags: <defaults>
</compile_context>

<pallas_src>
import functools

import jax
import jax.numpy as jnp
from jax.experimental import pallas as pl
from jax.experimental.pallas import tpu as pltpu


def _round_up(x, m):
    return ((x + m - 1) // m) * m


# ----------------------------------------------------------------------------
# Pallas kernels
# ----------------------------------------------------------------------------
def matmul_bias_relu_kernel(a_ref, w_ref, b_ref, o_ref):
    # a: (TM, K) bf16, w: (K, Cout) bf16, b: (1, Cout) f32 -> o: (TM, Cout) bf16
    acc = jnp.dot(a_ref[...], w_ref[...], preferred_element_type=jnp.float32)
    o_ref[...] = jnp.maximum(acc + b_ref[...], 0.0).astype(o_ref.dtype)


def conv_s1_relu_kernel(x_ref, w_ref, b_ref, o_ref, *, kh, kw, wp, m):
    # Fused direct conv + ReLU (stride 1), one image per grid step.
    #   x_ref: (1, Lx, Cin)   flattened zero-padded image (row-major H, W)
    #   w_ref: (kh*kw, Cin, Cout) bf16
    #   b_ref: (1, Cout) f32
    #   o_ref: (1, M, Cout)   M = OH * Wpad (over-computed cols cropped by caller)
    cout = o_ref.shape[-1]
    acc = jnp.zeros((m, cout), jnp.float32)
    for i in range(kh):
        for j in range(kw):
            start = i * wp + j                      # static slice per tap
            a = x_ref[0, start:start + m, :]
            acc += jnp.dot(a, w_ref[i * kw + j],
                           preferred_element_type=jnp.float32)
    o_ref[0] = jnp.maximum(acc + b_ref[...], 0.0).astype(o_ref.dtype)


def maxpool3x3s2_kernel(ee_ref, eo_ref, oe_ref, oo_ref, o_ref, *, oh, ow):
    # 3x3 / stride-2 max pool from four even/odd parity planes (all slices are
    # contiguous; the 9-tap window extraction is fused here, never hits HBM).
    ee = ee_ref[0]
    eo = eo_ref[0]
    oe = oe_ref[0]
    oo = oo_ref[0]
    m = jnp.maximum
    r = m(m(ee[:oh, :ow, :], ee[:oh, 1:ow + 1, :]),
          m(ee[1:oh + 1, :ow, :], ee[1:oh + 1, 1:ow + 1, :]))
    r = m(r, m(eo[:oh, :ow, :], eo[1:oh + 1, :ow, :]))
    r = m(r, m(oe[:oh, :ow, :], oe[:oh, 1:ow + 1, :]))
    r = m(r, oo[:oh, :ow, :])
    o_ref[0] = r


# ----------------------------------------------------------------------------
# Layer wrappers
# ----------------------------------------------------------------------------
def _im2col(x_nhwc, kh, kw, stride, pad):
    x = jnp.pad(x_nhwc, ((0, 0), (pad, pad), (pad, pad), (0, 0)))
    n, h, w, c = x.shape
    oh = (h - kh) // stride + 1
    ow = (w - kw) // stride + 1
    cols = []
    for i in range(kh):
        for j in range(kw):
            cols.append(x[:, i:i + stride * oh:stride, j:j + stride * ow:stride, :])
    patches = jnp.stack(cols, axis=3).reshape(n * oh * ow, kh * kw * c)
    return patches, oh, ow


def conv2d_relu_im2col(x_nhwc, w_mat, bias_row, kh, kw, stride, pad, tm=256):
    # conv1 path (C_in=3): small bf16 im2col + fused matmul+bias+ReLU.
    n = x_nhwc.shape[0]
    patches, oh, ow = _im2col(x_nhwc, kh, kw, stride, pad)
    m, k = patches.shape
    cout = w_mat.shape[1]
    mp = _round_up(m, tm)
    if mp != m:
        patches = jnp.pad(patches, ((0, mp - m), (0, 0)))

    out = pl.pallas_call(
        matmul_bias_relu_kernel,
        out_shape=jax.ShapeDtypeStruct((mp, cout), x_nhwc.dtype),
        grid_spec=pltpu.PrefetchScalarGridSpec(
            num_scalar_prefetch=0,
            grid=(mp // tm,),
            in_specs=[
                pl.BlockSpec((tm, k), lambda i: (i, 0)),
                pl.BlockSpec((k, cout), lambda i: (0, 0)),
                pl.BlockSpec((1, cout), lambda i: (0, 0)),
            ],
            out_specs=pl.BlockSpec((tm, cout), lambda i: (i, 0)),
        ),
        compiler_params=pltpu.CompilerParams(
            dimension_semantics=("parallel",)),
    )(patches, w_mat, bias_row)

    return out[:m].reshape(n, oh, ow, cout)


def conv2d_s1_relu(x_nhwc, w_taps, bias_row, kh, kw, pad):
    # Fused direct conv + ReLU for the stride-1 layers (no im2col in HBM).
    n, h, w, c = x_nhwc.shape
    cout = w_taps.shape[-1]
    oh = h + 2 * pad - kh + 1
    ow = w + 2 * pad - kw + 1
    wp = w + 2 * pad
    # Spatial zero-pad plus one extra bottom row so every tap's flat slice of
    # length OH*Wp stays in bounds.
    xp = jnp.pad(x_nhwc, ((0, 0), (pad, pad + 1), (pad, pad), (0, 0)))
    lx = (h + 2 * pad + 1) * wp
    x_flat = xp.reshape(n, lx, c)
    m = oh * wp  # over-computed rows per image; cols >= ow are garbage, cropped

    kernel = functools.partial(conv_s1_relu_kernel, kh=kh, kw=kw, wp=wp, m=m)
    out = pl.pallas_call(
        kernel,
        out_shape=jax.ShapeDtypeStruct((n, m, cout), x_nhwc.dtype),
        grid_spec=pltpu.PrefetchScalarGridSpec(
            num_scalar_prefetch=0,
            grid=(n,),
            in_specs=[
                pl.BlockSpec((1, lx, c), lambda i: (i, 0, 0)),
                pl.BlockSpec((kh * kw, c, cout), lambda i: (0, 0, 0)),
                pl.BlockSpec((1, cout), lambda i: (0, 0)),
            ],
            out_specs=pl.BlockSpec((1, m, cout), lambda i: (i, 0, 0)),
        ),
        compiler_params=pltpu.CompilerParams(
            dimension_semantics=("parallel",)),
    )(x_flat, w_taps, bias_row)

    return out.reshape(n, oh, wp, cout)[:, :, :ow, :]


def maxpool2d_3x3s2(x_nhwc):
    n, h, w, c = x_nhwc.shape
    oh = (h - 3) // 2 + 1
    ow = (w - 3) // 2 + 1
    # Even/odd parity split (total bytes == input; replaces the 9x stacking).
    ee = x_nhwc[:, 0::2, 0::2, :]
    eo = x_nhwc[:, 0::2, 1::2, :]
    oe = x_nhwc[:, 1::2, 0::2, :]
    oo = x_nhwc[:, 1::2, 1::2, :]

    kernel = functools.partial(maxpool3x3s2_kernel, oh=oh, ow=ow)
    in_specs = [pl.BlockSpec((1,) + t.shape[1:], lambda i: (i, 0, 0, 0))
                for t in (ee, eo, oe, oo)]
    out = pl.pallas_call(
        kernel,
        out_shape=jax.ShapeDtypeStruct((n, oh, ow, c), x_nhwc.dtype),
        grid_spec=pltpu.PrefetchScalarGridSpec(
            num_scalar_prefetch=0,
            grid=(n,),
            in_specs=in_specs,
            out_specs=pl.BlockSpec((1, oh, ow, c), lambda i: (i, 0, 0, 0)),
        ),
        compiler_params=pltpu.CompilerParams(
            dimension_semantics=("parallel",)),
    )(ee, eo, oe, oo)
    return out


# ----------------------------------------------------------------------------
# AlexNet features
# ----------------------------------------------------------------------------
def init_alexnet_params(key, c_in=3):
    shapes = [
        ((11, 11, c_in, 64), (64,)),
        ((5, 5, 64, 192), (192,)),
        ((3, 3, 192, 384), (384,)),
        ((3, 3, 384, 256), (256,)),
        ((3, 3, 256, 256), (256,)),
    ]
    params = []
    for ws, bs in shapes:
        key, kw_, kb_ = jax.random.split(key, 3)
        fan_in = ws[0] * ws[1] * ws[2]
        w = jax.random.normal(kw_, ws, jnp.float32) * (1.0 / jnp.sqrt(fan_in))
        b = jax.random.normal(kb_, bs, jnp.float32) * 0.01
        params.append((w, b))
    return params


def prepare_params(raw_params):
    # One-time weight layout/cast prep, kept out of the per-forward path.
    prepared = []
    for idx, (w, b) in enumerate(raw_params):
        kh, kw, cin, cout = w.shape
        if idx == 0:
            wk = w.reshape(kh * kw * cin, cout).astype(jnp.bfloat16)   # im2col layout
        else:
            wk = w.reshape(kh * kw, cin, cout).astype(jnp.bfloat16)    # per-tap slabs
        prepared.append((wk, b.reshape(1, cout).astype(jnp.float32)))
    return prepared


@jax.jit
def alexnet_features(x_nchw, prepared_params):
    # NCHW -> NHWC, bf16 activations (f32 accumulation inside the kernels).
    x = jnp.transpose(x_nchw, (0, 2, 3, 1)).astype(jnp.bfloat16)
    (w1, b1), (w2, b2), (w3, b3), (w4, b4), (w5, b5) = prepared_params

    x = conv2d_relu_im2col(x, w1, b1, 11, 11, 4, 2)   # conv1 + relu
    x = maxpool2d_3x3s2(x)                            # pool1
    x = conv2d_s1_relu(x, w2, b2, 5, 5, 2)            # conv2 + relu
    x = maxpool2d_3x3s2(x)                            # pool2
    x = conv2d_s1_relu(x, w3, b3, 3, 3, 1)            # conv3 + relu
    x = conv2d_s1_relu(x, w4, b4, 3, 3, 1)            # conv4 + relu
    x = conv2d_s1_relu(x, w5, b5, 3, 3, 1)            # conv5 + relu
    x = maxpool2d_3x3s2(x)                            # pool3

    # NHWC -> NCHW to match the PyTorch module's output layout.
    return jnp.transpose(x, (0, 3, 1, 2)).astype(jnp.float32)


# Pure-JAX f32 reference (for a loose numerical check of the bf16 Pallas path).
def _ref_features(x_nchw, raw_params):
    x = jnp.transpose(x_nchw, (0, 2, 3, 1))

    def conv(x, w, b, stride, pad):
        y = jax.lax.conv_general_dilated(
            x, w, (stride, stride), [(pad, pad), (pad, pad)],
            dimension_numbers=("NHWC", "HWIO", "NHWC"))
        return jax.nn.relu(y + b)

    def pool(x):
        return jax.lax.reduce_window(
            x, -jnp.inf, jax.lax.max, (1, 3, 3, 1), (1, 2, 2, 1), "VALID")

    (w1, b1), (w2, b2), (w3, b3), (w4, b4), (w5, b5) = raw_params
    x = pool(conv(x, w1, b1, 4, 2))
    x = pool(conv(x, w2, b2, 1, 2))
    x = conv(x, w3, b3, 1, 1)
    x = conv(x, w4, b4, 1, 1)
    x = pool(conv(x, w5, b5, 1, 1))
    return jnp.transpose(x, (0, 3, 1, 2))


if __name__ == "__main__":
    key = jax.random.PRNGKey(0)
    k_x, k_p = jax.random.split(key)

    # 64x64 spatial survives the full AlexNet stack (final feature map is 1x1).
    x = jax.random.normal(k_x, (2, 3, 64, 64), jnp.float32)
    raw_params = init_alexnet_params(k_p, c_in=3)
    params = prepare_params(raw_params)

    y = alexnet_features(x, params)
    y = jax.block_until_ready(y)

    assert y.shape == (2, 256, 1, 1), y.shape
    assert y.dtype == jnp.float32

    # Loose tolerance: Pallas path uses bf16 activations/weights with f32 accum.
    y_ref = jax.block_until_ready(_ref_features(x, raw_params))
    rel_err = float(jnp.max(jnp.abs(y - y_ref)) / (jnp.max(jnp.abs(y_ref)) + 1e-6))
    assert rel_err < 0.1, rel_err

    print("KERNEL_OK")
</pallas_src>

<mosaic_0001>
module attributes {stable_mosaic.version = 11 : i64} {
  func.func @matmul_bias_relu_kernel(%arg0: i32, %arg1: memref<256x363xbf16, #tpu.memory_space<vmem>>, %arg2: memref<363x64xbf16, #tpu.memory_space<vmem>>, %arg3: memref<1x64xf32, #tpu.memory_space<vmem>>, %arg4: memref<256x64xbf16, #tpu.memory_space<vmem>>) attributes {dimension_semantics = [#tpu.dimension_semantics<parallel>], iteration_bounds = array<i64: 2>, scalar_prefetch = 0 : i64, scratch_operands = 0 : i64, tpu.core_type = #tpu.core_type<tc>, window_params = [{transform_indices = @transform_0, window_bounds = array<i64: 256, 363>}, {pipeline_mode = #tpu.pipeline_mode<synchronous>, transform_indices = @transform_1, window_bounds = array<i64: 363, 64>}, {pipeline_mode = #tpu.pipeline_mode<synchronous>, transform_indices = @transform_2, window_bounds = array<i64: 1, 64>}, {transform_indices = @transform_3, window_bounds = array<i64: 256, 64>}]} {
    %c0 = arith.constant 0 : index
    %c0_0 = arith.constant 0 : index
    %0 = vector.load %arg1[%c0, %c0_0] : memref<256x363xbf16, #tpu.memory_space<vmem>>, vector<256x363xbf16>
    %c0_1 = arith.constant 0 : index
    %c0_2 = arith.constant 0 : index
    %1 = vector.load %arg2[%c0_1, %c0_2] : memref<363x64xbf16, #tpu.memory_space<vmem>>, vector<363x64xbf16>
    %cst = arith.constant dense<0.000000e+00> : vector<256x64xf32>
    %2 = tpu.matmul %0, %1, %cst {dimension_numbers = #tpu.dot_dimension_numbers<[1], [0], [0], [1], [0, 0, 1, 1], [], []>} : vector<256x363xbf16>, vector<363x64xbf16>, vector<256x64xf32> -> vector<256x64xf32>
    %c0_3 = arith.constant 0 : index
    %c0_4 = arith.constant 0 : index
    %3 = vector.load %arg3[%c0_3, %c0_4] : memref<1x64xf32, #tpu.memory_space<vmem>>, vector<1x64xf32>
    %4 = vector.broadcast %3 : vector<1x64xf32> to vector<256x64xf32>
    %5 = arith.addf %2, %4 : vector<256x64xf32>
    %cst_5 = arith.constant 0.000000e+00 : f32
    %6 = vector.broadcast %cst_5 : f32 to vector<256x64xf32>
    %7 = arith.maximumf %5, %6 : vector<256x64xf32>
    %8 = arith.truncf %7 : vector<256x64xf32> to vector<256x64xbf16>
    %c0_6 = arith.constant 0 : index
    %c0_7 = arith.constant 0 : index
    %9 = vector.load %arg4[%c0_6, %c0_7] : memref<256x64xbf16, #tpu.memory_space<vmem>>, vector<256x64xbf16>
    tpu.vector_store %arg4[%c0_6, %c0_7], %8 {strides = array<i32>} : memref<256x64xbf16, #tpu.memory_space<vmem>>, vector<256x64xbf16>,
    return
  }
  func.func @transform_0(%arg0: i32) -> (i32, i32) {
    %c0_i32 = arith.constant 0 : i32
    %c0_i32_0 = arith.constant 0 : i32
    return %arg0, %c0_i32 : i32, i32
  }
  func.func @transform_1(%arg0: i32) -> (i32, i32) {
    %c0_i32 = arith.constant 0 : i32
    %c0_i32_0 = arith.constant 0 : i32
    %c0_i32_1 = arith.constant 0 : i32
    return %c0_i32, %c0_i32_0 : i32, i32
  }
  func.func @transform_2(%arg0: i32) -> (i32, i32) {
    %c0_i32 = arith.constant 0 : i32
    %c0_i32_0 = arith.constant 0 : i32
    %c0_i32_1 = arith.constant 0 : i32
    return %c0_i32, %c0_i32_0 : i32, i32
  }
  func.func @transform_3(%arg0: i32) -> (i32, i32) {
    %c0_i32 = arith.constant 0 : i32
    %c0_i32_0 = arith.constant 0 : i32
    return %arg0, %c0_i32 : i32, i32
  }
}

module attributes {stable_mosaic.version = 11 : i64} {
  func.func @maxpool3x3s2_kernel(%arg0: i32, %arg1: memref<1x8x8x64xbf16, #tpu.memory_space<vmem>>, %arg2: memref<1x8x7x64xbf16, #tpu.memory_space<vmem>>, %arg3: memref<1x7x8x64xbf16, #tpu.memory_space<vmem>>, %arg4: memref<1x7x7x64xbf16, #tpu.memory_space<vmem>>, %arg5: memref<1x7x7x64xbf16, #tpu.memory_space<vmem>>) attributes {dimension_semantics = [#tpu.dimension_semantics<parallel>], iteration_bounds = array<i64: 2>, scalar_prefetch = 0 : i64, scratch_operands = 0 : i64, tpu.core_type = #tpu.core_type<tc>, window_params = [{transform_indices = @transform_0, window_bounds = array<i64: 1, 8, 8, 64>}, {transform_indices = @transform_1, window_bounds = array<i64: 1, 8, 7, 64>}, {transform_indices = @transform_2, window_bounds = array<i64: 1, 7, 8, 64>}, {transform_indices = @transform_3, window_bounds = array<i64: 1, 7, 7, 64>}, {transform_indices = @transform_4, window_bounds = array<i64: 1, 7, 7, 64>}]} {
    %c0 = arith.constant 0 : index
    %c0_0 = arith.constant 0 : index
    %c0_1 = arith.constant 0 : index
    %c0_2 = arith.constant 0 : index
    %0 = vector.load %arg1[%c0, %c0_0, %c0_1, %c0_2] : memref<1x8x8x64xbf16, #tpu.memory_space<vmem>>, vector<1x8x8x64xbf16>
    %1 = vector.shape_cast %0 : vector<1x8x8x64xbf16> to vector<8x8x64xbf16>
    %c0_3 = arith.constant 0 : index
    %c0_4 = arith.constant 0 : index
    %c0_5 = arith.constant 0 : index
    %c0_6 = arith.constant 0 : index
    %2 = vector.load %arg2[%c0_3, %c0_4, %c0_5, %c0_6] : memref<1x8x7x64xbf16, #tpu.memory_space<vmem>>, vector<1x8x7x64xbf16>
    %3 = vector.shape_cast %2 : vector<1x8x7x64xbf16> to vector<8x7x64xbf16>
    %c0_7 = arith.constant 0 : index
    %c0_8 = arith.constant 0 : index
    %c0_9 = arith.constant 0 : index
    %c0_10 = arith.constant 0 : index
    %4 = vector.load %arg3[%c0_7, %c0_8, %c0_9, %c0_10] : memref<1x7x8x64xbf16, #tpu.memory_space<vmem>>, vector<1x7x8x64xbf16>
    %5 = vector.shape_cast %4 : vector<1x7x8x64xbf16> to vector<7x8x64xbf16>
    %c0_11 = arith.constant 0 : index
    %c0_12 = arith.constant 0 : index
    %c0_13 = arith.constant 0 : index
    %c0_14 = arith.constant 0 : index
    %6 = vector.load %arg4[%c0_11, %c0_12, %c0_13, %c0_14] : memref<1x7x7x64xbf16, #tpu.memory_space<vmem>>, vector<1x7x7x64xbf16>
    %7 = vector.shape_cast %6 : vector<1x7x7x64xbf16> to vector<7x7x64xbf16>
    %8 = vector.extract_strided_slice %1 {offsets = [0, 0, 0], sizes = [7, 7, 64], strides = [1, 1, 1]} : vector<8x8x64xbf16> to vector<7x7x64xbf16>
    %9 = vector.extract_strided_slice %1 {offsets = [0, 1, 0], sizes = [7, 7, 64], strides = [1, 1, 1]} : vector<8x8x64xbf16> to vector<7x7x64xbf16>
    %10 = arith.maximumf %8, %9 : vector<7x7x64xbf16>
    %11 = vector.extract_strided_slice %1 {offsets = [1, 0, 0], sizes = [7, 7, 64], strides = [1, 1, 1]} : vector<8x8x64xbf16> to vector<7x7x64xbf16>
    %12 = vector.extract_strided_slice %1 {offsets = [1, 1, 0], sizes = [7, 7, 64], strides = [1, 1, 1]} : vector<8x8x64xbf16> to vector<7x7x64xbf16>
    %13 = arith.maximumf %11, %12 : vector<7x7x64xbf16>
    %14 = arith.maximumf %10, %13 : vector<7x7x64xbf16>
    %15 = vector.extract_strided_slice %3 {offsets = [0, 0, 0], sizes = [7, 7, 64], strides = [1, 1, 1]} : vector<8x7x64xbf16> to vector<7x7x64xbf16>
    %16 = vector.extract_strided_slice %3 {offsets = [1, 0, 0], sizes = [7, 7, 64], strides = [1, 1, 1]} : vector<8x7x64xbf16> to vector<7x7x64xbf16>
    %17 = arith.maximumf %15, %16 : vector<7x7x64xbf16>
    %18 = arith.maximumf %14, %17 : vector<7x7x64xbf16>
    %19 = vector.extract_strided_slice %5 {offsets = [0, 0, 0], sizes = [7, 7, 64], strides = [1, 1, 1]} : vector<7x8x64xbf16> to vector<7x7x64xbf16>
    %20 = vector.extract_strided_slice %5 {offsets = [0, 1, 0], sizes = [7, 7, 64], strides = [1, 1, 1]} : vector<7x8x64xbf16> to vector<7x7x64xbf16>
    %21 = arith.maximumf %19, %20 : vector<7x7x64xbf16>
    %22 = arith.maximumf %18, %21 : vector<7x7x64xbf16>
    %23 = arith.maximumf %22, %7 : vector<7x7x64xbf16>
    %c0_15 = arith.constant 0 : index
    %c0_16 = arith.constant 0 : index
    %c0_17 = arith.constant 0 : index
    %c0_18 = arith.constant 0 : index
    %24 = vector.load %arg5[%c0_15, %c0_16, %c0_17, %c0_18] : memref<1x7x7x64xbf16, #tpu.memory_space<vmem>>, vector<1x7x7x64xbf16>
    %25 = vector.shape_cast %24 : vector<1x7x7x64xbf16> to vector<7x7x64xbf16>
    %26 = vector.shape_cast %23 : vector<7x7x64xbf16> to vector<1x7x7x64xbf16>
    tpu.vector_store %arg5[%c0_15, %c0_16, %c0_17, %c0_18], %26 {strides = array<i32>} : memref<1x7x7x64xbf16, #tpu.memory_space<vmem>>, vector<1x7x7x64xbf16>,
    return
  }
  func.func @transform_0(%arg0: i32) -> (i32, i32, i32, i32) {
    %c0_i32 = arith.constant 0 : i32
    %c0_i32_0 = arith.constant 0 : i32
    %c0_i32_1 = arith.constant 0 : i32
    %c0_i32_2 = arith.constant 0 : i32
    return %arg0, %c0_i32, %c0_i32_0, %c0_i32_1 : i32, i32, i32, i32
  }
  func.func @transform_1(%arg0: i32) -> (i32, i32, i32, i32) {
    %c0_i32 = arith.constant 0 : i32
    %c0_i32_0 = arith.constant 0 : i32
    %c0_i32_1 = arith.constant 0 : i32
    %c0_i32_2 = arith.constant 0 : i32
    return %arg0, %c0_i32, %c0_i32_0, %c0_i32_1 : i32, i32, i32, i32
  }
  func.func @transform_2(%arg0: i32) -> (i32, i32, i32, i32) {
    %c0_i32 = arith.constant 0 : i32
    %c0_i32_0 = arith.constant 0 : i32
    %c0_i32_1 = arith.constant 0 : i32
    %c0_i32_2 = arith.constant 0 : i32
    return %arg0, %c0_i32, %c0_i32_0, %c0_i32_1 : i32, i32, i32, i32
  }
  func.func @transform_3(%arg0: i32) -> (i32, i32, i32, i32) {
    %c0_i32 = arith.constant 0 : i32
    %c0_i32_0 = arith.constant 0 : i32
    %c0_i32_1 = arith.constant 0 : i32
    %c0_i32_2 = arith.constant 0 : i32
    return %arg0, %c0_i32, %c0_i32_0, %c0_i32_1 : i32, i32, i32, i32
  }
  func.func @transform_4(%arg0: i32) -> (i32, i32, i32, i32) {
    %c0_i32 = arith.constant 0 : i32
    %c0_i32_0 = arith.constant 0 : i32
    %c0_i32_1 = arith.constant 0 : i32
    %c0_i32_2 = arith.constant 0 : i32
    return %arg0, %c0_i32, %c0_i32_0, %c0_i32_1 : i32, i32, i32, i32
  }
}

module attributes {stable_mosaic.version = 11 : i64} {
  func.func @conv_s1_relu_kernel(%arg0: i32, %arg1: memref<1x132x64xbf16, #tpu.memory_space<vmem>>, %arg2: memref<25x64x192xbf16, #tpu.memory_space<vmem>>, %arg3: memref<1x192xf32, #tpu.memory_space<vmem>>, %arg4: memref<1x77x192xbf16, #tpu.memory_space<vmem>>) attributes {dimension_semantics = [#tpu.dimension_semantics<parallel>], iteration_bounds = array<i64: 2>, scalar_prefetch = 0 : i64, scratch_operands = 0 : i64, tpu.core_type = #tpu.core_type<tc>, window_params = [{transform_indices = @transform_0, window_bounds = array<i64: 1, 132, 64>}, {pipeline_mode = #tpu.pipeline_mode<synchronous>, transform_indices = @transform_1, window_bounds = array<i64: 25, 64, 192>}, {pipeline_mode = #tpu.pipeline_mode<synchronous>, transform_indices = @transform_2, window_bounds = array<i64: 1, 192>}, {transform_indices = @transform_3, window_bounds = array<i64: 1, 77, 192>}]} {
    %cst = arith.constant 0.000000e+00 : f32
    %0 = vector.broadcast %cst : f32 to vector<77x192xf32>
    %c0 = arith.constant 0 : index
    %c0_0 = arith.constant 0 : index
    %c0_1 = arith.constant 0 : index
    %1 = vector.load %arg1[%c0, %c0_0, %c0_1] : memref<1x132x64xbf16, #tpu.memory_space<vmem>>, vector<1x77x64xbf16>
    %2 = vector.shape_cast %1 : vector<1x77x64xbf16> to vector<77x64xbf16>
    %c0_2 = arith.constant 0 : index
    %c0_3 = arith.constant 0 : index
    %c0_4 = arith.constant 0 : index
    %3 = vector.load %arg2[%c0_2, %c0_3, %c0_4] : memref<25x64x192xbf16, #tpu.memory_space<vmem>>, vector<1x64x192xbf16>
    %4 = vector.shape_cast %3 : vector<1x64x192xbf16> to vector<64x192xbf16>
    %cst_5 = arith.constant dense<0.000000e+00> : vector<77x192xf32>
    %5 = tpu.matmul %2, %4, %cst_5 {dimension_numbers = #tpu.dot_dimension_numbers<[1], [0], [0], [1], [0, 0, 1, 1], [], []>} : vector<77x64xbf16>, vector<64x192xbf16>, vector<77x192xf32> -> vector<77x192xf32>
    %6 = arith.addf %0, %5 : vector<77x192xf32>
    %c0_6 = arith.constant 0 : index
    %c1 = arith.constant 1 : index
    %c0_7 = arith.constant 0 : index
    %7 = vector.load %arg1[%c0_6, %c1, %c0_7] : memref<1x132x64xbf16, #tpu.memory_space<vmem>>, vector<1x77x64xbf16>
    %8 = vector.shape_cast %7 : vector<1x77x64xbf16> to vector<77x64xbf16>
    %c1_8 = arith.constant 1 : index
    %c0_9 = arith.constant 0 : index
    %c0_10 = arith.constant 0 : index
    %9 = vector.load %arg2[%c1_8, %c0_9, %c0_10] : memref<25x64x192xbf16, #tpu.memory_space<vmem>>, vector<1x64x192xbf16>
    %10 = vector.shape_cast %9 : vector<1x64x192xbf16> to vector<64x192xbf16>
    %cst_11 = arith.constant dense<0.000000e+00> : vector<77x192xf32>
    %11 = tpu.matmul %8, %10, %cst_11 {dimension_numbers = #tpu.dot_dimension_numbers<[1], [0], [0], [1], [0, 0, 1, 1], [], []>} : vector<77x64xbf16>, vector<64x192xbf16>, vector<77x192xf32> -> vector<77x192xf32>
    %12 = arith.addf %6, %11 : vector<77x192xf32>
    %c0_12 = arith.constant 0 : index
    %c2 = arith.constant 2 : index
    %c0_13 = arith.constant 0 : index
    %13 = vector.load %arg1[%c0_12, %c2, %c0_13] : memref<1x132x64xbf16, #tpu.memory_space<vmem>>, vector<1x77x64xbf16>
    %14 = vector.shape_cast %13 : vector<1x77x64xbf16> to vector<77x64xbf16>
    %c2_14 = arith.constant 2 : index
    %c0_15 = arith.constant 0 : index
    %c0_16 = arith.constant 0 : index
    %15 = vector.load %arg2[%c2_14, %c0_15, %c0_16] : memref<25x64x192xbf16, #tpu.memory_space<vmem>>, vector<1x64x192xbf16>
    %16 = vector.shape_cast %15 : vector<1x64x192xbf16> to vector<64x192xbf16>
    %cst_17 = arith.constant dense<0.000000e+00> : vector<77x192xf32>
    %17 = tpu.matmul %14, %16, %cst_17 {dimension_numbers = #tpu.dot_dimension_numbers<[1], [0], [0], [1], [0, 0, 1, 1], [], []>} : vector<77x64xbf16>, vector<64x192xbf16>, vector<77x192xf32> -> vector<77x192xf32>
    %18 = arith.addf %12, %17 : vector<77x192xf32>
    %c0_18 = arith.constant 0 : index
    %c3 = arith.constant 3 : index
    %c0_19 = arith.constant 0 : index
    %19 = vector.load %arg1[%c0_18, %c3, %c0_19] : memref<1x132x64xbf16, #tpu.memory_space<vmem>>, vector<1x77x64xbf16>
    %20 = vector.shape_cast %19 : vector<1x77x64xbf16> to vector<77x64xbf16>
    %c3_20 = arith.constant 3 : index
    %c0_21 = arith.constant 0 : index
    %c0_22 = arith.constant 0 : index
    %21 = vector.load %arg2[%c3_20, %c0_21, %c0_22] : memref<25x64x192xbf16, #tpu.memory_space<vmem>>, vector<1x64x192xbf16>
    %22 = vector.shape_cast %21 : vector<1x64x192xbf16> to vector<64x192xbf16>
    %cst_23 = arith.constant dense<0.000000e+00> : vector<77x192xf32>
    %23 = tpu.matmul %20, %22, %cst_23 {dimension_numbers = #tpu.dot_dimension_numbers<[1], [0], [0], [1], [0, 0, 1, 1], [], []>} : vector<77x64xbf16>, vector<64x192xbf16>, vector<77x192xf32> -> vector<77x192xf32>
    %24 = arith.addf %18, %23 : vector<77x192xf32>
    %c0_24 = arith.constant 0 : index
    %c4 = arith.constant 4 : index
    %c0_25 = arith.constant 0 : index
    %25 = vector.load %arg1[%c0_24, %c4, %c0_25] : memref<1x132x64xbf16, #tpu.memory_space<vmem>>, vector<1x77x64xbf16>
    %26 = vector.shape_cast %25 : vector<1x77x64xbf16> to vector<77x64xbf16>
    %c4_26 = arith.constant 4 : index
    %c0_27 = arith.constant 0 : index
    %c0_28 = arith.constant 0 : index
    %27 = vector.load %arg2[%c4_26, %c0_27, %c0_28] : memref<25x64x192xbf16, #tpu.memory_space<vmem>>, vector<1x64x192xbf16>
    %28 = vector.shape_cast %27 : vector<1x64x192xbf16> to vector<64x192xbf16>
    %cst_29 = arith.constant dense<0.000000e+00> : vector<77x192xf32>
    %29 = tpu.matmul %26, %28, %cst_29 {dimension_numbers = #tpu.dot_dimension_numbers<[1], [0], [0], [1], [0, 0, 1, 1], [], []>} : vector<77x64xbf16>, vector<64x192xbf16>, vector<77x192xf32> -> vector<77x192xf32>
    %30 = arith.addf %24, %29 : vector<77x192xf32>
    %c0_30 = arith.constant 0 : index
    %c11 = arith.constant 11 : index
    %c0_31 = arith.constant 0 : index
    %31 = vector.load %arg1[%c0_30, %c11, %c0_31] : memref<1x132x64xbf16, #tpu.memory_space<vmem>>, vector<1x77x64xbf16>
    %32 = vector.shape_cast %31 : vector<1x77x64xbf16> to vector<77x64xbf16>
    %c5 = arith.constant 5 : index
    %c0_32 = arith.constant 0 : index
    %c0_33 = arith.constant 0 : index
    %33 = vector.load %arg2[%c5, %c0_32, %c0_33] : memref<25x64x192xbf16, #tpu.memory_space<vmem>>, vector<1x64x192xbf16>
    %34 = vector.shape_cast %33 : vector<1x64x192xbf16> to vector<64x192xbf16>
    %cst_34 = arith.constant dense<0.000000e+00> : vector<77x192xf32>
    %35 = tpu.matmul %32, %34, %cst_34 {dimension_numbers = #tpu.dot_dimension_numbers<[1], [0], [0], [1], [0, 0, 1, 1], [], []>} : vector<77x64xbf16>, vector<64x192xbf16>, vector<77x192xf32> -> vector<77x192xf32>
    %36 = arith.addf %30, %35 : vector<77x192xf32>
    %c0_35 = arith.constant 0 : index
    %c12 = arith.constant 12 : index
    %c0_36 = arith.constant 0 : index
    %37 = vector.load %arg1[%c0_35, %c12, %c0_36] : memref<1x132x64xbf16, #tpu.memory_space<vmem>>, vector<1x77x64xbf16>
    %38 = vector.shape_cast %37 : vector<1x77x64xbf16> to vector<77x64xbf16>
    %c6 = arith.constant 6 : index
    %c0_37 = arith.constant 0 : index
    %c0_38 = arith.constant 0 : index
    %39 = vector.load %arg2[%c6, %c0_37, %c0_38] : memref<25x64x192xbf16, #tpu.memory_space<vmem>>, vector<1x64x192xbf16>
    %40 = vector.shape_cast %39 : vector<1x64x192xbf16> to vector<64x192xbf16>
    %cst_39 = arith.constant dense<0.000000e+00> : vector<77x192xf32>
    %41 = tpu.matmul %38, %40, %cst_39 {dimension_numbers = #tpu.dot_dimension_numbers<[1], [0], [0], [1], [0, 0, 1, 1], [], []>} : vector<77x64xbf16>, vector<64x192xbf16>, vector<77x192xf32> -> vector<77x192xf32>
    %42 = arith.addf %36, %41 : vector<77x192xf32>
    %c0_40 = arith.constant 0 : index
    %c13 = arith.constant 13 : index
    %c0_41 = arith.constant 0 : index
    %43 = vector.load %arg1[%c0_40, %c13, %c0_41] : memref<1x132x64xbf16, #tpu.memory_space<vmem>>, vector<1x77x64xbf16>
    %44 = vector.shape_cast %43 : vector<1x77x64xbf16> to vector<77x64xbf16>
    %c7 = arith.constant 7 : index
    %c0_42 = arith.constant 0 : index
    %c0_43 = arith.constant 0 : index
    %45 = vector.load %arg2[%c7, %c0_42, %c0_43] : memref<25x64x192xbf16, #tpu.memory_space<vmem>>, vector<1x64x192xbf16>
    %46 = vector.shape_cast %45 : vector<1x64x192xbf16> to vector<64x192xbf16>
    %cst_44 = arith.constant dense<0.000000e+00> : vector<77x192xf32>
    %47 = tpu.matmul %44, %46, %cst_44 {dimension_numbers = #tpu.dot_dimension_numbers<[1], [0], [0], [1], [0, 0, 1, 1], [], []>} : vector<77x64xbf16>, vector<64x192xbf16>, vector<77x192xf32> -> vector<77x192xf32>
    %48 = arith.addf %42, %47 : vector<77x192xf32>
    %c0_45 = arith.constant 0 : index
    %c14 = arith.constant 14 : index
    %c0_46 = arith.constant 0 : index
    %49 = vector.load %arg1[%c0_45, %c14, %c0_46] : memref<1x132x64xbf16, #tpu.memory_space<vmem>>, vector<1x77x64xbf16>
    %50 = vector.shape_cast %49 : vector<1x77x64xbf16> to vector<77x64xbf16>
    %c8 = arith.constant 8 : index
    %c0_47 = arith.constant 0 : index
    %c0_48 = arith.constant 0 : index
    %51 = vector.load %arg2[%c8, %c0_47, %c0_48] : memref<25x64x192xbf16, #tpu.memory_space<vmem>>, vector<1x64x192xbf16>
    %52 = vector.shape_cast %51 : vector<1x64x192xbf16> to vector<64x192xbf16>
    %cst_49 = arith.constant dense<0.000000e+00> : vector<77x192xf32>
    %53 = tpu.matmul %50, %52, %cst_49 {dimension_numbers = #tpu.dot_dimension_numbers<[1], [0], [0], [1], [0, 0, 1, 1], [], []>} : vector<77x64xbf16>, vector<64x192xbf16>, vector<77x192xf32> -> vector<77x192xf32>
    %54 = arith.addf %48, %53 : vector<77x192xf32>
    %c0_50 = arith.constant 0 : index
    %c15 = arith.constant 15 : index
    %c0_51 = arith.constant 0 : index
    %55 = vector.load %arg1[%c0_50, %c15, %c0_51] : memref<1x132x64xbf16, #tpu.memory_space<vmem>>, vector<1x77x64xbf16>
    %56 = vector.shape_cast %55 : vector<1x77x64xbf16> to vector<77x64xbf16>
    %c9 = arith.constant 9 : index
    %c0_52 = arith.constant 0 : index
    %c0_53 = arith.constant 0 : index
    %57 = vector.load %arg2[%c9, %c0_52, %c0_53] : memref<25x64x192xbf16, #tpu.memory_space<vmem>>, vector<1x64x192xbf16>
    %58 = vector.shape_cast %57 : vector<1x64x192xbf16> to vector<64x192xbf16>
    %cst_54 = arith.constant dense<0.000000e+00> : vector<77x192xf32>
    %59 = tpu.matmul %56, %58, %cst_54 {dimension_numbers = #tpu.dot_dimension_numbers<[1], [0], [0], [1], [0, 0, 1, 1], [], []>} : vector<77x64xbf16>, vector<64x192xbf16>, vector<77x192xf32> -> vector<77x192xf32>
    %60 = arith.addf %54, %59 : vector<77x192xf32>
    %c0_55 = arith.constant 0 : index
    %c22 = arith.constant 22 : index
    %c0_56 = arith.constant 0 : index
    %61 = vector.load %arg1[%c0_55, %c22, %c0_56] : memref<1x132x64xbf16, #tpu.memory_space<vmem>>, vector<1x77x64xbf16>
    %62 = vector.shape_cast %61 : vector<1x77x64xbf16> to vector<77x64xbf16>
    %c10 = arith.constant 10 : index
    %c0_57 = arith.constant 0 : index
    %c0_58 = arith.constant 0 : index
    %63 = vector.load %arg2[%c10, %c0_57, %c0_58] : memref<25x64x192xbf16, #tpu.memory_space<vmem>>, vector<1x64x192xbf16>
    %64 = vector.shape_cast %63 : vector<1x64x192xbf16> to vector<64x192xbf16>
    %cst_59 = arith.constant dense<0.000000e+00> : vector<77x192xf32>
    %65 = tpu.matmul %62, %64, %cst_59 {dimension_numbers = #tpu.dot_dimension_numbers<[1], [0], [0], [1], [0, 0, 1, 1], [], []>} : vector<77x64xbf16>, vector<64x192xbf16>, vector<77x192xf32> -> vector<77x192xf32>
    %66 = arith.addf %60, %65 : vector<77x192xf32>
    %c0_60 = arith.constant 0 : index
    %c23 = arith.constant 23 : index
    %c0_61 = arith.constant 0 : index
    %67 = vector.load %arg1[%c0_60, %c23, %c0_61] : memref<1x132x64xbf16, #tpu.memory_space<vmem>>, vector<1x77x64xbf16>
    %68 = vector.shape_cast %67 : vector<1x77x64xbf16> to vector<77x64xbf16>
    %c11_62 = arith.constant 11 : index
    %c0_63 = arith.constant 0 : index
    %c0_64 = arith.constant 0 : index
    %69 = vector.load %arg2[%c11_62, %c0_63, %c0_64] : memref<25x64x192xbf16, #tpu.memory_space<vmem>>, vector<1x64x192xbf16>
    %70 = vector.shape_cast %69 : vector<1x64x192xbf16> to vector<64x192xbf16>
    %cst_65 = arith.constant dense<0.000000e+00> : vector<77x192xf32>
    %71 = tpu.matmul %68, %70, %cst_65 {dimension_numbers = #tpu.dot_dimension_numbers<[1], [0], [0], [1], [0, 0, 1, 1], [], []>} : vector<77x64xbf16>, vector<64x192xbf16>, vector<77x192xf32> -> vector<77x192xf32>
    %72 = arith.addf %66, %71 : vector<77x192xf32>
    %c0_66 = arith.constant 0 : index
    %c24 = arith.constant 24 : index
    %c0_67 = arith.constant 0 : index
    %73 = vector.load %arg1[%c0_66, %c24, %c0_67] : memref<1x132x64xbf16, #tpu.memory_space<vmem>>, vector<1x77x64xbf16>
    %74 = vector.shape_cast %73 : vector<1x77x64xbf16> to vector<77x64xbf16>
    %c12_68 = arith.constant 12 : index
    %c0_69 = arith.constant 0 : index
    %c0_70 = arith.constant 0 : index
    %75 = vector.load %arg2[%c12_68, %c0_69, %c0_70] : memref<25x64x192xbf16, #tpu.memory_space<vmem>>, vector<1x64x192xbf16>
    %76 = vector.shape_cast %75 : vector<1x64x192xbf16> to vector<64x192xbf16>
    %cst_71 = arith.constant dense<0.000000e+00> : vector<77x192xf32>
    %77 = tpu.matmul %74, %76, %cst_71 {dimension_numbers = #tpu.dot_dimension_numbers<[1], [0], [0], [1], [0, 0, 1, 1], [], []>} : vector<77x64xbf16>, vector<64x192xbf16>, vector<77x192xf32> -> vector<77x192xf32>
    %78 = arith.addf %72, %77 : vector<77x192xf32>
    %c0_72 = arith.constant 0 : index
    %c25 = arith.constant 25 : index
    %c0_73 = arith.constant 0 : index
    %79 = vector.load %arg1[%c0_72, %c25, %c0_73] : memref<1x132x64xbf16, #tpu.memory_space<vmem>>, vector<1x77x64xbf16>
    %80 = vector.shape_cast %79 : vector<1x77x64xbf16> to vector<77x64xbf16>
    %c13_74 = arith.constant 13 : index
    %c0_75 = arith.constant 0 : index
    %c0_76 = arith.constant 0 : index
    %81 = vector.load %arg2[%c13_74, %c0_75, %c0_76] : memref<25x64x192xbf16, #tpu.memory_space<vmem>>, vector<1x64x192xbf16>
    %82 = vector.shape_cast %81 : vector<1x64x192xbf16> to vector<64x192xbf16>
    %cst_77 = arith.constant dense<0.000000e+00> : vector<77x192xf32>
    %83 = tpu.matmul %80, %82, %cst_77 {dimension_numbers = #tpu.dot_dimension_numbers<[1], [0], [0], [1], [0, 0, 1, 1], [], []>} : vector<77x64xbf16>, vector<64x192xbf16>, vector<77x192xf32> -> vector<77x192xf32>
    %84 = arith.addf %78, %83 : vector<77x192xf32>
    %c0_78 = arith.constant 0 : index
    %c26 = arith.constant 26 : index
    %c0_79 = arith.constant 0 : index
    %85 = vector.load %arg1[%c0_78, %c26, %c0_79] : memref<1x132x64xbf16, #tpu.memory_space<vmem>>, vector<1x77x64xbf16>
    %86 = vector.shape_cast %85 : vector<1x77x64xbf16> to vector<77x64xbf16>
    %c14_80 = arith.constant 14 : index
    %c0_81 = arith.constant 0 : index
    %c0_82 = arith.constant 0 : index
    %87 = vector.load %arg2[%c14_80, %c0_81, %c0_82] : memref<25x64x192xbf16, #tpu.memory_space<vmem>>, vector<1x64x192xbf16>
    %88 = vector.shape_cast %87 : vector<1x64x192xbf16> to vector<64x192xbf16>
    %cst_83 = arith.constant dense<0.000000e+00> : vector<77x192xf32>
    %89 = tpu.matmul %86, %88, %cst_83 {dimension_numbers = #tpu.dot_dimension_numbers<[1], [0], [0], [1], [0, 0, 1, 1], [], []>} : vector<77x64xbf16>, vector<64x192xbf16>, vector<77x192xf32> -> vector<77x192xf32>
    %90 = arith.addf %84, %89 : vector<77x192xf32>
    %c0_84 = arith.constant 0 : index
    %c33 = arith.constant 33 : index
    %c0_85 = arith.constant 0 : index
    %91 = vector.load %arg1[%c0_84, %c33, %c0_85] : memref<1x132x64xbf16, #tpu.memory_space<vmem>>, vector<1x77x64xbf16>
    %92 = vector.shape_cast %91 : vector<1x77x64xbf16> to vector<77x64xbf16>
    %c15_86 = arith.constant 15 : index
    %c0_87 = arith.constant 0 : index
    %c0_88 = arith.constant 0 : index
    %93 = vector.load %arg2[%c15_86, %c0_87, %c0_88] : memref<25x64x192xbf16, #tpu.memory_space<vmem>>, vector<1x64x192xbf16>
    %94 = vector.shape_cast %93 : vector<1x64x192xbf16> to vector<64x192xbf16>
    %cst_89 = arith.constant dense<0.000000e+00> : vector<77x192xf32>
    %95 = tpu.matmul %92, %94, %cst_89 {dimension_numbers = #tpu.dot_dimension_numbers<[1], [0], [0], [1], [0, 0, 1, 1], [], []>} : vector<77x64xbf16>, vector<64x192xbf16>, vector<77x192xf32> -> vector<77x192xf32>
    %96 = arith.addf %90, %95 : vector<77x192xf32>
    %c0_90 = arith.constant 0 : index
    %c34 = arith.constant 34 : index
    %c0_91 = arith.constant 0 : index
    %97 = vector.load %arg1[%c0_90, %c34, %c0_91] : memref<1x132x64xbf16, #tpu.memory_space<vmem>>, vector<1x77x64xbf16>
    %98 = vector.shape_cast %97 : vector<1x77x64xbf16> to vector<77x64xbf16>
    %c16 = arith.constant 16 : index
    %c0_92 = arith.constant 0 : index
    %c0_93 = arith.constant 0 : index
    %99 = vector.load %arg2[%c16, %c0_92, %c0_93] : memref<25x64x192xbf16, #tpu.memory_space<vmem>>, vector<1x64x192xbf16>
    %100 = vector.shape_cast %99 : vector<1x64x192xbf16> to vector<64x192xbf16>
    %cst_94 = arith.constant dense<0.000000e+00> : vector<77x192xf32>
    %101 = tpu.matmul %98, %100, %cst_94 {dimension_numbers = #tpu.dot_dimension_numbers<[1], [0], [0], [1], [0, 0, 1, 1], [], []>} : vector<77x64xbf16>, vector<64x192xbf16>, vector<77x192xf32> -> vector<77x192xf32>
    %102 = arith.addf %96, %101 : vector<77x192xf32>
    %c0_95 = arith.constant 0 : index
    %c35 = arith.constant 35 : index
    %c0_96 = arith.constant 0 : index
    %103 = vector.load %arg1[%c0_95, %c35, %c0_96] : memref<1x132x64xbf16, #tpu.memory_space<vmem>>, vector<1x77x64xbf16>
    %104 = vector.shape_cast %103 : vector<1x77x64xbf16> to vector<77x64xbf16>
    %c17 = arith.constant 17 : index
    %c0_97 = arith.constant 0 : index
    %c0_98 = arith.constant 0 : index
    %105 = vector.load %arg2[%c17, %c0_97, %c0_98] : memref<25x64x192xbf16, #tpu.memory_space<vmem>>, vector<1x64x192xbf16>
    %106 = vector.shape_cast %105 : vector<1x64x192xbf16> to vector<64x192xbf16>
    %cst_99 = arith.constant dense<0.000000e+00> : vector<77x192xf32>
    %107 = tpu.matmul %104, %106, %cst_99 {dimension_numbers = #tpu.dot_dimension_numbers<[1], [0], [0], [1], [0, 0, 1, 1], [], []>} : vector<77x64xbf16>, vector<64x192xbf16>, vector<77x192xf32> -> vector<77x192xf32>
    %108 = arith.addf %102, %107 : vector<77x192xf32>
    %c0_100 = arith.constant 0 : index
    %c36 = arith.constant 36 : index
    %c0_101 = arith.constant 0 : index
    %109 = vector.load %arg1[%c0_100, %c36, %c0_101] : memref<1x132x64xbf16, #tpu.memory_space<vmem>>, vector<1x77x64xbf16>
    %110 = vector.shape_cast %109 : vector<1x77x64xbf16> to vector<77x64xbf16>
    %c18 = arith.constant 18 : index
    %c0_102 = arith.constant 0 : index
    %c0_103 = arith.constant 0 : index
    %111 = vector.load %arg2[%c18, %c0_102, %c0_103] : memref<25x64x192xbf16, #tpu.memory_space<vmem>>, vector<1x64x192xbf16>
    %112 = vector.shape_cast %111 : vector<1x64x192xbf16> to vector<64x192xbf16>
    %cst_104 = arith.constant dense<0.000000e+00> : vector<77x192xf32>
    %113 = tpu.matmul %110, %112, %cst_104 {dimension_numbers = #tpu.dot_dimension_numbers<[1], [0], [0], [1], [0, 0, 1, 1], [], []>} : vector<77x64xbf16>, vector<64x192xbf16>, vector<77x192xf32> -> vector<77x192xf32>
    %114 = arith.addf %108, %113 : vector<77x192xf32>
    %c0_105 = arith.constant 0 : index
    %c37 = arith.constant 37 : index
    %c0_106 = arith.constant 0 : index
    %115 = vector.load %arg1[%c0_105, %c37, %c0_106] : memref<1x132x64xbf16, #tpu.memory_space<vmem>>, vector<1x77x64xbf16>
    %116 = vector.shape_cast %115 : vector<1x77x64xbf16> to vector<77x64xbf16>
    %c19 = arith.constant 19 : index
    %c0_107 = arith.constant 0 : index
    %c0_108 = arith.constant 0 : index
    %117 = vector.load %arg2[%c19, %c0_107, %c0_108] : memref<25x64x192xbf16, #tpu.memory_space<vmem>>, vector<1x64x192xbf16>
    %118 = vector.shape_cast %117 : vector<1x64x192xbf16> to vector<64x192xbf16>
    %cst_109 = arith.constant dense<0.000000e+00> : vector<77x192xf32>
    %119 = tpu.matmul %116, %118, %cst_109 {dimension_numbers = #tpu.dot_dimension_numbers<[1], [0], [0], [1], [0, 0, 1, 1], [], []>} : vector<77x64xbf16>, vector<64x192xbf16>, vector<77x192xf32> -> vector<77x192xf32>
    %120 = arith.addf %114, %119 : vector<77x192xf32>
    %c0_110 = arith.constant 0 : index
    %c44 = arith.constant 44 : index
    %c0_111 = arith.constant 0 : index
    %121 = vector.load %arg1[%c0_110, %c44, %c0_111] : memref<1x132x64xbf16, #tpu.memory_space<vmem>>, vector<1x77x64xbf16>
    %122 = vector.shape_cast %121 : vector<1x77x64xbf16> to vector<77x64xbf16>
    %c20 = arith.constant 20 : index
    %c0_112 = arith.constant 0 : index
    %c0_113 = arith.constant 0 : index
    %123 = vector.load %arg2[%c20, %c0_112, %c0_113] : memref<25x64x192xbf16, #tpu.memory_space<vmem>>, vector<1x64x192xbf16>
    %124 = vector.shape_cast %123 : vector<1x64x192xbf16> to vector<64x192xbf16>
    %cst_114 = arith.constant dense<0.000000e+00> : vector<77x192xf32>
    %125 = tpu.matmul %122, %124, %cst_114 {dimension_numbers = #tpu.dot_dimension_numbers<[1], [0], [0], [1], [0, 0, 1, 1], [], []>} : vector<77x64xbf16>, vector<64x192xbf16>, vector<77x192xf32> -> vector<77x192xf32>
    %126 = arith.addf %120, %125 : vector<77x192xf32>
    %c0_115 = arith.constant 0 : index
    %c45 = arith.constant 45 : index
    %c0_116 = arith.constant 0 : index
    %127 = vector.load %arg1[%c0_115, %c45, %c0_116] : memref<1x132x64xbf16, #tpu.memory_space<vmem>>, vector<1x77x64xbf16>
    %128 = vector.shape_cast %127 : vector<1x77x64xbf16> to vector<77x64xbf16>
    %c21 = arith.constant 21 : index
    %c0_117 = arith.constant 0 : index
    %c0_118 = arith.constant 0 : index
    %129 = vector.load %arg2[%c21, %c0_117, %c0_118] : memref<25x64x192xbf16, #tpu.memory_space<vmem>>, vector<1x64x192xbf16>
    %130 = vector.shape_cast %129 : vector<1x64x192xbf16> to vector<64x192xbf16>
    %cst_119 = arith.constant dense<0.000000e+00> : vector<77x192xf32>
    %131 = tpu.matmul %128, %130, %cst_119 {dimension_numbers = #tpu.dot_dimension_numbers<[1], [0], [0], [1], [0, 0, 1, 1], [], []>} : vector<77x64xbf16>, vector<64x192xbf16>, vector<77x192xf32> -> vector<77x192xf32>
    %132 = arith.addf %126, %131 : vector<77x192xf32>
    %c0_120 = arith.constant 0 : index
    %c46 = arith.constant 46 : index
    %c0_121 = arith.constant 0 : index
    %133 = vector.load %arg1[%c0_120, %c46, %c0_121] : memref<1x132x64xbf16, #tpu.memory_space<vmem>>, vector<1x77x64xbf16>
    %134 = vector.shape_cast %133 : vector<1x77x64xbf16> to vector<77x64xbf16>
    %c22_122 = arith.constant 22 : index
    %c0_123 = arith.constant 0 : index
    %c0_124 = arith.constant 0 : index
    %135 = vector.load %arg2[%c22_122, %c0_123, %c0_124] : memref<25x64x192xbf16, #tpu.memory_space<vmem>>, vector<1x64x192xbf16>
    %136 = vector.shape_cast %135 : vector<1x64x192xbf16> to vector<64x192xbf16>
    %cst_125 = arith.constant dense<0.000000e+00> : vector<77x192xf32>
    %137 = tpu.matmul %134, %136, %cst_125 {dimension_numbers = #tpu.dot_dimension_numbers<[1], [0], [0], [1], [0, 0, 1, 1], [], []>} : vector<77x64xbf16>, vector<64x192xbf16>, vector<77x192xf32> -> vector<77x192xf32>
    %138 = arith.addf %132, %137 : vector<77x192xf32>
    %c0_126 = arith.constant 0 : index
    %c47 = arith.constant 47 : index
    %c0_127 = arith.constant 0 : index
    %139 = vector.load %arg1[%c0_126, %c47, %c0_127] : memref<1x132x64xbf16, #tpu.memory_space<vmem>>, vector<1x77x64xbf16>
    %140 = vector.shape_cast %139 : vector<1x77x64xbf16> to vector<77x64xbf16>
    %c23_128 = arith.constant 23 : index
    %c0_129 = arith.constant 0 : index
    %c0_130 = arith.constant 0 : index
    %141 = vector.load %arg2[%c23_128, %c0_129, %c0_130] : memref<25x64x192xbf16, #tpu.memory_space<vmem>>, vector<1x64x192xbf16>
    %142 = vector.shape_cast %141 : vector<1x64x192xbf16> to vector<64x192xbf16>
    %cst_131 = arith.constant dense<0.000000e+00> : vector<77x192xf32>
    %143 = tpu.matmul %140, %142, %cst_131 {dimension_numbers = #tpu.dot_dimension_numbers<[1], [0], [0], [1], [0, 0, 1, 1], [], []>} : vector<77x64xbf16>, vector<64x192xbf16>, vector<77x192xf32> -> vector<77x192xf32>
    %144 = arith.addf %138, %143 : vector<77x192xf32>
    %c0_132 = arith.constant 0 : index
    %c48 = arith.constant 48 : index
    %c0_133 = arith.constant 0 : index
    %145 = vector.load %arg1[%c0_132, %c48, %c0_133] : memref<1x132x64xbf16, #tpu.memory_space<vmem>>, vector<1x77x64xbf16>
    %146 = vector.shape_cast %145 : vector<1x77x64xbf16> to vector<77x64xbf16>
    %c24_134 = arith.constant 24 : index
    %c0_135 = arith.constant 0 : index
    %c0_136 = arith.constant 0 : index
    %147 = vector.load %arg2[%c24_134, %c0_135, %c0_136] : memref<25x64x192xbf16, #tpu.memory_space<vmem>>, vector<1x64x192xbf16>
    %148 = vector.shape_cast %147 : vector<1x64x192xbf16> to vector<64x192xbf16>
    %cst_137 = arith.constant dense<0.000000e+00> : vector<77x192xf32>
    %149 = tpu.matmul %146, %148, %cst_137 {dimension_numbers = #tpu.dot_dimension_numbers<[1], [0], [0], [1], [0, 0, 1, 1], [], []>} : vector<77x64xbf16>, vector<64x192xbf16>, vector<77x192xf32> -> vector<77x192xf32>
    %150 = arith.addf %144, %149 : vector<77x192xf32>
    %c0_138 = arith.constant 0 : index
    %c0_139 = arith.constant 0 : index
    %151 = vector.load %arg3[%c0_138, %c0_139] : memref<1x192xf32, #tpu.memory_space<vmem>>, vector<1x192xf32>
    %152 = vector.broadcast %151 : vector<1x192xf32> to vector<77x192xf32>
    %153 = arith.addf %150, %152 : vector<77x192xf32>
    %cst_140 = arith.constant 0.000000e+00 : f32
    %154 = vector.broadcast %cst_140 : f32 to vector<77x192xf32>
    %155 = arith.maximumf %153, %154 : vector<77x192xf32>
    %156 = arith.truncf %155 : vector<77x192xf32> to vector<77x192xbf16>
    %c0_141 = arith.constant 0 : index
    %c0_142 = arith.constant 0 : index
    %c0_143 = arith.constant 0 : index
    %157 = vector.load %arg4[%c0_141, %c0_142, %c0_143] : memref<1x77x192xbf16, #tpu.memory_space<vmem>>, vector<1x77x192xbf16>
    %158 = vector.shape_cast %157 : vector<1x77x192xbf16> to vector<77x192xbf16>
    %159 = vector.shape_cast %156 : vector<77x192xbf16> to vector<1x77x192xbf16>
    tpu.vector_store %arg4[%c0_141, %c0_142, %c0_143], %159 {strides = array<i32>} : memref<1x77x192xbf16, #tpu.memory_space<vmem>>, vector<1x77x192xbf16>,
    return
  }
  func.func @transform_0(%arg0: i32) -> (i32, i32, i32) {
    %c0_i32 = arith.constant 0 : i32
    %c0_i32_0 = arith.constant 0 : i32
    %c0_i32_1 = arith.constant 0 : i32
    return %arg0, %c0_i32, %c0_i32_0 : i32, i32, i32
  }
  func.func @transform_1(%arg0: i32) -> (i32, i32, i32) {
    %c0_i32 = arith.constant 0 : i32
    %c0_i32_0 = arith.constant 0 : i32
    %c0_i32_1 = arith.constant 0 : i32
    %c0_i32_2 = arith.constant 0 : i32
    return %c0_i32, %c0_i32_0, %c0_i32_1 : i32, i32, i32
  }
  func.func @transform_2(%arg0: i32) -> (i32, i32) {
    %c0_i32 = arith.constant 0 : i32
    %c0_i32_0 = arith.constant 0 : i32
    %c0_i32_1 = arith.constant 0 : i32
    return %c0_i32, %c0_i32_0 : i32, i32
  }
  func.func @transform_3(%arg0: i32) -> (i32, i32, i32) {
    %c0_i32 = arith.constant 0 : i32
    %c0_i32_0 = arith.constant 0 : i32
    %c0_i32_1 = arith.constant 0 : i32
    return %arg0, %c0_i32, %c0_i32_0 : i32, i32, i32
  }
}

module attributes {stable_mosaic.version = 11 : i64} {
  func.func @maxpool3x3s2_kernel(%arg0: i32, %arg1: memref<1x4x4x192xbf16, #tpu.memory_space<vmem>>, %arg2: memref<1x4x3x192xbf16, #tpu.memory_space<vmem>>, %arg3: memref<1x3x4x192xbf16, #tpu.memory_space<vmem>>, %arg4: memref<1x3x3x192xbf16, #tpu.memory_space<vmem>>, %arg5: memref<1x3x3x192xbf16, #tpu.memory_space<vmem>>) attributes {dimension_semantics = [#tpu.dimension_semantics<parallel>], iteration_bounds = array<i64: 2>, scalar_prefetch = 0 : i64, scratch_operands = 0 : i64, tpu.core_type = #tpu.core_type<tc>, window_params = [{transform_indices = @transform_0, window_bounds = array<i64: 1, 4, 4, 192>}, {transform_indices = @transform_1, window_bounds = array<i64: 1, 4, 3, 192>}, {transform_indices = @transform_2, window_bounds = array<i64: 1, 3, 4, 192>}, {transform_indices = @transform_3, window_bounds = array<i64: 1, 3, 3, 192>}, {transform_indices = @transform_4, window_bounds = array<i64: 1, 3, 3, 192>}]} {
    %c0 = arith.constant 0 : index
    %c0_0 = arith.constant 0 : index
    %c0_1 = arith.constant 0 : index
    %c0_2 = arith.constant 0 : index
    %0 = vector.load %arg1[%c0, %c0_0, %c0_1, %c0_2] : memref<1x4x4x192xbf16, #tpu.memory_space<vmem>>, vector<1x4x4x192xbf16>
    %1 = vector.shape_cast %0 : vector<1x4x4x192xbf16> to vector<4x4x192xbf16>
    %c0_3 = arith.constant 0 : index
    %c0_4 = arith.constant 0 : index
    %c0_5 = arith.constant 0 : index
    %c0_6 = arith.constant 0 : index
    %2 = vector.load %arg2[%c0_3, %c0_4, %c0_5, %c0_6] : memref<1x4x3x192xbf16, #tpu.memory_space<vmem>>, vector<1x4x3x192xbf16>
    %3 = vector.shape_cast %2 : vector<1x4x3x192xbf16> to vector<4x3x192xbf16>
    %c0_7 = arith.constant 0 : index
    %c0_8 = arith.constant 0 : index
    %c0_9 = arith.constant 0 : index
    %c0_10 = arith.constant 0 : index
    %4 = vector.load %arg3[%c0_7, %c0_8, %c0_9, %c0_10] : memref<1x3x4x192xbf16, #tpu.memory_space<vmem>>, vector<1x3x4x192xbf16>
    %5 = vector.shape_cast %4 : vector<1x3x4x192xbf16> to vector<3x4x192xbf16>
    %c0_11 = arith.constant 0 : index
    %c0_12 = arith.constant 0 : index
    %c0_13 = arith.constant 0 : index
    %c0_14 = arith.constant 0 : index
    %6 = vector.load %arg4[%c0_11, %c0_12, %c0_13, %c0_14] : memref<1x3x3x192xbf16, #tpu.memory_space<vmem>>, vector<1x3x3x192xbf16>
    %7 = vector.shape_cast %6 : vector<1x3x3x192xbf16> to vector<3x3x192xbf16>
    %8 = vector.extract_strided_slice %1 {offsets = [0, 0, 0], sizes = [3, 3, 192], strides = [1, 1, 1]} : vector<4x4x192xbf16> to vector<3x3x192xbf16>
    %9 = vector.extract_strided_slice %1 {offsets = [0, 1, 0], sizes = [3, 3, 192], strides = [1, 1, 1]} : vector<4x4x192xbf16> to vector<3x3x192xbf16>
    %10 = arith.maximumf %8, %9 : vector<3x3x192xbf16>
    %11 = vector.extract_strided_slice %1 {offsets = [1, 0, 0], sizes = [3, 3, 192], strides = [1, 1, 1]} : vector<4x4x192xbf16> to vector<3x3x192xbf16>
    %12 = vector.extract_strided_slice %1 {offsets = [1, 1, 0], sizes = [3, 3, 192], strides = [1, 1, 1]} : vector<4x4x192xbf16> to vector<3x3x192xbf16>
    %13 = arith.maximumf %11, %12 : vector<3x3x192xbf16>
    %14 = arith.maximumf %10, %13 : vector<3x3x192xbf16>
    %15 = vector.extract_strided_slice %3 {offsets = [0, 0, 0], sizes = [3, 3, 192], strides = [1, 1, 1]} : vector<4x3x192xbf16> to vector<3x3x192xbf16>
    %16 = vector.extract_strided_slice %3 {offsets = [1, 0, 0], sizes = [3, 3, 192], strides = [1, 1, 1]} : vector<4x3x192xbf16> to vector<3x3x192xbf16>
    %17 = arith.maximumf %15, %16 : vector<3x3x192xbf16>
    %18 = arith.maximumf %14, %17 : vector<3x3x192xbf16>
    %19 = vector.extract_strided_slice %5 {offsets = [0, 0, 0], sizes = [3, 3, 192], strides = [1, 1, 1]} : vector<3x4x192xbf16> to vector<3x3x192xbf16>
    %20 = vector.extract_strided_slice %5 {offsets = [0, 1, 0], sizes = [3, 3, 192], strides = [1, 1, 1]} : vector<3x4x192xbf16> to vector<3x3x192xbf16>
    %21 = arith.maximumf %19, %20 : vector<3x3x192xbf16>
    %22 = arith.maximumf %18, %21 : vector<3x3x192xbf16>
    %23 = arith.maximumf %22, %7 : vector<3x3x192xbf16>
    %c0_15 = arith.constant 0 : index
    %c0_16 = arith.constant 0 : index
    %c0_17 = arith.constant 0 : index
    %c0_18 = arith.constant 0 : index
    %24 = vector.load %arg5[%c0_15, %c0_16, %c0_17, %c0_18] : memref<1x3x3x192xbf16, #tpu.memory_space<vmem>>, vector<1x3x3x192xbf16>
    %25 = vector.shape_cast %24 : vector<1x3x3x192xbf16> to vector<3x3x192xbf16>
    %26 = vector.shape_cast %23 : vector<3x3x192xbf16> to vector<1x3x3x192xbf16>
    tpu.vector_store %arg5[%c0_15, %c0_16, %c0_17, %c0_18], %26 {strides = array<i32>} : memref<1x3x3x192xbf16, #tpu.memory_space<vmem>>, vector<1x3x3x192xbf16>,
    return
  }
  func.func @transform_0(%arg0: i32) -> (i32, i32, i32, i32) {
    %c0_i32 = arith.constant 0 : i32
    %c0_i32_0 = arith.constant 0 : i32
    %c0_i32_1 = arith.constant 0 : i32
    %c0_i32_2 = arith.constant 0 : i32
    return %arg0, %c0_i32, %c0_i32_0, %c0_i32_1 : i32, i32, i32, i32
  }
  func.func @transform_1(%arg0: i32) -> (i32, i32, i32, i32) {
    %c0_i32 = arith.constant 0 : i32
    %c0_i32_0 = arith.constant 0 : i32
    %c0_i32_1 = arith.constant 0 : i32
    %c0_i32_2 = arith.constant 0 : i32
    return %arg0, %c0_i32, %c0_i32_0, %c0_i32_1 : i32, i32, i32, i32
  }
  func.func @transform_2(%arg0: i32) -> (i32, i32, i32, i32) {
    %c0_i32 = arith.constant 0 : i32
    %c0_i32_0 = arith.constant 0 : i32
    %c0_i32_1 = arith.constant 0 : i32
    %c0_i32_2 = arith.constant 0 : i32
    return %arg0, %c0_i32, %c0_i32_0, %c0_i32_1 : i32, i32, i32, i32
  }
  func.func @transform_3(%arg0: i32) -> (i32, i32, i32, i32) {
    %c0_i32 = arith.constant 0 : i32
    %c0_i32_0 = arith.constant 0 : i32
    %c0_i32_1 = arith.constant 0 : i32
    %c0_i32_2 = arith.constant 0 : i32
    return %arg0, %c0_i32, %c0_i32_0, %c0_i32_1 : i32, i32, i32, i32
  }
  func.func @transform_4(%arg0: i32) -> (i32, i32, i32, i32) {
    %c0_i32 = arith.constant 0 : i32
    %c0_i32_0 = arith.constant 0 : i32
    %c0_i32_1 = arith.constant 0 : i32
    %c0_i32_2 = arith.constant 0 : i32
    return %arg0, %c0_i32, %c0_i32_0, %c0_i32_1 : i32, i32, i32, i32
  }
}

module attributes {stable_mosaic.version = 11 : i64} {
  func.func @conv_s1_relu_kernel(%arg0: i32, %arg1: memref<1x30x192xbf16, #tpu.memory_space<vmem>>, %arg2: memref<9x192x384xbf16, #tpu.memory_space<vmem>>, %arg3: memref<1x384xf32, #tpu.memory_space<vmem>>, %arg4: memref<1x15x384xbf16, #tpu.memory_space<vmem>>) attributes {dimension_semantics = [#tpu.dimension_semantics<parallel>], iteration_bounds = array<i64: 2>, scalar_prefetch = 0 : i64, scratch_operands = 0 : i64, tpu.core_type = #tpu.core_type<tc>, window_params = [{transform_indices = @transform_0, window_bounds = array<i64: 1, 30, 192>}, {pipeline_mode = #tpu.pipeline_mode<synchronous>, transform_indices = @transform_1, window_bounds = array<i64: 9, 192, 384>}, {pipeline_mode = #tpu.pipeline_mode<synchronous>, transform_indices = @transform_2, window_bounds = array<i64: 1, 384>}, {transform_indices = @transform_3, window_bounds = array<i64: 1, 15, 384>}]} {
    %cst = arith.constant 0.000000e+00 : f32
    %0 = vector.broadcast %cst : f32 to vector<15x384xf32>
    %c0 = arith.constant 0 : index
    %c0_0 = arith.constant 0 : index
    %c0_1 = arith.constant 0 : index
    %1 = vector.load %arg1[%c0, %c0_0, %c0_1] : memref<1x30x192xbf16, #tpu.memory_space<vmem>>, vector<1x15x192xbf16>
    %2 = vector.shape_cast %1 : vector<1x15x192xbf16> to vector<15x192xbf16>
    %c0_2 = arith.constant 0 : index
    %c0_3 = arith.constant 0 : index
    %c0_4 = arith.constant 0 : index
    %3 = vector.load %arg2[%c0_2, %c0_3, %c0_4] : memref<9x192x384xbf16, #tpu.memory_space<vmem>>, vector<1x192x384xbf16>
    %4 = vector.shape_cast %3 : vector<1x192x384xbf16> to vector<192x384xbf16>
    %cst_5 = arith.constant dense<0.000000e+00> : vector<15x384xf32>
    %5 = tpu.matmul %2, %4, %cst_5 {dimension_numbers = #tpu.dot_dimension_numbers<[1], [0], [0], [1], [0, 0, 1, 1], [], []>} : vector<15x192xbf16>, vector<192x384xbf16>, vector<15x384xf32> -> vector<15x384xf32>
    %6 = arith.addf %0, %5 : vector<15x384xf32>
    %c0_6 = arith.constant 0 : index
    %c1 = arith.constant 1 : index
    %c0_7 = arith.constant 0 : index
    %7 = vector.load %arg1[%c0_6, %c1, %c0_7] : memref<1x30x192xbf16, #tpu.memory_space<vmem>>, vector<1x15x192xbf16>
    %8 = vector.shape_cast %7 : vector<1x15x192xbf16> to vector<15x192xbf16>
    %c1_8 = arith.constant 1 : index
    %c0_9 = arith.constant 0 : index
    %c0_10 = arith.constant 0 : index
    %9 = vector.load %arg2[%c1_8, %c0_9, %c0_10] : memref<9x192x384xbf16, #tpu.memory_space<vmem>>, vector<1x192x384xbf16>
    %10 = vector.shape_cast %9 : vector<1x192x384xbf16> to vector<192x384xbf16>
    %cst_11 = arith.constant dense<0.000000e+00> : vector<15x384xf32>
    %11 = tpu.matmul %8, %10, %cst_11 {dimension_numbers = #tpu.dot_dimension_numbers<[1], [0], [0], [1], [0, 0, 1, 1], [], []>} : vector<15x192xbf16>, vector<192x384xbf16>, vector<15x384xf32> -> vector<15x384xf32>
    %12 = arith.addf %6, %11 : vector<15x384xf32>
    %c0_12 = arith.constant 0 : index
    %c2 = arith.constant 2 : index
    %c0_13 = arith.constant 0 : index
    %13 = vector.load %arg1[%c0_12, %c2, %c0_13] : memref<1x30x192xbf16, #tpu.memory_space<vmem>>, vector<1x15x192xbf16>
    %14 = vector.shape_cast %13 : vector<1x15x192xbf16> to vector<15x192xbf16>
    %c2_14 = arith.constant 2 : index
    %c0_15 = arith.constant 0 : index
    %c0_16 = arith.constant 0 : index
    %15 = vector.load %arg2[%c2_14, %c0_15, %c0_16] : memref<9x192x384xbf16, #tpu.memory_space<vmem>>, vector<1x192x384xbf16>
    %16 = vector.shape_cast %15 : vector<1x192x384xbf16> to vector<192x384xbf16>
    %cst_17 = arith.constant dense<0.000000e+00> : vector<15x384xf32>
    %17 = tpu.matmul %14, %16, %cst_17 {dimension_numbers = #tpu.dot_dimension_numbers<[1], [0], [0], [1], [0, 0, 1, 1], [], []>} : vector<15x192xbf16>, vector<192x384xbf16>, vector<15x384xf32> -> vector<15x384xf32>
    %18 = arith.addf %12, %17 : vector<15x384xf32>
    %c0_18 = arith.constant 0 : index
    %c5 = arith.constant 5 : index
    %c0_19 = arith.constant 0 : index
    %19 = vector.load %arg1[%c0_18, %c5, %c0_19] : memref<1x30x192xbf16, #tpu.memory_space<vmem>>, vector<1x15x192xbf16>
    %20 = vector.shape_cast %19 : vector<1x15x192xbf16> to vector<15x192xbf16>
    %c3 = arith.constant 3 : index
    %c0_20 = arith.constant 0 : index
    %c0_21 = arith.constant 0 : index
    %21 = vector.load %arg2[%c3, %c0_20, %c0_21] : memref<9x192x384xbf16, #tpu.memory_space<vmem>>, vector<1x192x384xbf16>
    %22 = vector.shape_cast %21 : vector<1x192x384xbf16> to vector<192x384xbf16>
    %cst_22 = arith.constant dense<0.000000e+00> : vector<15x384xf32>
    %23 = tpu.matmul %20, %22, %cst_22 {dimension_numbers = #tpu.dot_dimension_numbers<[1], [0], [0], [1], [0, 0, 1, 1], [], []>} : vector<15x192xbf16>, vector<192x384xbf16>, vector<15x384xf32> -> vector<15x384xf32>
    %24 = arith.addf %18, %23 : vector<15x384xf32>
    %c0_23 = arith.constant 0 : index
    %c6 = arith.constant 6 : index
    %c0_24 = arith.constant 0 : index
    %25 = vector.load %arg1[%c0_23, %c6, %c0_24] : memref<1x30x192xbf16, #tpu.memory_space<vmem>>, vector<1x15x192xbf16>
    %26 = vector.shape_cast %25 : vector<1x15x192xbf16> to vector<15x192xbf16>
    %c4 = arith.constant 4 : index
    %c0_25 = arith.constant 0 : index
    %c0_26 = arith.constant 0 : index
    %27 = vector.load %arg2[%c4, %c0_25, %c0_26] : memref<9x192x384xbf16, #tpu.memory_space<vmem>>, vector<1x192x384xbf16>
    %28 = vector.shape_cast %27 : vector<1x192x384xbf16> to vector<192x384xbf16>
    %cst_27 = arith.constant dense<0.000000e+00> : vector<15x384xf32>
    %29 = tpu.matmul %26, %28, %cst_27 {dimension_numbers = #tpu.dot_dimension_numbers<[1], [0], [0], [1], [0, 0, 1, 1], [], []>} : vector<15x192xbf16>, vector<192x384xbf16>, vector<15x384xf32> -> vector<15x384xf32>
    %30 = arith.addf %24, %29 : vector<15x384xf32>
    %c0_28 = arith.constant 0 : index
    %c7 = arith.constant 7 : index
    %c0_29 = arith.constant 0 : index
    %31 = vector.load %arg1[%c0_28, %c7, %c0_29] : memref<1x30x192xbf16, #tpu.memory_space<vmem>>, vector<1x15x192xbf16>
    %32 = vector.shape_cast %31 : vector<1x15x192xbf16> to vector<15x192xbf16>
    %c5_30 = arith.constant 5 : index
    %c0_31 = arith.constant 0 : index
    %c0_32 = arith.constant 0 : index
    %33 = vector.load %arg2[%c5_30, %c0_31, %c0_32] : memref<9x192x384xbf16, #tpu.memory_space<vmem>>, vector<1x192x384xbf16>
    %34 = vector.shape_cast %33 : vector<1x192x384xbf16> to vector<192x384xbf16>
    %cst_33 = arith.constant dense<0.000000e+00> : vector<15x384xf32>
    %35 = tpu.matmul %32, %34, %cst_33 {dimension_numbers = #tpu.dot_dimension_numbers<[1], [0], [0], [1], [0, 0, 1, 1], [], []>} : vector<15x192xbf16>, vector<192x384xbf16>, vector<15x384xf32> -> vector<15x384xf32>
    %36 = arith.addf %30, %35 : vector<15x384xf32>
    %c0_34 = arith.constant 0 : index
    %c10 = arith.constant 10 : index
    %c0_35 = arith.constant 0 : index
    %37 = vector.load %arg1[%c0_34, %c10, %c0_35] : memref<1x30x192xbf16, #tpu.memory_space<vmem>>, vector<1x15x192xbf16>
    %38 = vector.shape_cast %37 : vector<1x15x192xbf16> to vector<15x192xbf16>
    %c6_36 = arith.constant 6 : index
    %c0_37 = arith.constant 0 : index
    %c0_38 = arith.constant 0 : index
    %39 = vector.load %arg2[%c6_36, %c0_37, %c0_38] : memref<9x192x384xbf16, #tpu.memory_space<vmem>>, vector<1x192x384xbf16>
    %40 = vector.shape_cast %39 : vector<1x192x384xbf16> to vector<192x384xbf16>
    %cst_39 = arith.constant dense<0.000000e+00> : vector<15x384xf32>
    %41 = tpu.matmul %38, %40, %cst_39 {dimension_numbers = #tpu.dot_dimension_numbers<[1], [0], [0], [1], [0, 0, 1, 1], [], []>} : vector<15x192xbf16>, vector<192x384xbf16>, vector<15x384xf32> -> vector<15x384xf32>
    %42 = arith.addf %36, %41 : vector<15x384xf32>
    %c0_40 = arith.constant 0 : index
    %c11 = arith.constant 11 : index
    %c0_41 = arith.constant 0 : index
    %43 = vector.load %arg1[%c0_40, %c11, %c0_41] : memref<1x30x192xbf16, #tpu.memory_space<vmem>>, vector<1x15x192xbf16>
    %44 = vector.shape_cast %43 : vector<1x15x192xbf16> to vector<15x192xbf16>
    %c7_42 = arith.constant 7 : index
    %c0_43 = arith.constant 0 : index
    %c0_44 = arith.constant 0 : index
    %45 = vector.load %arg2[%c7_42, %c0_43, %c0_44] : memref<9x192x384xbf16, #tpu.memory_space<vmem>>, vector<1x192x384xbf16>
    %46 = vector.shape_cast %45 : vector<1x192x384xbf16> to vector<192x384xbf16>
    %cst_45 = arith.constant dense<0.000000e+00> : vector<15x384xf32>
    %47 = tpu.matmul %44, %46, %cst_45 {dimension_numbers = #tpu.dot_dimension_numbers<[1], [0], [0], [1], [0, 0, 1, 1], [], []>} : vector<15x192xbf16>, vector<192x384xbf16>, vector<15x384xf32> -> vector<15x384xf32>
    %48 = arith.addf %42, %47 : vector<15x384xf32>
    %c0_46 = arith.constant 0 : index
    %c12 = arith.constant 12 : index
    %c0_47 = arith.constant 0 : index
    %49 = vector.load %arg1[%c0_46, %c12, %c0_47] : memref<1x30x192xbf16, #tpu.memory_space<vmem>>, vector<1x15x192xbf16>
    %50 = vector.shape_cast %49 : vector<1x15x192xbf16> to vector<15x192xbf16>
    %c8 = arith.constant 8 : index
    %c0_48 = arith.constant 0 : index
    %c0_49 = arith.constant 0 : index
    %51 = vector.load %arg2[%c8, %c0_48, %c0_49] : memref<9x192x384xbf16, #tpu.memory_space<vmem>>, vector<1x192x384xbf16>
    %52 = vector.shape_cast %51 : vector<1x192x384xbf16> to vector<192x384xbf16>
    %cst_50 = arith.constant dense<0.000000e+00> : vector<15x384xf32>
    %53 = tpu.matmul %50, %52, %cst_50 {dimension_numbers = #tpu.dot_dimension_numbers<[1], [0], [0], [1], [0, 0, 1, 1], [], []>} : vector<15x192xbf16>, vector<192x384xbf16>, vector<15x384xf32> -> vector<15x384xf32>
    %54 = arith.addf %48, %53 : vector<15x384xf32>
    %c0_51 = arith.constant 0 : index
    %c0_52 = arith.constant 0 : index
    %55 = vector.load %arg3[%c0_51, %c0_52] : memref<1x384xf32, #tpu.memory_space<vmem>>, vector<1x384xf32>
    %56 = vector.broadcast %55 : vector<1x384xf32> to vector<15x384xf32>
    %57 = arith.addf %54, %56 : vector<15x384xf32>
    %cst_53 = arith.constant 0.000000e+00 : f32
    %58 = vector.broadcast %cst_53 : f32 to vector<15x384xf32>
    %59 = arith.maximumf %57, %58 : vector<15x384xf32>
    %60 = arith.truncf %59 : vector<15x384xf32> to vector<15x384xbf16>
    %c0_54 = arith.constant 0 : index
    %c0_55 = arith.constant 0 : index
    %c0_56 = arith.constant 0 : index
    %61 = vector.load %arg4[%c0_54, %c0_55, %c0_56] : memref<1x15x384xbf16, #tpu.memory_space<vmem>>, vector<1x15x384xbf16>
    %62 = vector.shape_cast %61 : vector<1x15x384xbf16> to vector<15x384xbf16>
    %63 = vector.shape_cast %60 : vector<15x384xbf16> to vector<1x15x384xbf16>
    tpu.vector_store %arg4[%c0_54, %c0_55, %c0_56], %63 {strides = array<i32>} : memref<1x15x384xbf16, #tpu.memory_space<vmem>>, vector<1x15x384xbf16>,
    return
  }
  func.func @transform_0(%arg0: i32) -> (i32, i32, i32) {
    %c0_i32 = arith.constant 0 : i32
    %c0_i32_0 = arith.constant 0 : i32
    %c0_i32_1 = arith.constant 0 : i32
    return %arg0, %c0_i32, %c0_i32_0 : i32, i32, i32
  }
  func.func @transform_1(%arg0: i32) -> (i32, i32, i32) {
    %c0_i32 = arith.constant 0 : i32
    %c0_i32_0 = arith.constant 0 : i32
    %c0_i32_1 = arith.constant 0 : i32
    %c0_i32_2 = arith.constant 0 : i32
    return %c0_i32, %c0_i32_0, %c0_i32_1 : i32, i32, i32
  }
  func.func @transform_2(%arg0: i32) -> (i32, i32) {
    %c0_i32 = arith.constant 0 : i32
    %c0_i32_0 = arith.constant 0 : i32
    %c0_i32_1 = arith.constant 0 : i32
    return %c0_i32, %c0_i32_0 : i32, i32
  }
  func.func @transform_3(%arg0: i32) -> (i32, i32, i32) {
    %c0_i32 = arith.constant 0 : i32
    %c0_i32_0 = arith.constant 0 : i32
    %c0_i32_1 = arith.constant 0 : i32
    return %arg0, %c0_i32, %c0_i32_0 : i32, i32, i32
  }
}

module attributes {stable_mosaic.version = 11 : i64} {
  func.func @conv_s1_relu_kernel(%arg0: i32, %arg1: memref<1x30x384xbf16, #tpu.memory_space<vmem>>, %arg2: memref<9x384x256xbf16, #tpu.memory_space<vmem>>, %arg3: memref<1x256xf32, #tpu.memory_space<vmem>>, %arg4: memref<1x15x256xbf16, #tpu.memory_space<vmem>>) attributes {dimension_semantics = [#tpu.dimension_semantics<parallel>], iteration_bounds = array<i64: 2>, scalar_prefetch = 0 : i64, scratch_operands = 0 : i64, tpu.core_type = #tpu.core_type<tc>, window_params = [{transform_indices = @transform_0, window_bounds = array<i64: 1, 30, 384>}, {pipeline_mode = #tpu.pipeline_mode<synchronous>, transform_indices = @transform_1, window_bounds = array<i64: 9, 384, 256>}, {pipeline_mode = #tpu.pipeline_mode<synchronous>, transform_indices = @transform_2, window_bounds = array<i64: 1, 256>}, {transform_indices = @transform_3, window_bounds = array<i64: 1, 15, 256>}]} {
    %cst = arith.constant 0.000000e+00 : f32
    %0 = vector.broadcast %cst : f32 to vector<15x256xf32>
    %c0 = arith.constant 0 : index
    %c0_0 = arith.constant 0 : index
    %c0_1 = arith.constant 0 : index
    %1 = vector.load %arg1[%c0, %c0_0, %c0_1] : memref<1x30x384xbf16, #tpu.memory_space<vmem>>, vector<1x15x384xbf16>
    %2 = vector.shape_cast %1 : vector<1x15x384xbf16> to vector<15x384xbf16>
    %c0_2 = arith.constant 0 : index
    %c0_3 = arith.constant 0 : index
    %c0_4 = arith.constant 0 : index
    %3 = vector.load %arg2[%c0_2, %c0_3, %c0_4] : memref<9x384x256xbf16, #tpu.memory_space<vmem>>, vector<1x384x256xbf16>
    %4 = vector.shape_cast %3 : vector<1x384x256xbf16> to vector<384x256xbf16>
    %cst_5 = arith.constant dense<0.000000e+00> : vector<15x256xf32>
    %5 = tpu.matmul %2, %4, %cst_5 {dimension_numbers = #tpu.dot_dimension_numbers<[1], [0], [0], [1], [0, 0, 1, 1], [], []>} : vector<15x384xbf16>, vector<384x256xbf16>, vector<15x256xf32> -> vector<15x256xf32>
    %6 = arith.addf %0, %5 : vector<15x256xf32>
    %c0_6 = arith.constant 0 : index
    %c1 = arith.constant 1 : index
    %c0_7 = arith.constant 0 : index
    %7 = vector.load %arg1[%c0_6, %c1, %c0_7] : memref<1x30x384xbf16, #tpu.memory_space<vmem>>, vector<1x15x384xbf16>
    %8 = vector.shape_cast %7 : vector<1x15x384xbf16> to vector<15x384xbf16>
    %c1_8 = arith.constant 1 : index
    %c0_9 = arith.constant 0 : index
    %c0_10 = arith.constant 0 : index
    %9 = vector.load %arg2[%c1_8, %c0_9, %c0_10] : memref<9x384x256xbf16, #tpu.memory_space<vmem>>, vector<1x384x256xbf16>
    %10 = vector.shape_cast %9 : vector<1x384x256xbf16> to vector<384x256xbf16>
    %cst_11 = arith.constant dense<0.000000e+00> : vector<15x256xf32>
    %11 = tpu.matmul %8, %10, %cst_11 {dimension_numbers = #tpu.dot_dimension_numbers<[1], [0], [0], [1], [0, 0, 1, 1], [], []>} : vector<15x384xbf16>, vector<384x256xbf16>, vector<15x256xf32> -> vector<15x256xf32>
    %12 = arith.addf %6, %11 : vector<15x256xf32>
    %c0_12 = arith.constant 0 : index
    %c2 = arith.constant 2 : index
    %c0_13 = arith.constant 0 : index
    %13 = vector.load %arg1[%c0_12, %c2, %c0_13] : memref<1x30x384xbf16, #tpu.memory_space<vmem>>, vector<1x15x384xbf16>
    %14 = vector.shape_cast %13 : vector<1x15x384xbf16> to vector<15x384xbf16>
    %c2_14 = arith.constant 2 : index
    %c0_15 = arith.constant 0 : index
    %c0_16 = arith.constant 0 : index
    %15 = vector.load %arg2[%c2_14, %c0_15, %c0_16] : memref<9x384x256xbf16, #tpu.memory_space<vmem>>, vector<1x384x256xbf16>
    %16 = vector.shape_cast %15 : vector<1x384x256xbf16> to vector<384x256xbf16>
    %cst_17 = arith.constant dense<0.000000e+00> : vector<15x256xf32>
    %17 = tpu.matmul %14, %16, %cst_17 {dimension_numbers = #tpu.dot_dimension_numbers<[1], [0], [0], [1], [0, 0, 1, 1], [], []>} : vector<15x384xbf16>, vector<384x256xbf16>, vector<15x256xf32> -> vector<15x256xf32>
    %18 = arith.addf %12, %17 : vector<15x256xf32>
    %c0_18 = arith.constant 0 : index
    %c5 = arith.constant 5 : index
    %c0_19 = arith.constant 0 : index
    %19 = vector.load %arg1[%c0_18, %c5, %c0_19] : memref<1x30x384xbf16, #tpu.memory_space<vmem>>, vector<1x15x384xbf16>
    %20 = vector.shape_cast %19 : vector<1x15x384xbf16> to vector<15x384xbf16>
    %c3 = arith.constant 3 : index
    %c0_20 = arith.constant 0 : index
    %c0_21 = arith.constant 0 : index
    %21 = vector.load %arg2[%c3, %c0_20, %c0_21] : memref<9x384x256xbf16, #tpu.memory_space<vmem>>, vector<1x384x256xbf16>
    %22 = vector.shape_cast %21 : vector<1x384x256xbf16> to vector<384x256xbf16>
    %cst_22 = arith.constant dense<0.000000e+00> : vector<15x256xf32>
    %23 = tpu.matmul %20, %22, %cst_22 {dimension_numbers = #tpu.dot_dimension_numbers<[1], [0], [0], [1], [0, 0, 1, 1], [], []>} : vector<15x384xbf16>, vector<384x256xbf16>, vector<15x256xf32> -> vector<15x256xf32>
    %24 = arith.addf %18, %23 : vector<15x256xf32>
    %c0_23 = arith.constant 0 : index
    %c6 = arith.constant 6 : index
    %c0_24 = arith.constant 0 : index
    %25 = vector.load %arg1[%c0_23, %c6, %c0_24] : memref<1x30x384xbf16, #tpu.memory_space<vmem>>, vector<1x15x384xbf16>
    %26 = vector.shape_cast %25 : vector<1x15x384xbf16> to vector<15x384xbf16>
    %c4 = arith.constant 4 : index
    %c0_25 = arith.constant 0 : index
    %c0_26 = arith.constant 0 : index
    %27 = vector.load %arg2[%c4, %c0_25, %c0_26] : memref<9x384x256xbf16, #tpu.memory_space<vmem>>, vector<1x384x256xbf16>
    %28 = vector.shape_cast %27 : vector<1x384x256xbf16> to vector<384x256xbf16>
    %cst_27 = arith.constant dense<0.000000e+00> : vector<15x256xf32>
    %29 = tpu.matmul %26, %28, %cst_27 {dimension_numbers = #tpu.dot_dimension_numbers<[1], [0], [0], [1], [0, 0, 1, 1], [], []>} : vector<15x384xbf16>, vector<384x256xbf16>, vector<15x256xf32> -> vector<15x256xf32>
    %30 = arith.addf %24, %29 : vector<15x256xf32>
    %c0_28 = arith.constant 0 : index
    %c7 = arith.constant 7 : index
    %c0_29 = arith.constant 0 : index
    %31 = vector.load %arg1[%c0_28, %c7, %c0_29] : memref<1x30x384xbf16, #tpu.memory_space<vmem>>, vector<1x15x384xbf16>
    %32 = vector.shape_cast %31 : vector<1x15x384xbf16> to vector<15x384xbf16>
    %c5_30 = arith.constant 5 : index
    %c0_31 = arith.constant 0 : index
    %c0_32 = arith.constant 0 : index
    %33 = vector.load %arg2[%c5_30, %c0_31, %c0_32] : memref<9x384x256xbf16, #tpu.memory_space<vmem>>, vector<1x384x256xbf16>
    %34 = vector.shape_cast %33 : vector<1x384x256xbf16> to vector<384x256xbf16>
    %cst_33 = arith.constant dense<0.000000e+00> : vector<15x256xf32>
    %35 = tpu.matmul %32, %34, %cst_33 {dimension_numbers = #tpu.dot_dimension_numbers<[1], [0], [0], [1], [0, 0, 1, 1], [], []>} : vector<15x384xbf16>, vector<384x256xbf16>, vector<15x256xf32> -> vector<15x256xf32>
    %36 = arith.addf %30, %35 : vector<15x256xf32>
    %c0_34 = arith.constant 0 : index
    %c10 = arith.constant 10 : index
    %c0_35 = arith.constant 0 : index
    %37 = vector.load %arg1[%c0_34, %c10, %c0_35] : memref<1x30x384xbf16, #tpu.memory_space<vmem>>, vector<1x15x384xbf16>
    %38 = vector.shape_cast %37 : vector<1x15x384xbf16> to vector<15x384xbf16>
    %c6_36 = arith.constant 6 : index
    %c0_37 = arith.constant 0 : index
    %c0_38 = arith.constant 0 : index
    %39 = vector.load %arg2[%c6_36, %c0_37, %c0_38] : memref<9x384x256xbf16, #tpu.memory_space<vmem>>, vector<1x384x256xbf16>
    %40 = vector.shape_cast %39 : vector<1x384x256xbf16> to vector<384x256xbf16>
    %cst_39 = arith.constant dense<0.000000e+00> : vector<15x256xf32>
    %41 = tpu.matmul %38, %40, %cst_39 {dimension_numbers = #tpu.dot_dimension_numbers<[1], [0], [0], [1], [0, 0, 1, 1], [], []>} : vector<15x384xbf16>, vector<384x256xbf16>, vector<15x256xf32> -> vector<15x256xf32>
    %42 = arith.addf %36, %41 : vector<15x256xf32>
    %c0_40 = arith.constant 0 : index
    %c11 = arith.constant 11 : index
    %c0_41 = arith.constant 0 : index
    %43 = vector.load %arg1[%c0_40, %c11, %c0_41] : memref<1x30x384xbf16, #tpu.memory_space<vmem>>, vector<1x15x384xbf16>
    %44 = vector.shape_cast %43 : vector<1x15x384xbf16> to vector<15x384xbf16>
    %c7_42 = arith.constant 7 : index
    %c0_43 = arith.constant 0 : index
    %c0_44 = arith.constant 0 : index
    %45 = vector.load %arg2[%c7_42, %c0_43, %c0_44] : memref<9x384x256xbf16, #tpu.memory_space<vmem>>, vector<1x384x256xbf16>
    %46 = vector.shape_cast %45 : vector<1x384x256xbf16> to vector<384x256xbf16>
    %cst_45 = arith.constant dense<0.000000e+00> : vector<15x256xf32>
    %47 = tpu.matmul %44, %46, %cst_45 {dimension_numbers = #tpu.dot_dimension_numbers<[1], [0], [0], [1], [0, 0, 1, 1], [], []>} : vector<15x384xbf16>, vector<384x256xbf16>, vector<15x256xf32> -> vector<15x256xf32>
    %48 = arith.addf %42, %47 : vector<15x256xf32>
    %c0_46 = arith.constant 0 : index
    %c12 = arith.constant 12 : index
    %c0_47 = arith.constant 0 : index
    %49 = vector.load %arg1[%c0_46, %c12, %c0_47] : memref<1x30x384xbf16, #tpu.memory_space<vmem>>, vector<1x15x384xbf16>
    %50 = vector.shape_cast %49 : vector<1x15x384xbf16> to vector<15x384xbf16>
    %c8 = arith.constant 8 : index
    %c0_48 = arith.constant 0 : index
    %c0_49 = arith.constant 0 : index
    %51 = vector.load %arg2[%c8, %c0_48, %c0_49] : memref<9x384x256xbf16, #tpu.memory_space<vmem>>, vector<1x384x256xbf16>
    %52 = vector.shape_cast %51 : vector<1x384x256xbf16> to vector<384x256xbf16>
    %cst_50 = arith.constant dense<0.000000e+00> : vector<15x256xf32>
    %53 = tpu.matmul %50, %52, %cst_50 {dimension_numbers = #tpu.dot_dimension_numbers<[1], [0], [0], [1], [0, 0, 1, 1], [], []>} : vector<15x384xbf16>, vector<384x256xbf16>, vector<15x256xf32> -> vector<15x256xf32>
    %54 = arith.addf %48, %53 : vector<15x256xf32>
    %c0_51 = arith.constant 0 : index
    %c0_52 = arith.constant 0 : index
    %55 = vector.load %arg3[%c0_51, %c0_52] : memref<1x256xf32, #tpu.memory_space<vmem>>, vector<1x256xf32>
    %56 = vector.broadcast %55 : vector<1x256xf32> to vector<15x256xf32>
    %57 = arith.addf %54, %56 : vector<15x256xf32>
    %cst_53 = arith.constant 0.000000e+00 : f32
    %58 = vector.broadcast %cst_53 : f32 to vector<15x256xf32>
    %59 = arith.maximumf %57, %58 : vector<15x256xf32>
    %60 = arith.truncf %59 : vector<15x256xf32> to vector<15x256xbf16>
    %c0_54 = arith.constant 0 : index
    %c0_55 = arith.constant 0 : index
    %c0_56 = arith.constant 0 : index
    %61 = vector.load %arg4[%c0_54, %c0_55, %c0_56] : memref<1x15x256xbf16, #tpu.memory_space<vmem>>, vector<1x15x256xbf16>
    %62 = vector.shape_cast %61 : vector<1x15x256xbf16> to vector<15x256xbf16>
    %63 = vector.shape_cast %60 : vector<15x256xbf16> to vector<1x15x256xbf16>
    tpu.vector_store %arg4[%c0_54, %c0_55, %c0_56], %63 {strides = array<i32>} : memref<1x15x256xbf16, #tpu.memory_space<vmem>>, vector<1x15x256xbf16>,
    return
  }
  func.func @transform_0(%arg0: i32) -> (i32, i32, i32) {
    %c0_i32 = arith.constant 0 : i32
    %c0_i32_0 = arith.constant 0 : i32
    %c0_i32_1 = arith.constant 0 : i32
    return %arg0, %c0_i32, %c0_i32_0 : i32, i32, i32
  }
  func.func @transform_1(%arg0: i32) -> (i32, i32, i32) {
    %c0_i32 = arith.constant 0 : i32
    %c0_i32_0 = arith.constant 0 : i32
    %c0_i32_1 = arith.constant 0 : i32
    %c0_i32_2 = arith.constant 0 : i32
    return %c0_i32, %c0_i32_0, %c0_i32_1 : i32, i32, i32
  }
  func.func @transform_2(%arg0: i32) -> (i32, i32) {
    %c0_i32 = arith.constant 0 : i32
    %c0_i32_0 = arith.constant 0 : i32
    %c0_i32_1 = arith.constant 0 : i32
    return %c0_i32, %c0_i32_0 : i32, i32
  }
  func.func @transform_3(%arg0: i32) -> (i32, i32, i32) {
    %c0_i32 = arith.constant 0 : i32
    %c0_i32_0 = arith.constant 0 : i32
    %c0_i32_1 = arith.constant 0 : i32
    return %arg0, %c0_i32, %c0_i32_0 : i32, i32, i32
  }
}

module attributes {stable_mosaic.version = 11 : i64} {
  func.func @conv_s1_relu_kernel(%arg0: i32, %arg1: memref<1x30x256xbf16, #tpu.memory_space<vmem>>, %arg2: memref<9x256x256xbf16, #tpu.memory_space<vmem>>, %arg3: memref<1x256xf32, #tpu.memory_space<vmem>>, %arg4: memref<1x15x256xbf16, #tpu.memory_space<vmem>>) attributes {dimension_semantics = [#tpu.dimension_semantics<parallel>], iteration_bounds = array<i64: 2>, scalar_prefetch = 0 : i64, scratch_operands = 0 : i64, tpu.core_type = #tpu.core_type<tc>, window_params = [{transform_indices = @transform_0, window_bounds = array<i64: 1, 30, 256>}, {pipeline_mode = #tpu.pipeline_mode<synchronous>, transform_indices = @transform_1, window_bounds = array<i64: 9, 256, 256>}, {pipeline_mode = #tpu.pipeline_mode<synchronous>, transform_indices = @transform_2, window_bounds = array<i64: 1, 256>}, {transform_indices = @transform_3, window_bounds = array<i64: 1, 15, 256>}]} {
    %cst = arith.constant 0.000000e+00 : f32
    %0 = vector.broadcast %cst : f32 to vector<15x256xf32>
    %c0 = arith.constant 0 : index
    %c0_0 = arith.constant 0 : index
    %c0_1 = arith.constant 0 : index
    %1 = vector.load %arg1[%c0, %c0_0, %c0_1] : memref<1x30x256xbf16, #tpu.memory_space<vmem>>, vector<1x15x256xbf16>
    %2 = vector.shape_cast %1 : vector<1x15x256xbf16> to vector<15x256xbf16>
    %c0_2 = arith.constant 0 : index
    %c0_3 = arith.constant 0 : index
    %c0_4 = arith.constant 0 : index
    %3 = vector.load %arg2[%c0_2, %c0_3, %c0_4] : memref<9x256x256xbf16, #tpu.memory_space<vmem>>, vector<1x256x256xbf16>
    %4 = vector.shape_cast %3 : vector<1x256x256xbf16> to vector<256x256xbf16>
    %cst_5 = arith.constant dense<0.000000e+00> : vector<15x256xf32>
    %5 = tpu.matmul %2, %4, %cst_5 {dimension_numbers = #tpu.dot_dimension_numbers<[1], [0], [0], [1], [0, 0, 1, 1], [], []>} : vector<15x256xbf16>, vector<256x256xbf16>, vector<15x256xf32> -> vector<15x256xf32>
    %6 = arith.addf %0, %5 : vector<15x256xf32>
    %c0_6 = arith.constant 0 : index
    %c1 = arith.constant 1 : index
    %c0_7 = arith.constant 0 : index
    %7 = vector.load %arg1[%c0_6, %c1, %c0_7] : memref<1x30x256xbf16, #tpu.memory_space<vmem>>, vector<1x15x256xbf16>
    %8 = vector.shape_cast %7 : vector<1x15x256xbf16> to vector<15x256xbf16>
    %c1_8 = arith.constant 1 : index
    %c0_9 = arith.constant 0 : index
    %c0_10 = arith.constant 0 : index
    %9 = vector.load %arg2[%c1_8, %c0_9, %c0_10] : memref<9x256x256xbf16, #tpu.memory_space<vmem>>, vector<1x256x256xbf16>
    %10 = vector.shape_cast %9 : vector<1x256x256xbf16> to vector<256x256xbf16>
    %cst_11 = arith.constant dense<0.000000e+00> : vector<15x256xf32>
    %11 = tpu.matmul %8, %10, %cst_11 {dimension_numbers = #tpu.dot_dimension_numbers<[1], [0], [0], [1], [0, 0, 1, 1], [], []>} : vector<15x256xbf16>, vector<256x256xbf16>, vector<15x256xf32> -> vector<15x256xf32>
    %12 = arith.addf %6, %11 : vector<15x256xf32>
    %c0_12 = arith.constant 0 : index
    %c2 = arith.constant 2 : index
    %c0_13 = arith.constant 0 : index
    %13 = vector.load %arg1[%c0_12, %c2, %c0_13] : memref<1x30x256xbf16, #tpu.memory_space<vmem>>, vector<1x15x256xbf16>
    %14 = vector.shape_cast %13 : vector<1x15x256xbf16> to vector<15x256xbf16>
    %c2_14 = arith.constant 2 : index
    %c0_15 = arith.constant 0 : index
    %c0_16 = arith.constant 0 : index
    %15 = vector.load %arg2[%c2_14, %c0_15, %c0_16] : memref<9x256x256xbf16, #tpu.memory_space<vmem>>, vector<1x256x256xbf16>
    %16 = vector.shape_cast %15 : vector<1x256x256xbf16> to vector<256x256xbf16>
    %cst_17 = arith.constant dense<0.000000e+00> : vector<15x256xf32>
    %17 = tpu.matmul %14, %16, %cst_17 {dimension_numbers = #tpu.dot_dimension_numbers<[1], [0], [0], [1], [0, 0, 1, 1], [], []>} : vector<15x256xbf16>, vector<256x256xbf16>, vector<15x256xf32> -> vector<15x256xf32>
    %18 = arith.addf %12, %17 : vector<15x256xf32>
    %c0_18 = arith.constant 0 : index
    %c5 = arith.constant 5 : index
    %c0_19 = arith.constant 0 : index
    %19 = vector.load %arg1[%c0_18, %c5, %c0_19] : memref<1x30x256xbf16, #tpu.memory_space<vmem>>, vector<1x15x256xbf16>
    %20 = vector.shape_cast %19 : vector<1x15x256xbf16> to vector<15x256xbf16>
    %c3 = arith.constant 3 : index
    %c0_20 = arith.constant 0 : index
    %c0_21 = arith.constant 0 : index
    %21 = vector.load %arg2[%c3, %c0_20, %c0_21] : memref<9x256x256xbf16, #tpu.memory_space<vmem>>, vector<1x256x256xbf16>
    %22 = vector.shape_cast %21 : vector<1x256x256xbf16> to vector<256x256xbf16>
    %cst_22 = arith.constant dense<0.000000e+00> : vector<15x256xf32>
    %23 = tpu.matmul %20, %22, %cst_22 {dimension_numbers = #tpu.dot_dimension_numbers<[1], [0], [0], [1], [0, 0, 1, 1], [], []>} : vector<15x256xbf16>, vector<256x256xbf16>, vector<15x256xf32> -> vector<15x256xf32>
    %24 = arith.addf %18, %23 : vector<15x256xf32>
    %c0_23 = arith.constant 0 : index
    %c6 = arith.constant 6 : index
    %c0_24 = arith.constant 0 : index
    %25 = vector.load %arg1[%c0_23, %c6, %c0_24] : memref<1x30x256xbf16, #tpu.memory_space<vmem>>, vector<1x15x256xbf16>
    %26 = vector.shape_cast %25 : vector<1x15x256xbf16> to vector<15x256xbf16>
    %c4 = arith.constant 4 : index
    %c0_25 = arith.constant 0 : index
    %c0_26 = arith.constant 0 : index
    %27 = vector.load %arg2[%c4, %c0_25, %c0_26] : memref<9x256x256xbf16, #tpu.memory_space<vmem>>, vector<1x256x256xbf16>
    %28 = vector.shape_cast %27 : vector<1x256x256xbf16> to vector<256x256xbf16>
    %cst_27 = arith.constant dense<0.000000e+00> : vector<15x256xf32>
    %29 = tpu.matmul %26, %28, %cst_27 {dimension_numbers = #tpu.dot_dimension_numbers<[1], [0], [0], [1], [0, 0, 1, 1], [], []>} : vector<15x256xbf16>, vector<256x256xbf16>, vector<15x256xf32> -> vector<15x256xf32>
    %30 = arith.addf %24, %29 : vector<15x256xf32>
    %c0_28 = arith.constant 0 : index
    %c7 = arith.constant 7 : index
    %c0_29 = arith.constant 0 : index
    %31 = vector.load %arg1[%c0_28, %c7, %c0_29] : memref<1x30x256xbf16, #tpu.memory_space<vmem>>, vector<1x15x256xbf16>
    %32 = vector.shape_cast %31 : vector<1x15x256xbf16> to vector<15x256xbf16>
    %c5_30 = arith.constant 5 : index
    %c0_31 = arith.constant 0 : index
    %c0_32 = arith.constant 0 : index
    %33 = vector.load %arg2[%c5_30, %c0_31, %c0_32] : memref<9x256x256xbf16, #tpu.memory_space<vmem>>, vector<1x256x256xbf16>
    %34 = vector.shape_cast %33 : vector<1x256x256xbf16> to vector<256x256xbf16>
    %cst_33 = arith.constant dense<0.000000e+00> : vector<15x256xf32>
    %35 = tpu.matmul %32, %34, %cst_33 {dimension_numbers = #tpu.dot_dimension_numbers<[1], [0], [0], [1], [0, 0, 1, 1], [], []>} : vector<15x256xbf16>, vector<256x256xbf16>, vector<15x256xf32> -> vector<15x256xf32>
    %36 = arith.addf %30, %35 : vector<15x256xf32>
    %c0_34 = arith.constant 0 : index
    %c10 = arith.constant 10 : index
    %c0_35 = arith.constant 0 : index
    %37 = vector.load %arg1[%c0_34, %c10, %c0_35] : memref<1x30x256xbf16, #tpu.memory_space<vmem>>, vector<1x15x256xbf16>
    %38 = vector.shape_cast %37 : vector<1x15x256xbf16> to vector<15x256xbf16>
    %c6_36 = arith.constant 6 : index
    %c0_37 = arith.constant 0 : index
    %c0_38 = arith.constant 0 : index
    %39 = vector.load %arg2[%c6_36, %c0_37, %c0_38] : memref<9x256x256xbf16, #tpu.memory_space<vmem>>, vector<1x256x256xbf16>
    %40 = vector.shape_cast %39 : vector<1x256x256xbf16> to vector<256x256xbf16>
    %cst_39 = arith.constant dense<0.000000e+00> : vector<15x256xf32>
    %41 = tpu.matmul %38, %40, %cst_39 {dimension_numbers = #tpu.dot_dimension_numbers<[1], [0], [0], [1], [0, 0, 1, 1], [], []>} : vector<15x256xbf16>, vector<256x256xbf16>, vector<15x256xf32> -> vector<15x256xf32>
    %42 = arith.addf %36, %41 : vector<15x256xf32>
    %c0_40 = arith.constant 0 : index
    %c11 = arith.constant 11 : index
    %c0_41 = arith.constant 0 : index
    %43 = vector.load %arg1[%c0_40, %c11, %c0_41] : memref<1x30x256xbf16, #tpu.memory_space<vmem>>, vector<1x15x256xbf16>
    %44 = vector.shape_cast %43 : vector<1x15x256xbf16> to vector<15x256xbf16>
    %c7_42 = arith.constant 7 : index
    %c0_43 = arith.constant 0 : index
    %c0_44 = arith.constant 0 : index
    %45 = vector.load %arg2[%c7_42, %c0_43, %c0_44] : memref<9x256x256xbf16, #tpu.memory_space<vmem>>, vector<1x256x256xbf16>
    %46 = vector.shape_cast %45 : vector<1x256x256xbf16> to vector<256x256xbf16>
    %cst_45 = arith.constant dense<0.000000e+00> : vector<15x256xf32>
    %47 = tpu.matmul %44, %46, %cst_45 {dimension_numbers = #tpu.dot_dimension_numbers<[1], [0], [0], [1], [0, 0, 1, 1], [], []>} : vector<15x256xbf16>, vector<256x256xbf16>, vector<15x256xf32> -> vector<15x256xf32>
    %48 = arith.addf %42, %47 : vector<15x256xf32>
    %c0_46 = arith.constant 0 : index
    %c12 = arith.constant 12 : index
    %c0_47 = arith.constant 0 : index
    %49 = vector.load %arg1[%c0_46, %c12, %c0_47] : memref<1x30x256xbf16, #tpu.memory_space<vmem>>, vector<1x15x256xbf16>
    %50 = vector.shape_cast %49 : vector<1x15x256xbf16> to vector<15x256xbf16>
    %c8 = arith.constant 8 : index
    %c0_48 = arith.constant 0 : index
    %c0_49 = arith.constant 0 : index
    %51 = vector.load %arg2[%c8, %c0_48, %c0_49] : memref<9x256x256xbf16, #tpu.memory_space<vmem>>, vector<1x256x256xbf16>
    %52 = vector.shape_cast %51 : vector<1x256x256xbf16> to vector<256x256xbf16>
    %cst_50 = arith.constant dense<0.000000e+00> : vector<15x256xf32>
    %53 = tpu.matmul %50, %52, %cst_50 {dimension_numbers = #tpu.dot_dimension_numbers<[1], [0], [0], [1], [0, 0, 1, 1], [], []>} : vector<15x256xbf16>, vector<256x256xbf16>, vector<15x256xf32> -> vector<15x256xf32>
    %54 = arith.addf %48, %53 : vector<15x256xf32>
    %c0_51 = arith.constant 0 : index
    %c0_52 = arith.constant 0 : index
    %55 = vector.load %arg3[%c0_51, %c0_52] : memref<1x256xf32, #tpu.memory_space<vmem>>, vector<1x256xf32>
    %56 = vector.broadcast %55 : vector<1x256xf32> to vector<15x256xf32>
    %57 = arith.addf %54, %56 : vector<15x256xf32>
    %cst_53 = arith.constant 0.000000e+00 : f32
    %58 = vector.broadcast %cst_53 : f32 to vector<15x256xf32>
    %59 = arith.maximumf %57, %58 : vector<15x256xf32>
    %60 = arith.truncf %59 : vector<15x256xf32> to vector<15x256xbf16>
    %c0_54 = arith.constant 0 : index
    %c0_55 = arith.constant 0 : index
    %c0_56 = arith.constant 0 : index
    %61 = vector.load %arg4[%c0_54, %c0_55, %c0_56] : memref<1x15x256xbf16, #tpu.memory_space<vmem>>, vector<1x15x256xbf16>
    %62 = vector.shape_cast %61 : vector<1x15x256xbf16> to vector<15x256xbf16>
    %63 = vector.shape_cast %60 : vector<15x256xbf16> to vector<1x15x256xbf16>
    tpu.vector_store %arg4[%c0_54, %c0_55, %c0_56], %63 {strides = array<i32>} : memref<1x15x256xbf16, #tpu.memory_space<vmem>>, vector<1x15x256xbf16>,
    return
  }
  func.func @transform_0(%arg0: i32) -> (i32, i32, i32) {
    %c0_i32 = arith.constant 0 : i32
    %c0_i32_0 = arith.constant 0 : i32
    %c0_i32_1 = arith.constant 0 : i32
    return %arg0, %c0_i32, %c0_i32_0 : i32, i32, i32
  }
  func.func @transform_1(%arg0: i32) -> (i32, i32, i32) {
    %c0_i32 = arith.constant 0 : i32
    %c0_i32_0 = arith.constant 0 : i32
    %c0_i32_1 = arith.constant 0 : i32
    %c0_i32_2 = arith.constant 0 : i32
    return %c0_i32, %c0_i32_0, %c0_i32_1 : i32, i32, i32
  }
  func.func @transform_2(%arg0: i32) -> (i32, i32) {
    %c0_i32 = arith.constant 0 : i32
    %c0_i32_0 = arith.constant 0 : i32
    %c0_i32_1 = arith.constant 0 : i32
    return %c0_i32, %c0_i32_0 : i32, i32
  }
  func.func @transform_3(%arg0: i32) -> (i32, i32, i32) {
    %c0_i32 = arith.constant 0 : i32
    %c0_i32_0 = arith.constant 0 : i32
    %c0_i32_1 = arith.constant 0 : i32
    return %arg0, %c0_i32, %c0_i32_0 : i32, i32, i32
  }
}

module attributes {stable_mosaic.version = 11 : i64} {
  func.func @maxpool3x3s2_kernel(%arg0: i32, %arg1: memref<1x2x2x256xbf16, #tpu.memory_space<vmem>>, %arg2: memref<1x2x1x256xbf16, #tpu.memory_space<vmem>>, %arg3: memref<1x1x2x256xbf16, #tpu.memory_space<vmem>>, %arg4: memref<1x1x1x256xbf16, #tpu.memory_space<vmem>>, %arg5: memref<1x1x1x256xbf16, #tpu.memory_space<vmem>>) attributes {dimension_semantics = [#tpu.dimension_semantics<parallel>], iteration_bounds = array<i64: 2>, scalar_prefetch = 0 : i64, scratch_operands = 0 : i64, tpu.core_type = #tpu.core_type<tc>, window_params = [{transform_indices = @transform_0, window_bounds = array<i64: 1, 2, 2, 256>}, {transform_indices = @transform_1, window_bounds = array<i64: 1, 2, 1, 256>}, {transform_indices = @transform_2, window_bounds = array<i64: 1, 1, 2, 256>}, {transform_indices = @transform_3, window_bounds = array<i64: 1, 1, 1, 256>}, {transform_indices = @transform_4, window_bounds = array<i64: 1, 1, 1, 256>}]} {
    %c0 = arith.constant 0 : index
    %c0_0 = arith.constant 0 : index
    %c0_1 = arith.constant 0 : index
    %c0_2 = arith.constant 0 : index
    %0 = vector.load %arg1[%c0, %c0_0, %c0_1, %c0_2] : memref<1x2x2x256xbf16, #tpu.memory_space<vmem>>, vector<1x2x2x256xbf16>
    %1 = vector.shape_cast %0 : vector<1x2x2x256xbf16> to vector<2x2x256xbf16>
    %c0_3 = arith.constant 0 : index
    %c0_4 = arith.constant 0 : index
    %c0_5 = arith.constant 0 : index
    %c0_6 = arith.constant 0 : index
    %2 = vector.load %arg2[%c0_3, %c0_4, %c0_5, %c0_6] : memref<1x2x1x256xbf16, #tpu.memory_space<vmem>>, vector<1x2x1x256xbf16>
    %3 = vector.shape_cast %2 : vector<1x2x1x256xbf16> to vector<2x1x256xbf16>
    %c0_7 = arith.constant 0 : index
    %c0_8 = arith.constant 0 : index
    %c0_9 = arith.constant 0 : index
    %c0_10 = arith.constant 0 : index
    %4 = vector.load %arg3[%c0_7, %c0_8, %c0_9, %c0_10] : memref<1x1x2x256xbf16, #tpu.memory_space<vmem>>, vector<1x1x2x256xbf16>
    %5 = vector.shape_cast %4 : vector<1x1x2x256xbf16> to vector<1x2x256xbf16>
    %c0_11 = arith.constant 0 : index
    %c0_12 = arith.constant 0 : index
    %c0_13 = arith.constant 0 : index
    %c0_14 = arith.constant 0 : index
    %6 = vector.load %arg4[%c0_11, %c0_12, %c0_13, %c0_14] : memref<1x1x1x256xbf16, #tpu.memory_space<vmem>>, vector<1x1x1x256xbf16>
    %7 = vector.shape_cast %6 : vector<1x1x1x256xbf16> to vector<1x1x256xbf16>
    %8 = vector.extract_strided_slice %1 {offsets = [0, 0, 0], sizes = [1, 1, 256], strides = [1, 1, 1]} : vector<2x2x256xbf16> to vector<1x1x256xbf16>
    %9 = vector.extract_strided_slice %1 {offsets = [0, 1, 0], sizes = [1, 1, 256], strides = [1, 1, 1]} : vector<2x2x256xbf16> to vector<1x1x256xbf16>
    %10 = arith.maximumf %8, %9 : vector<1x1x256xbf16>
    %11 = vector.extract_strided_slice %1 {offsets = [1, 0, 0], sizes = [1, 1, 256], strides = [1, 1, 1]} : vector<2x2x256xbf16> to vector<1x1x256xbf16>
    %12 = vector.extract_strided_slice %1 {offsets = [1, 1, 0], sizes = [1, 1, 256], strides = [1, 1, 1]} : vector<2x2x256xbf16> to vector<1x1x256xbf16>
    %13 = arith.maximumf %11, %12 : vector<1x1x256xbf16>
    %14 = arith.maximumf %10, %13 : vector<1x1x256xbf16>
    %15 = vector.extract_strided_slice %3 {offsets = [0, 0, 0], sizes = [1, 1, 256], strides = [1, 1, 1]} : vector<2x1x256xbf16> to vector<1x1x256xbf16>
    %16 = vector.extract_strided_slice %3 {offsets = [1, 0, 0], sizes = [1, 1, 256], strides = [1, 1, 1]} : vector<2x1x256xbf16> to vector<1x1x256xbf16>
    %17 = arith.maximumf %15, %16 : vector<1x1x256xbf16>
    %18 = arith.maximumf %14, %17 : vector<1x1x256xbf16>
    %19 = vector.extract_strided_slice %5 {offsets = [0, 0, 0], sizes = [1, 1, 256], strides = [1, 1, 1]} : vector<1x2x256xbf16> to vector<1x1x256xbf16>
    %20 = vector.extract_strided_slice %5 {offsets = [0, 1, 0], sizes = [1, 1, 256], strides = [1, 1, 1]} : vector<1x2x256xbf16> to vector<1x1x256xbf16>
    %21 = arith.maximumf %19, %20 : vector<1x1x256xbf16>
    %22 = arith.maximumf %18, %21 : vector<1x1x256xbf16>
    %23 = arith.maximumf %22, %7 : vector<1x1x256xbf16>
    %c0_15 = arith.constant 0 : index
    %c0_16 = arith.constant 0 : index
    %c0_17 = arith.constant 0 : index
    %c0_18 = arith.constant 0 : index
    %24 = vector.load %arg5[%c0_15, %c0_16, %c0_17, %c0_18] : memref<1x1x1x256xbf16, #tpu.memory_space<vmem>>, vector<1x1x1x256xbf16>
    %25 = vector.shape_cast %24 : vector<1x1x1x256xbf16> to vector<1x1x256xbf16>
    %26 = vector.shape_cast %23 : vector<1x1x256xbf16> to vector<1x1x1x256xbf16>
    tpu.vector_store %arg5[%c0_15, %c0_16, %c0_17, %c0_18], %26 {strides = array<i32>} : memref<1x1x1x256xbf16, #tpu.memory_space<vmem>>, vector<1x1x1x256xbf16>,
    return
  }
  func.func @transform_0(%arg0: i32) -> (i32, i32, i32, i32) {
    %c0_i32 = arith.constant 0 : i32
    %c0_i32_0 = arith.constant 0 : i32
    %c0_i32_1 = arith.constant 0 : i32
    %c0_i32_2 = arith.constant 0 : i32
    return %arg0, %c0_i32, %c0_i32_0, %c0_i32_1 : i32, i32, i32, i32
  }
  func.func @transform_1(%arg0: i32) -> (i32, i32, i32, i32) {
    %c0_i32 = arith.constant 0 : i32
    %c0_i32_0 = arith.constant 0 : i32
    %c0_i32_1 = arith.constant 0 : i32
    %c0_i32_2 = arith.constant 0 : i32
    return %arg0, %c0_i32, %c0_i32_0, %c0_i32_1 : i32, i32, i32, i32
  }
  func.func @transform_2(%arg0: i32) -> (i32, i32, i32, i32) {
    %c0_i32 = arith.constant 0 : i32
    %c0_i32_0 = arith.constant 0 : i32
    %c0_i32_1 = arith.constant 0 : i32
    %c0_i32_2 = arith.constant 0 : i32
    return %arg0, %c0_i32, %c0_i32_0, %c0_i32_1 : i32, i32, i32, i32
  }
  func.func @transform_3(%arg0: i32) -> (i32, i32, i32, i32) {
    %c0_i32 = arith.constant 0 : i32
    %c0_i32_0 = arith.constant 0 : i32
    %c0_i32_1 = arith.constant 0 : i32
    %c0_i32_2 = arith.constant 0 : i32
    return %arg0, %c0_i32, %c0_i32_0, %c0_i32_1 : i32, i32, i32, i32
  }
  func.func @transform_4(%arg0: i32) -> (i32, i32, i32, i32) {
    %c0_i32 = arith.constant 0 : i32
    %c0_i32_0 = arith.constant 0 : i32
    %c0_i32_1 = arith.constant 0 : i32
    %c0_i32_2 = arith.constant 0 : i32
    return %arg0, %c0_i32, %c0_i32_0, %c0_i32_1 : i32, i32, i32, i32
  }
}

</mosaic_0001>

<bundles_post_ra>
// kernel: alexnet_features.8
= control target key start
LH: loop header
LB: loop body
LE: loop exit
PB: predicated region body
PF: predicated region fallthrough
CT: control target
= control target key end

     0   :  { %s1785_s12 = smov 0   ;;  %s2074_s0 = inlined_call_operand.vmem [shape: bf16[512,363], index: 0, kind: input, shape index: {}]   ;;  %s2075_s1 = inlined_call_operand.vmem [shape: bf16[363,64], index: 1, kind: input, shape index: {}]   ;;  %s2076_s2 = inlined_call_operand.vmem [shape: f32[1,64], index: 2, kind: input, shape index: {}]   ;;  %s2077_s3 = inlined_call_operand.vmem [shape: bf16[512,64], index: 3, kind: output, shape index: {}]  }
   0x1 LB: > { %s1299_s13 = sadd.s32 4294967295, %s1762_s12   ;;  %p1303_p0 = scmp.ge.s32.totalorder %s1762_s12, 1  ;;  %s1762_s12 = sphi %s1785_s12, %s13_s12  }
   0x2   : > { %p139_p1 = scmp.lt.s32.totalorder %s1762_s12, 3 }
   0x4   : > { %p140_p2 = pnand %p1303_p0, %p139_p1 }
   0x5   : > { %v1669_v0 = vld [vmem:[%s2075_s1 + $0x40] sm:$0xff] (!%p140_p2)   ;;  %s1304_s16 = sshll.u32 (!%p140_p2), %s1299_s13, 5  ;;  %v1671_v2 = vld [vmem:[%s2075_s1 + $0x48] sm:$0xff] (!%p140_p2)   ;;  %v1673_v4 = vld [vmem:[%s2075_s1 + $0x50] sm:$0xff] (!%p140_p2)   ;;  %vm721_vm0 = vcmask (!%p140_p2), 1044480   ;;  %vm722_vm1 = vcmask (!%p140_p2), 1045504  }
   0x6   : > { %143 = sbr.rel (%p140_p2) target bundleno = 352 (0x160), region = 32  ;;  %v1670_v1 = vld [vmem:[%s2075_s1] sm:$0xff] (!%p140_p2)   ;;  %1462 = vmatprep.subr.bf16.mxu0 (!%p140_p2), %v1669_v0  ;;  %1643 = vmatprep.subr.bf16.mxu1 (!%p140_p2), %v1669_v0  ;;  %p165_p3 = scmp.lt.s32.totalorder (!%p140_p2), %s1304_s16, 63  ;;  %v1672_v3 = vld [vmem:[%s2075_s1 + $0x8] sm:$0xff] (!%p140_p2)   ;;  %v1674_v5 = vld [vmem:[%s2075_s1 + $0x10] sm:$0xff] (!%p140_p2)   ;;  %v1764_v32 = vmov (!%p140_p2), 65535  }
   0x7   : > { %1463 = vmatpush3.bf16.msra.mxu0 (!%p140_p2), %v1670_v1  ;;  %1651 = vmatpush3.bf16.msra.mxu1 (!%p140_p2), %v1670_v1  ;;  %v1675_v6 = vld [vmem:[%s2075_s1 + $0x58] sm:$0xff] (!%p140_p2)   ;;  %v1677_v8 = vld [vmem:[%s2075_s1 + $0x60] sm:$0xff] (!%p140_p2)   ;;  %v1679_v10 = vld [vmem:[%s2075_s1 + $0x68] sm:$0xff] (!%p140_p2)   ;;  %v723_v33 = vsel (!%p140_p2), %vm721_vm0, 4294967295, %v1764_v32  ;;  %vm672_vm2 = vcmask (!%p140_p2), 875520   ;;  %vm1210_vm3 = vcmask (!%p140_p2), 519168  }
   0x8   : > { %1464 = vmatprep.subr.bf16.mxu0 (!%p140_p2), %v1671_v2  ;;  %1644 = vmatprep.subr.bf16.mxu1 (!%p140_p2), %v1671_v2  ;;  %v1676_v7 = vld [vmem:[%s2075_s1 + $0x18] sm:$0xff] (!%p140_p2)   ;;  %v1678_v9 = vld [vmem:[%s2075_s1 + $0x20] sm:$0xff] (!%p140_p2)   ;;  %v1680_v13 = vld [vmem:[%s2075_s1 + $0x28] sm:$0xff] (!%p140_p2)   ;;  %v724_v39 = vsel (!%p140_p2), %vm722_vm1, %v723_v33, 0 }
   0x9   : > { %v1681_v14 = vld [vmem:[%s2075_s1 + $0x70] sm:$0xff] (!%p140_p2)   ;;  %v1683_v16 = vld [vmem:[%s2075_s1 + $0x78] sm:$0xff] (!%p140_p2)   ;;  %v1691_v18 = vld [vmem:[%s2075_s1 + $0x80] sm:$0xff] (!%p140_p2)  }
   0xa   : > { %v1682_v15 = vld [vmem:[%s2075_s1 + $0x30] sm:$0xff] (!%p140_p2)   ;;  %v1684_v17 = vld [vmem:[%s2075_s1 + $0x38] sm:$0xff] (!%p140_p2)   ;;  %v1698_v23 = vld [vmem:[%s2075_s1 + $0x88] sm:$0xff] (!%p140_p2)  }
   0xb   : > { %1465 = vmatpush3.bf16.msra.mxu0 (!%p140_p2), %v1672_v3  ;;  %1652 = vmatpush3.bf16.msra.mxu1 (!%p140_p2), %v1672_v3  ;;  %v1699_v25 = vld [vmem:[%s2075_s1 + $0x90] sm:$0xff] (!%p140_p2)   ;;  %v1706_v29 = vld [vmem:[%s2075_s1 + $0x98] sm:$0xff] (!%p140_p2)   ;;  %v1707_v31 = vld [vmem:[%s2075_s1 + $0xa0] sm:$0xff] (!%p140_p2)  }
   0xc   : > { %1466 = vmatprep.subr.bf16.mxu0 (!%p140_p2), %v1673_v4  ;;  %1645 = vmatprep.subr.bf16.mxu1 (!%p140_p2), %v1673_v4  ;;  %v1714_v37 = vld [vmem:[%s2075_s1 + $0xa8] sm:$0xff] (!%p140_p2)   ;;  %v1715_v38 = vld [vmem:[%s2075_s1 + $0xb0] sm:$0x3f] (!%p140_p2)  }
   0xd   : > { %s2079_s16 = smov (!%p165_p3, %s1304_s16), 63  ;;  %v726_v40 = vand.u32 %v1715_v38, %v724_v39 }
   0xe   : > { %s1659_s29 = smul.u32 12, %s2079_s16  ;;  %s1307_s17 = sshll.u32 %s2079_s16, 2 }
   0xf   : > { %1467 = vmatpush3.bf16.msra.mxu0 %v1674_v5  ;;  %1653 = vmatpush3.bf16.msra.mxu1 %v1674_v5  ;;  %s1963_s20 = scalar_lea.vmem %s2077_s3, %s1307_s17 }
  0x10   : > { %1468 = vmatprep.subr.bf16.mxu0 %v1675_v6  ;;  %1646 = vmatprep.subr.bf16.mxu1 %v1675_v6  ;;  %s1826_s9 = scalar_lea.vmem %s2074_s0, %s1659_s29 }
  0x11   : > { %v1687_v11 = vld [vmem:[%s1826_s9 + $0x4] ss:$12 sps:$4 sm:$0xff]   ;;  %v1685_v19 = vld [vmem:[%s1826_s9] ss:$12 sps:$4 sm:$0xff]   ;;  %v1692_v21 = vld [vmem:[%s1826_s9 + $0x1c] ss:$12 sps:$4 sm:$0xff]  }
  0x12   : > { %v1690_v12 = vld [vmem:[%s1826_s9 + $0x124] ss:$12 sps:$4 sm:$0xff]   ;;  %760 = vmatprep.mubr.bf16.mxu0 %v1687_v11  ;;  %v1688_v20 = vld [vmem:[%s1826_s9 + $0x120] ss:$12 sps:$4 sm:$0xff]   ;;  %v1694_v22 = vld [vmem:[%s1826_s9 + $0x13c] ss:$12 sps:$4 sm:$0xff]  }
  0x13   : > { %1469 = vmatpush3.bf16.msra.mxu0 %v1676_v7  ;;  %1654 = vmatpush3.bf16.msra.mxu1 %v1676_v7  ;;  %v1696_v24 = vld [vmem:[%s1826_s9 + $0x18] ss:$12 sps:$4 sm:$0xff]   ;;  %v1700_v27 = vld [vmem:[%s1826_s9 + $0x34] ss:$12 sps:$4 sm:$0xff]   ;;  %v1704_v30 = vld [vmem:[%s1826_s9 + $0x30] ss:$12 sps:$4 sm:$0xff]  }
  0x14   : > { %1470 = vmatprep.subr.bf16.mxu0 %v1677_v8  ;;  %1647 = vmatprep.subr.bf16.mxu1 %v1677_v8  ;;  %v1697_v26 = vld [vmem:[%s1826_s9 + $0x138] ss:$12 sps:$4 sm:$0xff]   ;;  %v1702_v28 = vld [vmem:[%s1826_s9 + $0x154] ss:$12 sps:$4 sm:$0xff]   ;;  %v1705_v34 = vld [vmem:[%s1826_s9 + $0x150] ss:$12 sps:$4 sm:$0xff]  }
  0x15   : > { %856 = vmatprep.mubr.bf16.mxu1 %v1690_v12  ;;  %v1708_v35 = vld [vmem:[%s1826_s9 + $0x4c] ss:$12 sps:$4 sm:$0xff]   ;;  %v1712_v41 = vld [vmem:[%s1826_s9 + $0x48] ss:$12 sps:$4 sm:$0xff]   ;;  %v1716_v43 = vld [vmem:[%s1826_s9 + $0x64] ss:$12 sps:$4 sm:$0xff]  }
  0x16   : > { %v1710_v36 = vld [vmem:[%s1826_s9 + $0x16c] ss:$12 sps:$4 sm:$0xff]   ;;  %v1713_v42 = vld [vmem:[%s1826_s9 + $0x168] ss:$12 sps:$4 sm:$0xff]   ;;  %v1725_v50 = vld [vmem:[%s1826_s9 + $0x50] ss:$12 sps:$4 sm:$0xff]  }
  0x17   : > { %1471 = vmatpush3.bf16.msra.mxu0 %v1678_v9  ;;  %1655 = vmatpush3.bf16.msra.mxu1 %v1678_v9  ;;  %v1718_v44 = vld [vmem:[%s1826_s9 + $0x8] ss:$12 sps:$4 sm:$0xff]   ;;  %v1719_v45 = vld [vmem:[%s1826_s9 + $0x60] ss:$12 sps:$4 sm:$0xff]   ;;  %v1723_v48 = vld [vmem:[%s1826_s9 + $0x38] ss:$12 sps:$4 sm:$0xff]  }
  0x18   : > { %1472 = vmatprep.subr.bf16.mxu0 %v1679_v10  ;;  %1648 = vmatprep.subr.bf16.mxu1 %v1679_v10  ;;  %v1720_v46 = vld [vmem:[%s1826_s9 + $0x20] ss:$12 sps:$4 sm:$0xff]   ;;  %v1721_v47 = vld [vmem:[%s1826_s9 + $0x7c] ss:$12 sps:$4 sm:$0xff]   ;;  %v1724_v49 = vld [vmem:[%s1826_s9 + $0x78] ss:$12 sps:$4 sm:$0xff]  }
  0x19   : > { %v1726_v51 = vld [vmem:[%s1826_s9 + $0x94] ss:$12 sps:$4 sm:$0xff]   ;;  %v1729_v53 = vld [vmem:[%s1826_s9 + $0x90] ss:$12 sps:$4 sm:$0xff]   ;;  %v1731_v55 = vld [vmem:[%s1826_s9 + $0xac] ss:$12 sps:$4 sm:$0xff]  }
  0x1a   : > { %v1728_v52 = vld [vmem:[%s1826_s9 + $0x68] ss:$12 sps:$4 sm:$0xff]   ;;  %v1730_v54 = vld [vmem:[%s1826_s9 + $0x80] ss:$12 sps:$4 sm:$0xff]   ;;  %v1733_v56 = vld [vmem:[%s1826_s9 + $0x98] ss:$12 sps:$4 sm:$0xff]  }
  0x1b   : > { %1473 = vmatpush3.bf16.msra.mxu0 %v1680_v13  ;;  %1656 = vmatpush3.bf16.msra.mxu1 %v1680_v13  ;;  %v1734_v57 = vld [vmem:[%s1826_s9 + $0xa8] ss:$12 sps:$4 sm:$0xff]   ;;  %v1735_v58 = vld [vmem:[%s1826_s9 + $0xb0] ss:$12 sps:$4 sm:$0xff]   ;;  %v1739_v61 = vld [vmem:[%s1826_s9 + $0xc0] ss:$12 sps:$4 sm:$0xff]  }
  0x1c   : > { %1474 = vmatprep.subr.bf16.mxu0 %v1681_v14  ;;  %1649 = vmatprep.subr.bf16.mxu1 %v1681_v14  ;;  %v1736_v59 = vld [vmem:[%s1826_s9 + $0xc4] ss:$12 sps:$4 sm:$0xff]   ;;  %v1738_v60 = vld [vmem:[%s1826_s9 + $0xc8] ss:$12 sps:$4 sm:$0xff]   ;;  %v1740_v62 = vld [vmem:[%s1826_s9 + $0xe0] ss:$12 sps:$4 sm:$0xff]  }
  0x1d   : > { %v1741_v63 = vld [vmem:[%s1826_s9 + $0xdc] ss:$12 sps:$4 sm:$0xff]   ;;  %v1743_v0 = vld [vmem:[%s1826_s9 + $0xf8] ss:$12 sps:$4 sm:$0xff]   ;;  %v1746_v3 = vld [vmem:[%s1826_s9 + $0xf4] ss:$12 sps:$4 sm:$0xff]  }
  0x1e   : > { %v1744_v1 = vld [vmem:[%s1826_s9 + $0xd8] ss:$12 sps:$4 sm:$0xff]   ;;  %v1745_v2 = vld [vmem:[%s1826_s9 + $0x110] ss:$12 sps:$4 sm:$0xff]   ;;  %v1748_v4 = vld [vmem:[%s1826_s9 + $0x128] ss:$12 sps:$4 sm:$0xff]  }
  0x1f   : > { %1475 = vmatpush3.bf16.msra.mxu0 %v1682_v15  ;;  %1657 = vmatpush3.bf16.msra.mxu1 %v1682_v15  ;;  %v1749_v5 = vld [vmem:[%s1826_s9 + $0xf0] ss:$12 sps:$4 sm:$0xff]   ;;  %v1750_v6 = vld [vmem:[%s1826_s9 + $0x140] ss:$12 sps:$4 sm:$0xff]   ;;  %v1753_v8 = vld [vmem:[%s1826_s9 + $0x158] ss:$12 sps:$4 sm:$0xff]  }
  0x20   : > { %1476 = vmatprep.subr.bf16.mxu0 %v1683_v16  ;;  %1650 = vmatprep.subr.bf16.mxu1 %v1683_v16  ;;  %v1751_v7 = vld [vmem:[%s1826_s9 + $0x10c] ss:$12 sps:$4 sm:$0xff]   ;;  %v1754_v9 = vld [vmem:[%s1826_s9 + $0x108] ss:$12 sps:$4 sm:$0xff]   ;;  %v1755_v10 = vld [vmem:[%s1826_s9 + $0x170] ss:$12 sps:$4 sm:$0xff]  }
  0x23   : > { %1477 = vmatpush3.bf16.msra.mxu0 %v1684_v17  ;;  %1658 = vmatpush3.bf16.msra.mxu1 %v1684_v17 }
  0x24   : > { %1597 = vmatprep.subr.bf16.mxu1 %v1691_v18 }
  0x26   : > { %761 = vmatmul.mubr.bf16.vlgmr.msra.gmra.mrb[0].mxu0 %v1685_v19  ;;  %857 = vmatmul.mubr.bf16.vlgmr.msra.gmra.mrb[0].mxu1 %v1688_v20 }
  0x27   : > { %1598 = vmatpush3.bf16.msra.mxu1 %v1691_v18  ;;  %768 = vmatprep.mubr.bf16.mxu0 %v1692_v21 }
  0x28   : > { %864 = vmatprep.mubr.bf16.mxu1 %v1694_v22  ;;  %1599 = vmatprep.subr.bf16.mxu1 %v1698_v23 }
  0x2b   : > { %1600 = vmatpush3.bf16.msra.mxu1 %v1698_v23 }
  0x2c   : > { %1601 = vmatprep.subr.bf16.mxu1 %v1699_v25 }
  0x2e   : > { %769 = vmatmul.mubr.bf16.gmra.mrb[4].mxu0 %v1696_v24  ;;  %865 = vmatmul.mubr.bf16.gmra.mrb[4].mxu1 %v1697_v26 }
  0x2f   : > { %1602 = vmatpush3.bf16.msra.mxu1 %v1699_v25  ;;  %776 = vmatprep.mubr.bf16.mxu0 %v1700_v27 }
  0x30   : > { %872 = vmatprep.mubr.bf16.mxu1 %v1702_v28  ;;  %1603 = vmatprep.subr.bf16.mxu1 %v1706_v29 }
  0x33   : > { %1604 = vmatpush3.bf16.msra.mxu1 %v1706_v29 }
  0x34   : > { %1605 = vmatprep.subr.bf16.mxu1 %v1707_v31 }
  0x36   : > { %777 = vmatmul.mubr.bf16.gmra.mrb[8].mxu0 %v1704_v30  ;;  %873 = vmatmul.mubr.bf16.gmra.mrb[8].mxu1 %v1705_v34 }
  0x37   : > { %1606 = vmatpush3.bf16.msra.mxu1 %v1707_v31  ;;  %784 = vmatprep.mubr.bf16.mxu0 %v1708_v35 }
  0x38   : > { %880 = vmatprep.mubr.bf16.mxu1 %v1710_v36  ;;  %1607 = vmatprep.subr.bf16.mxu1 %v1714_v37 }
  0x3b   : > { %1608 = vmatpush3.bf16.msra.mxu1 %v1714_v37 }
  0x3c   : > { %1609 = vmatprep.subr.bf16.mxu1 %v726_v40 }
  0x3e   : > { %785 = vmatmul.mubr.bf16.gmra.mrb[12].mxu0 %v1712_v41  ;;  %881 = vmatmul.mubr.bf16.gmra.mrb[12].mxu1 %v1713_v42 }
  0x3f   : > { %1610 = vmatpush3.bf16.msra.mxu1 %v726_v40  ;;  %792 = vmatprep.mubr.bf16.mxu0 %v1716_v43 }
  0x40   : > { %1611 = vmatprep.mubr.msk.bf16.mxu1 %vm672_vm2, %v1718_v44 }
  0x46   : > { %793 = vmatmul.mubr.bf16.gmra.mrb[16].mxu0 %v1719_v45  ;;  %1612 = vmatmul.mubr.msk.bf16.vlgmr.msra.gmra.mrb[16].mxu1 %vm672_vm2, %v1720_v46 }
  0x47   : > { %800 = vmatprep.mubr.bf16.mxu0 %v1721_v47  ;;  %1615 = vmatprep.mubr.msk.bf16.mxu1 %vm672_vm2, %v1723_v48 }
  0x4e   : > { %801 = vmatmul.mubr.bf16.gmra.mrb[20].mxu0 %v1724_v49  ;;  %1616 = vmatmul.mubr.msk.bf16.gmra.mrb[20].mxu1 %vm672_vm2, %v1725_v50 }
  0x4f   : > { %808 = vmatprep.mubr.bf16.mxu0 %v1726_v51  ;;  %1619 = vmatprep.mubr.msk.bf16.mxu1 %vm672_vm2, %v1728_v52 }
  0x56   : > { %809 = vmatmul.mubr.bf16.gmra.mrb[24].mxu0 %v1729_v53  ;;  %1620 = vmatmul.mubr.msk.bf16.gmra.mrb[24].mxu1 %vm672_vm2, %v1730_v54 }
  0x57   : > { %816 = vmatprep.mubr.bf16.mxu0 %v1731_v55  ;;  %1623 = vmatprep.mubr.msk.bf16.mxu1 %vm672_vm2, %v1733_v56 }
  0x5e   : > { %817 = vmatmul.mubr.bf16.gmra.mrb[28].mxu0 %v1734_v57  ;;  %1624 = vmatmul.mubr.msk.bf16.gmra.mrb[28].mxu1 %vm672_vm2, %v1735_v58 }
  0x5f   : > { %824 = vmatprep.mubr.bf16.mxu0 %v1736_v59  ;;  %1627 = vmatprep.mubr.msk.bf16.mxu1 %vm672_vm2, %v1738_v60  ;;  %v1953_v59 = vld [vmem:[%s2076_s2] ss:$0 sm:$0xff] }
  0x66   : > { %825 = vmatmul.mubr.bf16.gmra.mrb[32].mxu0 %v1739_v61  ;;  %1628 = vmatmul.mubr.msk.bf16.gmra.mrb[32].mxu1 %vm672_vm2, %v1740_v62 }
  0x67   : > { %832 = vmatprep.mubr.bf16.mxu0 %v1741_v63  ;;  %1631 = vmatprep.mubr.msk.bf16.mxu1 %vm672_vm2, %v1743_v0 }
  0x6e   : > { %833 = vmatmul.mubr.bf16.gmra.mrb[36].mxu0 %v1744_v1  ;;  %1632 = vmatmul.mubr.msk.bf16.gmra.mrb[36].mxu1 %vm672_vm2, %v1745_v2 }
  0x6f   : > { %840 = vmatprep.mubr.bf16.mxu0 %v1746_v3  ;;  %1635 = vmatprep.mubr.msk.bf16.mxu1 %vm672_vm2, %v1748_v4 }
  0x76   : > { %841 = vmatmul.mubr.bf16.gmra.mrb[40].mxu0 %v1749_v5  ;;  %1636 = vmatmul.mubr.msk.bf16.gmra.mrb[40].mxu1 %vm672_vm2, %v1750_v6 }
  0x77   : > { %848 = vmatprep.mubr.bf16.mxu0 %v1751_v7  ;;  %1639 = vmatprep.mubr.msk.bf16.mxu1 %vm672_vm2, %v1753_v8 }
  0x7e   : > { %849 = vmatmul.mubr.bf16.gmra.mrb[44].mxu0 %v1754_v9  ;;  %1640 = vmatmul.mubr.msk.bf16.gmra.mrb[44].mxu1 %vm672_vm2, %v1755_v10 }
  0xf9   : > { %v1478_v11 = vpop.f32.mrb[0].mxu0  ;;  %v1550_v12 = vpop.f32.mrb[0].mxu1 }
  0xfa   : > { %v1479_v13 = vpop.f32.mrb[1].mxu0  ;;  %v1551_v14 = vpop.f32.mrb[1].mxu1 }
  0xfb   : > { %v1480_v15 = vadd.f32 %v1479_v13, %v1478_v11  ;;  %v1481_v16 = vpop.f32.mrb[2].mxu0  ;;  %v1934_v17 = vadd.f32 %v1551_v14, %v1550_v12  ;;  %v1553_v18 = vpop.f32.mrb[2].mxu1 }
  0xfc   : > { %v1482_v19 = vpop.f32.mrb[3].mxu0  ;;  %v1554_v20 = vpop.f32.mrb[3].mxu1 }
  0xfd   : > { %v1483_v21 = vadd.f32 %v1482_v19, %v1481_v16  ;;  %v1936_v22 = vadd.f32 %v1554_v20, %v1553_v18  ;;  %v763_v63 = vadd.f32 %v1480_v15, %v1953_v59 }
  0xff   : > { %v766_v8 = vadd.f32 %v1483_v21, %v1953_v59 }
 0x101   : > { %v1484_v23 = vpop.f32.mrb[4].mxu0  ;;  %v1556_v24 = vpop.f32.mrb[4].mxu1 }
 0x102   : > { %v1485_v25 = vpop.f32.mrb[5].mxu0  ;;  %v1557_v26 = vpop.f32.mrb[5].mxu1 }
 0x103   : > { %v1486_v27 = vadd.f32 %v1485_v25, %v1484_v23  ;;  %v1487_v28 = vpop.f32.mrb[6].mxu0  ;;  %v1938_v29 = vadd.f32 %v1557_v26, %v1556_v24  ;;  %v1559_v30 = vpop.f32.mrb[6].mxu1 }
 0x104   : > { %v1488_v31 = vpop.f32.mrb[7].mxu0  ;;  %v1560_v32 = vpop.f32.mrb[7].mxu1 }
 0x105   : > { %v1489_v33 = vadd.f32 %v1488_v31, %v1487_v28  ;;  %v1940_v34 = vadd.f32 %v1560_v32, %v1559_v30  ;;  %v771_v60 = vadd.f32 %v1486_v27, %v1953_v59 }
 0x107   : > { %v774_v3 = vadd.f32 %v1489_v33, %v1953_v59 }
 0x109   : > { %v1490_v35 = vpop.f32.mrb[8].mxu0  ;;  %v1562_v36 = vpop.f32.mrb[8].mxu1 }
 0x10a   : > { %v1491_v37 = vpop.f32.mrb[9].mxu0  ;;  %v1563_v38 = vpop.f32.mrb[9].mxu1 }
 0x10b   : > { %v1492_v39 = vadd.f32 %v1491_v37, %v1490_v35  ;;  %v1493_v40 = vpop.f32.mrb[10].mxu0  ;;  %v1942_v41 = vadd.f32 %v1563_v38, %v1562_v36  ;;  %v1565_v42 = vpop.f32.mrb[10].mxu1 }
 0x10c   : > { %v1494_v43 = vpop.f32.mrb[11].mxu0  ;;  %v1566_v44 = vpop.f32.mrb[11].mxu1 }
 0x10d   : > { %v1495_v45 = vadd.f32 %v1494_v43, %v1493_v40  ;;  %v1944_v46 = vadd.f32 %v1566_v44, %v1565_v42  ;;  %v779_v27 = vadd.f32 %v1492_v39, %v1953_v59 }
 0x10f   : > { %v782_v38 = vadd.f32 %v1495_v45, %v1953_v59 }
 0x111   : > { %v1496_v47 = vpop.f32.mrb[12].mxu0  ;;  %v1568_v48 = vpop.f32.mrb[12].mxu1 }
 0x112   : > { %v1497_v49 = vpop.f32.mrb[13].mxu0  ;;  %v1569_v50 = vpop.f32.mrb[13].mxu1 }
 0x113   : > { %v1498_v51 = vadd.f32 %v1497_v49, %v1496_v47  ;;  %v1499_v52 = vpop.f32.mrb[14].mxu0  ;;  %v1946_v53 = vadd.f32 %v1569_v50, %v1568_v48  ;;  %v1571_v54 = vpop.f32.mrb[14].mxu1 }
 0x114   : > { %v1500_v55 = vpop.f32.mrb[15].mxu0  ;;  %v1572_v56 = vpop.f32.mrb[15].mxu1 }
 0x115   : > { %v1501_v57 = vadd.f32 %v1500_v55, %v1499_v52  ;;  %v1948_v58 = vadd.f32 %v1572_v56, %v1571_v54  ;;  %v787_v23 = vadd.f32 %v1498_v51, %v1953_v59 }
 0x117   : > { %v790_v32 = vadd.f32 %v1501_v57, %v1953_v59 }
 0x119   : > { %v1502_v61 = vpop.f32.mrb[16].mxu0  ;;  %v1613_v62 = vpop.f32.mrb[16].mxu1 }
 0x11a   : > { %v932_v0 = vadd.f32 %v1613_v62, %v771_v60  ;;  %v1503_v1 = vpop.f32.mrb[17].mxu0  ;;  %v923_v2 = vpop.f32.mrb[17].mxu1 }
 0x11b   : > { %v1504_v4 = vadd.f32 %v1503_v1, %v1502_v61  ;;  %v924_v5 = vadd.f32 %v923_v2, %v763_v63  ;;  %v1505_v6 = vpop.f32.mrb[18].mxu0  ;;  %v1614_v7 = vpop.f32.mrb[18].mxu1 }
 0x11c   : > { %v1052_v9 = vmax.f32 %v932_v0, 0.0  ;;  %v935_v10 = vadd.f32 %v1614_v7, %v774_v3  ;;  %v1506_v11 = vpop.f32.mrb[19].mxu0  ;;  %v926_v12 = vpop.f32.mrb[19].mxu1 }
 0x11d   : > { %v1050_v13 = vmax.f32 %v924_v5, 0.0  ;;  %v1507_v14 = vadd.f32 %v1506_v11, %v1505_v6  ;;  %v927_v15 = vadd.f32 %v926_v12, %v766_v8  ;;  %v795_v60 = vadd.f32 %v1504_v4, %v1953_v59 }
 0x11e   : > { %v1432_v16 = vpack.c.bf16 %v1052_v9, %v1052_v9  ;;  %v1053_v18 = vmax.f32 %v935_v10, 0.0 }
 0x11f   : > { %v1430_v19 = vpack.c.bf16 %v1050_v13, %v1050_v13  ;;  %v1051_v20 = vmax.f32 %v927_v15, 0.0  ;;  %v798_v6 = vadd.f32 %v1507_v14, %v1953_v59 }
 0x120   : > { %1213 = vst.msk [vmem:[%s1963_s20 + $0x8] sm:$0xf] %vm1210_vm3, %v1432_v16  ;;  %v1433_v21 = vpack.c.bf16 %v1053_v18, %v1053_v18 }
 0x121   : > { %1211 = vst.msk [vmem:[%s1963_s20] sm:$0xf] %vm1210_vm3, %v1430_v19  ;;  %v1431_v24 = vpack.c.bf16 %v1051_v20, %v1051_v20  ;;  %v1508_v25 = vpop.f32.mrb[20].mxu0  ;;  %v1617_v26 = vpop.f32.mrb[20].mxu1 }
 0x122   : > { %1214 = vst.msk [vmem:[%s1963_s20 + $0xc] sm:$0xf] %vm1210_vm3, %v1433_v21  ;;  %v948_v28 = vadd.f32 %v1617_v26, %v787_v23  ;;  %v1509_v30 = vpop.f32.mrb[21].mxu0  ;;  %v939_v31 = vpop.f32.mrb[21].mxu1 }
 0x123   : > { %1212 = vst.msk [vmem:[%s1963_s20 + $0x4] sm:$0xf] %vm1210_vm3, %v1431_v24  ;;  %v1510_v33 = vadd.f32 %v1509_v30, %v1508_v25  ;;  %v940_v35 = vadd.f32 %v939_v31, %v779_v27  ;;  %v1511_v36 = vpop.f32.mrb[22].mxu0  ;;  %v1618_v37 = vpop.f32.mrb[22].mxu1 }
 0x124   : > { %v1056_v40 = vmax.f32 %v948_v28, 0.0  ;;  %v951_v42 = vadd.f32 %v1618_v37, %v790_v32  ;;  %v1512_v39 = vpop.f32.mrb[23].mxu0  ;;  %v942_v43 = vpop.f32.mrb[23].mxu1 }
 0x125   : > { %v1054_v44 = vmax.f32 %v940_v35, 0.0  ;;  %v1513_v47 = vadd.f32 %v1512_v39, %v1511_v36  ;;  %v943_v48 = vadd.f32 %v942_v43, %v782_v38  ;;  %v803_v55 = vadd.f32 %v1510_v33, %v1953_v59 }
 0x126   : > { %v1436_v49 = vpack.c.bf16 %v1056_v40, %v1056_v40  ;;  %v1057_v50 = vmax.f32 %v951_v42, 0.0 }
 0x127   : > { %v1434_v51 = vpack.c.bf16 %v1054_v44, %v1054_v44  ;;  %v1055_v52 = vmax.f32 %v943_v48, 0.0  ;;  %v806_v0 = vadd.f32 %v1513_v47, %v1953_v59 }
 0x128   : > { %1217 = vst.msk [vmem:[%s1963_s20 + $0x18] sm:$0xf] %vm1210_vm3, %v1436_v49  ;;  %v1437_v54 = vpack.c.bf16 %v1057_v50, %v1057_v50 }
 0x129   : > { %1215 = vst.msk [vmem:[%s1963_s20 + $0x10] sm:$0xf] %vm1210_vm3, %v1434_v51  ;;  %v1435_v45 = vpack.c.bf16 %v1055_v52, %v1055_v52  ;;  %v1514_v56 = vpop.f32.mrb[24].mxu0  ;;  %v1621_v57 = vpop.f32.mrb[24].mxu1 }
 0x12a   : > { %1218 = vst.msk [vmem:[%s1963_s20 + $0x1c] sm:$0xf] %vm1210_vm3, %v1437_v54  ;;  %v964_v61 = vadd.f32 %v1621_v57, %v803_v55  ;;  %v1515_v62 = vpop.f32.mrb[25].mxu0  ;;  %v955_v63 = vpop.f32.mrb[25].mxu1 }
 0x12b   : > { %1216 = vst.msk [vmem:[%s1963_s20 + $0x14] sm:$0xf] %vm1210_vm3, %v1435_v45  ;;  %v1516_v1 = vadd.f32 %v1515_v62, %v1514_v56  ;;  %v956_v2 = vadd.f32 %v955_v63, %v795_v60  ;;  %v1517_v3 = vpop.f32.mrb[26].mxu0  ;;  %v1622_v5 = vpop.f32.mrb[26].mxu1 }
 0x12c   : > { %v1060_v7 = vmax.f32 %v964_v61, 0.0  ;;  %v967_v8 = vadd.f32 %v1622_v5, %v806_v0  ;;  %v1518_v4 = vpop.f32.mrb[27].mxu0  ;;  %v958_v9 = vpop.f32.mrb[27].mxu1 }
 0x12d   : > { %v1058_v10 = vmax.f32 %v956_v2, 0.0  ;;  %v1519_v11 = vadd.f32 %v1518_v4, %v1517_v3  ;;  %v959_v12 = vadd.f32 %v958_v9, %v798_v6  ;;  %v811_v23 = vadd.f32 %v1516_v1, %v1953_v59 }
 0x12e   : > { %v1440_v13 = vpack.c.bf16 %v1060_v7, %v1060_v7  ;;  %v1061_v15 = vmax.f32 %v967_v8, 0.0 }
 0x12f   : > { %v1438_v16 = vpack.c.bf16 %v1058_v10, %v1058_v10  ;;  %v1059_v18 = vmax.f32 %v959_v12, 0.0  ;;  %v814_v31 = vadd.f32 %v1519_v11, %v1953_v59 }
 0x130   : > { %1221 = vst.msk [vmem:[%s1963_s20 + $0x28] sm:$0xf] %vm1210_vm3, %v1440_v13  ;;  %v1441_v19 = vpack.c.bf16 %v1061_v15, %v1061_v15 }
 0x131   : > { %1219 = vst.msk [vmem:[%s1963_s20 + $0x20] sm:$0xf] %vm1210_vm3, %v1438_v16  ;;  %v1439_v20 = vpack.c.bf16 %v1059_v18, %v1059_v18  ;;  %v1520_v14 = vpop.f32.mrb[28].mxu0  ;;  %v1625_v21 = vpop.f32.mrb[28].mxu1 }
 0x132   : > { %1222 = vst.msk [vmem:[%s1963_s20 + $0x2c] sm:$0xf] %vm1210_vm3, %v1441_v19  ;;  %v1521_v24 = vpop.f32.mrb[29].mxu0  ;;  %v971_v25 = vpop.f32.mrb[29].mxu1 }
 0x133   : > { %1220 = vst.msk [vmem:[%s1963_s20 + $0x24] sm:$0xf] %vm1210_vm3, %v1439_v20  ;;  %v1522_v26 = vadd.f32 %v1521_v24, %v1520_v14  ;;  %v972_v27 = vadd.f32 %v971_v25, %v811_v23  ;;  %v1523_v28 = vpop.f32.mrb[30].mxu0  ;;  %v1626_v30 = vpop.f32.mrb[30].mxu1  ;;  %v867_v23 = vadd.f32 %v1938_v29, %v1953_v59 }
 0x134   : > { %v1524_v32 = vpop.f32.mrb[31].mxu0  ;;  %v974_v33 = vpop.f32.mrb[31].mxu1 }
 0x135   : > { %v819_v35 = vadd.f32 %v1522_v26, %v1953_v59  ;;  %v1062_v36 = vmax.f32 %v972_v27, 0.0  ;;  %v1525_v37 = vadd.f32 %v1524_v32, %v1523_v28  ;;  %v975_v38 = vadd.f32 %v974_v33, %v814_v31 }
 0x136   : > { %v859_v28 = vadd.f32 %v1934_v17, %v1953_v59  ;;  %v870_v33 = vadd.f32 %v1940_v34, %v1953_v59  ;;  %v862_v17 = vadd.f32 %v1936_v22, %v1953_v59 }
 0x137   : > { %v980_v40 = vadd.f32 %v1625_v21, %v819_v35  ;;  %v1442_v42 = vpack.c.bf16 %v1062_v36, %v1062_v36  ;;  %v822_v39 = vadd.f32 %v1525_v37, %v1953_v59  ;;  %v1063_v43 = vmax.f32 %v975_v38, 0.0 }
 0x139   : > { %v1064_v44 = vmax.f32 %v980_v40, 0.0  ;;  %1223 = vst.msk [vmem:[%s1963_s20 + $0x30] sm:$0xf] %vm1210_vm3, %v1442_v42  ;;  %v983_v47 = vadd.f32 %v1626_v30, %v822_v39  ;;  %v1443_v48 = vpack.c.bf16 %v1063_v43, %v1063_v43  ;;  %v1526_v49 = vpop.f32.mrb[32].mxu0  ;;  %v1629_v50 = vpop.f32.mrb[32].mxu1 }
 0x13a   : > { %v1527_v51 = vpop.f32.mrb[33].mxu0  ;;  %v987_v52 = vpop.f32.mrb[33].mxu1 }
 0x13b   : > { %v1444_v54 = vpack.c.bf16 %v1064_v44, %v1064_v44  ;;  %v1065_v55 = vmax.f32 %v983_v47, 0.0  ;;  %1224 = vst.msk [vmem:[%s1963_s20 + $0x34] sm:$0xf] %vm1210_vm3, %v1443_v48  ;;  %v1528_v45 = vadd.f32 %v1527_v51, %v1526_v49  ;;  %v1529_v56 = vpop.f32.mrb[34].mxu0  ;;  %v1630_v57 = vpop.f32.mrb[34].mxu1 }
 0x13c   : > { %v1530_v60 = vpop.f32.mrb[35].mxu0  ;;  %v990_v61 = vpop.f32.mrb[35].mxu1 }
 0x13d   : > { %1225 = vst.msk [vmem:[%s1963_s20 + $0x38] sm:$0xf] %vm1210_vm3, %v1444_v54  ;;  %v1445_v62 = vpack.c.bf16 %v1065_v55, %v1065_v55  ;;  %v827_v63 = vadd.f32 %v1528_v45, %v1953_v59  ;;  %v1531_v0 = vadd.f32 %v1530_v60, %v1529_v56 }
 0x13f   : > { %1226 = vst.msk [vmem:[%s1963_s20 + $0x3c] sm:$0xf] %vm1210_vm3, %v1445_v62  ;;  %v988_v1 = vadd.f32 %v987_v52, %v827_v63  ;;  %v830_v2 = vadd.f32 %v1531_v0, %v1953_v59  ;;  %v875_v0 = vadd.f32 %v1942_v41, %v1953_v59 }
 0x141   : > { %v1066_v3 = vmax.f32 %v988_v1, 0.0  ;;  %v991_v5 = vadd.f32 %v990_v61, %v830_v2  ;;  %v1532_v6 = vpop.f32.mrb[36].mxu0  ;;  %v2011_v7 = vpop.f32.mrb[36].mxu1 }
 0x142   : > { %v1533_v8 = vpop.f32.mrb[37].mxu0  ;;  %v1003_v4 = vpop.f32.mrb[37].mxu1 }
 0x143   : > { %v1446_v9 = vpack.c.bf16 %v1066_v3, %v1066_v3  ;;  %v1067_v10 = vmax.f32 %v991_v5, 0.0  ;;  %v1534_v11 = vadd.f32 %v1533_v8, %v1532_v6  ;;  %v1535_v12 = vpop.f32.mrb[38].mxu0  ;;  %v2013_v13 = vpop.f32.mrb[38].mxu1 }
 0x144   : > { %v1536_v15 = vpop.f32.mrb[39].mxu0  ;;  %v1006_v16 = vpop.f32.mrb[39].mxu1 }
 0x145   : > { %1227 = vst.msk [vmem:[%s1963_s20 + $0x40] sm:$0xf] %vm1210_vm3, %v1446_v9  ;;  %v1447_v18 = vpack.c.bf16 %v1067_v10, %v1067_v10  ;;  %v835_v19 = vadd.f32 %v1534_v11, %v1953_v59  ;;  %v1537_v20 = vadd.f32 %v1536_v15, %v1535_v12 }
 0x147   : > { %1228 = vst.msk [vmem:[%s1963_s20 + $0x44] sm:$0xf] %vm1210_vm3, %v1447_v18  ;;  %v996_v14 = vadd.f32 %v1629_v50, %v835_v19  ;;  %v838_v21 = vadd.f32 %v1537_v20, %v1953_v59 }
 0x149   : > { %v1068_v24 = vmax.f32 %v996_v14, 0.0  ;;  %v999_v25 = vadd.f32 %v1630_v57, %v838_v21  ;;  %v1538_v26 = vpop.f32.mrb[40].mxu0  ;;  %v1637_v27 = vpop.f32.mrb[40].mxu1  ;;  %v883_v57 = vadd.f32 %v1946_v53, %v1953_v59  ;;  %v886_v53 = vadd.f32 %v1948_v58, %v1953_v59 }
 0x14a   : > { %v1028_v30 = vadd.f32 %v1637_v27, %v867_v23  ;;  %v1539_v31 = vpop.f32.mrb[41].mxu0  ;;  %v1019_v32 = vpop.f32.mrb[41].mxu1 }
 0x14b   : > { %v1448_v35 = vpack.c.bf16 %v1068_v24, %v1068_v24  ;;  %v1069_v36 = vmax.f32 %v999_v25, 0.0  ;;  %v1540_v37 = vadd.f32 %v1539_v31, %v1538_v26  ;;  %v1020_v38 = vadd.f32 %v1019_v32, %v859_v28  ;;  %v1541_v29 = vpop.f32.mrb[42].mxu0  ;;  %v1638_v40 = vpop.f32.mrb[42].mxu1 }
 0x14c   : > { %v1076_v42 = vmax.f32 %v1028_v30, 0.0  ;;  %v1031_v39 = vadd.f32 %v1638_v40, %v870_v33  ;;  %v1542_v43 = vpop.f32.mrb[43].mxu0  ;;  %v1022_v44 = vpop.f32.mrb[43].mxu1 }
 0x14d   : > { %1229 = vst.msk [vmem:[%s1963_s20 + $0x48] sm:$0xf] %vm1210_vm3, %v1448_v35  ;;  %v1449_v47 = vpack.c.bf16 %v1069_v36, %v1069_v36  ;;  %v843_v34 = vadd.f32 %v1540_v37, %v1953_v59  ;;  %v1074_v48 = vmax.f32 %v1020_v38, 0.0  ;;  %v1543_v49 = vadd.f32 %v1542_v43, %v1541_v29 }
 0x14e   : > { %v1456_v50 = vpack.c.bf16 %v1076_v42, %v1076_v42  ;;  %v1077_v51 = vmax.f32 %v1031_v39, 0.0  ;;  %v1023_v52 = vadd.f32 %v1022_v44, %v862_v17 }
 0x14f   : > { %1230 = vst.msk [vmem:[%s1963_s20 + $0x4c] sm:$0xf] %vm1210_vm3, %v1449_v47  ;;  %v1004_v54 = vadd.f32 %v1003_v4, %v843_v34  ;;  %v1454_v55 = vpack.c.bf16 %v1074_v48, %v1074_v48  ;;  %v846_v45 = vadd.f32 %v1543_v49, %v1953_v59 }
 0x150   : > { %1237 = vst.msk [vmem:[%s1963_s20 + $0x68] sm:$0xf] %vm1210_vm3, %v1456_v50  ;;  %v1457_v22 = vpack.c.bf16 %v1077_v51, %v1077_v51  ;;  %v1075_v56 = vmax.f32 %v1023_v52, 0.0 }
 0x151   : > { %v1070_v60 = vmax.f32 %v1004_v54, 0.0  ;;  %1235 = vst.msk [vmem:[%s1963_s20 + $0x60] sm:$0xf] %vm1210_vm3, %v1454_v55  ;;  %v1007_v61 = vadd.f32 %v1006_v16, %v846_v45  ;;  %v1544_v62 = vpop.f32.mrb[44].mxu0  ;;  %v1641_v63 = vpop.f32.mrb[44].mxu1  ;;  %v878_v16 = vadd.f32 %v1944_v46, %v1953_v59 }
 0x152   : > { %1238 = vst.msk [vmem:[%s1963_s20 + $0x6c] sm:$0xf] %vm1210_vm3, %v1457_v22  ;;  %v1455_v1 = vpack.c.bf16 %v1075_v56, %v1075_v56  ;;  %v1044_v2 = vadd.f32 %v1641_v63, %v883_v57  ;;  %v1545_v3 = vpop.f32.mrb[45].mxu0  ;;  %v1035_v5 = vpop.f32.mrb[45].mxu1 }
 0x153   : > { %v1450_v6 = vpack.c.bf16 %v1070_v60, %v1070_v60  ;;  %v1071_v8 = vmax.f32 %v1007_v61, 0.0  ;;  %v1546_v4 = vadd.f32 %v1545_v3, %v1544_v62  ;;  %v1036_v9 = vadd.f32 %v1035_v5, %v875_v0  ;;  %v1547_v10 = vpop.f32.mrb[46].mxu0  ;;  %v1642_v11 = vpop.f32.mrb[46].mxu1 }
 0x154   : > { %1236 = vst.msk [vmem:[%s1963_s20 + $0x64] sm:$0xf] %vm1210_vm3, %v1455_v1  ;;  %v1080_v41 = vmax.f32 %v1044_v2, 0.0  ;;  %v1047_v12 = vadd.f32 %v1642_v11, %v886_v53  ;;  %v1548_v15 = vpop.f32.mrb[47].mxu0  ;;  %v1038_v18 = vpop.f32.mrb[47].mxu1 }
 0x155   : > { %1231 = vst.msk [vmem:[%s1963_s20 + $0x50] sm:$0xf] %vm1210_vm3, %v1450_v6  ;;  %v1451_v58 = vpack.c.bf16 %v1071_v8, %v1071_v8  ;;  %v851_v19 = vadd.f32 %v1546_v4, %v1953_v59  ;;  %v1078_v20 = vmax.f32 %v1036_v9, 0.0  ;;  %v1549_v14 = vadd.f32 %v1548_v15, %v1547_v10 }
 0x156   : > { %v1460_v21 = vpack.c.bf16 %v1080_v41, %v1080_v41  ;;  %v1081_v23 = vmax.f32 %v1047_v12, 0.0  ;;  %v1039_v24 = vadd.f32 %v1038_v18, %v878_v16 }
 0x157   : > { %1232 = vst.msk [vmem:[%s1963_s20 + $0x54] sm:$0xf] %vm1210_vm3, %v1451_v58  ;;  %v1012_v25 = vadd.f32 %v2011_v7, %v851_v19  ;;  %v1458_v46 = vpack.c.bf16 %v1078_v20, %v1078_v20  ;;  %v854_v26 = vadd.f32 %v1549_v14, %v1953_v59 }
 0x158   : > { %1241 = vst.msk [vmem:[%s1963_s20 + $0x78] sm:$0xf] %vm1210_vm3, %v1460_v21  ;;  %v1461_v27 = vpack.c.bf16 %v1081_v23, %v1081_v23  ;;  %v1079_v28 = vmax.f32 %v1039_v24, 0.0 }
 0x159   : > { %v1072_v30 = vmax.f32 %v1012_v25, 0.0  ;;  %1239 = vst.msk [vmem:[%s1963_s20 + $0x70] sm:$0xf] %vm1210_vm3, %v1458_v46  ;;  %v1015_v31 = vadd.f32 %v2013_v13, %v854_v26 }
 0x15a   : > { %1242 = vst.msk [vmem:[%s1963_s20 + $0x7c] sm:$0xf] %vm1210_vm3, %v1461_v27  ;;  %v1459_v32 = vpack.c.bf16 %v1079_v28, %v1079_v28 }
 0x15b   : > { %v1452_v33 = vpack.c.bf16 %v1072_v30, %v1072_v30  ;;  %v1073_v35 = vmax.f32 %v1015_v31, 0.0 }
 0x15c   : > { %1240 = vst.msk [vmem:[%s1963_s20 + $0x74] sm:$0xf] %vm1210_vm3, %v1459_v32 }
 0x15d   : > { %1233 = vst.msk [vmem:[%s1963_s20 + $0x58] sm:$0xf] %vm1210_vm3, %v1452_v33  ;;  %v1453_v7 = vpack.c.bf16 %v1073_v35, %v1073_v35 }
 0x15f   : > { %1234 = vst.msk [vmem:[%s1963_s20 + $0x5c] sm:$0xf] %vm1210_vm3, %v1453_v7 }
 0x160 PF: > { %s13_s12 = sadd.s32 1, %s1762_s12  }
 0x161   : > { %p10_p4 = scmp.ge.s32.totalorder %s13_s12, 4  }
 0x163   :  { %12 = sbr.rel (!%p10_p4) target bundleno = 1 (0x1), region = 62 }

// kernel: alexnet_features.9
= control target key start
LH: loop header
LB: loop body
LE: loop exit
PB: predicated region body
PF: predicated region fallthrough
CT: control target
= control target key end

     0   :  { %s661_s15 = smov 0   ;;  %s820_s0 = inlined_call_operand.vmem [shape: bf16[2,8,8,64], index: 0, kind: input, shape index: {}]   ;;  %s821_s1 = inlined_call_operand.vmem [shape: bf16[2,8,7,64], index: 1, kind: input, shape index: {}]   ;;  %s822_s2 = inlined_call_operand.vmem [shape: bf16[2,7,8,64], index: 2, kind: input, shape index: {}]   ;;  %s823_s3 = inlined_call_operand.vmem [shape: bf16[2,7,7,64], index: 3, kind: input, shape index: {}]   ;;  %s824_s4 = inlined_call_operand.vmem [shape: bf16[2,7,7,64], index: 4, kind: output, shape index: {}]  }
   0x1 LB: > { %s603_s16 = sadd.s32 4294967295, %s634_s15   ;;  %p607_p0 = scmp.ge.s32.totalorder %s634_s15, 1  ;;  %s634_s15 = sphi %s661_s15, %s14_s15  }
   0x2   : > { %p192_p1 = scmp.lt.s32.totalorder %s634_s15, 3 }
   0x4   : > { %p193_p2 = pnand %p607_p0, %p192_p1 }
   0x5   : > { %p233_p3 = scmp.lt.s32.totalorder (!%p193_p2), %s603_s16, 1  ;;  %vm488_vm0 = vcmask (!%p193_p2), 519168   ;;  %vm489_vm1 = vsmask.f32 (!%p193_p2), 3328 }
   0x6   : > { %196 = sbr.rel (%p193_p2) target bundleno = 64 (0x40), region = 36  ;;  %vm754_vm2 = vmand (!%p193_p2), %vm488_vm0, %vm489_vm1 }
   0xd   : > { %s828_s16 = smov (!%p233_p3, %s603_s16), 1 }
   0xe   : > { %s617_s17 = sshll.u32 %s828_s16, 5  ;;  %s669_s18 = smul.u32 28, %s828_s16 }
   0xf   : > { %s674_s21 = scalar_lea.vmem %s820_s0, %s617_s17  ;;  %s679_s24 = scalar_lea.vmem %s821_s1, %s617_s17 }
  0x10   : > { %s685_s27 = scalar_lea.vmem %s822_s2, %s669_s18  ;;  %v258_v0 = vld [vmem:[%s674_s21] sm:$0xf]  ;;  %v259_v1 = vld [vmem:[%s674_s21 + $0x4] sm:$0xf]  ;;  %v260_v12 = vld [vmem:[%s674_s21 + $0x8] sm:$0xf]  ;;  %s728_s30 = scalar_lea.vmem %s823_s3, %s669_s18 }
  0x11   : > { %v690_v2 = vld [vmem:[%s679_s24] sm:$0xf]  ;;  %v693_v3 = vld [vmem:[%s679_s24 + $0x4] sm:$0xf]  ;;  %v289_v5 = vshrl.u32 %v258_v0, 16  ;;  %v292_v6 = vshll.u32 %v258_v0, 16  ;;  %s742_s7 = scalar_lea.vmem %s824_s4, %s669_s18 }
  0x12   : > { %v696_v4 = vld [vmem:[%s685_s27] sm:$0xf]  ;;  %v298_v7 = vshrl.u32 %v259_v1, 16  ;;  %v301_v8 = vshll.u32 %v259_v1, 16  ;;  %v383_v9 = vmax.bf16 %v693_v3, %v690_v2  ;;  %v704_v13 = vld [vmem:[%s679_s24 + $0x8] sm:$0xf] }
  0x13   : > { %v398_v10 = vshrl.u32 %v696_v4, 16  ;;  %v401_v11 = vshll.u32 %v696_v4, 16  ;;  %v291_v14 = vrot.slane %v289_v5, 4  ;;  %v294_v15 = vrot.slane %v292_v6, 5  ;;  %v707_v18 = vld [vmem:[%s685_s27 + $0x4] sm:$0xf] }
  0x14   : > { %v300_v16 = vrot.slane %v298_v7, 4  ;;  %v303_v17 = vrot.slane %v301_v8, 5  ;;  %v307_v21 = vshrl.u32 %v260_v12, 16  ;;  %v310_v22 = vshll.u32 %v260_v12, 16  ;;  %v261_v27 = vld [vmem:[%s674_s21 + $0xc] sm:$0xf] }
  0x15   : > { %v400_v19 = vrot.slane %v398_v10, 4  ;;  %v403_v20 = vrot.slane %v401_v11, 5  ;;  %v295_v23 = vor.u32 %v294_v15, %v291_v14  ;;  %v384_v25 = vmax.bf16 %v704_v13, %v693_v3  ;;  %v715_v32 = vld [vmem:[%s679_s24 + $0xc] sm:$0xf]  ;;  %v718_v40 = vld [vmem:[%s685_s27 + $0x8] sm:$0xf] }
  0x16   : > { %v304_v24 = vor.u32 %v303_v17, %v300_v16  ;;  %v407_v26 = vshrl.u32 %v707_v18, 16  ;;  %v309_v29 = vrot.slane %v307_v21, 4  ;;  %v312_v30 = vrot.slane %v310_v22, 5  ;;  %v262_v46 = vld [vmem:[%s674_s21 + $0x10] sm:$0xf] }
  0x17   : > { %v404_v28 = vor.u32 %v403_v20, %v400_v19  ;;  %v410_v31 = vshll.u32 %v707_v18, 16  ;;  %v296_v33 = vrot.slane %v295_v23, 4  ;;  %v316_v36 = vshrl.u32 %v261_v27, 16  ;;  %v733_v58 = vld [vmem:[%s679_s24 + $0x10] sm:$0xf] }
  0x18   : > { %v305_v34 = vrot.slane %v304_v24, 4  ;;  %v409_v35 = vrot.slane %v407_v26, 4  ;;  %v313_v38 = vor.u32 %v312_v30, %v309_v29  ;;  %v319_v41 = vshll.u32 %v261_v27, 16  ;;  %v736_v59 = vld [vmem:[%s685_s27 + $0xc] sm:$0xf] }
  0x19   : > { %v405_v37 = vrot.slane %v404_v28, 4  ;;  %v412_v39 = vrot.slane %v410_v31, 5  ;;  %v358_v42 = vmax.bf16 %v296_v33, %v258_v0  ;;  %v318_v44 = vrot.slane %v316_v36, 4  ;;  %v747_v6 = vld [vmem:[%s674_s21 + $0x14] sm:$0xf] }
  0x1a   : > { %v359_v43 = vmax.bf16 %v305_v34, %v259_v1  ;;  %v385_v45 = vmax.bf16 %v715_v32, %v704_v13  ;;  %v314_v48 = vrot.slane %v313_v38, 4  ;;  %v321_v50 = vrot.slane %v319_v41, 5  ;;  %v281_v1 = vld [vmem:[%s728_s30] sm:$0xf]  ;;  %v763_v28 = vld [vmem:[%s685_s27 + $0x10] sm:$0xf] }
  0x1b   : > { %v467_v47 = vmax.bf16 %v405_v37, %v696_v4  ;;  %v413_v49 = vor.u32 %v412_v39, %v409_v35  ;;  %v416_v52 = vshrl.u32 %v718_v40, 16  ;;  %v419_v53 = vshll.u32 %v718_v40, 16  ;;  %v264_v36 = vld [vmem:[%s674_s21 + $0x18] sm:$0xf]  ;;  %v283_v37 = vld [vmem:[%s728_s30 + $0x8] sm:$0xf] }
  0x1c   : > { %v376_v51 = vmax.bf16 %v359_v43, %v358_v42  ;;  %v325_v54 = vshrl.u32 %v262_v46, 16  ;;  %v360_v55 = vmax.bf16 %v314_v48, %v260_v12  ;;  %v322_v57 = vor.u32 %v321_v50, %v318_v44  ;;  %v491_v12 = vld [vmem:[%s742_s7] sm:$0xf]  ;;  %v781_v50 = vld [vmem:[%s685_s27 + $0x14] sm:$0xf] }
  0x1d   : > { %v414_v56 = vrot.slane %v413_v49, 4  ;;  %v328_v60 = vshll.u32 %v262_v46, 16  ;;  %v418_v62 = vrot.slane %v416_v52, 4  ;;  %v421_v63 = vrot.slane %v419_v53, 5 }
  0x1e   : > { %v390_v61 = vmax.bf16 %v383_v9, %v376_v51  ;;  %v327_v0 = vrot.slane %v325_v54, 4  ;;  %v377_v2 = vmax.bf16 %v360_v55, %v359_v43  ;;  %v323_v4 = vrot.slane %v322_v57, 4  ;;  %v497_v43 = vld [vmem:[%s742_s7 + $0x8] sm:$0xf]  ;;  %v284_v57 = vld [vmem:[%s728_s30 + $0xc] sm:$0xf] }
  0x1f   : > { %v468_v3 = vmax.bf16 %v414_v56, %v707_v18  ;;  %v330_v5 = vrot.slane %v328_v60, 5  ;;  %v422_v8 = vor.u32 %v421_v63, %v418_v62  ;;  %v386_v10 = vmax.bf16 %v733_v58, %v715_v32  ;;  %v282_v18 = vld [vmem:[%s728_s30 + $0x4] sm:$0xf]  ;;  %v265_v56 = vld [vmem:[%s674_s21 + $0x1c] sm:$0xf] }
  0x20   : > { %v474_v7 = vmax.bf16 %v467_v47, %v390_v61  ;;  %v425_v11 = vshrl.u32 %v736_v59, 16  ;;  %v391_v13 = vmax.bf16 %v384_v25, %v377_v2  ;;  %v361_v14 = vmax.bf16 %v323_v4, %v261_v27  ;;  %v494_v27 = vld [vmem:[%s742_s7 + $0x4] sm:$0xf]  ;;  %v500_v4 = vld [vmem:[%s742_s7 + $0xc] sm:$0xf] }
  0x21   : > { %v331_v15 = vor.u32 %v330_v5, %v327_v0  ;;  %v428_v16 = vshll.u32 %v736_v59, 16  ;;  %v423_v19 = vrot.slane %v422_v8, 4  ;;  %v334_v21 = vshrl.u32 %v747_v6, 16 }
  0x22   : > { %v481_v17 = vmax.bf16 %v474_v7, %v281_v1  ;;  %v427_v20 = vrot.slane %v425_v11, 4  ;;  %v475_v22 = vmax.bf16 %v468_v3, %v391_v13  ;;  %v378_v23 = vmax.bf16 %v361_v14, %v360_v55 }
  0x23   : > { %v332_v24 = vrot.slane %v331_v15, 4  ;;  %v430_v26 = vrot.slane %v428_v16, 5  ;;  %v469_v29 = vmax.bf16 %v423_v19, %v718_v40  ;;  %v336_v30 = vrot.slane %v334_v21, 4  ;;  %v272_v16 = vld [vmem:[%s679_s24 + $0x18] sm:$0xf] }
  0x24   : > { %v492_v25 = vsel %vm754_vm2, %v481_v17, %v491_v12  ;;  %v337_v31 = vshll.u32 %v747_v6, 16  ;;  %v482_v32 = vmax.bf16 %v475_v22, %v282_v18  ;;  %v392_v33 = vmax.bf16 %v385_v45, %v378_v23  ;;  %v271_v45 = vld [vmem:[%s679_s24 + $0x14] sm:$0xf]  ;;  %v280_v12 = vld [vmem:[%s685_s27 + $0x18] sm:$0xf] }
  0x25   : > { %493 = vst [vmem:[%s742_s7] sm:$0xf] %v492_v25  ;;  %v362_v34 = vmax.bf16 %v332_v24, %v262_v46  ;;  %v431_v35 = vor.u32 %v430_v26, %v427_v20  ;;  %v434_v39 = vshrl.u32 %v763_v28, 16  ;;  %v437_v41 = vshll.u32 %v763_v28, 16  ;;  %v285_v26 = vld [vmem:[%s728_s30 + $0x10] sm:$0xf] }
  0x26   : > { %v339_v38 = vrot.slane %v337_v31, 5  ;;  %v495_v40 = vsel %vm754_vm2, %v482_v32, %v494_v27  ;;  %v476_v42 = vmax.bf16 %v469_v29, %v392_v33  ;;  %v343_v51 = vshrl.u32 %v264_v36, 16  ;;  %v273_v31 = vld [vmem:[%s679_s24 + $0x1c] sm:$0xf] }
  0x27   : > { %v379_v44 = vmax.bf16 %v362_v34, %v361_v14  ;;  %v432_v47 = vrot.slane %v431_v35, 4  ;;  %496 = vst [vmem:[%s742_s7 + $0x4] sm:$0xf] %v495_v40  ;;  %v436_v48 = vrot.slane %v434_v39, 4  ;;  %v439_v49 = vrot.slane %v437_v41, 5 }
  0x28   : > { %v340_v46 = vor.u32 %v339_v38, %v336_v30  ;;  %v483_v52 = vmax.bf16 %v476_v42, %v283_v37  ;;  %v346_v55 = vshll.u32 %v264_v36, 16  ;;  %v387_v61 = vmax.bf16 %v271_v45, %v733_v58 }
  0x29   : > { %v393_v53 = vmax.bf16 %v386_v10, %v379_v44  ;;  %v470_v54 = vmax.bf16 %v432_v47, %v736_v59  ;;  %v440_v62 = vor.u32 %v439_v49, %v436_v48  ;;  %v345_v63 = vrot.slane %v343_v51, 4  ;;  %v286_v44 = vld [vmem:[%s728_s30 + $0x14] sm:$0xf] }
  0x2a   : > { %v341_v60 = vrot.slane %v340_v46, 4  ;;  %v498_v0 = vsel %vm754_vm2, %v483_v52, %v497_v43  ;;  %v348_v2 = vrot.slane %v346_v55, 5  ;;  %v443_v3 = vshrl.u32 %v781_v50, 16  ;;  %v506_v48 = vld [vmem:[%s742_s7 + $0x14] sm:$0xf] }
  0x2b   : > { %v477_v1 = vmax.bf16 %v470_v54, %v393_v53  ;;  %499 = vst [vmem:[%s742_s7 + $0x8] sm:$0xf] %v498_v0  ;;  %v441_v5 = vrot.slane %v440_v62, 4  ;;  %v446_v7 = vshll.u32 %v781_v50, 16  ;;  %v366_v58 = vshrl.u32 %v265_v56, 16 }
  0x2c   : > { %v363_v59 = vmax.bf16 %v341_v60, %v747_v6  ;;  %v349_v10 = vor.u32 %v348_v2, %v345_v63  ;;  %v445_v11 = vrot.slane %v443_v3, 4  ;;  %v369_v13 = vshll.u32 %v265_v56, 16  ;;  %v509_v55 = vld [vmem:[%s742_s7 + $0x18] sm:$0xf] }
  0x2d   : > { %v484_v8 = vmax.bf16 %v477_v1, %v284_v57  ;;  %v471_v15 = vmax.bf16 %v441_v5, %v763_v28  ;;  %v448_v17 = vrot.slane %v446_v7, 5  ;;  %v368_v18 = vrot.slane %v366_v58, 4 }
  0x2e   : > { %v380_v14 = vmax.bf16 %v363_v59, %v362_v34  ;;  %v350_v19 = vrot.slane %v349_v10, 4  ;;  %v371_v20 = vrot.slane %v369_v13, 5  ;;  %v452_v23 = vshrl.u32 %v280_v12, 16  ;;  %v503_v34 = vld [vmem:[%s742_s7 + $0x10] sm:$0xf] }
  0x2f   : > { %v501_v6 = vsel %vm754_vm2, %v484_v8, %v500_v4  ;;  %v449_v22 = vor.u32 %v448_v17, %v445_v11  ;;  %v455_v24 = vshll.u32 %v280_v12, 16  ;;  %v388_v27 = vmax.bf16 %v272_v16, %v271_v45 }
  0x30   : > { %502 = vst [vmem:[%s742_s7 + $0xc] sm:$0xf] %v501_v6  ;;  %v394_v21 = vmax.bf16 %v387_v61, %v380_v14  ;;  %v364_v25 = vmax.bf16 %v350_v19, %v264_v36  ;;  %v372_v29 = vor.u32 %v371_v20, %v368_v18  ;;  %v454_v32 = vrot.slane %v452_v23, 4 }
  0x31   : > { %v450_v30 = vrot.slane %v449_v22, 4  ;;  %v457_v33 = vrot.slane %v455_v24, 5  ;;  %v389_v42 = vmax.bf16 %v273_v31, %v272_v16 }
  0x32   : > { %v478_v28 = vmax.bf16 %v471_v15, %v394_v21  ;;  %v381_v35 = vmax.bf16 %v364_v25, %v363_v59  ;;  %v373_v37 = vrot.slane %v372_v29, 4 }
  0x33   : > { %v472_v39 = vmax.bf16 %v450_v30, %v781_v50  ;;  %v458_v41 = vor.u32 %v457_v33, %v454_v32  ;;  %v287_v50 = vld [vmem:[%s728_s30 + $0x18] sm:$0xf] }
  0x34   : > { %v485_v38 = vmax.bf16 %v478_v28, %v285_v26  ;;  %v395_v40 = vmax.bf16 %v388_v27, %v381_v35  ;;  %v375_v36 = vmax.bf16 %v373_v37, %v265_v56 }
  0x35   : > { %v459_v47 = vrot.slane %v458_v41, 4 }
  0x36   : > { %v504_v43 = vsel %vm754_vm2, %v485_v38, %v503_v34  ;;  %v479_v45 = vmax.bf16 %v472_v39, %v395_v40  ;;  %v382_v46 = vmax.bf16 %v375_v36, %v364_v25 }
  0x37   : > { %505 = vst [vmem:[%s742_s7 + $0x10] sm:$0xf] %v504_v43  ;;  %v473_v49 = vmax.bf16 %v459_v47, %v280_v12 }
  0x38   : > { %v486_v51 = vmax.bf16 %v479_v45, %v286_v44  ;;  %v396_v52 = vmax.bf16 %v389_v42, %v382_v46 }
  0x3a   : > { %v507_v53 = vsel %vm754_vm2, %v486_v51, %v506_v48  ;;  %v480_v54 = vmax.bf16 %v473_v49, %v396_v52 }
  0x3b   : > { %508 = vst [vmem:[%s742_s7 + $0x14] sm:$0xf] %v507_v53 }
  0x3c   : > { %v487_v56 = vmax.bf16 %v480_v54, %v287_v50 }
  0x3e   : > { %v510_v57 = vsel %vm754_vm2, %v487_v56, %v509_v55 }
  0x3f   : > { %511 = vst [vmem:[%s742_s7 + $0x18] sm:$0xf] %v510_v57 }
  0x40 PF: > { %s14_s15 = sadd.s32 1, %s634_s15  }
  0x41   : > { %p11_p4 = scmp.ge.s32.totalorder %s14_s15, 4  }
  0x43   :  { %13 = sbr.rel (!%p11_p4) target bundleno = 1 (0x1), region = 75 }

// kernel: alexnet_features.11
= control target key start
LH: loop header
LB: loop body
LE: loop exit
PB: predicated region body
PF: predicated region fallthrough
CT: control target
= control target key end

     0   :  { %s529_s15 = smov 0   ;;  %s614_s0 = inlined_call_operand.vmem [shape: bf16[2,4,4,192], index: 0, kind: input, shape index: {}]   ;;  %s615_s1 = inlined_call_operand.vmem [shape: bf16[2,4,3,192], index: 1, kind: input, shape index: {}]   ;;  %s616_s2 = inlined_call_operand.vmem [shape: bf16[2,3,4,192], index: 2, kind: input, shape index: {}]   ;;  %s617_s3 = inlined_call_operand.vmem [shape: bf16[2,3,3,192], index: 3, kind: input, shape index: {}]   ;;  %s618_s4 = inlined_call_operand.vmem [shape: bf16[2,3,3,192], index: 4, kind: output, shape index: {}]  }
   0x1 LB: > { %s471_s16 = sadd.s32 4294967295, %s502_s15   ;;  %p475_p0 = scmp.ge.s32.totalorder %s502_s15, 1  ;;  %s502_s15 = sphi %s529_s15, %s14_s15  }
   0x2   : > { %p192_p1 = scmp.lt.s32.totalorder %s502_s15, 3 }
   0x4   : > { %p193_p2 = pnand %p475_p0, %p192_p1 }
   0x5   : > { %p233_p3 = scmp.lt.s32.totalorder (!%p193_p2), %s471_s16, 1  ;;  %vm364_vm0 = vcmask (!%p193_p2), 1041408   ;;  %vm365_vm1 = vsmask.f32 (!%p193_p2), 1280  ;;  %vm367_vm2 = vcmask (!%p193_p2), 519170  }
   0x6   : > { %196 = sbr.rel (%p193_p2) target bundleno = 43 (0x2b), region = 36  ;;  %vm368_vm3 = vsmask.f32 (!%p193_p2), 3328  ;;  %vm576_vm4 = vmand (!%p193_p2), %vm364_vm0, %vm365_vm1 }
   0x7   : > { %vm369_vm5 = vmand (!%p193_p2), %vm367_vm2, %vm368_vm3 }
   0x8   : > { %vm593_vm6 = vmor (!%p193_p2), %vm369_vm5, %vm576_vm4 }
   0xd   : > { %s624_s16 = smov (!%p233_p3, %s471_s16), 1 }
   0xe   : > { %s485_s17 = sshll.u32 %s624_s16, 4  ;;  %s537_s18 = smul.u32 12, %s624_s16 }
   0xf   : > { %s237_s21 = scalar_lea.vmem %s614_s0, %s485_s17  ;;  %s554_s27 = scalar_lea.vmem %s615_s1, %s485_s17 }
  0x10   : > { %s546_s24 = scalar_lea.vmem %s616_s2, %s537_s18  ;;  %v258_v0 = vld [vmem:[%s237_s21] sm:$0xf]  ;;  %v259_v1 = vld [vmem:[%s237_s21 + $0x4] sm:$0xf]  ;;  %v260_v9 = vld [vmem:[%s237_s21 + $0x8] sm:$0xf]  ;;  %s571_s30 = scalar_lea.vmem %s617_s3, %s537_s18 }
  0x11   : > { %v549_v2 = vld [vmem:[%s546_s24] sm:$0xf]  ;;  %v273_v3 = vshrl.u32 %v258_v0, 16  ;;  %v276_v4 = vshll.u32 %v258_v0, 16  ;;  %v282_v5 = vshrl.u32 %v259_v1, 16  ;;  %v285_v6 = vshll.u32 %v259_v1, 16  ;;  %s584_s7 = scalar_lea.vmem %s618_s4, %s537_s18 }
  0x12   : > { %v326_v7 = vshrl.u32 %v549_v2, 16  ;;  %v329_v8 = vshll.u32 %v549_v2, 16  ;;  %v559_v14 = vld [vmem:[%s546_s24 + $0x4] sm:$0xf]  ;;  %v291_v17 = vshrl.u32 %v260_v9, 16  ;;  %v294_v18 = vshll.u32 %v260_v9, 16 }
  0x13   : > { %v275_v10 = vrot.slane %v273_v3, 6  ;;  %v278_v11 = vrot.slane %v276_v4, 7  ;;  %v284_v12 = vrot.slane %v282_v5, 6  ;;  %v287_v13 = vrot.slane %v285_v6, 7  ;;  %v262_v19 = vld [vmem:[%s554_s27] sm:$0xf] }
  0x14   : > { %v328_v15 = vrot.slane %v326_v7, 6  ;;  %v331_v16 = vrot.slane %v329_v8, 7  ;;  %v335_v22 = vshrl.u32 %v559_v14, 16  ;;  %v261_v23 = vld [vmem:[%s237_s21 + $0xc] sm:$0xf]  ;;  %v293_v26 = vrot.slane %v291_v17, 6 }
  0x15   : > { %v279_v20 = vor.u32 %v278_v11, %v275_v10  ;;  %v288_v21 = vor.u32 %v287_v13, %v284_v12  ;;  %v263_v24 = vld [vmem:[%s554_s27 + $0x4] sm:$0xf]  ;;  %v296_v27 = vrot.slane %v294_v18, 7  ;;  %v338_v28 = vshll.u32 %v559_v14, 16  ;;  %v268_v36 = vld [vmem:[%s546_s24 + $0x8] sm:$0xf] }
  0x16   : > { %v332_v25 = vor.u32 %v331_v16, %v328_v15  ;;  %v337_v31 = vrot.slane %v335_v22, 6  ;;  %v306_v32 = vshrl.u32 %v261_v23, 16  ;;  %v309_v37 = vshll.u32 %v261_v23, 16  ;;  %v264_v41 = vld [vmem:[%s554_s27 + $0x8] sm:$0xf] }
  0x17   : > { %v280_v29 = vrot.slane %v279_v20, 2  ;;  %v289_v30 = vrot.slane %v288_v21, 2  ;;  %v297_v34 = vor.u32 %v296_v27, %v293_v26  ;;  %v340_v35 = vrot.slane %v338_v28, 7  ;;  %v265_v56 = vld [vmem:[%s554_s27 + $0xc] sm:$0xf] }
  0x18   : > { %v333_v33 = vrot.slane %v332_v25, 2  ;;  %v319_v40 = vmax.bf16 %v263_v24, %v262_v19  ;;  %v308_v42 = vrot.slane %v306_v32, 6  ;;  %v311_v45 = vrot.slane %v309_v37, 7  ;;  %v269_v59 = vld [vmem:[%s571_s30] sm:$0xf] }
  0x19   : > { %v302_v38 = vmax.bf16 %v280_v29, %v258_v0  ;;  %v303_v39 = vmax.bf16 %v289_v30, %v259_v1  ;;  %v298_v43 = vrot.slane %v297_v34, 2  ;;  %v341_v44 = vor.u32 %v340_v35, %v337_v31  ;;  %v270_v7 = vld [vmem:[%s571_s30 + $0x4] sm:$0xf]  ;;  %v271_v16 = vld [vmem:[%s571_s30 + $0x8] sm:$0xf] }
  0x1a   : > { %v355_v47 = vmax.bf16 %v333_v33, %v549_v2  ;;  %v344_v48 = vshrl.u32 %v268_v36, 16  ;;  %v347_v49 = vshll.u32 %v268_v36, 16  ;;  %v320_v52 = vmax.bf16 %v264_v41, %v263_v24  ;;  %v371_v2 = vld [vmem:[%s584_s7] sm:$0xf]  ;;  %v374_v12 = vld [vmem:[%s584_s7 + $0x4] sm:$0xf] }
  0x1b   : > { %v316_v46 = vmax.bf16 %v303_v39, %v302_v38  ;;  %v304_v51 = vmax.bf16 %v298_v43, %v260_v9  ;;  %v342_v53 = vrot.slane %v341_v44, 2  ;;  %v312_v54 = vor.u32 %v311_v45, %v308_v42  ;;  %v377_v19 = vld [vmem:[%s584_s7 + $0x8] sm:$0xf] }
  0x1c   : > { %v346_v57 = vrot.slane %v344_v48, 6  ;;  %v349_v58 = vrot.slane %v347_v49, 7  ;;  %v321_v5 = vmax.bf16 %v265_v56, %v264_v41 }
  0x1d   : > { %v322_v55 = vmax.bf16 %v319_v40, %v316_v46  ;;  %v317_v60 = vmax.bf16 %v304_v51, %v303_v39  ;;  %v356_v61 = vmax.bf16 %v342_v53, %v559_v14  ;;  %v313_v62 = vrot.slane %v312_v54, 2 }
  0x1e   : > { %v350_v0 = vor.u32 %v349_v58, %v346_v57 }
  0x1f   : > { %v358_v63 = vmax.bf16 %v355_v47, %v322_v55  ;;  %v323_v3 = vmax.bf16 %v320_v52, %v317_v60  ;;  %v315_v4 = vmax.bf16 %v313_v62, %v261_v23 }
  0x20   : > { %v351_v8 = vrot.slane %v350_v0, 2 }
  0x21   : > { %v361_v6 = vmax.bf16 %v358_v63, %v269_v59  ;;  %v359_v9 = vmax.bf16 %v356_v61, %v323_v3  ;;  %v318_v10 = vmax.bf16 %v315_v4, %v304_v51 }
  0x22   : > { %v357_v13 = vmax.bf16 %v351_v8, %v268_v36 }
  0x23   : > { %v372_v11 = vsel %vm593_vm6, %v361_v6, %v371_v2  ;;  %v362_v14 = vmax.bf16 %v359_v9, %v270_v7  ;;  %v324_v15 = vmax.bf16 %v321_v5, %v318_v10 }
  0x24   : > { %373 = vst [vmem:[%s584_s7] sm:$0xf] %v372_v11 }
  0x25   : > { %v375_v17 = vsel %vm593_vm6, %v362_v14, %v374_v12  ;;  %v360_v18 = vmax.bf16 %v357_v13, %v324_v15 }
  0x26   : > { %376 = vst [vmem:[%s584_s7 + $0x4] sm:$0xf] %v375_v17 }
  0x27   : > { %v363_v20 = vmax.bf16 %v360_v18, %v271_v16 }
  0x29   : > { %v378_v21 = vsel %vm593_vm6, %v363_v20, %v377_v19 }
  0x2a   : > { %379 = vst [vmem:[%s584_s7 + $0x8] sm:$0xf] %v378_v21 }
  0x2b PF: > { %s14_s15 = sadd.s32 1, %s502_s15  }
  0x2c   : > { %p11_p4 = scmp.ge.s32.totalorder %s14_s15, 4  }
  0x2e   :  { %13 = sbr.rel (!%p11_p4) target bundleno = 1 (0x1), region = 75 }

// kernel: alexnet_features.10
= control target key start
LH: loop header
LB: loop body
LE: loop exit
PB: predicated region body
PF: predicated region fallthrough
CT: control target
= control target key end

     0   :  { %s6942_s12 = smov 0   ;;  %s8583_s0 = inlined_call_operand.vmem [shape: bf16[2,132,64], index: 0, kind: input, shape index: {}]   ;;  %s8584_s1 = inlined_call_operand.vmem [shape: bf16[25,64,192], index: 1, kind: input, shape index: {}]   ;;  %s8585_s2 = inlined_call_operand.vmem [shape: f32[1,192], index: 2, kind: input, shape index: {}]   ;;  %s8586_s3 = inlined_call_operand.vmem [shape: bf16[2,77,192], index: 3, kind: output, shape index: {}]  }
   0x1 LB: > { %s5425_s13 = sadd.s32 4294967295, %s6919_s12   ;;  %p5429_p0 = scmp.ge.s32.totalorder %s6919_s12, 1  ;;  %s6919_s12 = sphi %s6942_s12, %s13_s12  }
   0x2   : > { %p137_p1 = scmp.lt.s32.totalorder %s6919_s12, 3 }
   0x4   : > { %p138_p2 = pnand %p5429_p0, %p137_p1 }
   0x5   : > { %v6535_v0 = vld [vmem:[%s8584_s1 + $0x44] ss:$8 sps:$4 sm:$0xff] (!%p138_p2)   ;;  %p161_p3 = scmp.lt.s32.totalorder (!%p138_p2), %s5425_s13, 1  ;;  %v6921_v2 = vmov (!%p138_p2), 0   ;;  %v6539_v3 = vld [vmem:[%s8584_s1 + $0x40] ss:$8 sps:$4 sm:$0xff] (!%p138_p2)  }
   0x6   : > { %141 = sbr.rel (%p138_p2) target bundleno = 748 (0x2ec), region = 32  ;;  %v6537_v1 = vld [vmem:[%s8584_s1 + $0x304] ss:$8 sps:$4 sm:$0xff] (!%p138_p2)   ;;  %352 = vmatprep.mubr.bf16.mxu1 (!%p138_p2), %v6921_v2  ;;  %2725 = vmatprep.mubr.bf16.mxu0 (!%p138_p2), %v6921_v2  ;;  %v6540_v4 = vld [vmem:[%s8584_s1 + $0x300] ss:$8 sps:$4 sm:$0xff] (!%p138_p2)   ;;  %vm304_vm0 = vcmask (!%p138_p2), 523264  }
   0x7   : > { %320 = vmatprep.subr.bf16.mxu1 (!%p138_p2), %v6535_v0  ;;  %2693 = vmatprep.subr.bf16.mxu0 (!%p138_p2), %v6537_v1  ;;  %v6541_v5 = vld [vmem:[%s8584_s1 + $0x54] ss:$8 sps:$4 sm:$0xff] (!%p138_p2)   ;;  %v6545_v7 = vld [vmem:[%s8584_s1 + $0x50] ss:$8 sps:$4 sm:$0xff] (!%p138_p2)   ;;  %v6547_v9 = vld [vmem:[%s8584_s1 + $0x64] ss:$8 sps:$4 sm:$0xff] (!%p138_p2)  }
   0x8   : > { %321 = vmatpush1.bf16.msra.mxu1 (!%p138_p2), %v6539_v3  ;;  %2694 = vmatpush1.bf16.msra.mxu0 (!%p138_p2), %v6540_v4  ;;  %v6543_v6 = vld [vmem:[%s8584_s1 + $0x314] ss:$8 sps:$4 sm:$0xff] (!%p138_p2)   ;;  %v6546_v8 = vld [vmem:[%s8584_s1 + $0x310] ss:$8 sps:$4 sm:$0xff] (!%p138_p2)   ;;  %v6549_v10 = vld [vmem:[%s8584_s1 + $0x324] ss:$8 sps:$4 sm:$0xff] (!%p138_p2)  }
   0x9   : > { %322 = vmatprep.subr.bf16.mxu1 (!%p138_p2), %v6541_v5  ;;  %2695 = vmatprep.subr.bf16.mxu0 (!%p138_p2), %v6543_v6  ;;  %v6551_v11 = vld [vmem:[%s8584_s1 + $0x60] ss:$8 sps:$4 sm:$0xff] (!%p138_p2)   ;;  %v6553_v13 = vld [vmem:[%s8584_s1 + $0x74] ss:$8 sps:$4 sm:$0xff] (!%p138_p2)   ;;  %v6557_v15 = vld [vmem:[%s8584_s1 + $0x70] ss:$8 sps:$4 sm:$0xff] (!%p138_p2)  }
   0xa   : > { %v6552_v12 = vld [vmem:[%s8584_s1 + $0x320] ss:$8 sps:$4 sm:$0xff] (!%p138_p2)   ;;  %v6555_v14 = vld [vmem:[%s8584_s1 + $0x334] ss:$8 sps:$4 sm:$0xff] (!%p138_p2)   ;;  %v6558_v18 = vld [vmem:[%s8584_s1 + $0x330] ss:$8 sps:$4 sm:$0xff] (!%p138_p2)  }
   0xb   : > { %v6564_v21 = vld [vmem:[%s8584_s1 + $0x4] ss:$8 sps:$4 sm:$0xff] (!%p138_p2)   ;;  %v6568_v29 = vld [vmem:[%s8584_s1 + $0x340] ss:$8 sps:$4 sm:$0xff] (!%p138_p2)   ;;  %vm224_vm1 = vsmask.f32 (!%p138_p2), 7424 }
   0xc   : > { %323 = vmatpush1.bf16.msra.mxu1 (!%p138_p2), %v6545_v7  ;;  %2696 = vmatpush1.bf16.msra.mxu0 (!%p138_p2), %v6546_v8  ;;  %v6570_v31 = vld [vmem:[%s8584_s1 + $0x344] ss:$8 sps:$4 sm:$0xff] (!%p138_p2)   ;;  %v6562_v34 = vld [vmem:[%s8584_s1] ss:$8 sps:$4 sm:$0xff] (!%p138_p2)   ;;  %v6573_v35 = vld [vmem:[%s8584_s1 + $0x354] ss:$8 sps:$4 sm:$0xff] (!%p138_p2)  }
   0xd   : > { %s8590_s13 = smov (!%p161_p3, %s5425_s13), 1  ;;  %324 = vmatprep.subr.bf16.mxu1 %v6547_v9  ;;  %2697 = vmatprep.subr.bf16.mxu0 %v6549_v10  ;;  %v6571_v37 = vld [vmem:[%s8584_s1 + $0x350] ss:$8 sps:$4 sm:$0xff]   ;;  %v6579_v54 = vld [vmem:[%s8584_s1 + $0x360] ss:$8 sps:$4 sm:$0xff]   ;;  %vm553_vm2 = vcmask 1046528  }
   0xe   : > { %s6524_s28 = smul.u32 68, %s8590_s13  ;;  %v6581_v55 = vld [vmem:[%s8584_s1 + $0x364] ss:$8 sps:$4 sm:$0xff]   ;;  %v6582_v58 = vld [vmem:[%s8584_s1 + $0x10] ss:$8 sps:$4 sm:$0xff]   ;;  %vm966_vm4 = vcmask 1045504  }
   0xf   : > { %v6584_v59 = vld [vmem:[%s8584_s1 + $0x14] ss:$8 sps:$4 sm:$0xff]   ;;  %v6585_v63 = vld [vmem:[%s8584_s1 + $0x370] ss:$8 sps:$4 sm:$0xff]   ;;  %v6589_v7 = vld [vmem:[%s8584_s1 + $0x20] ss:$8 sps:$4 sm:$0xff]  }
  0x10   : > { %s6994_s16 = scalar_lea.vmem %s8583_s0, %s6524_s28  ;;  %325 = vmatpush1.bf16.msra.mxu1 %v6551_v11  ;;  %2698 = vmatpush1.bf16.msra.mxu0 %v6552_v12  ;;  %v6587_v0 = vld [vmem:[%s8584_s1 + $0x374] ss:$8 sps:$4 sm:$0xff]   ;;  %v6591_v8 = vld [vmem:[%s8584_s1 + $0x24] ss:$8 sps:$4 sm:$0xff]   ;;  %vm730_vm3 = vsmask.f32 6400 }
  0x11   : > { %v172_v16 = vld [vmem:[%s6994_s16] sm:$0xf]  ;;  %v7007_v17 = vld [vmem:[%s6994_s16 + $0x4] sm:$0xf]  ;;  %v7016_v20 = vld [vmem:[%s6994_s16 + $0x8] sm:$0xff]   ;;  %326 = vmatprep.subr.bf16.mxu1 %v6553_v13  ;;  %2699 = vmatprep.subr.bf16.mxu0 %v6555_v14  ;;  %vm1813_vm6 = vcmask 1044480  }
  0x12   : > { %v7013_v19 = vcombine.low %v172_v16, %v7007_v17  ;;  %v233_v24 = vshll.u32 %v7016_v20, 16  ;;  %v2185_v25 = vld [vmem:[%s6994_s16 + $0xc] sm:$0xf]  ;;  %v7026_v26 = vld [vmem:[%s6994_s16 + $0x10] sm:$0xf]  ;;  %v237_v36 = vshrl.u32 %v7016_v20, 16 }
  0x13   : > { %v5716_v30 = vcombine.low %v2185_v25, %v7026_v26  ;;  %v7047_v38 = vld [vmem:[%s6994_s16 + $0x10] sm:$0xff]   ;;  %v2188_v44 = vld [vmem:[%s6994_s16 + $0x18] sm:$0xf]  ;;  %v536_v45 = vld [vmem:[%s6994_s16] sm:$0xe]  ;;  %s6525_s26 = smul.u32 80, %s8590_s13 }
  0x14   : > { %v226_v22 = vshrl.u32 %v7013_v19, 16  ;;  %v228_v23 = vshll.u32 %v7013_v19, 16  ;;  %327 = vmatpush1.bf16.msra.mxu1 %v6557_v15  ;;  %2700 = vmatpush1.bf16.msra.mxu0 %v6558_v18  ;;  %v235_v28 = vrot.slane %v233_v24, 1  ;;  %v740_v33 = vrot.slane %v233_v24, 2  ;;  %v2187_v43 = vld [vmem:[%s6994_s16 + $0x14] sm:$0xf] }
  0x15   : > { %453 = vmatprep.subr.bf16.mxu1 %v6564_v21  ;;  %2894 = vmatprep.subr.bf16.mxu0 %v6570_v31  ;;  %v2807_v40 = vshll.u32 %v5716_v30, 16  ;;  %v739_v41 = vrot.slane %v237_v36, 1  ;;  %v241_v42 = vshll.u32 %v7047_v38, 16  ;;  %v2189_v47 = vld [vmem:[%s6994_s16 + $0x1c] sm:$0xf]  ;;  %v7059_v48 = vcombine.low %v7026_v26, %v2187_v43  ;;  %s8528_s29 = scalar_lea.vmem %s8586_s3, %s6525_s26 }
  0x16   : > { %v230_v27 = vrot.slane %v228_v23, 1  ;;  %v239_v46 = vor.u32 %v237_v36, %v235_v28  ;;  %v2190_v51 = vld [vmem:[%s6994_s16 + $0x20] sm:$0xf]  ;;  %v7066_v52 = vcombine.low %v2188_v44, %v2189_v47  ;;  %v7068_v53 = vcombine.low %v2187_v43, %v2188_v44  ;;  %v7097_v3 = vld [vmem:[%s6994_s16 + $0x18] sm:$0xff]   ;;  %v181_v11 = vld [vmem:[%s6994_s16 + $0x24] sm:$0x7] }
  0x17   : > { %5729 = vmatmul.mubr.msk.bf16.vlgmr.msra.gmra.mrb[0].mxu0 %vm304_vm0, %v5716_v30  ;;  %v7061_v49 = vor.u32 %v740_v33, %v739_v41  ;;  %v243_v50 = vrot.slane %v241_v42, 1  ;;  %v2805_v56 = vshrl.u32 %v5716_v30, 16  ;;  %v2809_v57 = vrot.slane %v2807_v40, 1  ;;  %v7110_v10 = vld [vmem:[%s6994_s16 + $0x20] sm:$0xf] }
  0x18   : > { %v231_v32 = vor.u32 %v230_v27, %v226_v22  ;;  %2895 = vmatpush1.bf16.msra.mxu0 %v6568_v29  ;;  %2735 = vmatprep.mubr.bf16.mxu0 %v6921_v2  ;;  %v245_v60 = vshrl.u32 %v7047_v38, 16  ;;  %v2811_v61 = vshll.u32 %v7068_v53, 16  ;;  %v7092_v1 = vcombine.low %v536_v45, %v7007_v17  ;;  %v6595_v15 = vld [vmem:[%s8584_s1 + $0x384] ss:$8 sps:$4 sm:$0xff]   ;;  %v6593_v22 = vld [vmem:[%s8584_s1 + $0x380] ss:$8 sps:$4 sm:$0xff]  }
  0x19   : > { %2896 = vmatprep.subr.bf16.mxu0 %v6573_v35  ;;  %v244_v62 = vsel %vm224_vm1, %v239_v46, %v243_v50  ;;  %v7099_v4 = vcombine.low %v2189_v47, %v2190_v51  ;;  %v2810_v5 = vor.u32 %v2809_v57, %v2805_v56  ;;  %v249_v9 = vshll.u32 %v7097_v3, 16  ;;  %v6598_v23 = vld [vmem:[%s8584_s1 + $0x34] ss:$8 sps:$4 sm:$0xff]   ;;  %v2191_v25 = vld [vmem:[%s6994_s16 + $0x24] sm:$0xf] }
  0x1a   : > { %v236_v39 = vsel %vm224_vm1, %v231_v32, %v235_v28  ;;  %v2813_v6 = vrot.slane %v2811_v61, 1  ;;  %v247_v12 = vor.u32 %v245_v60, %v243_v50  ;;  %v7118_v13 = vcombine.low %v7110_v10, %v181_v11  ;;  %v2192_v27 = vld [vmem:[%s6994_s16 + $0x28] sm:$0xf]  ;;  %v6596_v30 = vld [vmem:[%s8584_s1 + $0x30] ss:$8 sps:$4 sm:$0xff]  }
  0x1b   : > { %5453 = vmatmul.mubr.msk.bf16.vlgmr.msra.gmra.mrb[0].mxu1 %vm304_vm0, %v236_v39  ;;  %v251_v14 = vrot.slane %v249_v9, 1  ;;  %v554_v16 = vrot.slane %v7092_v1, 1  ;;  %v2815_v18 = vshrl.u32 %v7068_v53, 16  ;;  %v2818_v21 = vshll.u32 %v7099_v4, 16  ;;  %v6602_v32 = vld [vmem:[%s8584_s1 + $0x394] ss:$8 sps:$4 sm:$0xff]  }
  0x1c   : > { %454 = vmatpush1.bf16.msra.mxu1 %v6562_v34  ;;  %362 = vmatprep.mubr.bf16.mxu1 %v6921_v2  ;;  %v2814_v17 = vsel %vm224_vm1, %v2810_v5, %v2813_v6  ;;  %v253_v24 = vshrl.u32 %v7097_v3, 16  ;;  %v257_v29 = vshll.u32 %v7118_v13, 16  ;;  %v7143_v31 = vcombine.low %v2191_v25, %v2192_v27  ;;  %v6605_v39 = vld [vmem:[%s8584_s1 + $0x84] ss:$8 sps:$4 sm:$0xff]   ;;  %v2621_v51 = vld [vmem:[%s6994_s16 + $0x30] sm:$0x7] }
  0x1d   : > { %2897 = vmatpush1.bf16.msra.mxu0 %v6571_v37  ;;  %455 = vmatprep.subr.bf16.mxu1 %v6584_v59  ;;  %v252_v28 = vsel %vm224_vm1, %v247_v12, %v251_v14  ;;  %v555_v33 = vrot.slane %v7016_v20, 1  ;;  %v557_v34 = vrot.slane %v7047_v38, 1  ;;  %v2817_v35 = vor.u32 %v2815_v18, %v2813_v6  ;;  %v6600_v37 = vld [vmem:[%s8584_s1 + $0x390] ss:$8 sps:$4 sm:$0xff]   ;;  %v6609_v47 = vld [vmem:[%s8584_s1 + $0x3a4] ss:$8 sps:$4 sm:$0xff]  }
  0x1e   : > { %2898 = vmatprep.subr.bf16.mxu0 %v6581_v55  ;;  %v2820_v36 = vrot.slane %v2818_v21, 1  ;;  %v559_v43 = vrot.slane %v7097_v3, 1  ;;  %v255_v44 = vor.u32 %v253_v24, %v251_v14  ;;  %v259_v45 = vrot.slane %v257_v29, 1  ;;  %v7172_v50 = vld [vmem:[%s6994_s16 + $0x2c] sm:$0xf] }
  0x1f   : > { %5730 = vmatmul.mubr.msk.bf16.gmra.mrb[4].mxu0 %vm304_vm0, %v7068_v53  ;;  %v7160_v40 = vsel %vm553_vm2, %v554_v16, %v555_v33  ;;  %v7163_v41 = vsel %vm553_vm2, %v555_v33, %v557_v34  ;;  %v2825_v46 = vshll.u32 %v7143_v31, 16  ;;  %v732_v55 = vshrl.u32 %v7092_v1, 16  ;;  %v6615_v59 = vld [vmem:[%s8584_s1 + $0x3b4] ss:$8 sps:$4 sm:$0xff]   ;;  %v6621_v14 = vld [vmem:[%s8584_s1 + $0x3c4] ss:$8 sps:$4 sm:$0xff]  }
  0x20   : > { %456 = vmatpush1.bf16.msra.mxu1 %v6582_v58  ;;  %2926 = vmatprep.mubr.bf16.mxu0 %v6921_v2  ;;  %v2821_v56 = vsel %vm224_vm1, %v2817_v35, %v2820_v36  ;;  %v2822_v57 = vshrl.u32 %v7099_v4, 16  ;;  %v6607_v58 = vld [vmem:[%s8584_s1 + $0x3a0] ss:$8 sps:$4 sm:$0xff]   ;;  %v743_v11 = vrot.slane %v245_v60, 1  ;;  %v744_v12 = vrot.slane %v241_v42, 2 }
  0x21   : > { %2899 = vmatpush1.bf16.msra.mxu0 %v6579_v54  ;;  %457 = vmatprep.subr.bf16.mxu1 %v6591_v8  ;;  %v7178_v54 = vsel %vm553_vm2, %v557_v34, %v559_v43  ;;  %v734_v61 = vrot.slane %v732_v55, 1  ;;  %v2827_v5 = vrot.slane %v2825_v46, 1  ;;  %v7195_v8 = vcombine.low %v7172_v50, %v2621_v51  ;;  %v6612_v34 = vld [vmem:[%s8584_s1 + $0x94] ss:$8 sps:$4 sm:$0xff]   ;;  %v6616_v46 = vld [vmem:[%s8584_s1 + $0xa0] ss:$8 sps:$4 sm:$0xff]  }
  0x22   : > { %2900 = vmatprep.subr.bf16.mxu0 %v6587_v0  ;;  %v261_v0 = vshrl.u32 %v7118_v13, 16  ;;  %v747_v16 = vrot.slane %v253_v24, 1  ;;  %v745_v18 = vor.u32 %v744_v12, %v743_v11  ;;  %v6624_v51 = vld [vmem:[%s8584_s1 + $0xb4] ss:$8 sps:$4 sm:$0xff]   ;;  %v6625_v11 = vld [vmem:[%s8584_s1 + $0x3d0] ss:$8 sps:$4 sm:$0xff]  }
  0x23   : > { %5454 = vmatmul.mubr.msk.bf16.gmra.mrb[4].mxu1 %vm304_vm0, %v244_v62  ;;  %v735_v62 = vshll.u32 %v7092_v1, 16  ;;  %v6613_v1 = vld [vmem:[%s8584_s1 + $0x3b0] ss:$8 sps:$4 sm:$0xff]   ;;  %v2836_v33 = vshrl.u32 %v7195_v8, 16  ;;  %vm1584_vm5 = vsmask.f32 5376 }
  0x24   : > { %372 = vmatprep.mubr.bf16.mxu1 %v6921_v2  ;;  %458 = vmatpush1.bf16.msra.mxu1 %v6589_v7  ;;  %v2824_v7 = vor.u32 %v2822_v57, %v2820_v36  ;;  %v7220_v24 = vsel %vm730_vm3, %v7061_v49, %v745_v18  ;;  %v2997_v36 = vld [vmem:[%s6994_s16 + $0xc] sm:$0xe]  ;;  %v6622_v57 = vld [vmem:[%s8584_s1 + $0xb0] ss:$8 sps:$4 sm:$0xff]   ;;  %vm1992_vm7 = vsmask.f32 4352 }
  0x25   : > { %2901 = vmatpush1.bf16.msra.mxu0 %v6585_v63  ;;  %459 = vmatprep.subr.bf16.mxu1 %v6598_v23  ;;  %v260_v63 = vsel %vm224_vm1, %v255_v44, %v259_v45  ;;  %v737_v6 = vrot.slane %v735_v62, 2  ;;  %v2832_v23 = vshll.u32 %v7195_v8, 16  ;;  %v5763_v44 = vcombine.low %v2997_v36, %v7026_v26  ;;  %v6650_v36 = vld [vmem:[%s8584_s1 + $0x404] ss:$8 sps:$4 sm:$0xff]  }
  0x26   : > { %3078 = vmatprep.subr.bf16.mxu0 %v6595_v15  ;;  %v2828_v21 = vsel %vm224_vm1, %v2824_v7, %v2827_v5  ;;  %v3015_v26 = vrot.slane %v7068_v53, 1  ;;  %v6630_v53 = vld [vmem:[%s8584_s1 + $0xc4] ss:$8 sps:$4 sm:$0xff]   ;;  %vm5349_vm8 = vcmask 1043456   ;;  %vm5350_vm9 = vcmask 523268  }
  0x27   : > { %v738_v15 = vor.u32 %v737_v6, %v734_v61  ;;  %v3014_v55 = vrot.slane %v5763_v44, 1  ;;  %v7304_v7 = vld [vmem:[%s6994_s16 + $0x20] sm:$0xff]   ;;  %vm8530_vm10 = vmor %vm5350_vm9, %vm5349_vm8  ;;  %vm5361_vm11 = vcmask 1042432   ;;  %vm5362_vm12 = vsmask.f32 2304 }
  0x28   : > { %5750 = vmatmul.mubr.msk.bf16.vlgmr.msra.gmra.mrb[0].mxu0 %vm304_vm0, %v2814_v17  ;;  %460 = vmatpush1.bf16.msra.mxu1 %v6596_v30  ;;  %v748_v17 = vrot.slane %v249_v9, 2  ;;  %v263_v9 = vor.u32 %v261_v0, %v259_v45  ;;  %v6627_v0 = vld [vmem:[%s8584_s1 + $0x3d4] ss:$8 sps:$4 sm:$0xff]   ;;  %vm5364_vm13 = vcmask 522244   ;;  %vm5363_vm14 = vmand %vm5361_vm11, %vm5362_vm12 }
  0x29   : > { %2936 = vmatprep.mubr.bf16.mxu0 %v6921_v2  ;;  %3079 = vmatpush1.bf16.msra.mxu0 %v6593_v22  ;;  %v7213_v60 = vsel %vm730_vm3, %v738_v15, %v7061_v49  ;;  %v2829_v22 = vshrl.u32 %v7143_v31, 16  ;;  %v537_v49 = vld [vmem:[%s6994_s16 + $0x24] sm:$0xf]  ;;  %v3016_v61 = vsel %vm553_vm2, %v3014_v55, %v3015_v26  ;;  %v7319_v15 = vld [vmem:[%s6994_s16 + $0x28] sm:$0xff]   ;;  %v6637_v55 = vld [vmem:[%s8584_s1 + $0xd4] ss:$8 sps:$4 sm:$0xff]  }
  0x2a   : > { %3080 = vmatprep.subr.bf16.mxu0 %v6602_v32  ;;  %618 = vmatprep.subr.bf16.mxu1 %v6605_v39  ;;  %v749_v42 = vor.u32 %v748_v17, %v747_v16  ;;  %v7232_v30 = vcombine.low %v7110_v10, %v537_v49  ;;  %v6603_v32 = vld [vmem:[%s8584_s1 + $0x80] ss:$8 sps:$4 sm:$0xff]   ;;  %v3245_v16 = vshrl.u32 %v7304_v7, 16  ;;  %vm5365_vm15 = vmand %vm5364_vm13, %vm730_vm3 }
  0x2b   : > { %5455 = vmatmul.mubr.msk.bf16.gmra.mrb[8].mxu1 %vm304_vm0, %v252_v28  ;;  %v2831_v27 = vor.u32 %v2829_v22, %v2827_v5  ;;  %v2834_v28 = vrot.slane %v2832_v23, 1  ;;  %v6632_v22 = vld [vmem:[%s8584_s1 + $0x3e0] ss:$8 sps:$4 sm:$0xff]   ;;  %v6640_v23 = vld [vmem:[%s8584_s1 + $0x3f4] ss:$8 sps:$4 sm:$0xff]  }
  0x2c   : > { %382 = vmatprep.mubr.bf16.mxu1 %v6921_v2  ;;  %v7223_v25 = vsel %vm730_vm3, %v745_v18, %v749_v42  ;;  %v561_v35 = vrot.slane %v7232_v30, 1  ;;  %v752_v45 = vshrl.u32 %v7232_v30, 16  ;;  %v3241_v18 = vshll.u32 %v7304_v7, 16 }
  0x2d   : > { %3081 = vmatpush1.bf16.msra.mxu0 %v6600_v37  ;;  %v2835_v29 = vsel %vm224_vm1, %v2831_v27, %v2834_v28  ;;  %v6610_v37 = vld [vmem:[%s8584_s1 + $0x90] ss:$8 sps:$4 sm:$0xff]   ;;  %v2838_v39 = vor.u32 %v2836_v33, %v2834_v28 }
  0x2e   : > { %3082 = vmatprep.subr.bf16.mxu0 %v6609_v47  ;;  %v7252_v10 = vsel %vm553_vm2, %v559_v43, %v561_v35  ;;  %v755_v43 = vshll.u32 %v7232_v30, 16  ;;  %v754_v47 = vrot.slane %v752_v45, 1  ;;  %v3628_v27 = vrot.slane %v3241_v18, 2  ;;  %v6638_v33 = vld [vmem:[%s8584_s1 + $0x3f0] ss:$8 sps:$4 sm:$0xff]  }
  0x2f   : > { %v3422_v30 = vld [vmem:[%s6994_s16 + $0x10] sm:$0xe] }
  0x30   : > { %5751 = vmatmul.mubr.msk.bf16.gmra.mrb[4].mxu0 %vm304_vm0, %v2821_v56  ;;  %v757_v56 = vrot.slane %v755_v43, 2  ;;  %v3181_v43 = vld [vmem:[%s6994_s16 + $0x10] sm:$0xf] }
  0x31   : > { %2946 = vmatprep.mubr.bf16.mxu0 %v6921_v2  ;;  %3083 = vmatpush1.bf16.msra.mxu0 %v6607_v58  ;;  %v7280_v58 = vld [vmem:[%s6994_s16 + $0x18] sm:$0xff]  }
  0x32   : > { %3084 = vmatprep.subr.bf16.mxu0 %v6615_v59  ;;  %v7282_v59 = vor.u32 %v757_v56, %v754_v47  ;;  %v3237_v62 = vshrl.u32 %v7280_v58, 16  ;;  %v3233_v5 = vshll.u32 %v7280_v58, 16  ;;  %v6628_v47 = vld [vmem:[%s8584_s1 + $0xc0] ss:$8 sps:$4 sm:$0xff]   ;;  %v6645_v56 = vld [vmem:[%s8584_s1 + $0xe4] ss:$8 sps:$4 sm:$0xff]  }
  0x33   : > { %5456 = vmatmul.mubr.msk.bf16.gmra.mrb[12].mxu1 %vm304_vm0, %v260_v63 }
  0x34   : > { %392 = vmatprep.mubr.bf16.mxu1 %v6921_v2  ;;  %v7294_v63 = vsel %vm730_vm3, %v749_v42, %v7282_v59  ;;  %v3623_v6 = vrot.slane %v3237_v62, 1  ;;  %v3624_v12 = vrot.slane %v3233_v5, 2  ;;  %v3253_v42 = vshrl.u32 %v7319_v15, 16 }
  0x35   : > { %3085 = vmatpush1.bf16.msra.mxu0 %v6613_v1  ;;  %v3017_v1 = vrot.slane %v7099_v4, 1 }
  0x36   : > { %3319 = vmatprep.subr.bf16.mxu0 %v6621_v14  ;;  %v6634_v14 = vld [vmem:[%s8584_s1 + $0x3e4] ss:$8 sps:$4 sm:$0xff]   ;;  %v7323_v17 = vor.u32 %v3624_v12, %v3623_v6  ;;  %v3631_v28 = vrot.slane %v3253_v42, 1  ;;  %v6651_v6 = vld [vmem:[%s8584_s1 + $0xf0] ss:$8 sps:$4 sm:$0xff]  }
  0x37   : > { %v6655_v12 = vld [vmem:[%s8584_s1 + $0x410] ss:$8 sps:$4 sm:$0xff]  }
  0x38   : > { %5752 = vmatmul.mubr.msk.bf16.gmra.mrb[8].mxu0 %vm304_vm0, %v2828_v21  ;;  %v3018_v21 = vsel %vm553_vm2, %v3015_v26, %v3017_v1  ;;  %v6635_v26 = vld [vmem:[%s8584_s1 + $0xd0] ss:$8 sps:$4 sm:$0xff]  }
  0x39   : > { %2956 = vmatprep.mubr.bf16.mxu0 %v6921_v2 }
  0x3b   : > { %5457 = vmatmul.mubr.msk.bf16.gmra.mrb[16].mxu1 %vm304_vm0, %v263_v9  ;;  %v3249_v9 = vshll.u32 %v7319_v15, 16 }
  0x3c   : > { %485 = vmatprep.mubr.bf16.mxu1 %v6921_v2 }
  0x3d   : > { %v3632_v49 = vrot.slane %v3249_v9, 2 }
  0x40   : > { %5753 = vmatmul.mubr.msk.bf16.gmra.mrb[12].mxu0 %vm304_vm0, %v2835_v29 }
  0x41   : > { %2966 = vmatprep.mubr.bf16.mxu0 %v6921_v2 }
  0x43   : > { %5466 = vmatmul.mubr.msk.bf16.vlgmr.msra.gmra.mrb[0].mxu1 %vm304_vm0, %v7013_v19  ;;  %v6618_v19 = vld [vmem:[%s8584_s1 + $0xa4] ss:$8 sps:$4 sm:$0xff]  }
  0x44   : > { %619 = vmatpush1.bf16.msra.mxu1 %v6603_v32  ;;  %495 = vmatprep.mubr.bf16.mxu1 %v6921_v2  ;;  %v3019_v32 = vrot.slane %v7143_v31, 1 }
  0x45   : > { %620 = vmatprep.subr.bf16.mxu1 %v6612_v34  ;;  %v2998_v34 = vld [vmem:[%s6994_s16 + $0x30] sm:$0xf] }
  0x46   : > { %v5764_v44 = vcombine.low %v7172_v50, %v2998_v34 }
  0x48   : > { %621 = vmatpush1.bf16.msra.mxu1 %v6610_v37  ;;  %5754 = vmatmul.mubr.msk.bf16.gmra.mrb[16].mxu0 %vm304_vm0, %v2838_v39  ;;  %v7359_v39 = vor.u32 %v3632_v49, %v3631_v28  ;;  %v3021_v45 = vrot.slane %v5764_v44, 1  ;;  %v6674_v44 = vld [vmem:[%s8584_s1 + $0x124] ss:$8 sps:$4 sm:$0xff]  }
  0x49   : > { %622 = vmatprep.subr.bf16.mxu1 %v6618_v19  ;;  %3110 = vmatprep.mubr.bf16.mxu0 %v6921_v2 }
  0x4a   : > { %v3022_v50 = vsel %vm553_vm2, %v3019_v32, %v3021_v45 }
  0x4b   : > { %5467 = vmatmul.mubr.msk.bf16.gmra.mrb[4].mxu1 %vm304_vm0, %v7016_v20  ;;  %v6619_v20 = vld [vmem:[%s8584_s1 + $0x3c0] ss:$8 sps:$4 sm:$0xff]  }
  0x4c   : > { %505 = vmatprep.mubr.bf16.mxu1 %v6921_v2  ;;  %623 = vmatpush1.bf16.msra.mxu1 %v6616_v46  ;;  %v7374_v46 = vld [vmem:[%s6994_s16 + $0x14] sm:$0xf] }
  0x4d   : > { %624 = vmatprep.subr.bf16.mxu1 %v6624_v51  ;;  %v5786_v51 = vcombine.low %v3181_v43, %v7374_v46  ;;  %v7493_v43 = vcombine.low %v3422_v30, %v7374_v46  ;;  %v6678_v46 = vld [vmem:[%s8584_s1 + $0x130] ss:$8 sps:$4 sm:$0xff]  }
  0x50   : > { %625 = vmatpush1.bf16.msra.mxu1 %v6622_v57  ;;  %5773 = vmatmul.mubr.msk.bf16.vlgmr.msra.gmra.mrb[0].mxu0 %vm304_vm0, %v3016_v61  ;;  %v3226_v57 = vshrl.u32 %v5786_v51, 16  ;;  %v6643_v61 = vld [vmem:[%s8584_s1 + $0xe0] ss:$8 sps:$4 sm:$0xff]  }
  0x51   : > { %815 = vmatprep.subr.bf16.mxu1 %v6630_v53  ;;  %3120 = vmatprep.mubr.bf16.mxu0 %v6921_v2 }
  0x52   : > { %3320 = vmatpush1.bf16.msra.mxu0 %v6619_v20 }
  0x53   : > { %5468 = vmatmul.mubr.msk.bf16.gmra.mrb[8].mxu1 %vm304_vm0, %v7047_v38  ;;  %3321 = vmatprep.subr.bf16.mxu0 %v6627_v0  ;;  %v3627_v38 = vrot.slane %v3245_v16, 1  ;;  %v3235_v0 = vrot.slane %v3233_v5, 1 }
  0x54   : > { %515 = vmatprep.mubr.bf16.mxu1 %v6921_v2 }
  0x55   : > { %v3629_v29 = vor.u32 %v3628_v27, %v3627_v38  ;;  %v3243_v38 = vrot.slane %v3241_v18, 1  ;;  %v6668_v27 = vld [vmem:[%s8584_s1 + $0x430] ss:$8 sps:$4 sm:$0xff]  }
  0x56   : > { %3322 = vmatpush1.bf16.msra.mxu0 %v6625_v11  ;;  %v6648_v11 = vld [vmem:[%s8584_s1 + $0x400] ss:$8 sps:$4 sm:$0xff]  }
  0x57   : > { %3323 = vmatprep.subr.bf16.mxu0 %v6634_v14  ;;  %v7357_v37 = vsel %vm730_vm3, %v7323_v17, %v3629_v29  ;;  %v7364_v19 = vsel %vm730_vm3, %v3629_v29, %v7359_v39  ;;  %v3239_v14 = vor.u32 %v3237_v62, %v3235_v0  ;;  %v3190_v62 = vld [vmem:[%s6994_s16 + $0x34] sm:$0x7]  ;;  %v3247_v28 = vor.u32 %v3245_v16, %v3243_v38 }
  0x58   : > { %5774 = vmatmul.mubr.msk.bf16.gmra.mrb[4].mxu0 %vm304_vm0, %v3018_v21  ;;  %v6664_v21 = vld [vmem:[%s8584_s1 + $0x424] ss:$8 sps:$4 sm:$0xff]   ;;  %v3251_v29 = vrot.slane %v3249_v9, 1  ;;  %v6658_v9 = vld [vmem:[%s8584_s1 + $0x100] ss:$8 sps:$4 sm:$0xff]  }
  0x59   : > { %3130 = vmatprep.mubr.bf16.mxu0 %v6921_v2  ;;  %v3244_v18 = vsel %vm224_vm1, %v3239_v14, %v3243_v38  ;;  %v922_v38 = vld [vmem:[%s6994_s16 + $0x10] sm:$0xf] }
  0x5a   : > { %3324 = vmatpush1.bf16.msra.mxu0 %v6632_v22  ;;  %v6662_v22 = vld [vmem:[%s8584_s1 + $0x420] ss:$8 sps:$4 sm:$0xff]  }
  0x5b   : > { %5469 = vmatmul.mubr.msk.bf16.gmra.mrb[12].mxu1 %vm304_vm0, %v7097_v3  ;;  %3325 = vmatprep.subr.bf16.mxu0 %v6640_v23  ;;  %v3020_v3 = vsel %vm553_vm2, %v3017_v1, %v3019_v32  ;;  %v6660_v1 = vld [vmem:[%s8584_s1 + $0x104] ss:$8 sps:$4 sm:$0xff]   ;;  %v7441_v23 = vld [vmem:[%s6994_s16 + $0x30] sm:$0xf] }
  0x5c   : > { %525 = vmatprep.mubr.bf16.mxu1 %v6921_v2  ;;  %v5790_v49 = vcombine.low %v7441_v23, %v3190_v62  ;;  %v6677_v32 = vld [vmem:[%s8584_s1 + $0x444] ss:$8 sps:$4 sm:$0xff]   ;;  %v6687_v62 = vld [vmem:[%s8584_s1 + $0x140] ss:$8 sps:$4 sm:$0xff]  }
  0x5e   : > { %3326 = vmatpush1.bf16.msra.mxu0 %v6638_v33  ;;  %v3252_v33 = vsel %vm224_vm1, %v3247_v28, %v3251_v29  ;;  %v3257_v34 = vshll.u32 %v5790_v49, 16 }
  0x5f   : > { %3503 = vmatprep.subr.bf16.mxu0 %v6650_v36 }
  0x60   : > { %5775 = vmatmul.mubr.msk.bf16.gmra.mrb[8].mxu0 %vm304_vm0, %v3020_v3  ;;  %v3259_v16 = vrot.slane %v3257_v34, 1  ;;  %v6667_v3 = vld [vmem:[%s8584_s1 + $0x114] ss:$8 sps:$4 sm:$0xff]  }
  0x61   : > { %3140 = vmatprep.mubr.bf16.mxu0 %v6921_v2 }
  0x63   : > { %5470 = vmatmul.mubr.msk.bf16.gmra.mrb[16].mxu1 %vm304_vm0, %v7118_v13  ;;  %v3228_v13 = vshll.u32 %v5786_v51, 16  ;;  %v3440_v51 = vrot.slane %v7280_v58, 1  ;;  %v6675_v58 = vld [vmem:[%s8584_s1 + $0x440] ss:$8 sps:$4 sm:$0xff]  }
  0x64   : > { %650 = vmatprep.mubr.bf16.mxu1 %v6921_v2 }
  0x65   : > { %v3230_v53 = vrot.slane %v3228_v13, 1 }
  0x67   : > { %v3231_v20 = vor.u32 %v3230_v53, %v3226_v57  ;;  %v6693_v57 = vld [vmem:[%s8584_s1 + $0x464] ss:$8 sps:$4 sm:$0xff]  }
  0x68   : > { %5776 = vmatmul.mubr.msk.bf16.gmra.mrb[12].mxu0 %vm304_vm0, %v3022_v50  ;;  %v3439_v50 = vrot.slane %v7493_v43, 1 }
  0x69   : > { %3150 = vmatprep.mubr.bf16.mxu0 %v6921_v2  ;;  %v3236_v5 = vsel %vm224_vm1, %v3231_v20, %v3235_v0  ;;  %v3423_v20 = vld [vmem:[%s6994_s16 + $0x34] sm:$0xf]  ;;  %v6712_v0 = vld [vmem:[%s8584_s1 + $0x484] ss:$8 sps:$4 sm:$0xff]  }
  0x6a   : > { %v3441_v13 = vsel %vm553_vm2, %v3439_v50, %v3440_v51  ;;  %v6719_v50 = vld [vmem:[%s8584_s1 + $0x494] ss:$8 sps:$4 sm:$0xff]  }
  0x6b   : > { %5489 = vmatmul.mubr.msk.bf16.vlgmr.msra.gmra.mrb[0].mxu1 %vm304_vm0, %v7160_v40  ;;  %v6653_v40 = vld [vmem:[%s8584_s1 + $0xf4] ss:$8 sps:$4 sm:$0xff]  }
  0x6c   : > { %816 = vmatpush1.bf16.msra.mxu1 %v6628_v47  ;;  %660 = vmatprep.mubr.bf16.mxu1 %v6921_v2  ;;  %v6680_v47 = vld [vmem:[%s8584_s1 + $0x134] ss:$8 sps:$4 sm:$0xff]  }
  0x6d   : > { %817 = vmatprep.subr.bf16.mxu1 %v6637_v55  ;;  %v6689_v55 = vld [vmem:[%s8584_s1 + $0x144] ss:$8 sps:$4 sm:$0xff]  }
  0x70   : > { %818 = vmatpush1.bf16.msra.mxu1 %v6635_v26  ;;  %5777 = vmatmul.mubr.msk.bf16.gmra.mrb[16].mxu0 %vm304_vm0, %v3021_v45  ;;  %v3442_v26 = vrot.slane %v7304_v7, 1  ;;  %v6691_v7 = vld [vmem:[%s8584_s1 + $0x460] ss:$8 sps:$4 sm:$0xff]  }
  0x71   : > { %819 = vmatprep.subr.bf16.mxu1 %v6645_v56  ;;  %3351 = vmatprep.mubr.bf16.mxu0 %v6921_v2  ;;  %v6681_v56 = vld [vmem:[%s8584_s1 + $0x450] ss:$8 sps:$4 sm:$0xff]  }
  0x72   : > { %v3443_v53 = vsel %vm553_vm2, %v3440_v51, %v3442_v26 }
  0x73   : > { %5490 = vmatmul.mubr.msk.bf16.gmra.mrb[4].mxu1 %vm304_vm0, %v7163_v41  ;;  %v6657_v41 = vld [vmem:[%s8584_s1 + $0x414] ss:$8 sps:$4 sm:$0xff]  }
  0x74   : > { %670 = vmatprep.mubr.bf16.mxu1 %v6921_v2  ;;  %820 = vmatpush1.bf16.msra.mxu1 %v6643_v61  ;;  %v3444_v61 = vrot.slane %v7319_v15, 1  ;;  %v7557_v15 = vld [vmem:[%s6994_s16 + $0xc] sm:$0xf] }
  0x75   : > { %821 = vmatprep.subr.bf16.mxu1 %v6653_v40  ;;  %v6699_v40 = vld [vmem:[%s8584_s1 + $0x470] ss:$8 sps:$4 sm:$0xff]  }
  0x78   : > { %822 = vmatpush1.bf16.msra.mxu1 %v6651_v6  ;;  %5799 = vmatmul.mubr.msk.bf16.vlgmr.msra.gmra.mrb[0].mxu0 %vm304_vm0, %v3236_v5  ;;  %v7554_v6 = vld [vmem:[%s6994_s16 + $0x8] sm:$0xf] }
  0x79   : > { %1033 = vmatprep.subr.bf16.mxu1 %v6660_v1  ;;  %3361 = vmatprep.mubr.bf16.mxu0 %v6921_v2  ;;  %v3445_v1 = vsel %vm553_vm2, %v3442_v26, %v3444_v61  ;;  %v5524_v5 = vcombine.low %v7554_v6, %v7557_v15  ;;  %v5551_v26 = vcombine.low %v7557_v15, %v922_v38 }
  0x7a   : > { %3504 = vmatpush1.bf16.msra.mxu0 %v6648_v11  ;;  %v7561_v11 = vcombine.low %v7441_v23, %v3423_v20 }
  0x7b   : > { %5491 = vmatmul.mubr.msk.bf16.gmra.mrb[8].mxu1 %vm304_vm0, %v7178_v54  ;;  %3505 = vmatprep.subr.bf16.mxu0 %v6657_v41  ;;  %v6670_v54 = vld [vmem:[%s8584_s1 + $0x434] ss:$8 sps:$4 sm:$0xff]   ;;  %v968_v14 = vrot.slane %v5524_v5, 2  ;;  %v1165_v20 = vshrl.u32 %v5551_v26, 16 }
  0x7c   : > { %680 = vmatprep.mubr.bf16.mxu1 %v6921_v2  ;;  %v3446_v41 = vrot.slane %v7561_v11, 1 }
  0x7d   : > { %v1167_v5 = vrot.slane %v1165_v20, 1 }
  0x7e   : > { %3506 = vmatpush1.bf16.msra.mxu0 %v6655_v12 }
  0x7f   : > { %3507 = vmatprep.subr.bf16.mxu0 %v6664_v21  ;;  %v7574_v21 = vld [vmem:[%s6994_s16 + $0x14] sm:$0xf] }
  0x80   : > { %5800 = vmatmul.mubr.msk.bf16.gmra.mrb[4].mxu0 %vm304_vm0, %v3244_v18  ;;  %v6698_v18 = vld [vmem:[%s8584_s1 + $0x154] ss:$8 sps:$4 sm:$0xff]  }
  0x81   : > { %3371 = vmatprep.mubr.bf16.mxu0 %v6921_v2 }
  0x82   : > { %3508 = vmatpush1.bf16.msra.mxu0 %v6662_v22  ;;  %v3447_v22 = vsel %vm553_vm2, %v3444_v61, %v3446_v41  ;;  %v3639_v61 = vshll.u32 %v7561_v11, 16 }
  0x83   : > { %5492 = vmatmul.mubr.msk.bf16.gmra.mrb[12].mxu1 %vm304_vm0, %v7252_v10  ;;  %3509 = vmatprep.subr.bf16.mxu0 %v6670_v54  ;;  %v3255_v10 = vor.u32 %v3253_v42, %v3251_v29  ;;  %v3261_v42 = vshrl.u32 %v5790_v49, 16  ;;  %v3616_v54 = vshrl.u32 %v7493_v43, 16  ;;  %v6696_v29 = vld [vmem:[%s8584_s1 + $0x150] ss:$8 sps:$4 sm:$0xff]  }
  0x84   : > { %690 = vmatprep.mubr.bf16.mxu1 %v6921_v2  ;;  %v7595_v49 = vld [vmem:[%s6994_s16 + $0x18] sm:$0xf] }
  0x85   : > { %v3260_v36 = vsel %vm224_vm1, %v3255_v10, %v3259_v16  ;;  %v3263_v45 = vor.u32 %v3261_v42, %v3259_v16  ;;  %v3618_v34 = vrot.slane %v3616_v54, 1 }
  0x86   : > { %3510 = vmatpush1.bf16.msra.mxu0 %v6668_v27  ;;  %v3619_v27 = vshll.u32 %v7493_v43, 16  ;;  %v6722_v43 = vld [vmem:[%s8584_s1 + $0x184] ss:$8 sps:$4 sm:$0xff]  }
  0x87   : > { %3699 = vmatprep.subr.bf16.mxu0 %v6677_v32  ;;  %v7598_v32 = vld [vmem:[%s6994_s16 + $0x1c] sm:$0xf] }
  0x88   : > { %5801 = vmatmul.mubr.msk.bf16.gmra.mrb[8].mxu0 %vm304_vm0, %v3252_v33  ;;  %v6706_v33 = vld [vmem:[%s8584_s1 + $0x164] ss:$8 sps:$4 sm:$0xff]   ;;  %v3621_v10 = vrot.slane %v3619_v27, 2 }
  0x89   : > { %3381 = vmatprep.mubr.bf16.mxu0 %v6921_v2 }
  0x8a   : > { %v3622_v42 = vor.u32 %v3621_v10, %v3618_v34 }
  0x8b   : > { %5493 = vmatmul.mubr.msk.bf16.gmra.mrb[16].mxu1 %vm304_vm0, %v561_v35  ;;  %v6665_v35 = vld [vmem:[%s8584_s1 + $0x110] ss:$8 sps:$4 sm:$0xff]  }
  0x8c   : > { %847 = vmatprep.mubr.bf16.mxu1 %v6921_v2 }
  0x90   : > { %5802 = vmatmul.mubr.msk.bf16.gmra.mrb[12].mxu0 %vm304_vm0, %v3260_v36  ;;  %v6704_v36 = vld [vmem:[%s8584_s1 + $0x160] ss:$8 sps:$4 sm:$0xff]  }
  0x91   : > { %3391 = vmatprep.mubr.bf16.mxu0 %v6921_v2 }
  0x93   : > { %5510 = vmatmul.mubr.msk.bf16.vlgmr.msra.gmra.mrb[0].mxu1 %vm304_vm0, %v7213_v60  ;;  %v6672_v60 = vld [vmem:[%s8584_s1 + $0x120] ss:$8 sps:$4 sm:$0xff]  }
  0x94   : > { %1034 = vmatpush1.bf16.msra.mxu1 %v6658_v9  ;;  %857 = vmatprep.mubr.bf16.mxu1 %v6921_v2  ;;  %v5526_v9 = vcombine.low %v7595_v49, %v7598_v32 }
  0x95   : > { %1035 = vmatprep.subr.bf16.mxu1 %v6667_v3  ;;  %v6715_v3 = vld [vmem:[%s8584_s1 + $0x174] ss:$8 sps:$4 sm:$0xff]  }
  0x96   : > { %v972_v30 = vrot.slane %v5526_v9, 2  ;;  %v6736_v9 = vld [vmem:[%s8584_s1 + $0x1a4] ss:$8 sps:$4 sm:$0xff]  }
  0x98   : > { %1036 = vmatpush1.bf16.msra.mxu1 %v6665_v35  ;;  %5803 = vmatmul.mubr.msk.bf16.gmra.mrb[16].mxu0 %vm304_vm0, %v3263_v45  ;;  %v6713_v35 = vld [vmem:[%s8584_s1 + $0x170] ss:$8 sps:$4 sm:$0xff]   ;;  %v7623_v45 = vld [vmem:[%s6994_s16 + $0x24] sm:$0xf] }
  0x99   : > { %1037 = vmatprep.subr.bf16.mxu1 %v6674_v44  ;;  %3535 = vmatprep.mubr.bf16.mxu0 %v6921_v2  ;;  %v7620_v44 = vld [vmem:[%s6994_s16 + $0x20] sm:$0xf] }
  0x9a   : > { %v5553_v27 = vcombine.low %v7598_v32, %v7620_v44 }
  0x9b   : > { %5511 = vmatmul.mubr.msk.bf16.gmra.mrb[4].mxu1 %vm304_vm0, %v7220_v24  ;;  %v6683_v24 = vld [vmem:[%s8584_s1 + $0x454] ss:$8 sps:$4 sm:$0xff]  }
  0x9c   : > { %867 = vmatprep.mubr.bf16.mxu1 %v6921_v2  ;;  %1038 = vmatpush1.bf16.msra.mxu1 %v6672_v60  ;;  %v3626_v60 = vsel %vm730_vm3, %v3622_v42, %v7323_v17  ;;  %v6717_v17 = vld [vmem:[%s8584_s1 + $0x490] ss:$8 sps:$4 sm:$0xff]   ;;  %v1183_v34 = vshrl.u32 %v5553_v27, 16  ;;  %v1186_v10 = vshll.u32 %v5553_v27, 16  ;;  %v6750_v27 = vld [vmem:[%s8584_s1 + $0x1c0] ss:$8 sps:$4 sm:$0xff]  }
  0x9d   : > { %1039 = vmatprep.subr.bf16.mxu1 %v6680_v47  ;;  %v6710_v47 = vld [vmem:[%s8584_s1 + $0x480] ss:$8 sps:$4 sm:$0xff]  }
  0xa0   : > { %1040 = vmatpush1.bf16.msra.mxu1 %v6678_v46  ;;  %5822 = vmatmul.mubr.msk.bf16.vlgmr.msra.gmra.mrb[0].mxu0 %vm304_vm0, %v3441_v13  ;;  %v5527_v46 = vcombine.low %v7620_v44, %v7623_v45  ;;  %v1188_v44 = vrot.slane %v1186_v10, 2  ;;  %v6759_v10 = vld [vmem:[%s8584_s1 + $0x1d0] ss:$8 sps:$4 sm:$0xff]  }
  0xa1   : > { %1255 = vmatprep.subr.bf16.mxu1 %v6689_v55  ;;  %3545 = vmatprep.mubr.bf16.mxu0 %v6921_v2  ;;  %v6725_v55 = vld [vmem:[%s8584_s1 + $0x4a4] ss:$8 sps:$4 sm:$0xff]  }
  0xa2   : > { %3700 = vmatpush1.bf16.msra.mxu0 %v6675_v58  ;;  %v974_v13 = vrot.slane %v5527_v46, 2  ;;  %v1136_v58 = vld [vmem:[%s6994_s16 + $0x4] sm:$0xe] }
  0xa3   : > { %5512 = vmatmul.mubr.msk.bf16.gmra.mrb[8].mxu1 %vm304_vm0, %v7223_v25  ;;  %3701 = vmatprep.subr.bf16.mxu0 %v6683_v24  ;;  %v6701_v25 = vld [vmem:[%s8584_s1 + $0x474] ss:$8 sps:$4 sm:$0xff]   ;;  %v6723_v24 = vld [vmem:[%s8584_s1 + $0x4a0] ss:$8 sps:$4 sm:$0xff]  }
  0xa4   : > { %877 = vmatprep.mubr.bf16.mxu1 %v6921_v2 }
  0xa6   : > { %3702 = vmatpush1.bf16.msra.mxu0 %v6681_v56  ;;  %v6731_v56 = vld [vmem:[%s8584_s1 + $0x4b4] ss:$8 sps:$4 sm:$0xff]  }
  0xa7   : > { %3703 = vmatprep.subr.bf16.mxu0 %v6693_v57  ;;  %v5550_v57 = vcombine.low %v1136_v58, %v7554_v6  ;;  %v7731_v58 = vld [vmem:[%s6994_s16 + $0x20] sm:$0xff]  }
  0xa8   : > { %5823 = vmatmul.mubr.msk.bf16.gmra.mrb[4].mxu0 %vm304_vm0, %v3443_v53  ;;  %v975_v53 = vsel %vm966_vm4, %v972_v30, %v974_v13 }
  0xa9   : > { %3555 = vmatprep.mubr.bf16.mxu0 %v6921_v2  ;;  %v1157_v15 = vshrl.u32 %v5550_v57, 16 }
  0xaa   : > { %3704 = vmatpush1.bf16.msra.mxu0 %v6691_v7  ;;  %v6716_v7 = vld [vmem:[%s6994_s16 + $0x28] ss:$0 sps:$4 sm:$0x11]  }
  0xab   : > { %5513 = vmatmul.mubr.msk.bf16.gmra.mrb[12].mxu1 %vm304_vm0, %v7294_v63  ;;  %3705 = vmatprep.subr.bf16.mxu0 %v6701_v25  ;;  %v6684_v63 = vld [vmem:[%s6994_s16] sm:$0xfc]   ;;  %v3636_v25 = vshrl.u32 %v7561_v11, 16  ;;  %v976_v6 = vrot.slane %v6716_v7, 2  ;;  %v3853_v7 = vrot.slane %v7731_v58, 2 }
  0xac   : > { %887 = vmatprep.mubr.bf16.mxu1 %v6921_v2  ;;  %v967_v12 = vrot.slane %v6684_v63, 2  ;;  %v3641_v63 = vrot.slane %v3639_v61, 2  ;;  %v6756_v61 = vld [vmem:[%s8584_s1 + $0x4e4] ss:$8 sps:$4 sm:$0xff]  }
  0xad   : > { %v3638_v11 = vrot.slane %v3636_v25, 1  ;;  %v6745_v25 = vld [vmem:[%s8584_s1 + $0x4d0] ss:$8 sps:$4 sm:$0xff]  }
  0xae   : > { %3706 = vmatpush1.bf16.msra.mxu0 %v6699_v40  ;;  %v969_v23 = vsel %vm966_vm4, %v967_v12, %v968_v14  ;;  %v6729_v40 = vld [vmem:[%s8584_s1 + $0x4b0] ss:$8 sps:$4 sm:$0xff]   ;;  %v5552_v12 = vcombine.low %v7574_v21, %v7595_v49 }
  0xaf   : > { %3916 = vmatprep.subr.bf16.mxu0 %v6712_v0  ;;  %v1168_v0 = vshll.u32 %v5551_v26, 16  ;;  %v6747_v26 = vld [vmem:[%s8584_s1 + $0x4d4] ss:$8 sps:$4 sm:$0xff]  }
  0xb0   : > { %5824 = vmatmul.mubr.msk.bf16.gmra.mrb[8].mxu0 %vm304_vm0, %v3445_v1  ;;  %v1160_v1 = vshll.u32 %v5550_v57, 16  ;;  %v1177_v54 = vshll.u32 %v5552_v12, 16 }
  0xb1   : > { %3565 = vmatprep.mubr.bf16.mxu0 %v6921_v2 }
  0xb2   : > { %v1179_v49 = vrot.slane %v1177_v54, 2 }
  0xb3   : > { %5514 = vmatmul.mubr.msk.bf16.gmra.mrb[16].mxu1 %vm304_vm0, %v7282_v59  ;;  %v5525_v59 = vcombine.low %v922_v38, %v7574_v21  ;;  %v1159_v38 = vrot.slane %v1157_v15, 1 }
  0xb4   : > { %1065 = vmatprep.mubr.bf16.mxu1 %v6921_v2 }
  0xb5   : > { %v970_v28 = vrot.slane %v5525_v59, 2 }
  0xb7   : > { %v971_v16 = vsel %vm966_vm4, %v968_v14, %v970_v28  ;;  %v973_v51 = vsel %vm966_vm4, %v970_v28, %v972_v30  ;;  %v977_v14 = vsel %vm966_vm4, %v974_v13, %v976_v6  ;;  %v6720_v28 = vld [vmem:[%s8584_s1 + $0x180] ss:$8 sps:$4 sm:$0xff]   ;;  %v6764_v6 = vld [vmem:[%s8584_s1 + $0x4f4] ss:$8 sps:$4 sm:$0xff]  }
  0xb8   : > { %5825 = vmatmul.mubr.msk.bf16.gmra.mrb[12].mxu0 %vm304_vm0, %v3447_v22  ;;  %v1162_v22 = vrot.slane %v1160_v1, 2 }
  0xb9   : > { %3575 = vmatprep.mubr.bf16.mxu0 %v6921_v2 }
  0xbb   : > { %5537 = vmatmul.mubr.msk.bf16.vlgmr.msra.gmra.mrb[0].mxu1 %vm304_vm0, %v969_v23  ;;  %v3642_v23 = vor.u32 %v3641_v63, %v3638_v11  ;;  %v6762_v11 = vld [vmem:[%s8584_s1 + $0x4f0] ss:$8 sps:$4 sm:$0xff]   ;;  %v6772_v63 = vld [vmem:[%s8584_s1 + $0x504] ss:$8 sps:$4 sm:$0xff]  }
  0xbc   : > { %1256 = vmatpush1.bf16.msra.mxu1 %v6687_v62  ;;  %1075 = vmatprep.mubr.bf16.mxu1 %v6921_v2  ;;  %v1163_v62 = vor.u32 %v1162_v22, %v1159_v38  ;;  %v7785_v22 = vld [vmem:[%s6994_s16 + $0xc] sm:$0xff]  }
  0xbd   : > { %1257 = vmatprep.subr.bf16.mxu1 %v6698_v18  ;;  %v1174_v18 = vshrl.u32 %v5552_v12, 16  ;;  %v3643_v21 = vsel %vm730_vm3, %v7359_v39, %v3642_v23  ;;  %v6728_v39 = vld [vmem:[%s8584_s1 + $0x194] ss:$8 sps:$4 sm:$0xff]  }
  0xc0   : > { %1258 = vmatpush1.bf16.msra.mxu1 %v6696_v29  ;;  %5826 = vmatmul.mubr.msk.bf16.gmra.mrb[16].mxu0 %vm304_vm0, %v3446_v41  ;;  %v1170_v41 = vrot.slane %v1168_v0, 2  ;;  %v1176_v29 = vrot.slane %v1174_v18, 1  ;;  %v7753_v0 = vld [vmem:[%s6994_s16 + $0x28] sm:$0xff]   ;;  %v7795_v18 = vld [vmem:[%s6994_s16 + $0x38] ss:$0 sps:$4 sm:$0x11]  }
  0xc1   : > { %1259 = vmatprep.subr.bf16.mxu1 %v6706_v33  ;;  %3731 = vmatprep.mubr.bf16.mxu0 %v6921_v2  ;;  %v6726_v33 = vld [vmem:[%s8584_s1 + $0x190] ss:$8 sps:$4 sm:$0xff]   ;;  %v3855_v1 = vrot.slane %v7753_v0, 2 }
  0xc2   : > { %v1171_v59 = vor.u32 %v1170_v41, %v1167_v5  ;;  %v1180_v32 = vor.u32 %v1179_v49, %v1176_v29  ;;  %v1358_v5 = vld [vmem:[%s6994_s16 + $0x4] sm:$0xc]  ;;  %v7775_v41 = vld [vmem:[%s6994_s16 + $0x8] sm:$0xf]  ;;  %v6761_v29 = vld [vmem:[%s8584_s1 + $0x1d4] ss:$8 sps:$4 sm:$0xff]  }
  0xc3   : > { %5538 = vmatmul.mubr.msk.bf16.gmra.mrb[4].mxu1 %vm304_vm0, %v971_v16  ;;  %v1137_v16 = vld [vmem:[%s6994_s16 + $0x28] sm:$0xf]  ;;  %v3856_v12 = vsel %vm966_vm4, %v3853_v7, %v3855_v1  ;;  %v7782_v38 = vcombine.low %v1358_v5, %v7775_v41  ;;  %v6791_v5 = vld [vmem:[%s8584_s1 + $0x534] ss:$8 sps:$4 sm:$0xff]  }
  0xc4   : > { %1085 = vmatprep.mubr.bf16.mxu1 %v6921_v2  ;;  %1260 = vmatpush1.bf16.msra.mxu1 %v6704_v36  ;;  %v7704_v36 = vld [vmem:[%s6994_s16 + $0x10] sm:$0xfc]   ;;  %v5554_v42 = vcombine.low %v7623_v45, %v1137_v16  ;;  %v1181_v30 = vsel %vm730_vm3, %v1171_v59, %v1180_v32 }
  0xc5   : > { %1261 = vmatprep.subr.bf16.mxu1 %v6715_v3  ;;  %v7707_v3 = vld [vmem:[%s6994_s16 + $0x18] sm:$0xff]   ;;  %v3850_v45 = vrot.slane %v7704_v36, 2  ;;  %v4029_v49 = vshrl.u32 %v7704_v36, 16 }
  0xc6   : > { %v1195_v46 = vshll.u32 %v5554_v42, 16 }
  0xc8   : > { %1262 = vmatpush1.bf16.msra.mxu1 %v6713_v35  ;;  %5843 = vmatmul.mubr.msk.bf16.vlgmr.msra.gmra.mrb[0].mxu0 %vm304_vm0, %v3626_v60  ;;  %v1185_v35 = vrot.slane %v1183_v34, 1  ;;  %v6743_v60 = vld [vmem:[%s8584_s1 + $0x1b4] ss:$8 sps:$4 sm:$0xff]  }
  0xc9   : > { %1472 = vmatprep.subr.bf16.mxu1 %v6722_v43  ;;  %3741 = vmatprep.mubr.bf16.mxu0 %v6921_v2  ;;  %v6734_v43 = vld [vmem:[%s8584_s1 + $0x1a0] ss:$8 sps:$4 sm:$0xff]  }
  0xca   : > { %3917 = vmatpush1.bf16.msra.mxu0 %v6710_v47  ;;  %v3851_v47 = vrot.slane %v7707_v3, 2 }
  0xcb   : > { %5539 = vmatmul.mubr.msk.bf16.gmra.mrb[8].mxu1 %vm304_vm0, %v973_v51  ;;  %3918 = vmatprep.subr.bf16.mxu0 %v6719_v50  ;;  %v1189_v50 = vor.u32 %v1188_v44, %v1185_v35  ;;  %v1192_v51 = vshrl.u32 %v5554_v42, 16  ;;  %v7827_v44 = vld [vmem:[%s6994_s16 + $0x1c] sm:$0xff]  }
  0xcc   : > { %1095 = vmatprep.mubr.bf16.mxu1 %v6921_v2  ;;  %v3852_v13 = vsel %vm966_vm4, %v3850_v45, %v3851_v47  ;;  %v3854_v20 = vsel %vm966_vm4, %v3851_v47, %v3853_v7 }
  0xcd   : > { %v1194_v57 = vrot.slane %v1192_v51, 1  ;;  %v4049_v51 = vshll.u32 %v7731_v58, 16 }
  0xce   : > { %3919 = vmatpush1.bf16.msra.mxu0 %v6717_v17  ;;  %v6741_v17 = vld [vmem:[%s8584_s1 + $0x1b0] ss:$8 sps:$4 sm:$0xff]  }
  0xcf   : > { %3920 = vmatprep.subr.bf16.mxu0 %v6725_v55  ;;  %v6752_v55 = vld [vmem:[%s8584_s1 + $0x1c4] ss:$8 sps:$4 sm:$0xff]  }
  0xd0   : > { %5844 = vmatmul.mubr.msk.bf16.gmra.mrb[4].mxu0 %vm304_vm0, %v7357_v37  ;;  %v6740_v37 = vld [vmem:[%s8584_s1 + $0x4c4] ss:$8 sps:$4 sm:$0xff]  }
  0xd1   : > { %3751 = vmatprep.mubr.bf16.mxu0 %v6921_v2 }
  0xd2   : > { %3921 = vmatpush1.bf16.msra.mxu0 %v6723_v24  ;;  %v6738_v24 = vld [vmem:[%s8584_s1 + $0x4c0] ss:$8 sps:$4 sm:$0xff]  }
  0xd3   : > { %5540 = vmatmul.mubr.msk.bf16.gmra.mrb[12].mxu1 %vm304_vm0, %v975_v53  ;;  %3922 = vmatprep.subr.bf16.mxu0 %v6731_v56  ;;  %v1190_v56 = vsel %vm730_vm3, %v1180_v32, %v1189_v50  ;;  %v1197_v53 = vrot.slane %v1195_v46, 2  ;;  %v4037_v32 = vshrl.u32 %v7707_v3, 16  ;;  %v1411_v46 = vrot.slane %v7827_v44, 2 }
  0xd4   : > { %1105 = vmatprep.mubr.bf16.mxu1 %v6921_v2 }
  0xd5   : > { %v4039_v42 = vrot.slane %v4037_v32, 2  ;;  %v1597_v32 = vshll.u32 %v7785_v22, 16 }
  0xd6   : > { %3923 = vmatpush1.bf16.msra.mxu0 %v6729_v40  ;;  %v1198_v40 = vor.u32 %v1197_v53, %v1194_v57  ;;  %v7857_v53 = vld [vmem:[%s6994_s16 + $0x24] sm:$0xff]  }
  0xd7   : > { %4136 = vmatprep.subr.bf16.mxu0 %v6740_v37  ;;  %v6754_v37 = vld [vmem:[%s8584_s1 + $0x4e0] ss:$8 sps:$4 sm:$0xff]  }
  0xd8   : > { %5845 = vmatmul.mubr.msk.bf16.gmra.mrb[8].mxu0 %vm304_vm0, %v7364_v19  ;;  %v1172_v19 = vsel %vm730_vm3, %v1163_v62, %v1171_v59  ;;  %v1199_v15 = vsel %vm730_vm3, %v1189_v50, %v1198_v40  ;;  %v1406_v62 = vrot.slane %v7782_v38, 2  ;;  %v1407_v59 = vrot.slane %v7785_v22, 2 }
  0xd9   : > { %3761 = vmatprep.mubr.bf16.mxu0 %v6921_v2  ;;  %v4046_v50 = vshrl.u32 %v7731_v58, 16 }
  0xdb   : > { %5541 = vmatmul.mubr.msk.bf16.gmra.mrb[16].mxu1 %vm304_vm0, %v977_v14  ;;  %v7779_v14 = vld [vmem:[%s6994_s16 + $0x30] sm:$0xff]   ;;  %v4048_v58 = vrot.slane %v4046_v50, 2 }
  0xdc   : > { %1287 = vmatprep.mubr.bf16.mxu1 %v6921_v2 }
  0xe0   : > { %5846 = vmatmul.mubr.msk.bf16.gmra.mrb[12].mxu0 %vm304_vm0, %v3643_v21  ;;  %v1408_v21 = vsel %vm966_vm4, %v1406_v62, %v1407_v59 }
  0xe1   : > { %3771 = vmatprep.mubr.bf16.mxu0 %v6921_v2 }
  0xe3   : > { %5563 = vmatmul.mubr.msk.bf16.vlgmr.msra.gmra.mrb[0].mxu1 %vm304_vm0, %v1172_v19  ;;  %v7803_v19 = vld [vmem:[%s6994_s16 + $0x14] sm:$0xff]  }
  0xe4   : > { %1473 = vmatpush1.bf16.msra.mxu1 %v6720_v28  ;;  %1297 = vmatprep.mubr.bf16.mxu1 %v6921_v2  ;;  %v3859_v28 = vrot.slane %v7795_v18, 2  ;;  %v1409_v34 = vrot.slane %v7803_v19, 2 }
  0xe5   : > { %1474 = vmatprep.subr.bf16.mxu1 %v6728_v39  ;;  %v4032_v39 = vshll.u32 %v7704_v36, 16  ;;  %v4031_v36 = vrot.slane %v4029_v49, 2  ;;  %v1589_v49 = vshll.u32 %v7782_v38, 16 }
  0xe6   : > { %v1410_v35 = vsel %vm966_vm4, %v1407_v59, %v1409_v34  ;;  %v1412_v57 = vsel %vm966_vm4, %v1409_v34, %v1411_v46  ;;  %v2233_v34 = vrot.slane %v7059_v48, 3 }
  0xe8   : > { %1475 = vmatpush1.bf16.msra.mxu1 %v6726_v33  ;;  %5847 = vmatmul.mubr.msk.bf16.gmra.mrb[16].mxu0 %vm304_vm0, %v3642_v23  ;;  %v3857_v23 = vrot.slane %v7779_v14, 2  ;;  %v4040_v33 = vshll.u32 %v7707_v3, 16  ;;  %v4034_v3 = vrot.slane %v4032_v39, 3  ;;  %v6800_v39 = vld [vmem:[%s8584_s1 + $0x544] ss:$8 sps:$4 sm:$0xff]  }
  0xe9   : > { %1476 = vmatprep.subr.bf16.mxu1 %v6736_v9  ;;  %3948 = vmatprep.mubr.bf16.mxu0 %v6921_v2  ;;  %v6768_v9 = vld [vmem:[%s8584_s1 + $0x1e4] ss:$8 sps:$4 sm:$0xff]  }
  0xea   : > { %v3858_v54 = vsel %vm966_vm4, %v3855_v1, %v3857_v23  ;;  %v3860_v16 = vsel %vm966_vm4, %v3857_v23, %v3859_v28  ;;  %v4035_v45 = vor.u32 %v4034_v3, %v4031_v36  ;;  %v1591_v3 = vrot.slane %v1589_v49, 3 }
  0xeb   : > { %5564 = vmatmul.mubr.msk.bf16.gmra.mrb[4].mxu1 %vm304_vm0, %v1181_v30  ;;  %v4042_v30 = vrot.slane %v4040_v33, 3 }
  0xec   : > { %1307 = vmatprep.mubr.bf16.mxu1 %v6921_v2  ;;  %1477 = vmatpush1.bf16.msra.mxu1 %v6734_v43  ;;  %v6766_v43 = vld [vmem:[%s8584_s1 + $0x1e0] ss:$8 sps:$4 sm:$0xff]  }
  0xed   : > { %1478 = vmatprep.subr.bf16.mxu1 %v6743_v60  ;;  %v6775_v60 = vld [vmem:[%s8584_s1 + $0x1f4] ss:$8 sps:$4 sm:$0xff]   ;;  %v4043_v47 = vor.u32 %v4042_v30, %v4039_v42 }
  0xf0   : > { %1479 = vmatpush1.bf16.msra.mxu1 %v6741_v17  ;;  %5870 = vmatmul.mubr.msk.bf16.vlgmr.msra.gmra.mrb[0].mxu0 %vm304_vm0, %v3852_v13  ;;  %v6773_v17 = vld [vmem:[%s8584_s1 + $0x1f0] ss:$8 sps:$4 sm:$0xff]   ;;  %v4044_v13 = vsel %vm1584_vm5, %v4035_v45, %v4043_v47  ;;  %v4076_v45 = vshll.u32 %v7795_v18, 16 }
  0xf1   : > { %1693 = vmatprep.subr.bf16.mxu1 %v6752_v55  ;;  %3958 = vmatprep.mubr.bf16.mxu0 %v6921_v2  ;;  %v6782_v55 = vld [vmem:[%s8584_s1 + $0x204] ss:$8 sps:$4 sm:$0xff]  }
  0xf2   : > { %4137 = vmatpush1.bf16.msra.mxu0 %v6738_v24  ;;  %v4051_v24 = vrot.slane %v4049_v51, 3  ;;  %v1603_v51 = vshrl.u32 %v7803_v19, 16 }
  0xf3   : > { %5565 = vmatmul.mubr.msk.bf16.gmra.mrb[8].mxu1 %vm304_vm0, %v1190_v56  ;;  %4138 = vmatprep.subr.bf16.mxu0 %v6747_v26  ;;  %v6770_v26 = vld [vmem:[%s8584_s1 + $0x500] ss:$8 sps:$4 sm:$0xff]   ;;  %v6779_v56 = vld [vmem:[%s8584_s1 + $0x514] ss:$8 sps:$4 sm:$0xff]  }
  0xf4   : > { %1317 = vmatprep.mubr.bf16.mxu1 %v6921_v2  ;;  %v4052_v7 = vor.u32 %v4051_v24, %v4048_v58 }
  0xf6   : > { %4139 = vmatpush1.bf16.msra.mxu0 %v6745_v25  ;;  %v4055_v25 = vshrl.u32 %v7753_v0, 16 }
  0xf7   : > { %4140 = vmatprep.subr.bf16.mxu0 %v6756_v61  ;;  %v4058_v61 = vshll.u32 %v7753_v0, 16 }
  0xf8   : > { %5871 = vmatmul.mubr.msk.bf16.gmra.mrb[4].mxu0 %vm304_vm0, %v3854_v20  ;;  %v6785_v20 = vld [vmem:[%s8584_s1 + $0x524] ss:$8 sps:$4 sm:$0xff]   ;;  %v4057_v0 = vrot.slane %v4055_v25, 2 }
  0xf9   : > { %3968 = vmatprep.mubr.bf16.mxu0 %v6921_v2  ;;  %v4060_v1 = vrot.slane %v4058_v61, 3  ;;  %v4239_v61 = vld [vmem:[%s6994_s16 + $0x14] sm:$0xc] }
  0xfa   : > { %4141 = vmatpush1.bf16.msra.mxu0 %v6754_v37  ;;  %v1413_v37 = vrot.slane %v7857_v53, 2 }
  0xfb   : > { %5566 = vmatmul.mubr.msk.bf16.gmra.mrb[12].mxu1 %vm304_vm0, %v1199_v15  ;;  %4142 = vmatprep.subr.bf16.mxu0 %v6764_v6  ;;  %v2184_v6 = vld [vmem:[%s6994_s16 + $0x8] sm:$0x8]  ;;  %v4053_v15 = vsel %vm1584_vm5, %v4043_v47, %v4052_v7  ;;  %v4061_v59 = vor.u32 %v4060_v1, %v4057_v0  ;;  %v1612_v0 = vshrl.u32 %v7827_v44, 16  ;;  %v1615_v1 = vshll.u32 %v7827_v44, 16 }
  0xfc   : > { %1327 = vmatprep.mubr.bf16.mxu1 %v6921_v2  ;;  %v1414_v62 = vsel %vm966_vm4, %v1411_v46, %v1413_v37  ;;  %v1606_v46 = vshll.u32 %v7803_v19, 16 }
  0xfe   : > { %4143 = vmatpush1.bf16.msra.mxu0 %v6762_v11  ;;  %v6783_v11 = vld [vmem:[%s8584_s1 + $0x520] ss:$8 sps:$4 sm:$0xff]  }
  0xff   : > { %4353 = vmatprep.subr.bf16.mxu0 %v6772_v63  ;;  %v7878_v63 = vld [vmem:[%s6994_s16 + $0x2c] ss:$0 sps:$4 sm:$0x11]  }
 0x100   : > { %5872 = vmatmul.mubr.msk.bf16.gmra.mrb[8].mxu0 %vm304_vm0, %v3856_v12  ;;  %v6900_v12 = vld [vmem:[%s6994_s16 + $0xc] sm:$0xf]  ;;  %v1415_v28 = vrot.slane %v7878_v63, 2 }
 0x101   : > { %3978 = vmatprep.mubr.bf16.mxu0 %v6921_v2  ;;  %v7884_v23 = vcombine.low %v2184_v6, %v6900_v12 }
 0x102   : > { %v1416_v42 = vsel %vm966_vm4, %v1413_v37, %v1415_v28  ;;  %v7952_v37 = vld [vmem:[%s6994_s16 + $0x20] sm:$0xf]  ;;  %v6803_v28 = vld [vmem:[%s8584_s1 + $0x234] ss:$8 sps:$4 sm:$0xff]  }
 0x103   : > { %5567 = vmatmul.mubr.msk.bf16.gmra.mrb[16].mxu1 %vm304_vm0, %v1198_v40  ;;  %v6777_v40 = vld [vmem:[%s8584_s1 + $0x510] ss:$8 sps:$4 sm:$0xff]   ;;  %v2232_v33 = vrot.slane %v7884_v23, 3 }
 0x104   : > { %1504 = vmatprep.mubr.bf16.mxu1 %v6921_v2 }
 0x108   : > { %5873 = vmatmul.mubr.msk.bf16.gmra.mrb[12].mxu0 %vm304_vm0, %v3858_v54  ;;  %v4064_v54 = vshrl.u32 %v7779_v14, 16 }
 0x109   : > { %3988 = vmatprep.mubr.bf16.mxu0 %v6921_v2 }
 0x10b   : > { %5590 = vmatmul.mubr.msk.bf16.vlgmr.msra.gmra.mrb[0].mxu1 %vm304_vm0, %v1408_v21  ;;  %v4067_v21 = vshll.u32 %v7779_v14, 16  ;;  %v1594_v14 = vshrl.u32 %v7785_v22, 16 }
 0x10c   : > { %1694 = vmatpush1.bf16.msra.mxu1 %v6750_v27  ;;  %1514 = vmatprep.mubr.bf16.mxu1 %v6921_v2  ;;  %v6789_v27 = vld [vmem:[%s8584_s1 + $0x530] ss:$8 sps:$4 sm:$0xff]  }
 0x10d   : > { %1695 = vmatprep.subr.bf16.mxu1 %v6761_v29  ;;  %v1586_v29 = vshrl.u32 %v7782_v38, 16  ;;  %v4069_v38 = vrot.slane %v4067_v21, 3  ;;  %v1596_v30 = vrot.slane %v1594_v14, 2  ;;  %v1617_v21 = vrot.slane %v1615_v1, 3 }
 0x10f   : > { %v1588_v36 = vrot.slane %v1586_v29, 2 }
 0x110   : > { %1696 = vmatpush1.bf16.msra.mxu1 %v6759_v10  ;;  %5874 = vmatmul.mubr.msk.bf16.gmra.mrb[16].mxu0 %vm304_vm0, %v3860_v16  ;;  %v4062_v10 = vsel %vm1584_vm5, %v4052_v7, %v4061_v59  ;;  %v4066_v16 = vrot.slane %v4064_v54, 2  ;;  %v6788_v7 = vld [vmem:[%s8584_s1 + $0x214] ss:$8 sps:$4 sm:$0xff]   ;;  %v1614_v54 = vrot.slane %v1612_v0, 2 }
 0x111   : > { %1697 = vmatprep.subr.bf16.mxu1 %v6768_v9  ;;  %4168 = vmatprep.mubr.bf16.mxu0 %v6921_v2  ;;  %v7908_v9 = vsel %vm1813_vm6, %v2232_v33, %v2233_v34  ;;  %v1592_v47 = vor.u32 %v1591_v3, %v1588_v36  ;;  %v7991_v33 = vld [vmem:[%s6994_s16 + $0x28] sm:$0xf]  ;;  %v6811_v36 = vld [vmem:[%s8584_s1 + $0x244] ss:$8 sps:$4 sm:$0xff]  }
 0x113   : > { %5591 = vmatmul.mubr.msk.bf16.gmra.mrb[4].mxu1 %vm304_vm0, %v1410_v35  ;;  %v1599_v35 = vrot.slane %v1597_v32, 3 }
 0x114   : > { %1524 = vmatprep.mubr.bf16.mxu1 %v6921_v2  ;;  %1698 = vmatpush1.bf16.msra.mxu1 %v6766_v43  ;;  %v4070_v43 = vor.u32 %v4069_v38, %v4066_v16  ;;  %v1624_v16 = vshll.u32 %v7857_v53, 16  ;;  %v6801_v38 = vld [vmem:[%s8584_s1 + $0x230] ss:$8 sps:$4 sm:$0xff]  }
 0x115   : > { %1699 = vmatprep.subr.bf16.mxu1 %v6775_v60  ;;  %v4073_v60 = vshrl.u32 %v7795_v18, 16  ;;  %v1600_v50 = vor.u32 %v1599_v35, %v1596_v30  ;;  %v4078_v18 = vrot.slane %v4076_v45, 3  ;;  %v6798_v30 = vld [vmem:[%s8584_s1 + $0x540] ss:$8 sps:$4 sm:$0xff]   ;;  %v6807_v35 = vld [vmem:[%s8584_s1 + $0x554] ss:$8 sps:$4 sm:$0xff]  }
 0x116   : > { %v1626_v45 = vrot.slane %v1624_v16, 3 }
 0x117   : > { %v1601_v24 = vsel %vm1584_vm5, %v1592_v47, %v1600_v50  ;;  %v2411_v47 = vshrl.u32 %v7884_v23, 16 }
 0x118   : > { %1700 = vmatpush1.bf16.msra.mxu1 %v6773_v17  ;;  %5891 = vmatmul.mubr.msk.bf16.vlgmr.msra.gmra.mrb[0].mxu0 %vm304_vm0, %v4044_v13  ;;  %v2235_v17 = vrot.slane %v7066_v52, 3  ;;  %v4075_v13 = vrot.slane %v4073_v60, 2 }
 0x119   : > { %1880 = vmatprep.subr.bf16.mxu1 %v6782_v55  ;;  %4178 = vmatprep.mubr.bf16.mxu0 %v6921_v2  ;;  %v4071_v55 = vsel %vm1584_vm5, %v4061_v59, %v4070_v43 }
 0x11a   : > { %4354 = vmatpush1.bf16.msra.mxu0 %v6770_v26  ;;  %v7928_v58 = vsel %vm1813_vm6, %v2233_v34, %v2235_v17  ;;  %v6780_v26 = vld [vmem:[%s8584_s1 + $0x200] ss:$8 sps:$4 sm:$0xff]   ;;  %v4079_v25 = vor.u32 %v4078_v18, %v4075_v13  ;;  %v1618_v34 = vor.u32 %v1617_v21, %v1614_v54  ;;  %v6805_v18 = vld [vmem:[%s8584_s1 + $0x550] ss:$8 sps:$4 sm:$0xff]  }
 0x11b   : > { %5592 = vmatmul.mubr.msk.bf16.gmra.mrb[8].mxu1 %vm304_vm0, %v1412_v57  ;;  %4355 = vmatprep.subr.bf16.mxu0 %v6779_v56  ;;  %v1605_v56 = vrot.slane %v1603_v51, 2  ;;  %v1608_v57 = vrot.slane %v1606_v46, 3 }
 0x11c   : > { %1534 = vmatprep.mubr.bf16.mxu1 %v6921_v2 }
 0x11d   : > { %v1609_v6 = vor.u32 %v1608_v57, %v1605_v56  ;;  %v2422_v56 = vshll.u32 %v7059_v48, 16 }
 0x11e   : > { %4356 = vmatpush1.bf16.msra.mxu0 %v6777_v40  ;;  %v7946_v40 = vld [vmem:[%s6994_s16 + $0x18] sm:$0xf] }
 0x11f   : > { %4357 = vmatprep.subr.bf16.mxu0 %v6785_v20  ;;  %v7949_v20 = vld [vmem:[%s6994_s16 + $0x1c] sm:$0xf]  ;;  %v7965_v12 = vcombine.low %v4239_v61, %v7946_v40  ;;  %v1610_v59 = vsel %vm1584_vm5, %v1600_v50, %v1609_v6  ;;  %v2414_v50 = vshll.u32 %v7884_v23, 16  ;;  %v6815_v23 = vld [vmem:[%s8584_s1 + $0x564] ss:$8 sps:$4 sm:$0xff]  }
 0x120   : > { %5892 = vmatmul.mubr.msk.bf16.gmra.mrb[4].mxu0 %vm304_vm0, %v4053_v15  ;;  %v6786_v15 = vld [vmem:[%s8584_s1 + $0x210] ss:$8 sps:$4 sm:$0xff]  }
 0x121   : > { %4188 = vmatprep.mubr.bf16.mxu0 %v6921_v2  ;;  %v4287_v29 = vrot.slane %v7965_v12, 2 }
 0x122   : > { %4358 = vmatpush1.bf16.msra.mxu0 %v6783_v11  ;;  %v6796_v11 = vld [vmem:[%s8584_s1 + $0x224] ss:$8 sps:$4 sm:$0xff]  }
 0x123   : > { %5593 = vmatmul.mubr.msk.bf16.gmra.mrb[12].mxu1 %vm304_vm0, %v1414_v62  ;;  %4359 = vmatprep.subr.bf16.mxu0 %v6791_v5  ;;  %v4080_v5 = vsel %vm1584_vm5, %v4070_v43, %v4079_v25  ;;  %v7969_v62 = vcombine.low %v7949_v20, %v7952_v37  ;;  %v1619_v43 = vsel %vm1584_vm5, %v1609_v6, %v1618_v34  ;;  %v1633_v25 = vshll.u32 %v7878_v63, 16 }
 0x124   : > { %1544 = vmatprep.mubr.bf16.mxu1 %v6921_v2 }
 0x125   : > { %v4288_v49 = vrot.slane %v7969_v62, 2 }
 0x126   : > { %4360 = vmatpush1.bf16.msra.mxu0 %v6789_v27  ;;  %v6794_v27 = vld [vmem:[%s8584_s1 + $0x220] ss:$8 sps:$4 sm:$0xff]  }
 0x127   : > { %4573 = vmatprep.subr.bf16.mxu0 %v6800_v39  ;;  %v7988_v39 = vld [vmem:[%s6994_s16 + $0x24] sm:$0xf]  ;;  %v4289_v3 = vsel %vm966_vm4, %v4287_v29, %v4288_v49  ;;  %v6820_v29 = vld [vmem:[%s8584_s1 + $0x570] ss:$8 sps:$4 sm:$0xff]  }
 0x128   : > { %5893 = vmatmul.mubr.msk.bf16.gmra.mrb[8].mxu0 %vm304_vm0, %v4062_v10  ;;  %v1621_v10 = vshrl.u32 %v7857_v53, 16 }
 0x129   : > { %4198 = vmatprep.mubr.bf16.mxu0 %v6921_v2 }
 0x12a   : > { %v1623_v60 = vrot.slane %v1621_v10, 2 }
 0x12b   : > { %5594 = vmatmul.mubr.msk.bf16.gmra.mrb[16].mxu1 %vm304_vm0, %v1416_v42  ;;  %v8005_v42 = vcombine.low %v7988_v39, %v7991_v33 }
 0x12c   : > { %1725 = vmatprep.mubr.bf16.mxu1 %v6921_v2  ;;  %v1627_v57 = vor.u32 %v1626_v45, %v1623_v60 }
 0x12d   : > { %v4290_v13 = vrot.slane %v8005_v42, 2 }
 0x12e   : > { %v1628_v54 = vsel %vm1584_vm5, %v1618_v34, %v1627_v57  ;;  %v6828_v34 = vld [vmem:[%s8584_s1 + $0x584] ss:$8 sps:$4 sm:$0xff]  }
 0x12f   : > { %v4291_v61 = vsel %vm966_vm4, %v4288_v49, %v4290_v13  ;;  %v8061_v49 = vld [vmem:[%s6994_s16 + $0x34] sm:$0xf] }
 0x130   : > { %5894 = vmatmul.mubr.msk.bf16.gmra.mrb[12].mxu0 %vm304_vm0, %v4071_v55  ;;  %v2419_v55 = vshrl.u32 %v7059_v48, 16  ;;  %v2413_v48 = vrot.slane %v2411_v47, 3 }
 0x131   : > { %4208 = vmatprep.mubr.bf16.mxu0 %v6921_v2 }
 0x133   : > { %5611 = vmatmul.mubr.msk.bf16.vlgmr.msra.gmra.mrb[0].mxu1 %vm304_vm0, %v1601_v24  ;;  %v8029_v24 = vld [vmem:[%s6994_s16 + $0x2c] sm:$0xf] }
 0x134   : > { %1881 = vmatpush1.bf16.msra.mxu1 %v6780_v26  ;;  %1735 = vmatprep.mubr.bf16.mxu1 %v6921_v2  ;;  %v8032_v26 = vld [vmem:[%s6994_s16 + $0x30] sm:$0xf] }
 0x135   : > { %1882 = vmatprep.subr.bf16.mxu1 %v6788_v7  ;;  %v1630_v7 = vshrl.u32 %v7878_v63, 16  ;;  %v8044_v6 = vcombine.low %v8029_v24, %v8032_v26  ;;  %v6822_v63 = vld [vmem:[%s8584_s1 + $0x574] ss:$8 sps:$4 sm:$0xff]  }
 0x137   : > { %v1632_v21 = vrot.slane %v1630_v7, 2 }
 0x138   : > { %1883 = vmatpush1.bf16.msra.mxu1 %v6786_v15  ;;  %5895 = vmatmul.mubr.msk.bf16.gmra.mrb[16].mxu0 %vm304_vm0, %v4080_v5  ;;  %v6813_v15 = vld [vmem:[%s8584_s1 + $0x560] ss:$8 sps:$4 sm:$0xff]   ;;  %v2421_v5 = vrot.slane %v2419_v55, 3 }
 0x139   : > { %1884 = vmatprep.subr.bf16.mxu1 %v6796_v11  ;;  %4385 = vmatprep.mubr.bf16.mxu0 %v6921_v2  ;;  %v2416_v11 = vrot.slane %v2414_v50, 4 }
 0x13b   : > { %5612 = vmatmul.mubr.msk.bf16.gmra.mrb[4].mxu1 %vm304_vm0, %v1610_v59  ;;  %v2424_v59 = vrot.slane %v2422_v56, 4  ;;  %v2431_v56 = vshll.u32 %v7066_v52, 16 }
 0x13c   : > { %1745 = vmatprep.mubr.bf16.mxu1 %v6921_v2  ;;  %1885 = vmatpush1.bf16.msra.mxu1 %v6794_v27  ;;  %v1635_v27 = vrot.slane %v1633_v25, 3 }
 0x13d   : > { %1886 = vmatprep.subr.bf16.mxu1 %v6803_v28  ;;  %v4292_v28 = vrot.slane %v8044_v6, 2  ;;  %v2433_v25 = vrot.slane %v2431_v56, 4  ;;  %v4483_v56 = vshrl.u32 %v8005_v42, 16 }
 0x140   : > { %1887 = vmatpush1.bf16.msra.mxu1 %v6801_v38  ;;  %5918 = vmatmul.mubr.msk.bf16.vlgmr.msra.gmra.mrb[0].mxu0 %vm304_vm0, %v4289_v3  ;;  %v8064_v38 = vld [vmem:[%s6994_s16 + $0x38] sm:$0xf]  ;;  %v2417_v3 = vor.u32 %v2416_v11, %v2413_v48 }
 0x141   : > { %2081 = vmatprep.subr.bf16.mxu1 %v6811_v36  ;;  %4395 = vmatprep.mubr.bf16.mxu0 %v6921_v2  ;;  %v1636_v36 = vor.u32 %v1635_v27, %v1632_v21  ;;  %v8074_v60 = vcombine.low %v8061_v49, %v8064_v38  ;;  %v4477_v21 = vshll.u32 %v7969_v62, 16 }
 0x142   : > { %4574 = vmatpush1.bf16.msra.mxu0 %v6798_v30  ;;  %v2425_v30 = vor.u32 %v2424_v59, %v2421_v5  ;;  %v6819_v5 = vld [vmem:[%s8584_s1 + $0x254] ss:$8 sps:$4 sm:$0xff]   ;;  %v4469_v59 = vshll.u32 %v7965_v12, 16 }
 0x143   : > { %5613 = vmatmul.mubr.msk.bf16.gmra.mrb[8].mxu1 %vm304_vm0, %v1619_v43  ;;  %4575 = vmatprep.subr.bf16.mxu0 %v6807_v35  ;;  %v1796_v35 = vld [vmem:[%s6994_s16 + $0x4] sm:$0x8]  ;;  %v4293_v43 = vsel %vm966_vm4, %v4290_v13, %v4292_v28  ;;  %v1637_v47 = vsel %vm1584_vm5, %v1627_v57, %v1636_v36  ;;  %v4294_v55 = vrot.slane %v8074_v60, 2 }
 0x144   : > { %1755 = vmatprep.mubr.bf16.mxu1 %v6921_v2  ;;  %v8077_v45 = vsel %vm1992_vm7, %v2417_v3, %v2425_v30  ;;  %v8081_v50 = vcombine.low %v1796_v35, %v7775_v41  ;;  %v8093_v41 = vld [vmem:[%s6994_s16 + $0x3c] ss:$0 sps:$4 sm:$0x11]   ;;  %v4471_v3 = vrot.slane %v4469_v59, 3  ;;  %v4479_v35 = vrot.slane %v4477_v21, 3 }
 0x145   : > { %v4295_v57 = vsel %vm966_vm4, %v4292_v28, %v4294_v55  ;;  %v4296_v11 = vrot.slane %v8093_v41, 2  ;;  %v1817_v28 = vrot.slane %v7803_v19, 3  ;;  %v6842_v19 = vld [vmem:[%s8584_s1 + $0x290] ss:$8 sps:$4 sm:$0xff]  }
 0x146   : > { %4576 = vmatpush1.bf16.msra.mxu0 %v6805_v18  ;;  %v1814_v13 = vrot.slane %v8081_v50, 3  ;;  %v1815_v18 = vrot.slane %v7785_v22, 3 }
 0x147   : > { %4577 = vmatprep.subr.bf16.mxu0 %v6815_v23  ;;  %v2428_v23 = vshrl.u32 %v7066_v52, 16  ;;  %v6886_v52 = vld [vmem:[%s8584_s1 + $0x610] ss:$8 sps:$4 sm:$0xff]  }
 0x148   : > { %5919 = vmatmul.mubr.msk.bf16.gmra.mrb[4].mxu0 %vm304_vm0, %v4291_v61  ;;  %v1816_v61 = vsel %vm1813_vm6, %v1814_v13, %v1815_v18 }
 0x149   : > { %4405 = vmatprep.mubr.bf16.mxu0 %v6921_v2  ;;  %v2430_v7 = vrot.slane %v2428_v23, 3 }
 0x14a   : > { %4578 = vmatpush1.bf16.msra.mxu0 %v6813_v15  ;;  %v6809_v15 = vld [vmem:[%s8584_s1 + $0x240] ss:$8 sps:$4 sm:$0xff]  }
 0x14b   : > { %5614 = vmatmul.mubr.msk.bf16.gmra.mrb[12].mxu1 %vm304_vm0, %v1628_v54  ;;  %4579 = vmatprep.subr.bf16.mxu0 %v6822_v63  ;;  %v8100_v48 = vor.u32 %v2433_v25, %v2430_v7  ;;  %v4466_v63 = vshrl.u32 %v7965_v12, 16  ;;  %v4474_v54 = vshrl.u32 %v7969_v62, 16  ;;  %v4297_v12 = vsel %vm966_vm4, %v4294_v55, %v4296_v11  ;;  %v6831_v55 = vld [vmem:[%s8584_s1 + $0x274] ss:$8 sps:$4 sm:$0xff]   ;;  %v6829_v7 = vld [vmem:[%s8584_s1 + $0x270] ss:$8 sps:$4 sm:$0xff]  }
 0x14c   : > { %1765 = vmatprep.mubr.bf16.mxu1 %v6921_v2  ;;  %v6838_v25 = vld [vmem:[%s8584_s1 + $0x284] ss:$8 sps:$4 sm:$0xff]  }
 0x14d   : > { %v8114_v27 = vsel %vm1992_vm7, %v2425_v30, %v8100_v48  ;;  %v4468_v36 = vrot.slane %v4466_v63, 2  ;;  %v4476_v30 = vrot.slane %v4474_v54, 2  ;;  %v6835_v63 = vld [vmem:[%s8584_s1 + $0x594] ss:$8 sps:$4 sm:$0xff]  }
 0x14e   : > { %4580 = vmatpush1.bf16.msra.mxu0 %v6820_v29  ;;  %v6817_v29 = vld [vmem:[%s8584_s1 + $0x250] ss:$8 sps:$4 sm:$0xff]  }
 0x14f   : > { %4759 = vmatprep.subr.bf16.mxu0 %v6828_v34  ;;  %v6825_v34 = vld [vmem:[%s8584_s1 + $0x264] ss:$8 sps:$4 sm:$0xff]   ;;  %v4472_v13 = vor.u32 %v4471_v3, %v4468_v36  ;;  %v4480_v23 = vor.u32 %v4479_v35, %v4476_v30  ;;  %v6833_v36 = vld [vmem:[%s8584_s1 + $0x590] ss:$8 sps:$4 sm:$0xff]   ;;  %v1821_v3 = vrot.slane %v7857_v53, 3 }
 0x150   : > { %5920 = vmatmul.mubr.msk.bf16.gmra.mrb[8].mxu0 %vm304_vm0, %v4293_v43  ;;  %v1818_v43 = vsel %vm1813_vm6, %v1815_v18, %v1817_v28  ;;  %v4486_v18 = vshll.u32 %v8005_v42, 16  ;;  %v6866_v53 = vld [vmem:[%s8584_s1 + $0x5e4] ss:$8 sps:$4 sm:$0xff]  }
 0x151   : > { %4415 = vmatprep.mubr.bf16.mxu0 %v6921_v2 }
 0x152   : > { %v4488_v11 = vrot.slane %v4486_v18, 3 }
 0x153   : > { %5615 = vmatmul.mubr.msk.bf16.gmra.mrb[16].mxu1 %vm304_vm0, %v1637_v47  ;;  %v6823_v47 = vld [vmem:[%s8584_s1 + $0x260] ss:$8 sps:$4 sm:$0xff]  }
 0x154   : > { %1912 = vmatprep.mubr.bf16.mxu1 %v6921_v2 }
 0x158   : > { %5921 = vmatmul.mubr.msk.bf16.gmra.mrb[12].mxu0 %vm304_vm0, %v4295_v57  ;;  %v1819_v57 = vrot.slane %v7827_v44, 3 }
 0x159   : > { %4425 = vmatprep.mubr.bf16.mxu0 %v6921_v2 }
 0x15a   : > { %v1820_v59 = vsel %vm1813_vm6, %v1817_v28, %v1819_v57  ;;  %v6841_v28 = vld [vmem:[%s8584_s1 + $0x5a4] ss:$8 sps:$4 sm:$0xff]  }
 0x15b   : > { %5634 = vmatmul.mubr.msk.bf16.vlgmr.msra.gmra.mrb[0].mxu1 %vm304_vm0, %v1816_v61  ;;  %v4481_v61 = vsel %vm1584_vm5, %v4472_v13, %v4480_v23  ;;  %v6847_v13 = vld [vmem:[%s8584_s1 + $0x5b4] ss:$8 sps:$4 sm:$0xff]  }
 0x15c   : > { %2082 = vmatpush1.bf16.msra.mxu1 %v6809_v15  ;;  %1922 = vmatprep.mubr.bf16.mxu1 %v6921_v2  ;;  %v4485_v15 = vrot.slane %v4483_v56, 2 }
 0x15d   : > { %2083 = vmatprep.subr.bf16.mxu1 %v6819_v5  ;;  %v6826_v5 = vld [vmem:[%s8584_s1 + $0x580] ss:$8 sps:$4 sm:$0xff]  }
 0x160   : > { %2084 = vmatpush1.bf16.msra.mxu1 %v6817_v29  ;;  %5922 = vmatmul.mubr.msk.bf16.gmra.mrb[16].mxu0 %vm304_vm0, %v4297_v12  ;;  %v4489_v29 = vor.u32 %v4488_v11, %v4485_v15  ;;  %v4492_v12 = vshrl.u32 %v8044_v6, 16  ;;  %v6845_v15 = vld [vmem:[%s8584_s1 + $0x5b0] ss:$8 sps:$4 sm:$0xff]  }
 0x161   : > { %2085 = vmatprep.subr.bf16.mxu1 %v6825_v34  ;;  %4605 = vmatprep.mubr.bf16.mxu0 %v6921_v2  ;;  %v4495_v34 = vshll.u32 %v8044_v6, 16 }
 0x162   : > { %v4490_v30 = vsel %vm1584_vm5, %v4480_v23, %v4489_v29  ;;  %v4494_v35 = vrot.slane %v4492_v12, 2  ;;  %v1822_v23 = vsel %vm1813_vm6, %v1819_v57, %v1821_v3  ;;  %v6854_v57 = vld [vmem:[%s8584_s1 + $0x5c4] ss:$8 sps:$4 sm:$0xff]  }
 0x163   : > { %5635 = vmatmul.mubr.msk.bf16.gmra.mrb[4].mxu1 %vm304_vm0, %v1818_v43  ;;  %v4497_v43 = vrot.slane %v4495_v34, 3 }
 0x164   : > { %1932 = vmatprep.mubr.bf16.mxu1 %v6921_v2  ;;  %2086 = vmatpush1.bf16.msra.mxu1 %v6823_v47  ;;  %v6839_v47 = vld [vmem:[%s8584_s1 + $0x5a0] ss:$8 sps:$4 sm:$0xff]  }
 0x165   : > { %2087 = vmatprep.subr.bf16.mxu1 %v6831_v55  ;;  %v8184_v55 = vld [vmem:[%s6994_s16 + $0x2c] ss:$0 sps:$4 sm:$0x33]  }
 0x166   : > { %v1823_v11 = vrot.slane %v8184_v55, 3 }
 0x168   : > { %2088 = vmatpush1.bf16.msra.mxu1 %v6829_v7  ;;  %5939 = vmatmul.mubr.msk.bf16.vlgmr.msra.gmra.mrb[0].mxu0 %vm304_vm0, %v4481_v61  ;;  %v4498_v7 = vor.u32 %v4497_v43, %v4494_v35  ;;  %v4504_v61 = vshll.u32 %v8074_v60, 16 }
 0x169   : > { %2298 = vmatprep.subr.bf16.mxu1 %v6838_v25  ;;  %4615 = vmatprep.mubr.bf16.mxu0 %v6921_v2  ;;  %v4501_v25 = vshrl.u32 %v8074_v60, 16 }
 0x16a   : > { %4760 = vmatpush1.bf16.msra.mxu0 %v6826_v5  ;;  %v1994_v5 = vshrl.u32 %v8081_v50, 16 }
 0x16b   : > { %5636 = vmatmul.mubr.msk.bf16.gmra.mrb[8].mxu1 %vm304_vm0, %v1820_v59  ;;  %4761 = vmatprep.subr.bf16.mxu0 %v6835_v63  ;;  %v1997_v63 = vshll.u32 %v8081_v50, 16  ;;  %v4499_v59 = vsel %vm1584_vm5, %v4489_v29, %v4498_v7  ;;  %v2002_v50 = vrot.slane %v1597_v32, 4 }
 0x16c   : > { %1942 = vmatprep.mubr.bf16.mxu1 %v6921_v2  ;;  %v1996_v35 = vrot.slane %v1994_v5, 3  ;;  %v2006_v5 = vrot.slane %v1606_v46, 4 }
 0x16d   : > { %v1999_v43 = vrot.slane %v1997_v63, 4 }
 0x16e   : > { %4762 = vmatpush1.bf16.msra.mxu0 %v6833_v36  ;;  %v4503_v36 = vrot.slane %v4501_v25, 2 }
 0x16f   : > { %4763 = vmatprep.subr.bf16.mxu0 %v6841_v28  ;;  %v4506_v28 = vrot.slane %v4504_v61, 3 }
 0x170   : > { %5940 = vmatmul.mubr.msk.bf16.gmra.mrb[4].mxu0 %vm304_vm0, %v4490_v30  ;;  %v1824_v30 = vsel %vm1813_vm6, %v1821_v3, %v1823_v11  ;;  %v2000_v3 = vor.u32 %v1999_v43, %v1996_v35  ;;  %v2009_v35 = vrot.slane %v1612_v0, 3  ;;  %v2010_v43 = vrot.slane %v1615_v1, 4  ;;  %v6855_v1 = vld [vmem:[%s8584_s1 + $0x2b0] ss:$8 sps:$4 sm:$0xff]  }
 0x171   : > { %4625 = vmatprep.mubr.bf16.mxu0 %v6921_v2  ;;  %v4507_v29 = vor.u32 %v4506_v28, %v4503_v36  ;;  %v4694_v0 = vrot.slane %v7969_v62, 3 }
 0x172   : > { %4764 = vmatpush1.bf16.msra.mxu0 %v6839_v47  ;;  %v2001_v47 = vrot.slane %v1594_v14, 3  ;;  %v2011_v44 = vor.u32 %v2010_v43, %v2009_v35 }
 0x173   : > { %5637 = vmatmul.mubr.msk.bf16.gmra.mrb[12].mxu1 %vm304_vm0, %v1822_v23  ;;  %4765 = vmatprep.subr.bf16.mxu0 %v6847_v13  ;;  %v4510_v13 = vshrl.u32 %v8093_v41, 16  ;;  %v4513_v23 = vshll.u32 %v8093_v41, 16  ;;  %v4508_v14 = vsel %vm1584_vm5, %v4498_v7, %v4507_v29  ;;  %v2005_v41 = vrot.slane %v1603_v51, 3  ;;  %v6844_v7 = vld [vmem:[%s8584_s1 + $0x294] ss:$8 sps:$4 sm:$0xff]  }
 0x174   : > { %1952 = vmatprep.mubr.bf16.mxu1 %v6921_v2  ;;  %v6851_v51 = vld [vmem:[%s8584_s1 + $0x2a4] ss:$8 sps:$4 sm:$0xff]  }
 0x175   : > { %v4512_v22 = vrot.slane %v4510_v13, 2  ;;  %v4515_v32 = vrot.slane %v4513_v23, 3  ;;  %v2007_v36 = vor.u32 %v2006_v5, %v2005_v41  ;;  %v6863_v13 = vld [vmem:[%s8584_s1 + $0x2c4] ss:$8 sps:$4 sm:$0xff]   ;;  %v2021_v41 = vshll.u32 %v8184_v55, 16 }
 0x176   : > { %4766 = vmatpush1.bf16.msra.mxu0 %v6845_v15  ;;  %v2003_v15 = vor.u32 %v2002_v50, %v2001_v47  ;;  %v6849_v47 = vld [vmem:[%s8584_s1 + $0x2a0] ss:$8 sps:$4 sm:$0xff]   ;;  %v6857_v50 = vld [vmem:[%s8584_s1 + $0x2b4] ss:$8 sps:$4 sm:$0xff]  }
 0x177   : > { %4959 = vmatprep.subr.bf16.mxu0 %v6854_v57  ;;  %v6836_v57 = vld [vmem:[%s8584_s1 + $0x280] ss:$8 sps:$4 sm:$0xff]   ;;  %v4516_v63 = vor.u32 %v4515_v32, %v4512_v22  ;;  %v2013_v22 = vrot.slane %v1621_v10, 3  ;;  %v2014_v32 = vrot.slane %v1624_v16, 4  ;;  %v2018_v16 = vshrl.u32 %v8184_v55, 16 }
 0x178   : > { %5941 = vmatmul.mubr.msk.bf16.gmra.mrb[8].mxu0 %vm304_vm0, %v4499_v59  ;;  %v2004_v11 = vsel %vm1992_vm7, %v2000_v3, %v2003_v15  ;;  %v4676_v59 = vld [vmem:[%s6994_s16 + $0x14] sm:$0x8]  ;;  %v6852_v3 = vld [vmem:[%s8584_s1 + $0x5c0] ss:$8 sps:$4 sm:$0xff]   ;;  %v4698_v55 = vrot.slane %v8044_v6, 3 }
 0x179   : > { %4635 = vmatprep.mubr.bf16.mxu0 %v6921_v2  ;;  %v4517_v46 = vsel %vm1584_vm5, %v4507_v29, %v4516_v63  ;;  %v8246_v28 = vcombine.low %v4676_v59, %v7946_v40  ;;  %v2015_v10 = vor.u32 %v2014_v32, %v2013_v22  ;;  %v6873_v63 = vld [vmem:[%s8584_s1 + $0x5f4] ss:$8 sps:$4 sm:$0xff]  }
 0x17b   : > { %5638 = vmatmul.mubr.msk.bf16.gmra.mrb[16].mxu1 %vm304_vm0, %v1824_v30  ;;  %v2008_v30 = vsel %vm1992_vm7, %v2003_v15, %v2007_v36  ;;  %v4693_v29 = vrot.slane %v8246_v28, 3  ;;  %v6860_v15 = vld [vmem:[%s8584_s1 + $0x5d4] ss:$8 sps:$4 sm:$0xff]   ;;  %v2016_v59 = vsel %vm1992_vm7, %v2011_v44, %v2015_v10 }
 0x17c   : > { %2113 = vmatprep.mubr.bf16.mxu1 %v6921_v2 }
 0x17d   : > { %v4695_v23 = vsel %vm1813_vm6, %v4693_v29, %v4694_v0 }
 0x180   : > { %5942 = vmatmul.mubr.msk.bf16.gmra.mrb[12].mxu0 %vm304_vm0, %v4508_v14  ;;  %v2012_v14 = vsel %vm1992_vm7, %v2007_v36, %v2011_v44  ;;  %v2020_v36 = vrot.slane %v2018_v16, 3  ;;  %v6884_v16 = vld [vmem:[%s8584_s1 + $0x2f4] ss:$8 sps:$4 sm:$0xff]  }
 0x181   : > { %4645 = vmatprep.mubr.bf16.mxu0 %v6921_v2 }
 0x183   : > { %5655 = vmatmul.mubr.msk.bf16.vlgmr.msra.gmra.mrb[0].mxu1 %vm304_vm0, %v2004_v11  ;;  %v4696_v11 = vrot.slane %v8005_v42, 3  ;;  %v6905_v42 = vld [vmem:[%s8584_s1 + $0x304] ss:$8 sps:$4 sm:$0xff]  }
 0x184   : > { %2299 = vmatpush1.bf16.msra.mxu1 %v6836_v57  ;;  %2123 = vmatprep.mubr.bf16.mxu1 %v6921_v2  ;;  %v6858_v57 = vld [vmem:[%s8584_s1 + $0x5d0] ss:$8 sps:$4 sm:$0xff]  }
 0x185   : > { %2300 = vmatprep.subr.bf16.mxu1 %v6844_v7  ;;  %v4697_v5 = vsel %vm1813_vm6, %v4694_v0, %v4696_v11  ;;  %v6864_v7 = vld [vmem:[%s8584_s1 + $0x5e0] ss:$8 sps:$4 sm:$0xff]   ;;  %v4699_v35 = vsel %vm1813_vm6, %v4696_v11, %v4698_v55 }
 0x186   : > { %v6861_v0 = vld [vmem:[%s8584_s1 + $0x2c0] ss:$8 sps:$4 sm:$0xff]  }
 0x187   : > { %v6901_v11 = vld [vmem:[%s6994_s16 + $0x20] sm:$0xf] }
 0x188   : > { %2301 = vmatpush1.bf16.msra.mxu1 %v6842_v19  ;;  %5943 = vmatmul.mubr.msk.bf16.gmra.mrb[16].mxu0 %vm304_vm0, %v4517_v46  ;;  %v2023_v19 = vrot.slane %v2021_v41, 4  ;;  %v6881_v46 = vld [vmem:[%s8584_s1 + $0x604] ss:$8 sps:$4 sm:$0xff]   ;;  %v6882_v41 = vld [vmem:[%s8584_s1 + $0x2f0] ss:$8 sps:$4 sm:$0xff]  }
 0x189   : > { %2302 = vmatprep.subr.bf16.mxu1 %v6851_v51  ;;  %4791 = vmatprep.mubr.bf16.mxu0 %v6921_v2  ;;  %v6871_v51 = vld [vmem:[%s8584_s1 + $0x5f0] ss:$8 sps:$4 sm:$0xff]  }
 0x18b   : > { %5656 = vmatmul.mubr.msk.bf16.gmra.mrb[4].mxu1 %vm304_vm0, %v2008_v30  ;;  %v2024_v30 = vor.u32 %v2023_v19, %v2020_v36  ;;  %v6903_v19 = vld [vmem:[%s6994_s16 + $0x28] sm:$0xf] }
 0x18c   : > { %2133 = vmatprep.mubr.bf16.mxu1 %v6921_v2  ;;  %2303 = vmatpush1.bf16.msra.mxu1 %v6849_v47  ;;  %v4700_v47 = vrot.slane %v8074_v60, 3 }
 0x18d   : > { %2304 = vmatprep.subr.bf16.mxu1 %v6857_v50  ;;  %v2025_v43 = vsel %vm1992_vm7, %v2015_v10, %v2024_v30  ;;  %v8323_v50 = vld [vmem:[%s6994_s16 + $0x3c] ss:$0 sps:$4 sm:$0x33]   ;;  %v6875_v10 = vld [vmem:[%s8584_s1 + $0x2e0] ss:$8 sps:$4 sm:$0xff]   ;;  %v4887_v30 = vrot.slane %v4492_v12, 3 }
 0x18e   : > { %v4701_v29 = vsel %vm1813_vm6, %v4698_v55, %v4700_v47  ;;  %v4702_v44 = vrot.slane %v8323_v50, 3  ;;  %v6904_v55 = vld [vmem:[%s6994_s16 + $0x2c] sm:$0xf]  ;;  %v6892_v12 = vld [vmem:[%s8584_s1 + $0x630] ss:$8 sps:$4 sm:$0xff]  }
 0x190   : > { %2305 = vmatpush1.bf16.msra.mxu1 %v6855_v1  ;;  %5962 = vmatmul.mubr.msk.bf16.vlgmr.msra.gmra.mrb[0].mxu0 %vm304_vm0, %v4695_v23  ;;  %v6870_v1 = vld [vmem:[%s8584_s1 + $0x2d4] ss:$8 sps:$4 sm:$0xff]   ;;  %v4875_v23 = vshll.u32 %v8246_v28, 16 }
 0x191   : > { %2518 = vmatprep.subr.bf16.mxu1 %v6863_v13  ;;  %4801 = vmatprep.mubr.bf16.mxu0 %v6921_v2  ;;  %v4872_v13 = vshrl.u32 %v8246_v28, 16  ;;  %v4879_v28 = vrot.slane %v4474_v54, 3 }
 0x192   : > { %4960 = vmatpush1.bf16.msra.mxu0 %v6852_v3  ;;  %v6868_v3 = vld [vmem:[%s8584_s1 + $0x2d0] ss:$8 sps:$4 sm:$0xff]   ;;  %v4877_v32 = vrot.slane %v4875_v23, 4 }
 0x193   : > { %5657 = vmatmul.mubr.msk.bf16.gmra.mrb[8].mxu1 %vm304_vm0, %v2012_v14  ;;  %4961 = vmatprep.subr.bf16.mxu0 %v6860_v15  ;;  %v4703_v15 = vsel %vm1813_vm6, %v4700_v47, %v4702_v44  ;;  %v6877_v14 = vld [vmem:[%s8584_s1 + $0x2e4] ss:$8 sps:$4 sm:$0xff]   ;;  %v4874_v22 = vrot.slane %v4872_v13, 3  ;;  %v6894_v47 = vld [vmem:[%s8584_s1 + $0x634] ss:$8 sps:$4 sm:$0xff]   ;;  %v4892_v13 = vrot.slane %v4504_v61, 4 }
 0x194   : > { %2143 = vmatprep.mubr.bf16.mxu1 %v6921_v2 }
 0x195   : > { %v4878_v62 = vor.u32 %v4877_v32, %v4874_v22 }
 0x196   : > { %4962 = vmatpush1.bf16.msra.mxu0 %v6858_v57  ;;  %v6902_v57 = vld [vmem:[%s6994_s16 + $0x24] sm:$0xf] }
 0x197   : > { %4963 = vmatprep.subr.bf16.mxu0 %v6866_v53  ;;  %v8353_v53 = vcombine.low %v6901_v11, %v6902_v57 }
 0x198   : > { %5963 = vmatmul.mubr.msk.bf16.gmra.mrb[4].mxu0 %vm304_vm0, %v4697_v5 }
 0x199   : > { %4811 = vmatprep.mubr.bf16.mxu0 %v6921_v2  ;;  %v2437_v32 = vshrl.u32 %v8353_v53, 16 }
 0x19a   : > { %4964 = vmatpush1.bf16.msra.mxu0 %v6864_v7  ;;  %v4883_v7 = vrot.slane %v4483_v56, 3 }
 0x19b   : > { %5658 = vmatmul.mubr.msk.bf16.gmra.mrb[12].mxu1 %vm304_vm0, %v2016_v59  ;;  %4965 = vmatprep.subr.bf16.mxu0 %v6873_v63  ;;  %v4884_v63 = vrot.slane %v4486_v18, 4  ;;  %v6888_v59 = vld [vmem:[%s8584_s1 + $0x614] ss:$8 sps:$4 sm:$0xff]   ;;  %v2439_v57 = vrot.slane %v2437_v32, 3 }
 0x19c   : > { %2153 = vmatprep.mubr.bf16.mxu1 %v6921_v2 }
 0x19d   : > { %v4885_v56 = vor.u32 %v4884_v63, %v4883_v7 }
 0x19e   : > { %4966 = vmatpush1.bf16.msra.mxu0 %v6871_v51  ;;  %v8386_v51 = vcombine.low %v6903_v19, %v6904_v55 }
 0x19f   : > { %5134 = vmatprep.subr.bf16.mxu0 %v6881_v46 }
 0x1a0   : > { %5964 = vmatmul.mubr.msk.bf16.gmra.mrb[8].mxu0 %vm304_vm0, %v4699_v35  ;;  %v2239_v18 = vrot.slane %v8386_v51, 3  ;;  %v4888_v35 = vrot.slane %v4495_v34, 4 }
 0x1a1   : > { %4821 = vmatprep.mubr.bf16.mxu0 %v6921_v2 }
 0x1a2   : > { %v4889_v6 = vor.u32 %v4888_v35, %v4887_v30 }
 0x1a3   : > { %5659 = vmatmul.mubr.msk.bf16.gmra.mrb[16].mxu1 %vm304_vm0, %v2025_v43  ;;  %v6889_v43 = vld [vmem:[%s8584_s1 + $0x620] ss:$8 sps:$4 sm:$0xff]  }
 0x1a4   : > { %2330 = vmatprep.mubr.bf16.mxu1 %v6921_v2  ;;  %v4890_v44 = vsel %vm1992_vm7, %v4885_v56, %v4889_v6 }
 0x1a8   : > { %5965 = vmatmul.mubr.msk.bf16.gmra.mrb[12].mxu0 %vm304_vm0, %v4701_v29 }
 0x1a9   : > { %4831 = vmatprep.mubr.bf16.mxu0 %v6921_v2 }
 0x1ab   : > { %5682 = vmatmul.mubr.msk.bf16.vlgmr.msra.gmra.mrb[0].mxu1 %vm304_vm0, %v7908_v9  ;;  %v4880_v9 = vrot.slane %v4477_v21, 4  ;;  %v2237_v21 = vrot.slane %v8353_v53, 3 }
 0x1ac   : > { %2519 = vmatpush1.bf16.msra.mxu1 %v6861_v0  ;;  %2340 = vmatprep.mubr.bf16.mxu1 %v6921_v2  ;;  %v8415_v0 = vld [vmem:[%s6994_s16 + $0x30] ss:$0 sps:$4 sm:$0x33]  }
 0x1ad   : > { %2520 = vmatprep.subr.bf16.mxu1 %v6870_v1  ;;  %v4881_v54 = vor.u32 %v4880_v9, %v4879_v28  ;;  %v2238_v36 = vsel %vm1813_vm6, %v2235_v17, %v2237_v21  ;;  %v6891_v17 = vld [vmem:[%s8584_s1 + $0x624] ss:$8 sps:$4 sm:$0xff]   ;;  %v2240_v29 = vsel %vm1813_vm6, %v2237_v21, %v2239_v18  ;;  %v2241_v34 = vrot.slane %v8415_v0, 3  ;;  %v6907_v9 = vld [vmem:[%s8584_s1 + $0x314] ss:$8 sps:$4 sm:$0xff]  }
 0x1ae   : > { %v4891_v1 = vrot.slane %v4501_v25, 3  ;;  %v2440_v28 = vshll.u32 %v8353_v53, 16  ;;  %v6909_v53 = vld [vmem:[%s8584_s1 + $0x324] ss:$8 sps:$4 sm:$0xff]   ;;  %v2449_v21 = vshll.u32 %v8386_v51, 16 }
 0x1af   : > { %v4882_v5 = vsel %vm1992_vm7, %v4878_v62, %v4881_v54  ;;  %v4886_v46 = vsel %vm1992_vm7, %v4881_v54, %v4885_v56  ;;  %v2242_v23 = vsel %vm1813_vm6, %v2239_v18, %v2241_v34  ;;  %v6910_v62 = vld [vmem:[%s8584_s1 + $0x320] ss:$8 sps:$4 sm:$0xff]   ;;  %v2446_v54 = vshrl.u32 %v8386_v51, 16 }
 0x1b0   : > { %2521 = vmatpush1.bf16.msra.mxu1 %v6868_v3  ;;  %5966 = vmatmul.mubr.msk.bf16.gmra.mrb[16].mxu0 %vm304_vm0, %v4703_v15  ;;  %v4893_v3 = vor.u32 %v4892_v13, %v4891_v1  ;;  %v4896_v15 = vshrl.u32 %v8323_v50, 16  ;;  %v2451_v63 = vrot.slane %v2449_v21, 4 }
 0x1b1   : > { %2522 = vmatprep.subr.bf16.mxu1 %v6877_v14  ;;  %4991 = vmatprep.mubr.bf16.mxu0 %v6921_v2  ;;  %v4899_v14 = vshll.u32 %v8323_v50, 16  ;;  %v6906_v50 = vld [vmem:[%s8584_s1 + $0x300] ss:$8 sps:$4 sm:$0xff]   ;;  %v2448_v7 = vrot.slane %v2446_v54, 3 }
 0x1b2   : > { %v4894_v25 = vsel %vm1992_vm7, %v4889_v6, %v4893_v3  ;;  %v4898_v60 = vrot.slane %v4896_v15, 3 }
 0x1b3   : > { %5683 = vmatmul.mubr.msk.bf16.gmra.mrb[4].mxu1 %vm304_vm0, %v7928_v58  ;;  %v6879_v58 = vld [vmem:[%s8584_s1 + $0x600] ss:$8 sps:$4 sm:$0xff]   ;;  %v4901_v61 = vrot.slane %v4899_v14, 4 }
 0x1b4   : > { %2350 = vmatprep.mubr.bf16.mxu1 %v6921_v2  ;;  %2523 = vmatpush1.bf16.msra.mxu1 %v6875_v10  ;;  %v2442_v10 = vrot.slane %v2440_v28, 4 }
 0x1b5   : > { %2524 = vmatprep.subr.bf16.mxu1 %v6884_v16  ;;  %v4902_v22 = vor.u32 %v4901_v61, %v4898_v60 }
 0x1b6   : > { %v2443_v16 = vor.u32 %v2442_v10, %v2439_v57 }
 0x1b7   : > { %v4903_v11 = vsel %vm1992_vm7, %v4893_v3, %v4902_v22 }
 0x1b8   : > { %2525 = vmatpush1.bf16.msra.mxu1 %v6882_v41  ;;  %5983 = vmatmul.mubr.msk.bf16.vlgmr.msra.gmra.mrb[0].mxu0 %vm304_vm0, %v4882_v5  ;;  %v5996_v41 = vcombine.low %v7946_v40, %v7949_v20  ;;  %v6911_v5 = vld [vmem:[%s8584_s1 + $0x334] ss:$8 sps:$4 sm:$0xff]   ;;  %v2452_v40 = vor.u32 %v2451_v63, %v2448_v7  ;;  %v2455_v20 = vshrl.u32 %v8415_v0, 16 }
 0x1b9   : > { %6036 = vmatprep.subr.bf16.mxu1 %v6905_v42  ;;  %5001 = vmatprep.mubr.bf16.mxu0 %v6921_v2  ;;  %v5998_v42 = vcombine.low %v7991_v33, %v8029_v24 }
 0x1ba   : > { %5135 = vmatpush1.bf16.msra.mxu0 %v6879_v58  ;;  %v6912_v58 = vld [vmem:[%s8584_s1 + $0x330] ss:$8 sps:$4 sm:$0xff]   ;;  %v2457_v19 = vrot.slane %v2455_v20, 3 }
 0x1bb   : > { %5684 = vmatmul.mubr.msk.bf16.gmra.mrb[8].mxu1 %vm304_vm0, %v2238_v36  ;;  %5136 = vmatprep.subr.bf16.mxu0 %v6888_v59  ;;  %v5997_v59 = vcombine.low %v7952_v37, %v7988_v39  ;;  %v2453_v36 = vsel %vm1992_vm7, %v2443_v16, %v2452_v40  ;;  %v5999_v37 = vcombine.low %v8032_v26, %v8061_v49  ;;  %v5062_v39 = vld [vmem:[%s6994_s16 + $0x3c] sm:$0x7]  ;;  %v5239_v49 = vlaneseq }
 0x1bc   : > { %2360 = vmatprep.mubr.bf16.mxu1 %v6921_v2  ;;  %v6000_v33 = vcombine.low %v8064_v38, %v5062_v39 }
 0x1be   : > { %5137 = vmatpush1.bf16.msra.mxu0 %v6886_v52 }
 0x1bf   : > { %5138 = vmatprep.subr.bf16.mxu0 %v6891_v17 }
 0x1c0   : > { %5984 = vmatmul.mubr.msk.bf16.gmra.mrb[4].mxu0 %vm304_vm0, %v4886_v46 }
 0x1c1   : > { %5011 = vmatprep.mubr.bf16.mxu0 %v6921_v2 }
 0x1c2   : > { %5139 = vmatpush1.bf16.msra.mxu0 %v6889_v43 }
 0x1c3   : > { %5685 = vmatmul.mubr.msk.bf16.gmra.mrb[12].mxu1 %vm304_vm0, %v2240_v29  ;;  %5140 = vmatprep.subr.bf16.mxu0 %v6894_v47 }
 0x1c4   : > { %2370 = vmatprep.mubr.bf16.mxu1 %v6921_v2 }
 0x1c6   : > { %5141 = vmatpush1.bf16.msra.mxu0 %v6892_v12 }
 0x1c8   : > { %5985 = vmatmul.mubr.msk.bf16.gmra.mrb[8].mxu0 %vm304_vm0, %v4890_v44 }
 0x1c9   : > { %5021 = vmatprep.mubr.bf16.mxu0 %v6921_v2 }
 0x1cb   : > { %5686 = vmatmul.mubr.msk.bf16.gmra.mrb[16].mxu1 %vm304_vm0, %v2242_v23 }
 0x1cc   : > { %2550 = vmatprep.mubr.bf16.mxu1 %v6921_v2 }
 0x1d0   : > { %5986 = vmatmul.mubr.msk.bf16.gmra.mrb[12].mxu0 %vm304_vm0, %v4894_v25 }
 0x1d1   : > { %5031 = vmatprep.mubr.bf16.mxu0 %v6921_v2 }
 0x1d3   : > { %5703 = vmatmul.mubr.msk.bf16.vlgmr.msra.gmra.mrb[0].mxu1 %vm304_vm0, %v8077_v45  ;;  %v6908_v45 = vld [vmem:[%s8584_s1 + $0x310] ss:$8 sps:$4 sm:$0xff]  }
 0x1d4   : > { %6040 = vmatpush1.bf16.msra.mxu1 %v6906_v50  ;;  %2560 = vmatprep.mubr.bf16.mxu1 %v6921_v2 }
 0x1d5   : > { %6037 = vmatprep.subr.bf16.mxu1 %v6907_v9 }
 0x1d8   : > { %6041 = vmatpush1.bf16.msra.mxu1 %v6908_v45  ;;  %5987 = vmatmul.mubr.msk.bf16.gmra.mrb[16].mxu0 %vm304_vm0, %v4903_v11 }
 0x1d9   : > { %6038 = vmatprep.subr.bf16.mxu1 %v6909_v53  ;;  %5166 = vmatprep.mubr.bf16.mxu0 %v6921_v2 }
 0x1db   : > { %5704 = vmatmul.mubr.msk.bf16.gmra.mrb[4].mxu1 %vm304_vm0, %v8114_v27  ;;  %v2444_v27 = vsel %vm1992_vm7, %v8100_v48, %v2443_v16  ;;  %v2458_v48 = vshll.u32 %v8415_v0, 16 }
 0x1dc   : > { %2570 = vmatprep.mubr.bf16.mxu1 %v6921_v2  ;;  %6042 = vmatpush1.bf16.msra.mxu1 %v6910_v62 }
 0x1dd   : > { %6039 = vmatprep.subr.bf16.mxu1 %v6911_v5  ;;  %v2460_v55 = vrot.slane %v2458_v48, 4 }
 0x1df   : > { %v2461_v51 = vor.u32 %v2460_v55, %v2457_v19 }
 0x1e0   : > { %6043 = vmatpush1.bf16.msra.mxu1 %v6912_v58  ;;  %6009 = vmatmul.mubr.msk.bf16.vlgmr.msra.gmra.mrb[0].mxu0 %vm304_vm0, %v5996_v41 }
 0x1e1   : > { %5176 = vmatprep.mubr.bf16.mxu0 %v6921_v2  ;;  %v2462_v56 = vsel %vm1992_vm7, %v2452_v40, %v2461_v51 }
 0x1e3   : > { %5705 = vmatmul.mubr.msk.bf16.gmra.mrb[8].mxu1 %vm304_vm0, %v2444_v27 }
 0x1e4   : > { %2580 = vmatprep.mubr.bf16.mxu1 %v6921_v2 }
 0x1e8   : > { %6010 = vmatmul.mubr.msk.bf16.gmra.mrb[4].mxu0 %vm304_vm0, %v5997_v59 }
 0x1e9   : > { %5186 = vmatprep.mubr.bf16.mxu0 %v6921_v2 }
 0x1eb   : > { %5706 = vmatmul.mubr.msk.bf16.gmra.mrb[12].mxu1 %vm304_vm0, %v2453_v36 }
 0x1ec   : > { %2590 = vmatprep.mubr.bf16.mxu1 %v6921_v2 }
 0x1f0   : > { %6011 = vmatmul.mubr.msk.bf16.gmra.mrb[8].mxu0 %vm304_vm0, %v5998_v42 }
 0x1f1   : > { %5196 = vmatprep.mubr.bf16.mxu0 %v6921_v2 }
 0x1f3   : > { %5707 = vmatmul.mubr.msk.bf16.gmra.mrb[16].mxu1 %vm304_vm0, %v2462_v56 }
 0x1f4   : > { %2745 = vmatprep.mubr.bf16.mxu1 %v6921_v2 }
 0x1f8   : > { %6012 = vmatmul.mubr.msk.bf16.gmra.mrb[12].mxu0 %vm304_vm0, %v5999_v37 }
 0x1f9   : > { %5206 = vmatprep.mubr.bf16.mxu0 %v6921_v2 }
 0x1fb   : > { %5731 = vmatmul.mubr.msk.bf16.vlgmr.msra.gmra.mrb[8].mxu1 %vm304_vm0, %v7099_v4  ;;  %v5240_v4 = vshrl.u32 %v5239_v49, 7 }
 0x1fc   : > { %2755 = vmatprep.mubr.bf16.mxu1 %v6921_v2 }
 0x1fd   : > { %v5241_v38 = vsub.s32 0, %v5240_v4  ;;  %v5245_v35 = vsub.s32 1, %v5240_v4 }
 0x200   : > { %6013 = vmatmul.mubr.msk.bf16.gmra.mrb[16].mxu0 %vm304_vm0, %v6000_v33 }
 0x203   : > { %5732 = vmatmul.mubr.msk.bf16.gmra.mrb[12].mxu1 %vm304_vm0, %v7143_v31  ;;  %v5237_v31 = vld [vmem:[%s8585_s2] sm:$0x3] }
 0x204   : > { %2765 = vmatprep.mubr.bf16.mxu1 %v6921_v2  ;;  %v8516_v43 = vrot.slane %v5237_v31, %v5241_v38  ;;  %v8518_v47 = vrot.slane %v5237_v31, %v5245_v35 }
 0x20b   : > { %5733 = vmatmul.mubr.msk.bf16.gmra.mrb[16].mxu1 %vm304_vm0, %v7195_v8  ;;  %vm5366_vm0 = vmor %vm5365_vm15, %vm5363_vm14 }
 0x2a6   : > { %v2552_v24 = vpop.f32.mrb[0].mxu1 }
 0x2a7   : > { %v2554_v26 = vpop.f32.mrb[1].mxu1 }
 0x2a8   : > { %v2556_v52 = vpop.f32.mrb[2].mxu1 }
 0x2a9   : > { %v2558_v17 = vpop.f32.mrb[3].mxu1 }
 0x2ae   : > { %v2562_v18 = vpop.f32.mrb[4].mxu1 }
 0x2af   : > { %v2564_v46 = vpop.f32.mrb[5].mxu1 }
 0x2b0   : > { %v2566_v30 = vpop.f32.mrb[6].mxu1 }
 0x2b1   : > { %v2568_v2 = vpop.f32.mrb[7].mxu1 }
 0x2b3   : > { %v5168_v8 = vpop.f32.mrb[0].mxu0 }
 0x2b4   : > { %v6044_v29 = vadd.f32 %v5168_v8, %v2552_v24  ;;  %v5170_v0 = vpop.f32.mrb[1].mxu0 }
 0x2b5   : > { %v6045_v6 = vadd.f32 %v5170_v0, %v2554_v26  ;;  %v5172_v12 = vpop.f32.mrb[2].mxu0 }
 0x2b6   : > { %v5249_v34 = vadd.f32 %v6044_v29, %v8516_v43  ;;  %v6046_v44 = vadd.f32 %v5172_v12, %v2556_v52  ;;  %v5174_v1 = vpop.f32.mrb[3].mxu0 }
 0x2b7   : > { %v5250_v13 = vadd.f32 %v6045_v6, %v8518_v47  ;;  %v6047_v23 = vadd.f32 %v5174_v1, %v2558_v17 }
 0x2b8   : > { %v5269_v3 = vmax.f32 %v5249_v34, 0.0  ;;  %v5251_v15 = vadd.f32 %v6046_v44, %v8516_v43 }
 0x2b9   : > { %v5270_v14 = vmax.f32 %v5250_v13, 0.0  ;;  %v5252_v25 = vadd.f32 %v6047_v23, %v8518_v47 }
 0x2ba   : > { %v5271_v61 = vmax.f32 %v5251_v15, 0.0 }
 0x2bb   : > { %v6026_v22 = vpack.c.bf16 %v5270_v14, %v5269_v3  ;;  %v5272_v50 = vmax.f32 %v5252_v25, 0.0  ;;  %v5178_v32 = vpop.f32.mrb[4].mxu0 }
 0x2bc   : > { %v6048_v28 = vadd.f32 %v5178_v32, %v2562_v18  ;;  %v5180_v9 = vpop.f32.mrb[5].mxu0 }
 0x2bd   : > { %5352 = vst.msk [vmem:[%s8528_s29] sm:$0xff] %vm8530_vm10, %v6026_v22  ;;  %v6027_v11 = vpack.c.bf16 %v5272_v50, %v5271_v61  ;;  %v6049_v45 = vadd.f32 %v5180_v9, %v2564_v46  ;;  %v5182_v57 = vpop.f32.mrb[6].mxu0 }
 0x2be   : > { %v5253_v10 = vadd.f32 %v6048_v28, %v8516_v43  ;;  %v6050_v53 = vadd.f32 %v5182_v57, %v2566_v30  ;;  %v5184_v16 = vpop.f32.mrb[7].mxu0 }
 0x2bf   : > { %5353 = vst.msk [vmem:[%s8528_s29 + $0x8] sm:$0xff] %vm8530_vm10, %v6027_v11  ;;  %v5254_v62 = vadd.f32 %v6049_v45, %v8518_v47  ;;  %v6051_v54 = vadd.f32 %v5184_v16, %v2568_v2 }
 0x2c0   : > { %v5273_v21 = vmax.f32 %v5253_v10, 0.0  ;;  %v5255_v41 = vadd.f32 %v6050_v53, %v8516_v43 }
 0x2c1   : > { %v5274_v5 = vmax.f32 %v5254_v62, 0.0  ;;  %v5256_v27 = vadd.f32 %v6051_v54, %v8518_v47 }
 0x2c2   : > { %v5275_v7 = vmax.f32 %v5255_v41, 0.0 }
 0x2c3   : > { %v6028_v63 = vpack.c.bf16 %v5274_v5, %v5273_v21  ;;  %v5276_v58 = vmax.f32 %v5256_v27, 0.0  ;;  %v5188_v40 = vpop.f32.mrb[8].mxu0 }
 0x2c4   : > { %v5190_v20 = vpop.f32.mrb[9].mxu0 }
 0x2c5   : > { %5354 = vst.msk [vmem:[%s8528_s29 + $0x10] sm:$0xff] %vm8530_vm10, %v6028_v63  ;;  %v6029_v48 = vpack.c.bf16 %v5276_v58, %v5275_v7  ;;  %v5192_v59 = vpop.f32.mrb[10].mxu0 }
 0x2c6   : > { %v5194_v36 = vpop.f32.mrb[11].mxu0 }
 0x2c7   : > { %5355 = vst.msk [vmem:[%s8528_s29 + $0x18] sm:$0xff] %vm8530_vm10, %v6029_v48 }
 0x2cb   : > { %v5198_v19 = vpop.f32.mrb[12].mxu0 }
 0x2cc   : > { %v5200_v55 = vpop.f32.mrb[13].mxu0 }
 0x2cd   : > { %v5202_v42 = vpop.f32.mrb[14].mxu0 }
 0x2ce   : > { %v2747_v51 = vpop.f32.mrb[8].mxu1  ;;  %v5204_v39 = vpop.f32.mrb[15].mxu0 }
 0x2cf   : > { %v6052_v56 = vadd.f32 %v5188_v40, %v2747_v51  ;;  %v2749_v37 = vpop.f32.mrb[9].mxu1 }
 0x2d0   : > { %v6053_v33 = vadd.f32 %v5190_v20, %v2749_v37  ;;  %v2751_v24 = vpop.f32.mrb[10].mxu1 }
 0x2d1   : > { %v5257_v26 = vadd.f32 %v6052_v56, %v8516_v43  ;;  %v6054_v49 = vadd.f32 %v5192_v59, %v2751_v24  ;;  %v2753_v52 = vpop.f32.mrb[11].mxu1 }
 0x2d2   : > { %v5258_v17 = vadd.f32 %v6053_v33, %v8518_v47  ;;  %v6055_v4 = vadd.f32 %v5194_v36, %v2753_v52 }
 0x2d3   : > { %v5277_v18 = vmax.f32 %v5257_v26, 0.0  ;;  %v5259_v46 = vadd.f32 %v6054_v49, %v8516_v43  ;;  %v5208_v31 = vpop.f32.mrb[16].mxu0 }
 0x2d4   : > { %v5278_v38 = vmax.f32 %v5258_v17, 0.0  ;;  %v5260_v30 = vadd.f32 %v6055_v4, %v8518_v47  ;;  %v5210_v2 = vpop.f32.mrb[17].mxu0 }
 0x2d5   : > { %v5279_v35 = vmax.f32 %v5259_v46, 0.0  ;;  %v5212_v6 = vpop.f32.mrb[18].mxu0 }
 0x2d6   : > { %v6030_v8 = vpack.c.bf16 %v5278_v38, %v5277_v18  ;;  %v5280_v29 = vmax.f32 %v5260_v30, 0.0  ;;  %v2757_v0 = vpop.f32.mrb[12].mxu1  ;;  %v5214_v44 = vpop.f32.mrb[19].mxu0 }
 0x2d7   : > { %v6056_v12 = vadd.f32 %v5198_v19, %v2757_v0  ;;  %v2759_v34 = vpop.f32.mrb[13].mxu1  ;;  %v5367_v19 = vld [vmem:[%s8528_s29 + $0x48] sm:$0x77] }
 0x2d8   : > { %5356 = vst.msk [vmem:[%s8528_s29 + $0x20] sm:$0xff] %vm8530_vm10, %v6030_v8  ;;  %v6031_v1 = vpack.c.bf16 %v5280_v29, %v5279_v35  ;;  %v6057_v13 = vadd.f32 %v5200_v55, %v2759_v34  ;;  %v2761_v23 = vpop.f32.mrb[14].mxu1 }
 0x2d9   : > { %v5261_v3 = vadd.f32 %v6056_v12, %v8516_v43  ;;  %v6058_v15 = vadd.f32 %v5202_v42, %v2761_v23  ;;  %v2763_v14 = vpop.f32.mrb[15].mxu1 }
 0x2da   : > { %5357 = vst.msk [vmem:[%s8528_s29 + $0x28] sm:$0xff] %vm8530_vm10, %v6031_v1  ;;  %v5262_v25 = vadd.f32 %v6057_v13, %v8518_v47  ;;  %v6059_v61 = vadd.f32 %v5204_v39, %v2763_v14 }
 0x2db   : > { %v5281_v22 = vmax.f32 %v5261_v3, 0.0  ;;  %v5263_v50 = vadd.f32 %v6058_v15, %v8516_v43 }
 0x2dc   : > { %v5282_v32 = vmax.f32 %v5262_v25, 0.0  ;;  %v5264_v28 = vadd.f32 %v6059_v61, %v8518_v47 }
 0x2dd   : > { %v5283_v9 = vmax.f32 %v5263_v50, 0.0 }
 0x2de   : > { %v6032_v11 = vpack.c.bf16 %v5282_v32, %v5281_v22  ;;  %v5284_v45 = vmax.f32 %v5264_v28, 0.0  ;;  %v2767_v57 = vpop.f32.mrb[16].mxu1 }
 0x2df   : > { %v6060_v10 = vadd.f32 %v5208_v31, %v2767_v57  ;;  %v2769_v53 = vpop.f32.mrb[17].mxu1 }
 0x2e0   : > { %5358 = vst.msk [vmem:[%s8528_s29 + $0x30] sm:$0xff] %vm8530_vm10, %v6032_v11  ;;  %v6033_v16 = vpack.c.bf16 %v5284_v45, %v5283_v9  ;;  %v6061_v62 = vadd.f32 %v5210_v2, %v2769_v53  ;;  %v2771_v54 = vpop.f32.mrb[18].mxu1 }
 0x2e1   : > { %v5265_v21 = vadd.f32 %v6060_v10, %v8516_v43  ;;  %v6062_v41 = vadd.f32 %v5212_v6, %v2771_v54  ;;  %v2773_v5 = vpop.f32.mrb[19].mxu1 }
 0x2e2   : > { %5359 = vst.msk [vmem:[%s8528_s29 + $0x38] sm:$0xff] %vm8530_vm10, %v6033_v16  ;;  %v5266_v27 = vadd.f32 %v6061_v62, %v8518_v47  ;;  %v6063_v7 = vadd.f32 %v5214_v44, %v2773_v5 }
 0x2e3   : > { %v5285_v63 = vmax.f32 %v5265_v21, 0.0  ;;  %v5267_v58 = vadd.f32 %v6062_v41, %v8516_v43 }
 0x2e4   : > { %v5286_v40 = vmax.f32 %v5266_v27, 0.0  ;;  %v5268_v20 = vadd.f32 %v6063_v7, %v8518_v47 }
 0x2e5   : > { %v5287_v48 = vmax.f32 %v5267_v58, 0.0 }
 0x2e6   : > { %v6034_v59 = vpack.c.bf16 %v5286_v40, %v5285_v63  ;;  %v5288_v36 = vmax.f32 %v5268_v20, 0.0 }
 0x2e8   : > { %5360 = vst.msk [vmem:[%s8528_s29 + $0x40] sm:$0xff] %vm8530_vm10, %v6034_v59  ;;  %v6035_v55 = vpack.c.bf16 %v5288_v36, %v5287_v48 }
 0x2ea   : > { %v5368_v51 = vsel %vm5366_vm0, %v6035_v55, %v5367_v19 }
 0x2eb   : > { %5369 = vst [vmem:[%s8528_s29 + $0x48] sm:$0x77] %v5368_v51 }
 0x2ec PF: > { %s13_s12 = sadd.s32 1, %s6919_s12  }
 0x2ed   : > { %p10_p4 = scmp.ge.s32.totalorder %s13_s12, 4  }
 0x2ef   :  { %12 = sbr.rel (!%p10_p4) target bundleno = 1 (0x1), region = 86 }

// kernel: alexnet_features.12
= control target key start
LH: loop header
LB: loop body
LE: loop exit
PB: predicated region body
PF: predicated region fallthrough
CT: control target
= control target key end

     0   :  { %s4810_s12 = smov 0   ;;  %s6108_s0 = inlined_call_operand.vmem [shape: bf16[2,30,192], index: 0, kind: input, shape index: {}]   ;;  %s6109_s1 = inlined_call_operand.vmem [shape: bf16[9,192,384], index: 1, kind: input, shape index: {}]   ;;  %s6110_s2 = inlined_call_operand.vmem [shape: f32[1,384], index: 2, kind: input, shape index: {}]   ;;  %s6111_s3 = inlined_call_operand.vmem [shape: bf16[2,15,384], index: 3, kind: output, shape index: {}]  }
   0x1 LB: > { %s3517_s13 = sadd.s32 4294967295, %s4787_s12   ;;  %p3521_p0 = scmp.ge.s32.totalorder %s4787_s12, 1  ;;  %s4787_s12 = sphi %s4810_s12, %s13_s12  }
   0x2   : > { %p137_p1 = scmp.lt.s32.totalorder %s4787_s12, 3 }
   0x4   : > { %p138_p2 = pnand %p3521_p0, %p137_p1 }
   0x5   : > { %v4326_v0 = vld [vmem:[%s6109_s1 + $0x124] ss:$12 sps:$4 sm:$0xff] (!%p138_p2)   ;;  %v4789_v1 = vmov (!%p138_p2), 0   ;;  %v4328_v2 = vld [vmem:[%s6109_s1 + $0x128] ss:$12 sps:$4 sm:$0xff] (!%p138_p2)   ;;  %p161_p3 = scmp.lt.s32.totalorder (!%p138_p2), %s3517_s13, 1 }
   0x6   : > { %141 = sbr.rel (%p138_p2) target bundleno = 662 (0x296), region = 32  ;;  %533 = vmatprep.subr.bf16.mxu1 (!%p138_p2), %v4789_v1  ;;  %490 = vmatprep.subr.bf16.mxu0 (!%p138_p2), %v4326_v0  ;;  %v4329_v3 = vld [vmem:[%s6109_s1 + $0x120] ss:$12 sps:$4 sm:$0xff] (!%p138_p2)   ;;  %v4330_v4 = vld [vmem:[%s6109_s1 + $0x13c] ss:$12 sps:$4 sm:$0xff] (!%p138_p2)   ;;  %vm486_vm0 = vcmask (!%p138_p2), 523264  }
   0x7   : > { %534 = vmatpush1.bf16.msra.mxu1 (!%p138_p2), %v4328_v2  ;;  %491 = vmatpush1.bf16.msra.mxu0 (!%p138_p2), %v4329_v3  ;;  %v4332_v5 = vld [vmem:[%s6109_s1 + $0x140] ss:$12 sps:$4 sm:$0xff] (!%p138_p2)   ;;  %v4333_v6 = vld [vmem:[%s6109_s1 + $0x138] ss:$12 sps:$4 sm:$0xff] (!%p138_p2)   ;;  %v4337_v9 = vld [vmem:[%s6109_s1 + $0x150] ss:$12 sps:$4 sm:$0xff] (!%p138_p2)  }
   0x8   : > { %535 = vmatprep.subr.bf16.mxu1 (!%p138_p2), %v4789_v1  ;;  %492 = vmatprep.subr.bf16.mxu0 (!%p138_p2), %v4330_v4  ;;  %v4334_v7 = vld [vmem:[%s6109_s1 + $0x154] ss:$12 sps:$4 sm:$0xff] (!%p138_p2)   ;;  %v4336_v8 = vld [vmem:[%s6109_s1 + $0x158] ss:$12 sps:$4 sm:$0xff] (!%p138_p2)   ;;  %v4340_v11 = vld [vmem:[%s6109_s1 + $0x170] ss:$12 sps:$4 sm:$0xff] (!%p138_p2)  }
   0x9   : > { %v4338_v10 = vld [vmem:[%s6109_s1 + $0x16c] ss:$12 sps:$4 sm:$0xff] (!%p138_p2)   ;;  %v4341_v12 = vld [vmem:[%s6109_s1 + $0x168] ss:$12 sps:$4 sm:$0xff] (!%p138_p2)   ;;  %v4342_v13 = vld [vmem:[%s6109_s1 + $0x184] ss:$12 sps:$4 sm:$0xff] (!%p138_p2)  }
   0xa   : > { %v4344_v14 = vld [vmem:[%s6109_s1 + $0x188] ss:$12 sps:$4 sm:$0xff] (!%p138_p2)   ;;  %v4345_v15 = vld [vmem:[%s6109_s1 + $0x180] ss:$12 sps:$4 sm:$0xff] (!%p138_p2)   ;;  %v4349_v18 = vld [vmem:[%s6109_s1 + $0x198] ss:$12 sps:$4 sm:$0xff] (!%p138_p2)  }
   0xb   : > { %536 = vmatpush1.bf16.msra.mxu1 (!%p138_p2), %v4332_v5  ;;  %493 = vmatpush1.bf16.msra.mxu0 (!%p138_p2), %v4333_v6  ;;  %v4346_v16 = vld [vmem:[%s6109_s1 + $0x19c] ss:$12 sps:$4 sm:$0xff] (!%p138_p2)   ;;  %v4348_v17 = vld [vmem:[%s6109_s1 + $0x1a0] ss:$12 sps:$4 sm:$0xff] (!%p138_p2)   ;;  %v4352_v20 = vld [vmem:[%s6109_s1 + $0x1b8] ss:$12 sps:$4 sm:$0xff] (!%p138_p2)  }
   0xc   : > { %537 = vmatprep.subr.bf16.mxu1 (!%p138_p2), %v4789_v1  ;;  %494 = vmatprep.subr.bf16.mxu0 (!%p138_p2), %v4334_v7  ;;  %v4350_v19 = vld [vmem:[%s6109_s1 + $0x1b4] ss:$12 sps:$4 sm:$0xff] (!%p138_p2)   ;;  %v4353_v21 = vld [vmem:[%s6109_s1 + $0x1b0] ss:$12 sps:$4 sm:$0xff] (!%p138_p2)   ;;  %v4354_v22 = vld [vmem:[%s6109_s1 + $0x1cc] ss:$12 sps:$4 sm:$0xff] (!%p138_p2)  }
   0xd   : > { %s6115_s13 = smov (!%p161_p3, %s3517_s13), 1  ;;  %v4356_v23 = vld [vmem:[%s6109_s1 + $0x1d0] ss:$12 sps:$4 sm:$0xff]   ;;  %v4357_v24 = vld [vmem:[%s6109_s1 + $0x1c8] ss:$12 sps:$4 sm:$0xff]   ;;  %vm918_vm1 = vcmask 1046528  }
   0xe   : > { %s4279_s27 = sshll.u32 %s6115_s13, 5  ;;  %v4358_v27 = vld [vmem:[%s6109_s1 + $0x1e4] ss:$12 sps:$4 sm:$0xff]   ;;  %v4360_v29 = vld [vmem:[%s6109_s1 + $0x1e8] ss:$12 sps:$4 sm:$0xff]   ;;  %vm1654_vm3 = vcmask 1044480  }
   0xf   : > { %538 = vmatpush1.bf16.msra.mxu1 %v4336_v8  ;;  %495 = vmatpush1.bf16.msra.mxu0 %v4337_v9  ;;  %s4901_s9 = scalar_lea.vmem %s6108_s0, %s4279_s27  ;;  %v4361_v32 = vld [vmem:[%s6109_s1 + $0x1e0] ss:$12 sps:$4 sm:$0xff]   ;;  %v4362_v33 = vld [vmem:[%s6109_s1 + $0x1fc] ss:$12 sps:$4 sm:$0xff]   ;;  %v4365_v38 = vld [vmem:[%s6109_s1 + $0x1f8] ss:$12 sps:$4 sm:$0xff]  }
  0x10   : > { %539 = vmatprep.subr.bf16.mxu1 %v4789_v1  ;;  %496 = vmatprep.subr.bf16.mxu0 %v4338_v10  ;;  %v172_v25 = vld [vmem:[%s4901_s9] sm:$0xff]  ;;  %v4912_v26 = vld [vmem:[%s4901_s9 + $0x8] sm:$0xff]  ;;  %v4369_v42 = vld [vmem:[%s6109_s1 + $0x210] ss:$12 sps:$4 sm:$0xff]   ;;  %vm1272_vm2 = vsmask.f32 5376 }
  0x11   : > { %v3574_v28 = vcombine.high %v172_v25, %v4912_v26  ;;  %v4929_v35 = vcombine.low %v172_v25, %v4912_v26  ;;  %v4364_v36 = vld [vmem:[%s6109_s1 + $0x200] ss:$12 sps:$4 sm:$0xff]   ;;  %v4368_v41 = vld [vmem:[%s6109_s1 + $0x218] ss:$12 sps:$4 sm:$0xff]   ;;  %v4372_v46 = vld [vmem:[%s6109_s1 + $0x230] ss:$12 sps:$4 sm:$0xff]  }
  0x12   : > { %v4366_v39 = vld [vmem:[%s6109_s1 + $0x214] ss:$12 sps:$4 sm:$0xff]   ;;  %v4370_v43 = vld [vmem:[%s6109_s1 + $0x22c] ss:$12 sps:$4 sm:$0xff]   ;;  %v4378_v48 = vld [vmem:[%s6109_s1 + $0x4] ss:$12 sps:$4 sm:$0xff]  }
  0x13   : > { %540 = vmatpush1.bf16.msra.mxu1 %v4340_v11  ;;  %497 = vmatpush1.bf16.msra.mxu0 %v4341_v12  ;;  %v287_v30 = vshrl.u32 %v3574_v28, 16  ;;  %v289_v31 = vshll.u32 %v3574_v28, 16  ;;  %v282_v40 = vshll.u32 %v4929_v35, 16  ;;  %v280_v44 = vshrl.u32 %v4929_v35, 16  ;;  %v4373_v47 = vld [vmem:[%s6109_s1 + $0x228] ss:$12 sps:$4 sm:$0xff]  }
  0x14   : > { %541 = vmatprep.subr.bf16.mxu1 %v4789_v1  ;;  %498 = vmatprep.subr.bf16.mxu0 %v4342_v13  ;;  %v4379_v50 = vld [vmem:[%s6109_s1 + $0x8] ss:$12 sps:$4 sm:$0xff]   ;;  %v4376_v51 = vld [vmem:[%s6109_s1] ss:$12 sps:$4 sm:$0xff]   ;;  %v4380_v54 = vld [vmem:[%s6109_s1 + $0x18] ss:$12 sps:$4 sm:$0xff]  }
  0x15   : > { %v291_v34 = vrot.slane %v289_v31, 1  ;;  %v284_v45 = vrot.slane %v282_v40, 1  ;;  %v4382_v52 = vld [vmem:[%s6109_s1 + $0x1c] ss:$12 sps:$4 sm:$0xff]   ;;  %v4383_v53 = vld [vmem:[%s6109_s1 + $0x20] ss:$12 sps:$4 sm:$0xff]  }
  0x16   : > { %v4386_v55 = vld [vmem:[%s6109_s1 + $0x34] ss:$12 sps:$4 sm:$0xff]   ;;  %v4387_v56 = vld [vmem:[%s6109_s1 + $0x38] ss:$12 sps:$4 sm:$0xff]   ;;  %v4384_v57 = vld [vmem:[%s6109_s1 + $0x30] ss:$12 sps:$4 sm:$0xff]  }
  0x17   : > { %542 = vmatpush1.bf16.msra.mxu1 %v4344_v14  ;;  %499 = vmatpush1.bf16.msra.mxu0 %v4345_v15  ;;  %v292_v37 = vor.u32 %v291_v34, %v287_v30  ;;  %v285_v49 = vor.u32 %v284_v45, %v280_v44  ;;  %v4390_v58 = vld [vmem:[%s6109_s1 + $0x4c] ss:$12 sps:$4 sm:$0xff]   ;;  %v4391_v59 = vld [vmem:[%s6109_s1 + $0x50] ss:$12 sps:$4 sm:$0xff]   ;;  %v4388_v60 = vld [vmem:[%s6109_s1 + $0x48] ss:$12 sps:$4 sm:$0xff]  }
  0x18   : > { %543 = vmatprep.subr.bf16.mxu1 %v4789_v1  ;;  %500 = vmatprep.subr.bf16.mxu0 %v4346_v16  ;;  %v4394_v61 = vld [vmem:[%s6109_s1 + $0x64] ss:$12 sps:$4 sm:$0xff]   ;;  %v4395_v62 = vld [vmem:[%s6109_s1 + $0x68] ss:$12 sps:$4 sm:$0xff]   ;;  %v4392_v63 = vld [vmem:[%s6109_s1 + $0x60] ss:$12 sps:$4 sm:$0xff]  }
  0x19   : > { %3612 = vmatprep.mubr.msk.bf16.mxu1 %vm486_vm0, %v292_v37  ;;  %3611 = vmatprep.mubr.msk.bf16.mxu0 %vm486_vm0, %v292_v37  ;;  %v4398_v0 = vld [vmem:[%s6109_s1 + $0x7c] ss:$12 sps:$4 sm:$0xff]   ;;  %v4399_v2 = vld [vmem:[%s6109_s1 + $0x80] ss:$12 sps:$4 sm:$0xff]   ;;  %v4396_v3 = vld [vmem:[%s6109_s1 + $0x78] ss:$12 sps:$4 sm:$0xff]  }
  0x1a   : > { %v4402_v4 = vld [vmem:[%s6109_s1 + $0x94] ss:$12 sps:$4 sm:$0xff]   ;;  %v4403_v5 = vld [vmem:[%s6109_s1 + $0x98] ss:$12 sps:$4 sm:$0xff]   ;;  %v4400_v6 = vld [vmem:[%s6109_s1 + $0x90] ss:$12 sps:$4 sm:$0xff]  }
  0x1b   : > { %544 = vmatpush1.bf16.msra.mxu1 %v4348_v17  ;;  %501 = vmatpush1.bf16.msra.mxu0 %v4349_v18  ;;  %v4406_v7 = vld [vmem:[%s6109_s1 + $0xac] ss:$12 sps:$4 sm:$0xff]   ;;  %v4407_v8 = vld [vmem:[%s6109_s1 + $0xb0] ss:$12 sps:$4 sm:$0xff]   ;;  %v4404_v9 = vld [vmem:[%s6109_s1 + $0xa8] ss:$12 sps:$4 sm:$0xff]  }
  0x1c   : > { %545 = vmatprep.subr.bf16.mxu1 %v4789_v1  ;;  %502 = vmatprep.subr.bf16.mxu0 %v4350_v19  ;;  %v4410_v10 = vld [vmem:[%s6109_s1 + $0xc4] ss:$12 sps:$4 sm:$0xff]   ;;  %v4411_v11 = vld [vmem:[%s6109_s1 + $0xc8] ss:$12 sps:$4 sm:$0xff]   ;;  %v4408_v12 = vld [vmem:[%s6109_s1 + $0xc0] ss:$12 sps:$4 sm:$0xff]  }
  0x1d   : > { %v4414_v13 = vld [vmem:[%s6109_s1 + $0xdc] ss:$12 sps:$4 sm:$0xff]   ;;  %v4415_v14 = vld [vmem:[%s6109_s1 + $0xe0] ss:$12 sps:$4 sm:$0xff]   ;;  %v4412_v15 = vld [vmem:[%s6109_s1 + $0xd8] ss:$12 sps:$4 sm:$0xff]  }
  0x1e   : > { %v4418_v16 = vld [vmem:[%s6109_s1 + $0xf4] ss:$12 sps:$4 sm:$0xff]   ;;  %v4419_v17 = vld [vmem:[%s6109_s1 + $0xf8] ss:$12 sps:$4 sm:$0xff]   ;;  %v4439_v40 = vld [vmem:[%s6109_s1 + $0x290] ss:$12 sps:$4 sm:$0xff]  }
  0x1f   : > { %546 = vmatpush1.bf16.msra.mxu1 %v4352_v20  ;;  %503 = vmatpush1.bf16.msra.mxu0 %v4353_v21  ;;  %v5071_v18 = vld [vmem:[%s4901_s9] sm:$0xee]  ;;  %v5074_v19 = vld [vmem:[%s4901_s9 + $0x10] sm:$0x11]  ;;  %v4422_v21 = vld [vmem:[%s6109_s1 + $0x10c] ss:$12 sps:$4 sm:$0xff]  }
  0x20   : > { %547 = vmatprep.subr.bf16.mxu1 %v4789_v1  ;;  %504 = vmatprep.subr.bf16.mxu0 %v4354_v22  ;;  %v4416_v20 = vld [vmem:[%s6109_s1 + $0xf0] ss:$12 sps:$4 sm:$0xff]   ;;  %v3700_v22 = vcombine.high %v5071_v18, %v4912_v26  ;;  %v4420_v25 = vld [vmem:[%s6109_s1 + $0x108] ss:$12 sps:$4 sm:$0xff]   ;;  %v4424_v31 = vld [vmem:[%s6109_s1 + $0x240] ss:$12 sps:$4 sm:$0xff]  }
  0x21   : > { %v4427_v30 = vld [vmem:[%s6109_s1 + $0x248] ss:$12 sps:$4 sm:$0xff]   ;;  %v4431_v34 = vld [vmem:[%s6109_s1 + $0x260] ss:$12 sps:$4 sm:$0xff]   ;;  %vm1996_vm4 = vsmask.f32 4352 }
  0x22   : > { %v4434_v37 = vld [vmem:[%s6109_s1 + $0x274] ss:$12 sps:$4 sm:$0xff]   ;;  %v4446_v45 = vld [vmem:[%s6109_s1 + $0x2bc] ss:$12 sps:$4 sm:$0xff]   ;;  %vm2723_vm5 = vsmask.f32 6400 }
  0x23   : > { %548 = vmatpush1.bf16.msra.mxu1 %v4356_v23  ;;  %505 = vmatpush1.bf16.msra.mxu0 %v4357_v24  ;;  %v3702_v23 = vcombine.high %v5074_v19, %v5074_v19  ;;  %v4423_v24 = vld [vmem:[%s6109_s1 + $0x110] ss:$12 sps:$4 sm:$0xff]   ;;  %v4440_v44 = vld [vmem:[%s6109_s1 + $0x2a0] ss:$12 sps:$4 sm:$0xff]   ;;  %vm3105_vm6 = vcmask 1045504   ;;  %s4316_s14 = smul.u32 24, %s6115_s13 }
  0x24   : > { %549 = vmatprep.subr.bf16.mxu1 %v4789_v1  ;;  %506 = vmatprep.subr.bf16.mxu0 %v4358_v27  ;;  %v4426_v27 = vld [vmem:[%s6109_s1 + $0x244] ss:$12 sps:$4 sm:$0xff]   ;;  %vm3449_vm7 = vcmask 1043456   ;;  %vm3450_vm8 = vsmask.f32 3328  ;;  %vm3452_vm9 = vcmask 1047556  }
  0x25   : > { %vm3453_vm10 = vsmask.f32 7424  ;;  %vm6092_vm11 = vmand %vm3449_vm7, %vm3450_vm8  ;;  %s170_s16 = scalar_lea.vmem %s6111_s3, %s4316_s14 }
  0x26   : > { %vm3454_vm12 = vmand %vm3452_vm9, %vm3453_vm10 }
  0x27   : > { %550 = vmatpush1.bf16.msra.mxu1 %v4360_v29  ;;  %507 = vmatpush1.bf16.msra.mxu0 %v4361_v32  ;;  %v923_v29 = vrot.slane %v3702_v23, 1  ;;  %v4430_v32 = vld [vmem:[%s6109_s1 + $0x25c] ss:$12 sps:$4 sm:$0xff]   ;;  %v4476_v23 = vld [vmem:[%s6109_s1 + $0x360] ss:$12 sps:$4 sm:$0xff]   ;;  %vm3455_vm13 = vmor %vm3454_vm12, %vm6092_vm11 }
  0x28   : > { %551 = vmatprep.subr.bf16.mxu1 %v4789_v1  ;;  %508 = vmatprep.subr.bf16.mxu0 %v4362_v33 }
  0x2b   : > { %552 = vmatpush1.bf16.msra.mxu1 %v4364_v36  ;;  %509 = vmatpush1.bf16.msra.mxu0 %v4365_v38  ;;  %v4428_v36 = vld [vmem:[%s6109_s1 + $0x258] ss:$12 sps:$4 sm:$0xff]   ;;  %v4432_v38 = vld [vmem:[%s6109_s1 + $0x270] ss:$12 sps:$4 sm:$0xff]  }
  0x2c   : > { %553 = vmatprep.subr.bf16.mxu1 %v4789_v1  ;;  %510 = vmatprep.subr.bf16.mxu0 %v4366_v39  ;;  %v4438_v39 = vld [vmem:[%s6109_s1 + $0x28c] ss:$12 sps:$4 sm:$0xff]  }
  0x2f   : > { %554 = vmatpush1.bf16.msra.mxu1 %v4368_v41  ;;  %511 = vmatpush1.bf16.msra.mxu0 %v4369_v42  ;;  %v4436_v41 = vld [vmem:[%s6109_s1 + $0x288] ss:$12 sps:$4 sm:$0xff]   ;;  %v4442_v42 = vld [vmem:[%s6109_s1 + $0x2a4] ss:$12 sps:$4 sm:$0xff]  }
  0x30   : > { %555 = vmatprep.subr.bf16.mxu1 %v4789_v1  ;;  %512 = vmatprep.subr.bf16.mxu0 %v4370_v43  ;;  %v4443_v43 = vld [vmem:[%s6109_s1 + $0x2a8] ss:$12 sps:$4 sm:$0xff]  }
  0x33   : > { %556 = vmatpush1.bf16.msra.mxu1 %v4372_v46  ;;  %513 = vmatpush1.bf16.msra.mxu0 %v4373_v47  ;;  %v4447_v46 = vld [vmem:[%s6109_s1 + $0x2c0] ss:$12 sps:$4 sm:$0xff]   ;;  %v4444_v47 = vld [vmem:[%s6109_s1 + $0x2b8] ss:$12 sps:$4 sm:$0xff]  }
  0x34   : > { %812 = vmatprep.subr.bf16.mxu1 %v4789_v1  ;;  %769 = vmatprep.subr.bf16.mxu0 %v4378_v48  ;;  %v4450_v48 = vld [vmem:[%s6109_s1 + $0x2d4] ss:$12 sps:$4 sm:$0xff]  }
  0x36   : > { %566 = vmatmul.mubr.bf16.vlgmr.msra.gmra.mrb[0].mxu1 %v285_v49  ;;  %523 = vmatmul.mubr.bf16.vlgmr.msra.gmra.mrb[0].mxu0 %v285_v49  ;;  %v4451_v49 = vld [vmem:[%s6109_s1 + $0x2d8] ss:$12 sps:$4 sm:$0xff]  }
  0x37   : > { %813 = vmatpush1.bf16.msra.mxu1 %v4379_v50  ;;  %770 = vmatpush1.bf16.msra.mxu0 %v4376_v51  ;;  %v4448_v50 = vld [vmem:[%s6109_s1 + $0x2d0] ss:$12 sps:$4 sm:$0xff]   ;;  %v4454_v51 = vld [vmem:[%s6109_s1 + $0x2ec] ss:$12 sps:$4 sm:$0xff]  }
  0x38   : > { %814 = vmatprep.subr.bf16.mxu1 %v4789_v1  ;;  %771 = vmatprep.subr.bf16.mxu0 %v4382_v52  ;;  %v4455_v52 = vld [vmem:[%s6109_s1 + $0x2f0] ss:$12 sps:$4 sm:$0xff]  }
  0x39   : > { %3650 = vmatprep.mubr.msk.bf16.mxu1 %vm486_vm0, %v3574_v28  ;;  %3649 = vmatprep.mubr.msk.bf16.mxu0 %vm486_vm0, %v3574_v28  ;;  %v922_v28 = vrot.slane %v3700_v22, 1  ;;  %v4479_v22 = vld [vmem:[%s6109_s1 + $0x368] ss:$12 sps:$4 sm:$0xff]  }
  0x3b   : > { %815 = vmatpush1.bf16.msra.mxu1 %v4383_v53  ;;  %772 = vmatpush1.bf16.msra.mxu0 %v4380_v54  ;;  %v924_v33 = vsel %vm918_vm1, %v922_v28, %v923_v29  ;;  %v4452_v53 = vld [vmem:[%s6109_s1 + $0x2e8] ss:$12 sps:$4 sm:$0xff]   ;;  %v4458_v54 = vld [vmem:[%s6109_s1 + $0x304] ss:$12 sps:$4 sm:$0xff]  }
  0x3c   : > { %816 = vmatprep.subr.bf16.mxu1 %v4789_v1  ;;  %773 = vmatprep.subr.bf16.mxu0 %v4386_v55  ;;  %v4459_v55 = vld [vmem:[%s6109_s1 + $0x308] ss:$12 sps:$4 sm:$0xff]   ;;  %v4480_v28 = vld [vmem:[%s6109_s1 + $0x378] ss:$12 sps:$4 sm:$0xff]  }
  0x3d   : > { %v4486_v29 = vld [vmem:[%s6109_s1 + $0x394] ss:$12 sps:$4 sm:$0xff]  }
  0x3f   : > { %817 = vmatpush1.bf16.msra.mxu1 %v4387_v56  ;;  %774 = vmatpush1.bf16.msra.mxu0 %v4384_v57  ;;  %v5186_v56 = vld [vmem:[%s4901_s9] sm:$0xcc]  ;;  %v5189_v57 = vld [vmem:[%s4901_s9 + $0x10] sm:$0x33] }
  0x40   : > { %818 = vmatprep.subr.bf16.mxu1 %v4789_v1  ;;  %775 = vmatprep.subr.bf16.mxu0 %v4390_v58  ;;  %v4456_v58 = vld [vmem:[%s6109_s1 + $0x300] ss:$12 sps:$4 sm:$0xff]  }
  0x43   : > { %819 = vmatpush1.bf16.msra.mxu1 %v4391_v59  ;;  %776 = vmatpush1.bf16.msra.mxu0 %v4388_v60  ;;  %v4462_v59 = vld [vmem:[%s6109_s1 + $0x31c] ss:$12 sps:$4 sm:$0xff]   ;;  %v3790_v60 = vcombine.high %v5186_v56, %v4912_v26 }
  0x44   : > { %820 = vmatprep.subr.bf16.mxu1 %v4789_v1  ;;  %777 = vmatprep.subr.bf16.mxu0 %v4394_v61  ;;  %v3792_v61 = vcombine.high %v5189_v57, %v5189_v57 }
  0x47   : > { %821 = vmatpush1.bf16.msra.mxu1 %v4395_v62  ;;  %778 = vmatpush1.bf16.msra.mxu0 %v4392_v63  ;;  %v4463_v62 = vld [vmem:[%s6109_s1 + $0x320] ss:$12 sps:$4 sm:$0xff]   ;;  %v4460_v63 = vld [vmem:[%s6109_s1 + $0x318] ss:$12 sps:$4 sm:$0xff]  }
  0x48   : > { %822 = vmatprep.subr.bf16.mxu1 %v4789_v1  ;;  %779 = vmatprep.subr.bf16.mxu0 %v4398_v0  ;;  %v4466_v0 = vld [vmem:[%s6109_s1 + $0x334] ss:$12 sps:$4 sm:$0xff]  }
  0x4b   : > { %823 = vmatpush1.bf16.msra.mxu1 %v4399_v2  ;;  %780 = vmatpush1.bf16.msra.mxu0 %v4396_v3  ;;  %v1291_v2 = vshrl.u32 %v3790_v60, 16  ;;  %v1294_v3 = vshll.u32 %v3790_v60, 16  ;;  %v4518_v60 = vld [vmem:[%s6109_s1 + $0x454] ss:$12 sps:$4 sm:$0xff]  }
  0x4c   : > { %824 = vmatprep.subr.bf16.mxu1 %v4789_v1  ;;  %781 = vmatprep.subr.bf16.mxu0 %v4402_v4  ;;  %v1299_v4 = vshrl.u32 %v3792_v61, 16 }
  0x4f   : > { %825 = vmatpush1.bf16.msra.mxu1 %v4403_v5  ;;  %782 = vmatpush1.bf16.msra.mxu0 %v4400_v6  ;;  %v1302_v5 = vshll.u32 %v3792_v61, 16  ;;  %v4467_v6 = vld [vmem:[%s6109_s1 + $0x338] ss:$12 sps:$4 sm:$0xff]  }
  0x50   : > { %826 = vmatprep.subr.bf16.mxu1 %v4789_v1  ;;  %783 = vmatprep.subr.bf16.mxu0 %v4406_v7  ;;  %v3699_v7 = vcombine.low %v5071_v18, %v4912_v26  ;;  %v4471_v26 = vld [vmem:[%s6109_s1 + $0x350] ss:$12 sps:$4 sm:$0xff]   ;;  %v4519_v61 = vld [vmem:[%s6109_s1 + $0x458] ss:$12 sps:$4 sm:$0xff]  }
  0x51   : > { %v4478_v18 = vld [vmem:[%s6109_s1 + $0x364] ss:$12 sps:$4 sm:$0xff]  }
  0x53   : > { %827 = vmatpush1.bf16.msra.mxu1 %v4407_v8  ;;  %784 = vmatpush1.bf16.msra.mxu0 %v4404_v9  ;;  %v3701_v8 = vcombine.low %v5074_v19, %v5074_v19  ;;  %v4464_v9 = vld [vmem:[%s6109_s1 + $0x330] ss:$12 sps:$4 sm:$0xff]  }
  0x54   : > { %828 = vmatprep.subr.bf16.mxu1 %v4789_v1  ;;  %785 = vmatprep.subr.bf16.mxu0 %v4410_v10  ;;  %v4470_v10 = vld [vmem:[%s6109_s1 + $0x34c] ss:$12 sps:$4 sm:$0xff]  }
  0x57   : > { %829 = vmatpush1.bf16.msra.mxu1 %v4411_v11  ;;  %786 = vmatpush1.bf16.msra.mxu0 %v4408_v12  ;;  %v1293_v11 = vrot.slane %v1291_v2, 2  ;;  %v1296_v12 = vrot.slane %v1294_v3, 3  ;;  %v5351_v3 = vld [vmem:[%s4901_s9] sm:$0x88] }
  0x58   : > { %830 = vmatprep.subr.bf16.mxu1 %v4789_v1  ;;  %787 = vmatprep.subr.bf16.mxu0 %v4414_v13  ;;  %v1301_v13 = vrot.slane %v1299_v4, 2  ;;  %v5354_v4 = vld [vmem:[%s4901_s9 + $0x10] sm:$0x77] }
  0x59   : > { %v1297_v19 = vor.u32 %v1296_v12, %v1293_v11  ;;  %v4520_v12 = vld [vmem:[%s6109_s1 + $0x468] ss:$12 sps:$4 sm:$0xff]  }
  0x5b   : > { %831 = vmatpush1.bf16.msra.mxu1 %v4415_v14  ;;  %788 = vmatpush1.bf16.msra.mxu0 %v4412_v15  ;;  %v1304_v14 = vrot.slane %v1302_v5, 3  ;;  %v919_v15 = vrot.slane %v3699_v7, 1  ;;  %v4516_v5 = vld [vmem:[%s6109_s1 + $0x450] ss:$12 sps:$4 sm:$0xff]  }
  0x5c   : > { %832 = vmatprep.subr.bf16.mxu1 %v4789_v1  ;;  %789 = vmatprep.subr.bf16.mxu0 %v4418_v16  ;;  %v920_v16 = vrot.slane %v3701_v8, 1  ;;  %v5369_v8 = vcombine.high %v5354_v4, %v5354_v4 }
  0x5f   : > { %833 = vmatpush1.bf16.msra.mxu1 %v4419_v17  ;;  %790 = vmatpush1.bf16.msra.mxu0 %v4416_v20  ;;  %v4468_v17 = vld [vmem:[%s6109_s1 + $0x348] ss:$12 sps:$4 sm:$0xff]   ;;  %v1305_v20 = vor.u32 %v1304_v14, %v1301_v13  ;;  %v4530_v13 = vld [vmem:[%s6109_s1 + $0x484] ss:$12 sps:$4 sm:$0xff]  }
  0x60   : > { %834 = vmatprep.subr.bf16.mxu1 %v4789_v1  ;;  %791 = vmatprep.subr.bf16.mxu0 %v4422_v21  ;;  %v921_v21 = vsel %vm918_vm1, %v919_v15, %v920_v16  ;;  %v4531_v16 = vld [vmem:[%s6109_s1 + $0x488] ss:$12 sps:$4 sm:$0xff]  }
  0x63   : > { %835 = vmatpush1.bf16.msra.mxu1 %v4423_v24  ;;  %792 = vmatpush1.bf16.msra.mxu0 %v4420_v25  ;;  %v4482_v24 = vld [vmem:[%s6109_s1 + $0x37c] ss:$12 sps:$4 sm:$0xff]   ;;  %v1306_v25 = vsel %vm1272_vm2, %v1297_v19, %v1305_v20  ;;  %v4535_v20 = vld [vmem:[%s6109_s1 + $0x4a0] ss:$12 sps:$4 sm:$0xff]  }
  0x64   : > { %1164 = vmatprep.subr.bf16.mxu1 %v4789_v1  ;;  %1121 = vmatprep.subr.bf16.mxu0 %v4426_v27  ;;  %v4483_v27 = vld [vmem:[%s6109_s1 + $0x380] ss:$12 sps:$4 sm:$0xff]  }
  0x66   : > { %845 = vmatmul.mubr.bf16.vlgmr.msra.gmra.mrb[4].mxu1 %v4929_v35  ;;  %802 = vmatmul.mubr.bf16.vlgmr.msra.gmra.mrb[0].mxu0 %v4929_v35  ;;  %v4435_v35 = vld [vmem:[%s6109_s1 + $0x278] ss:$12 sps:$4 sm:$0xff]  }
  0x67   : > { %1165 = vmatpush1.bf16.msra.mxu1 %v4427_v30  ;;  %1122 = vmatpush1.bf16.msra.mxu0 %v4424_v31  ;;  %v4487_v30 = vld [vmem:[%s6109_s1 + $0x398] ss:$12 sps:$4 sm:$0xff]   ;;  %v4484_v31 = vld [vmem:[%s6109_s1 + $0x390] ss:$12 sps:$4 sm:$0xff]  }
  0x68   : > { %1166 = vmatprep.subr.bf16.mxu1 %v4789_v1  ;;  %1123 = vmatprep.subr.bf16.mxu0 %v4430_v32  ;;  %v4490_v32 = vld [vmem:[%s6109_s1 + $0x3ac] ss:$12 sps:$4 sm:$0xff]  }
  0x69   : > { %3740 = vmatprep.mubr.msk.bf16.mxu1 %vm486_vm0, %v924_v33  ;;  %3739 = vmatprep.mubr.msk.bf16.mxu0 %vm486_vm0, %v924_v33  ;;  %v4491_v33 = vld [vmem:[%s6109_s1 + $0x3b0] ss:$12 sps:$4 sm:$0xff]  }
  0x6b   : > { %1167 = vmatpush1.bf16.msra.mxu1 %v4431_v34  ;;  %1124 = vmatpush1.bf16.msra.mxu0 %v4428_v36  ;;  %v4488_v34 = vld [vmem:[%s6109_s1 + $0x3a8] ss:$12 sps:$4 sm:$0xff]   ;;  %v4494_v36 = vld [vmem:[%s6109_s1 + $0x3c4] ss:$12 sps:$4 sm:$0xff]  }
  0x6c   : > { %1168 = vmatprep.subr.bf16.mxu1 %v4789_v1  ;;  %1125 = vmatprep.subr.bf16.mxu0 %v4434_v37  ;;  %v4495_v37 = vld [vmem:[%s6109_s1 + $0x3c8] ss:$12 sps:$4 sm:$0xff]  }
  0x6f   : > { %1169 = vmatpush1.bf16.msra.mxu1 %v4435_v35  ;;  %1126 = vmatpush1.bf16.msra.mxu0 %v4432_v38  ;;  %v4492_v35 = vld [vmem:[%s6109_s1 + $0x3c0] ss:$12 sps:$4 sm:$0xff]   ;;  %v4498_v38 = vld [vmem:[%s6109_s1 + $0x3dc] ss:$12 sps:$4 sm:$0xff]  }
  0x70   : > { %1170 = vmatprep.subr.bf16.mxu1 %v4789_v1  ;;  %1127 = vmatprep.subr.bf16.mxu0 %v4438_v39  ;;  %v4499_v39 = vld [vmem:[%s6109_s1 + $0x3e0] ss:$12 sps:$4 sm:$0xff]  }
  0x73   : > { %1171 = vmatpush1.bf16.msra.mxu1 %v4439_v40  ;;  %1128 = vmatpush1.bf16.msra.mxu0 %v4436_v41  ;;  %v4496_v40 = vld [vmem:[%s6109_s1 + $0x3d8] ss:$12 sps:$4 sm:$0xff]   ;;  %v4502_v41 = vld [vmem:[%s6109_s1 + $0x3f4] ss:$12 sps:$4 sm:$0xff]  }
  0x74   : > { %1172 = vmatprep.subr.bf16.mxu1 %v4789_v1  ;;  %1129 = vmatprep.subr.bf16.mxu0 %v4442_v42  ;;  %v4503_v42 = vld [vmem:[%s6109_s1 + $0x3f8] ss:$12 sps:$4 sm:$0xff]  }
  0x77   : > { %1173 = vmatpush1.bf16.msra.mxu1 %v4443_v43  ;;  %1130 = vmatpush1.bf16.msra.mxu0 %v4440_v44  ;;  %v4500_v43 = vld [vmem:[%s6109_s1 + $0x3f0] ss:$12 sps:$4 sm:$0xff]   ;;  %v4506_v44 = vld [vmem:[%s6109_s1 + $0x40c] ss:$12 sps:$4 sm:$0xff]  }
  0x78   : > { %1174 = vmatprep.subr.bf16.mxu1 %v4789_v1  ;;  %1131 = vmatprep.subr.bf16.mxu0 %v4446_v45  ;;  %v4507_v45 = vld [vmem:[%s6109_s1 + $0x410] ss:$12 sps:$4 sm:$0xff]  }
  0x7b   : > { %1175 = vmatpush1.bf16.msra.mxu1 %v4447_v46  ;;  %1132 = vmatpush1.bf16.msra.mxu0 %v4444_v47  ;;  %v4504_v46 = vld [vmem:[%s6109_s1 + $0x408] ss:$12 sps:$4 sm:$0xff]   ;;  %v4510_v47 = vld [vmem:[%s6109_s1 + $0x424] ss:$12 sps:$4 sm:$0xff]  }
  0x7c   : > { %1176 = vmatprep.subr.bf16.mxu1 %v4789_v1  ;;  %1133 = vmatprep.subr.bf16.mxu0 %v4450_v48  ;;  %v5321_v48 = vld [vmem:[%s4901_s9 + $0x8] sm:$0xff] }
  0x7d   : > { %v5365_v7 = vcombine.high %v5351_v3, %v5321_v48 }
  0x7f   : > { %1177 = vmatpush1.bf16.msra.mxu1 %v4451_v49  ;;  %1134 = vmatpush1.bf16.msra.mxu0 %v4448_v50  ;;  %v3789_v49 = vcombine.low %v5186_v56, %v5321_v48  ;;  %v3791_v50 = vcombine.low %v5189_v57, %v5189_v57  ;;  %v1658_v14 = vrot.slane %v5365_v7, 3 }
  0x80   : > { %1178 = vmatprep.subr.bf16.mxu1 %v4789_v1  ;;  %1135 = vmatprep.subr.bf16.mxu0 %v4454_v51  ;;  %v4511_v51 = vld [vmem:[%s6109_s1 + $0x428] ss:$12 sps:$4 sm:$0xff]  }
  0x81   : > { %v1282_v56 = vshrl.u32 %v3791_v50, 16  ;;  %v1285_v57 = vshll.u32 %v3791_v50, 16  ;;  %v2018_v50 = vshll.u32 %v5365_v7, 16 }
  0x83   : > { %1179 = vmatpush1.bf16.msra.mxu1 %v4455_v52  ;;  %1136 = vmatpush1.bf16.msra.mxu0 %v4452_v53  ;;  %v4508_v52 = vld [vmem:[%s6109_s1 + $0x420] ss:$12 sps:$4 sm:$0xff]   ;;  %v4514_v53 = vld [vmem:[%s6109_s1 + $0x43c] ss:$12 sps:$4 sm:$0xff]   ;;  %v1287_v2 = vrot.slane %v1285_v57, 3 }
  0x84   : > { %1180 = vmatprep.subr.bf16.mxu1 %v4789_v1  ;;  %1137 = vmatprep.subr.bf16.mxu0 %v4458_v54  ;;  %v1274_v54 = vshrl.u32 %v3789_v49, 16  ;;  %v4574_v57 = vld [vmem:[%s6109_s1 + $0x58c] ss:$12 sps:$4 sm:$0xff]  }
  0x87   : > { %1181 = vmatpush1.bf16.msra.mxu1 %v4459_v55  ;;  %1138 = vmatpush1.bf16.msra.mxu0 %v4456_v58  ;;  %v1277_v55 = vshll.u32 %v3789_v49, 16  ;;  %v4515_v58 = vld [vmem:[%s6109_s1 + $0x440] ss:$12 sps:$4 sm:$0xff]   ;;  %v2015_v49 = vshrl.u32 %v5365_v7, 16 }
  0x88   : > { %1182 = vmatprep.subr.bf16.mxu1 %v4789_v1  ;;  %1139 = vmatprep.subr.bf16.mxu0 %v4462_v59  ;;  %v4512_v59 = vld [vmem:[%s6109_s1 + $0x438] ss:$12 sps:$4 sm:$0xff]   ;;  %v4580_v7 = vld [vmem:[%s6109_s1 + $0x5a0] ss:$12 sps:$4 sm:$0xff]  }
  0x8b   : > { %1183 = vmatpush1.bf16.msra.mxu1 %v4463_v62  ;;  %1140 = vmatpush1.bf16.msra.mxu0 %v4460_v63  ;;  %v1276_v62 = vrot.slane %v1274_v54, 2  ;;  %v1279_v63 = vrot.slane %v1277_v55, 3  ;;  %v5496_v54 = vcombine.low %v5351_v3, %v5321_v48  ;;  %v5500_v55 = vcombine.low %v5354_v4, %v5354_v4  ;;  %v4575_v48 = vld [vmem:[%s6109_s1 + $0x590] ss:$12 sps:$4 sm:$0xff]   ;;  %v4583_v3 = vld [vmem:[%s6109_s1 + $0x5a8] ss:$12 sps:$4 sm:$0xff]  }
  0x8c   : > { %1184 = vmatprep.subr.bf16.mxu1 %v4789_v1  ;;  %1141 = vmatprep.subr.bf16.mxu0 %v4466_v0  ;;  %v1284_v0 = vrot.slane %v1282_v56, 2  ;;  %v4568_v56 = vld [vmem:[%s6109_s1 + $0x570] ss:$12 sps:$4 sm:$0xff]  }
  0x8e   : > { %v1288_v11 = vor.u32 %v1287_v2, %v1284_v0  ;;  %v4572_v0 = vld [vmem:[%s6109_s1 + $0x588] ss:$12 sps:$4 sm:$0xff]   ;;  %v4582_v2 = vld [vmem:[%s6109_s1 + $0x5a4] ss:$12 sps:$4 sm:$0xff]  }
  0x8f   : > { %1185 = vmatpush1.bf16.msra.mxu1 %v4467_v6  ;;  %1142 = vmatpush1.bf16.msra.mxu0 %v4464_v9  ;;  %v4522_v6 = vld [vmem:[%s6109_s1 + $0x46c] ss:$12 sps:$4 sm:$0xff]   ;;  %v4523_v9 = vld [vmem:[%s6109_s1 + $0x470] ss:$12 sps:$4 sm:$0xff]  }
  0x90   : > { %1186 = vmatprep.subr.bf16.mxu1 %v4789_v1  ;;  %1143 = vmatprep.subr.bf16.mxu0 %v4470_v10  ;;  %v1280_v10 = vor.u32 %v1279_v63, %v1276_v62  ;;  %v1655_v62 = vrot.slane %v5496_v54, 3  ;;  %v1656_v63 = vrot.slane %v5500_v55, 3 }
  0x92   : > { %v1289_v15 = vsel %vm1272_vm2, %v1280_v10, %v1288_v11  ;;  %v4584_v11 = vld [vmem:[%s6109_s1 + $0x5b8] ss:$12 sps:$4 sm:$0xff]  }
  0x93   : > { %1187 = vmatpush1.bf16.msra.mxu1 %v4471_v26  ;;  %1144 = vmatpush1.bf16.msra.mxu0 %v4468_v17  ;;  %v1659_v26 = vrot.slane %v5369_v8, 3  ;;  %v4528_v17 = vld [vmem:[%s6109_s1 + $0x480] ss:$12 sps:$4 sm:$0xff]  }
  0x94   : > { %1546 = vmatprep.subr.bf16.mxu1 %v4789_v1  ;;  %1503 = vmatprep.subr.bf16.mxu0 %v4478_v18  ;;  %v4534_v18 = vld [vmem:[%s6109_s1 + $0x49c] ss:$12 sps:$4 sm:$0xff]  }
  0x95   : > { %v1660_v19 = vsel %vm1654_vm3, %v1658_v14, %v1659_v26  ;;  %v4588_v14 = vld [vmem:[%s6109_s1 + $0x5d0] ss:$12 sps:$4 sm:$0xff]   ;;  %v4594_v26 = vld [vmem:[%s6109_s1 + $0x5ec] ss:$12 sps:$4 sm:$0xff]  }
  0x96   : > { %1197 = vmatmul.mubr.bf16.vlgmr.msra.gmra.mrb[8].mxu1 %v921_v21  ;;  %1154 = vmatmul.mubr.bf16.vlgmr.msra.gmra.mrb[0].mxu0 %v921_v21  ;;  %v4532_v21 = vld [vmem:[%s6109_s1 + $0x498] ss:$12 sps:$4 sm:$0xff]  }
  0x97   : > { %1547 = vmatpush1.bf16.msra.mxu1 %v4479_v22  ;;  %1504 = vmatpush1.bf16.msra.mxu0 %v4476_v23  ;;  %v4538_v22 = vld [vmem:[%s6109_s1 + $0x4b4] ss:$12 sps:$4 sm:$0xff]   ;;  %v4539_v23 = vld [vmem:[%s6109_s1 + $0x4b8] ss:$12 sps:$4 sm:$0xff]  }
  0x98   : > { %1548 = vmatprep.subr.bf16.mxu1 %v4789_v1  ;;  %1505 = vmatprep.subr.bf16.mxu0 %v4482_v24  ;;  %v4536_v24 = vld [vmem:[%s6109_s1 + $0x4b0] ss:$12 sps:$4 sm:$0xff]  }
  0x99   : > { %3830 = vmatprep.mubr.msk.bf16.mxu1 %vm486_vm0, %v1306_v25  ;;  %3829 = vmatprep.mubr.msk.bf16.mxu0 %vm486_vm0, %v1306_v25  ;;  %v4542_v25 = vld [vmem:[%s6109_s1 + $0x4cc] ss:$12 sps:$4 sm:$0xff]  }
  0x9b   : > { %1549 = vmatpush1.bf16.msra.mxu1 %v4483_v27  ;;  %1506 = vmatpush1.bf16.msra.mxu0 %v4480_v28  ;;  %v4543_v27 = vld [vmem:[%s6109_s1 + $0x4d0] ss:$12 sps:$4 sm:$0xff]   ;;  %v4540_v28 = vld [vmem:[%s6109_s1 + $0x4c8] ss:$12 sps:$4 sm:$0xff]  }
  0x9c   : > { %1550 = vmatprep.subr.bf16.mxu1 %v4789_v1  ;;  %1507 = vmatprep.subr.bf16.mxu0 %v4486_v29  ;;  %v4546_v29 = vld [vmem:[%s6109_s1 + $0x4e4] ss:$12 sps:$4 sm:$0xff]  }
  0x9f   : > { %1551 = vmatpush1.bf16.msra.mxu1 %v4487_v30  ;;  %1508 = vmatpush1.bf16.msra.mxu0 %v4484_v31  ;;  %v4544_v30 = vld [vmem:[%s6109_s1 + $0x4e0] ss:$12 sps:$4 sm:$0xff]   ;;  %v4547_v31 = vld [vmem:[%s6109_s1 + $0x4e8] ss:$12 sps:$4 sm:$0xff]  }
  0xa0   : > { %1552 = vmatprep.subr.bf16.mxu1 %v4789_v1  ;;  %1509 = vmatprep.subr.bf16.mxu0 %v4490_v32  ;;  %v4550_v32 = vld [vmem:[%s6109_s1 + $0x4fc] ss:$12 sps:$4 sm:$0xff]  }
  0xa3   : > { %1553 = vmatpush1.bf16.msra.mxu1 %v4491_v33  ;;  %1510 = vmatpush1.bf16.msra.mxu0 %v4488_v34  ;;  %v4551_v33 = vld [vmem:[%s6109_s1 + $0x500] ss:$12 sps:$4 sm:$0xff]   ;;  %v4548_v34 = vld [vmem:[%s6109_s1 + $0x4f8] ss:$12 sps:$4 sm:$0xff]  }
  0xa4   : > { %1554 = vmatprep.subr.bf16.mxu1 %v4789_v1  ;;  %1511 = vmatprep.subr.bf16.mxu0 %v4494_v36  ;;  %v4554_v36 = vld [vmem:[%s6109_s1 + $0x514] ss:$12 sps:$4 sm:$0xff]  }
  0xa7   : > { %1555 = vmatpush1.bf16.msra.mxu1 %v4495_v37  ;;  %1512 = vmatpush1.bf16.msra.mxu0 %v4492_v35  ;;  %v4555_v37 = vld [vmem:[%s6109_s1 + $0x518] ss:$12 sps:$4 sm:$0xff]   ;;  %v4552_v35 = vld [vmem:[%s6109_s1 + $0x510] ss:$12 sps:$4 sm:$0xff]  }
  0xa8   : > { %1556 = vmatprep.subr.bf16.mxu1 %v4789_v1  ;;  %1513 = vmatprep.subr.bf16.mxu0 %v4498_v38  ;;  %v4558_v38 = vld [vmem:[%s6109_s1 + $0x52c] ss:$12 sps:$4 sm:$0xff]  }
  0xab   : > { %1557 = vmatpush1.bf16.msra.mxu1 %v4499_v39  ;;  %1514 = vmatpush1.bf16.msra.mxu0 %v4496_v40  ;;  %v4559_v39 = vld [vmem:[%s6109_s1 + $0x530] ss:$12 sps:$4 sm:$0xff]   ;;  %v4556_v40 = vld [vmem:[%s6109_s1 + $0x528] ss:$12 sps:$4 sm:$0xff]  }
  0xac   : > { %1558 = vmatprep.subr.bf16.mxu1 %v4789_v1  ;;  %1515 = vmatprep.subr.bf16.mxu0 %v4502_v41  ;;  %v4562_v41 = vld [vmem:[%s6109_s1 + $0x544] ss:$12 sps:$4 sm:$0xff]  }
  0xaf   : > { %1559 = vmatpush1.bf16.msra.mxu1 %v4503_v42  ;;  %1516 = vmatpush1.bf16.msra.mxu0 %v4500_v43  ;;  %v4563_v42 = vld [vmem:[%s6109_s1 + $0x548] ss:$12 sps:$4 sm:$0xff]   ;;  %v4560_v43 = vld [vmem:[%s6109_s1 + $0x540] ss:$12 sps:$4 sm:$0xff]  }
  0xb0   : > { %1560 = vmatprep.subr.bf16.mxu1 %v4789_v1  ;;  %1517 = vmatprep.subr.bf16.mxu0 %v4506_v44  ;;  %v4566_v44 = vld [vmem:[%s6109_s1 + $0x55c] ss:$12 sps:$4 sm:$0xff]  }
  0xb3   : > { %1561 = vmatpush1.bf16.msra.mxu1 %v4507_v45  ;;  %1518 = vmatpush1.bf16.msra.mxu0 %v4504_v46  ;;  %v4567_v45 = vld [vmem:[%s6109_s1 + $0x560] ss:$12 sps:$4 sm:$0xff]   ;;  %v4564_v46 = vld [vmem:[%s6109_s1 + $0x558] ss:$12 sps:$4 sm:$0xff]  }
  0xb4   : > { %1562 = vmatprep.subr.bf16.mxu1 %v4789_v1  ;;  %1519 = vmatprep.subr.bf16.mxu0 %v4510_v47  ;;  %v4570_v47 = vld [vmem:[%s6109_s1 + $0x574] ss:$12 sps:$4 sm:$0xff]  }
  0xb7   : > { %1563 = vmatpush1.bf16.msra.mxu1 %v4511_v51  ;;  %1520 = vmatpush1.bf16.msra.mxu0 %v4508_v52  ;;  %v2023_v51 = vshrl.u32 %v5369_v8, 16  ;;  %v4571_v52 = vld [vmem:[%s6109_s1 + $0x578] ss:$12 sps:$4 sm:$0xff]  }
  0xb8   : > { %1564 = vmatprep.subr.bf16.mxu1 %v4789_v1  ;;  %1521 = vmatprep.subr.bf16.mxu0 %v4514_v53  ;;  %v2026_v53 = vshll.u32 %v5369_v8, 16  ;;  %v4586_v8 = vld [vmem:[%s6109_s1 + $0x5bc] ss:$12 sps:$4 sm:$0xff]  }
  0xbb   : > { %1565 = vmatpush1.bf16.msra.mxu1 %v4515_v58  ;;  %1522 = vmatpush1.bf16.msra.mxu0 %v4512_v59  ;;  %v2017_v58 = vrot.slane %v2015_v49, 3  ;;  %v2020_v59 = vrot.slane %v2018_v50, 4 }
  0xbc   : > { %1566 = vmatprep.subr.bf16.mxu1 %v4789_v1  ;;  %1523 = vmatprep.subr.bf16.mxu0 %v4518_v60  ;;  %v2025_v60 = vrot.slane %v2023_v51, 3  ;;  %v5637_v51 = vld [vmem:[%s4901_s9 + $0x8] sm:$0xee] }
  0xbd   : > { %v2021_v4 = vor.u32 %v2020_v59, %v2017_v58 }
  0xbf   : > { %1567 = vmatpush1.bf16.msra.mxu1 %v4519_v61  ;;  %1524 = vmatpush1.bf16.msra.mxu0 %v4516_v5  ;;  %v2028_v61 = vrot.slane %v2026_v53, 4  ;;  %v5643_v53 = vld [vmem:[%s4901_s9 + $0x18] sm:$0x11] }
  0xc0   : > { %1568 = vmatprep.subr.bf16.mxu1 %v4789_v1  ;;  %1525 = vmatprep.subr.bf16.mxu0 %v4522_v6  ;;  %v1657_v6 = vsel %vm1654_vm3, %v1655_v62, %v1656_v63 }
  0xc1   : > { %v2029_v5 = vor.u32 %v2028_v61, %v2025_v60  ;;  %v4624_v60 = vld [vmem:[%s6109_s1 + $0x6a8] ss:$12 sps:$4 sm:$0xff]   ;;  %v4630_v61 = vld [vmem:[%s6109_s1 + $0x6c4] ss:$12 sps:$4 sm:$0xff]  }
  0xc3   : > { %1569 = vmatpush1.bf16.msra.mxu1 %v4523_v9  ;;  %1526 = vmatpush1.bf16.msra.mxu0 %v4520_v12  ;;  %v4587_v9 = vld [vmem:[%s6109_s1 + $0x5c0] ss:$12 sps:$4 sm:$0xff]   ;;  %v2030_v10 = vsel %vm1996_vm4, %v2021_v4, %v2029_v5  ;;  %v4634_v4 = vld [vmem:[%s6109_s1 + $0x6dc] ss:$12 sps:$4 sm:$0xff]  }
  0xc4   : > { %1900 = vmatprep.subr.bf16.mxu1 %v4789_v1  ;;  %1857 = vmatprep.subr.bf16.mxu0 %v4530_v13  ;;  %v4590_v12 = vld [vmem:[%s6109_s1 + $0x5d4] ss:$12 sps:$4 sm:$0xff]   ;;  %v4591_v13 = vld [vmem:[%s6109_s1 + $0x5d8] ss:$12 sps:$4 sm:$0xff]  }
  0xc6   : > { %1579 = vmatmul.mubr.bf16.vlgmr.msra.gmra.mrb[12].mxu1 %v1289_v15  ;;  %1536 = vmatmul.mubr.bf16.vlgmr.msra.gmra.mrb[0].mxu0 %v1289_v15  ;;  %v4595_v15 = vld [vmem:[%s6109_s1 + $0x5f0] ss:$12 sps:$4 sm:$0xff]  }
  0xc7   : > { %1901 = vmatpush1.bf16.msra.mxu1 %v4531_v16  ;;  %1858 = vmatpush1.bf16.msra.mxu0 %v4528_v17  ;;  %v4592_v16 = vld [vmem:[%s6109_s1 + $0x5e8] ss:$12 sps:$4 sm:$0xff]   ;;  %v4598_v17 = vld [vmem:[%s6109_s1 + $0x604] ss:$12 sps:$4 sm:$0xff]  }
  0xc8   : > { %1902 = vmatprep.subr.bf16.mxu1 %v4789_v1  ;;  %1859 = vmatprep.subr.bf16.mxu0 %v4534_v18  ;;  %v4599_v18 = vld [vmem:[%s6109_s1 + $0x608] ss:$12 sps:$4 sm:$0xff]  }
  0xc9   : > { %3920 = vmatprep.mubr.msk.bf16.mxu1 %vm486_vm0, %v1660_v19  ;;  %3919 = vmatprep.mubr.msk.bf16.mxu0 %vm486_vm0, %v1660_v19  ;;  %v4596_v19 = vld [vmem:[%s6109_s1 + $0x600] ss:$12 sps:$4 sm:$0xff]  }
  0xcb   : > { %1903 = vmatpush1.bf16.msra.mxu1 %v4535_v20  ;;  %1860 = vmatpush1.bf16.msra.mxu0 %v4532_v21  ;;  %v4602_v20 = vld [vmem:[%s6109_s1 + $0x61c] ss:$12 sps:$4 sm:$0xff]   ;;  %v4603_v21 = vld [vmem:[%s6109_s1 + $0x620] ss:$12 sps:$4 sm:$0xff]  }
  0xcc   : > { %1904 = vmatprep.subr.bf16.mxu1 %v4789_v1  ;;  %1861 = vmatprep.subr.bf16.mxu0 %v4538_v22  ;;  %v4600_v22 = vld [vmem:[%s6109_s1 + $0x618] ss:$12 sps:$4 sm:$0xff]  }
  0xcf   : > { %1905 = vmatpush1.bf16.msra.mxu1 %v4539_v23  ;;  %1862 = vmatpush1.bf16.msra.mxu0 %v4536_v24  ;;  %v4606_v24 = vld [vmem:[%s6109_s1 + $0x634] ss:$12 sps:$4 sm:$0xff]  }
  0xd0   : > { %1906 = vmatprep.subr.bf16.mxu1 %v4789_v1  ;;  %1863 = vmatprep.subr.bf16.mxu0 %v4542_v25 }
  0xd3   : > { %1907 = vmatpush1.bf16.msra.mxu1 %v4543_v27  ;;  %1864 = vmatpush1.bf16.msra.mxu0 %v4540_v28  ;;  %v4607_v28 = vld [vmem:[%s6109_s1 + $0x638] ss:$12 sps:$4 sm:$0xff]  }
  0xd4   : > { %1908 = vmatprep.subr.bf16.mxu1 %v4789_v1  ;;  %1865 = vmatprep.subr.bf16.mxu0 %v4546_v29 }
  0xd7   : > { %1909 = vmatpush1.bf16.msra.mxu1 %v4547_v31  ;;  %1866 = vmatpush1.bf16.msra.mxu0 %v4544_v30  ;;  %v4604_v30 = vld [vmem:[%s6109_s1 + $0x630] ss:$12 sps:$4 sm:$0xff]   ;;  %v4610_v31 = vld [vmem:[%s6109_s1 + $0x64c] ss:$12 sps:$4 sm:$0xff]  }
  0xd8   : > { %1910 = vmatprep.subr.bf16.mxu1 %v4789_v1  ;;  %1867 = vmatprep.subr.bf16.mxu0 %v4550_v32  ;;  %v4611_v32 = vld [vmem:[%s6109_s1 + $0x650] ss:$12 sps:$4 sm:$0xff]  }
  0xdb   : > { %1911 = vmatpush1.bf16.msra.mxu1 %v4551_v33  ;;  %1868 = vmatpush1.bf16.msra.mxu0 %v4548_v34  ;;  %v4608_v33 = vld [vmem:[%s6109_s1 + $0x648] ss:$12 sps:$4 sm:$0xff]   ;;  %v4614_v34 = vld [vmem:[%s6109_s1 + $0x664] ss:$12 sps:$4 sm:$0xff]  }
  0xdc   : > { %1912 = vmatprep.subr.bf16.mxu1 %v4789_v1  ;;  %1869 = vmatprep.subr.bf16.mxu0 %v4554_v36  ;;  %v4615_v36 = vld [vmem:[%s6109_s1 + $0x668] ss:$12 sps:$4 sm:$0xff]  }
  0xdf   : > { %1913 = vmatpush1.bf16.msra.mxu1 %v4555_v37  ;;  %1870 = vmatpush1.bf16.msra.mxu0 %v4552_v35  ;;  %v4612_v37 = vld [vmem:[%s6109_s1 + $0x660] ss:$12 sps:$4 sm:$0xff]   ;;  %v4618_v35 = vld [vmem:[%s6109_s1 + $0x67c] ss:$12 sps:$4 sm:$0xff]  }
  0xe0   : > { %1914 = vmatprep.subr.bf16.mxu1 %v4789_v1  ;;  %1871 = vmatprep.subr.bf16.mxu0 %v4558_v38  ;;  %v1998_v38 = vshrl.u32 %v5496_v54, 16 }
  0xe3   : > { %1915 = vmatpush1.bf16.msra.mxu1 %v4559_v39  ;;  %1872 = vmatpush1.bf16.msra.mxu0 %v4556_v40  ;;  %v2001_v39 = vshll.u32 %v5496_v54, 16  ;;  %v2006_v40 = vshrl.u32 %v5500_v55, 16  ;;  %v4620_v54 = vld [vmem:[%s6109_s1 + $0x690] ss:$12 sps:$4 sm:$0xff]  }
  0xe4   : > { %1916 = vmatprep.subr.bf16.mxu1 %v4789_v1  ;;  %1873 = vmatprep.subr.bf16.mxu0 %v4562_v41  ;;  %v4619_v41 = vld [vmem:[%s6109_s1 + $0x680] ss:$12 sps:$4 sm:$0xff]  }
  0xe5   : > { %v2008_v49 = vrot.slane %v2006_v40, 3 }
  0xe7   : > { %1917 = vmatpush1.bf16.msra.mxu1 %v4563_v42  ;;  %1874 = vmatpush1.bf16.msra.mxu0 %v4560_v43  ;;  %v2009_v42 = vshll.u32 %v5500_v55, 16  ;;  %v4616_v43 = vld [vmem:[%s6109_s1 + $0x678] ss:$12 sps:$4 sm:$0xff]  }
  0xe8   : > { %1918 = vmatprep.subr.bf16.mxu1 %v4789_v1  ;;  %1875 = vmatprep.subr.bf16.mxu0 %v4566_v44  ;;  %v4622_v44 = vld [vmem:[%s6109_s1 + $0x694] ss:$12 sps:$4 sm:$0xff]   ;;  %v4626_v55 = vld [vmem:[%s6109_s1 + $0x6ac] ss:$12 sps:$4 sm:$0xff]  }
  0xe9   : > { %v2011_v50 = vrot.slane %v2009_v42, 4 }
  0xeb   : > { %1919 = vmatpush1.bf16.msra.mxu1 %v4567_v45  ;;  %1876 = vmatpush1.bf16.msra.mxu0 %v4564_v46  ;;  %v4623_v45 = vld [vmem:[%s6109_s1 + $0x698] ss:$12 sps:$4 sm:$0xff]   ;;  %v2000_v46 = vrot.slane %v1998_v38, 3  ;;  %v2012_v59 = vor.u32 %v2011_v50, %v2008_v49  ;;  %v4670_v38 = vld [vmem:[%s6109_s1 + $0x7b4] ss:$12 sps:$4 sm:$0xff]  }
  0xec   : > { %1920 = vmatprep.subr.bf16.mxu1 %v4789_v1  ;;  %1877 = vmatprep.subr.bf16.mxu0 %v4570_v47  ;;  %v2003_v47 = vrot.slane %v2001_v39, 4 }
  0xee   : > { %v2004_v58 = vor.u32 %v2003_v47, %v2000_v46  ;;  %v4668_v46 = vld [vmem:[%s6109_s1 + $0x7b0] ss:$12 sps:$4 sm:$0xff]   ;;  %v4674_v47 = vld [vmem:[%s6109_s1 + $0x7cc] ss:$12 sps:$4 sm:$0xff]  }
  0xef   : > { %1921 = vmatpush1.bf16.msra.mxu1 %v4571_v52  ;;  %1878 = vmatpush1.bf16.msra.mxu0 %v4568_v56  ;;  %v5640_v52 = vld [vmem:[%s4901_s9 + $0x10] sm:$0xff] }
  0xf0   : > { %1922 = vmatprep.subr.bf16.mxu1 %v4789_v1  ;;  %1879 = vmatprep.subr.bf16.mxu0 %v4574_v57  ;;  %v5654_v56 = vcombine.high %v5637_v51, %v5640_v52  ;;  %v5658_v57 = vcombine.high %v5643_v53, %v5643_v53 }
  0xf2   : > { %v2385_v62 = vrot.slane %v5654_v56, 1  ;;  %v2386_v63 = vrot.slane %v5658_v57, 1  ;;  %v2742_v39 = vshrl.u32 %v5654_v56, 16  ;;  %v2745_v40 = vshll.u32 %v5654_v56, 16 }
  0xf3   : > { %1923 = vmatpush1.bf16.msra.mxu1 %v4575_v48  ;;  %1880 = vmatpush1.bf16.msra.mxu0 %v4572_v0  ;;  %v4627_v48 = vld [vmem:[%s6109_s1 + $0x6b0] ss:$12 sps:$4 sm:$0xff]   ;;  %v2013_v0 = vsel %vm1996_vm4, %v2004_v58, %v2012_v59  ;;  %v2753_v42 = vshll.u32 %v5658_v57, 16 }
  0xf4   : > { %2270 = vmatprep.subr.bf16.mxu1 %v4789_v1  ;;  %2227 = vmatprep.subr.bf16.mxu0 %v4582_v2  ;;  %v4631_v2 = vld [vmem:[%s6109_s1 + $0x6c8] ss:$12 sps:$4 sm:$0xff]   ;;  %v2387_v5 = vsel %vm918_vm1, %v2385_v62, %v2386_v63  ;;  %v2744_v49 = vrot.slane %v2742_v39, 1  ;;  %v2747_v50 = vrot.slane %v2745_v40, 2  ;;  %v4680_v62 = vld [vmem:[%s6109_s1 + $0x7e0] ss:$12 sps:$4 sm:$0xff]  }
  0xf5   : > { %v4686_v63 = vld [vmem:[%s6109_s1 + $0x7fc] ss:$12 sps:$4 sm:$0xff]   ;;  %v4723_v39 = vld [vmem:[%s6109_s1 + $0x8d8] ss:$12 sps:$4 sm:$0xff]  }
  0xf6   : > { %1933 = vmatmul.mubr.bf16.vlgmr.msra.gmra.mrb[16].mxu1 %v1657_v6  ;;  %1890 = vmatmul.mubr.bf16.vlgmr.msra.gmra.mrb[0].mxu0 %v1657_v6  ;;  %v4635_v6 = vld [vmem:[%s6109_s1 + $0x6e0] ss:$12 sps:$4 sm:$0xff]   ;;  %v2748_v58 = vor.u32 %v2747_v50, %v2744_v49 }
  0xf7   : > { %2271 = vmatpush1.bf16.msra.mxu1 %v4583_v3  ;;  %2228 = vmatpush1.bf16.msra.mxu0 %v4580_v7  ;;  %v4628_v3 = vld [vmem:[%s6109_s1 + $0x6c0] ss:$12 sps:$4 sm:$0xff]   ;;  %v4632_v7 = vld [vmem:[%s6109_s1 + $0x6d8] ss:$12 sps:$4 sm:$0xff]  }
  0xf8   : > { %2272 = vmatprep.subr.bf16.mxu1 %v4789_v1  ;;  %2229 = vmatprep.subr.bf16.mxu0 %v4586_v8  ;;  %v4638_v8 = vld [vmem:[%s6109_s1 + $0x6f4] ss:$12 sps:$4 sm:$0xff]  }
  0xf9   : > { %4006 = vmatprep.mubr.msk.bf16.mxu1 %vm486_vm0, %v2030_v10  ;;  %4005 = vmatprep.mubr.msk.bf16.mxu0 %vm486_vm0, %v2030_v10  ;;  %v4636_v10 = vld [vmem:[%s6109_s1 + $0x6f0] ss:$12 sps:$4 sm:$0xff]  }
  0xfb   : > { %2273 = vmatpush1.bf16.msra.mxu1 %v4587_v9  ;;  %2230 = vmatpush1.bf16.msra.mxu0 %v4584_v11  ;;  %v4639_v9 = vld [vmem:[%s6109_s1 + $0x6f8] ss:$12 sps:$4 sm:$0xff]  }
  0xfc   : > { %2274 = vmatprep.subr.bf16.mxu1 %v4789_v1  ;;  %2231 = vmatprep.subr.bf16.mxu0 %v4590_v12  ;;  %v4642_v11 = vld [vmem:[%s6109_s1 + $0x70c] ss:$12 sps:$4 sm:$0xff]   ;;  %v4643_v12 = vld [vmem:[%s6109_s1 + $0x710] ss:$12 sps:$4 sm:$0xff]  }
  0xff   : > { %2275 = vmatpush1.bf16.msra.mxu1 %v4591_v13  ;;  %2232 = vmatpush1.bf16.msra.mxu0 %v4588_v14  ;;  %v4640_v13 = vld [vmem:[%s6109_s1 + $0x708] ss:$12 sps:$4 sm:$0xff]   ;;  %v4646_v14 = vld [vmem:[%s6109_s1 + $0x724] ss:$12 sps:$4 sm:$0xff]  }
 0x100   : > { %2276 = vmatprep.subr.bf16.mxu1 %v4789_v1  ;;  %2233 = vmatprep.subr.bf16.mxu0 %v4594_v26  ;;  %v4647_v26 = vld [vmem:[%s6109_s1 + $0x728] ss:$12 sps:$4 sm:$0xff]  }
 0x103   : > { %2277 = vmatpush1.bf16.msra.mxu1 %v4595_v15  ;;  %2234 = vmatpush1.bf16.msra.mxu0 %v4592_v16  ;;  %v4644_v15 = vld [vmem:[%s6109_s1 + $0x720] ss:$12 sps:$4 sm:$0xff]   ;;  %v4650_v16 = vld [vmem:[%s6109_s1 + $0x73c] ss:$12 sps:$4 sm:$0xff]  }
 0x104   : > { %2278 = vmatprep.subr.bf16.mxu1 %v4789_v1  ;;  %2235 = vmatprep.subr.bf16.mxu0 %v4598_v17  ;;  %v4651_v17 = vld [vmem:[%s6109_s1 + $0x740] ss:$12 sps:$4 sm:$0xff]  }
 0x107   : > { %2279 = vmatpush1.bf16.msra.mxu1 %v4599_v18  ;;  %2236 = vmatpush1.bf16.msra.mxu0 %v4596_v19  ;;  %v4648_v18 = vld [vmem:[%s6109_s1 + $0x738] ss:$12 sps:$4 sm:$0xff]  }
 0x108   : > { %2280 = vmatprep.subr.bf16.mxu1 %v4789_v1  ;;  %2237 = vmatprep.subr.bf16.mxu0 %v4602_v20  ;;  %v4654_v20 = vld [vmem:[%s6109_s1 + $0x754] ss:$12 sps:$4 sm:$0xff]  }
 0x109   : > { %v5582_v23 = vpop.f32.mrb[0].mxu1 }
 0x10a   : > { %v569_v25 = vpop.f32.mrb[1].mxu1 }
 0x10b   : > { %v5587_v27 = vpop.f32.mrb[2].mxu1  ;;  %2281 = vmatpush1.bf16.msra.mxu1 %v4603_v21  ;;  %2238 = vmatpush1.bf16.msra.mxu0 %v4600_v22  ;;  %v4655_v25 = vld [vmem:[%s6109_s1 + $0x758] ss:$12 sps:$4 sm:$0xff]  }
 0x10c   : > { %v572_v29 = vpop.f32.mrb[3].mxu1  ;;  %2282 = vmatprep.subr.bf16.mxu1 %v4789_v1  ;;  %2239 = vmatprep.subr.bf16.mxu0 %v4606_v24 }
 0x10f   : > { %2283 = vmatpush1.bf16.msra.mxu1 %v4607_v28  ;;  %2240 = vmatpush1.bf16.msra.mxu0 %v4604_v30  ;;  %v4652_v30 = vld [vmem:[%s6109_s1 + $0x750] ss:$12 sps:$4 sm:$0xff]  }
 0x110   : > { %2284 = vmatprep.subr.bf16.mxu1 %v4789_v1  ;;  %2241 = vmatprep.subr.bf16.mxu0 %v4610_v31  ;;  %v4659_v31 = vld [vmem:[%s6109_s1 + $0x770] ss:$12 sps:$4 sm:$0xff]  }
 0x113   : > { %2285 = vmatpush1.bf16.msra.mxu1 %v4611_v32  ;;  %2242 = vmatpush1.bf16.msra.mxu0 %v4608_v33  ;;  %v4662_v32 = vld [vmem:[%s6109_s1 + $0x784] ss:$12 sps:$4 sm:$0xff]   ;;  %v4663_v33 = vld [vmem:[%s6109_s1 + $0x788] ss:$12 sps:$4 sm:$0xff]  }
 0x114   : > { %2286 = vmatprep.subr.bf16.mxu1 %v4789_v1  ;;  %2243 = vmatprep.subr.bf16.mxu0 %v4614_v34  ;;  %v4660_v34 = vld [vmem:[%s6109_s1 + $0x780] ss:$12 sps:$4 sm:$0xff]  }
 0x117   : > { %2287 = vmatpush1.bf16.msra.mxu1 %v4615_v36  ;;  %2244 = vmatpush1.bf16.msra.mxu0 %v4612_v37  ;;  %v4666_v36 = vld [vmem:[%s6109_s1 + $0x79c] ss:$12 sps:$4 sm:$0xff]   ;;  %v4667_v37 = vld [vmem:[%s6109_s1 + $0x7a0] ss:$12 sps:$4 sm:$0xff]  }
 0x118   : > { %2288 = vmatprep.subr.bf16.mxu1 %v4789_v1  ;;  %2245 = vmatprep.subr.bf16.mxu0 %v4618_v35  ;;  %v4664_v35 = vld [vmem:[%s6109_s1 + $0x798] ss:$12 sps:$4 sm:$0xff]  }
 0x11b   : > { %2289 = vmatpush1.bf16.msra.mxu1 %v4619_v41  ;;  %2246 = vmatpush1.bf16.msra.mxu0 %v4616_v43  ;;  %v2750_v41 = vshrl.u32 %v5658_v57, 16  ;;  %v4671_v43 = vld [vmem:[%s6109_s1 + $0x7b8] ss:$12 sps:$4 sm:$0xff]   ;;  %v4672_v57 = vld [vmem:[%s6109_s1 + $0x7c8] ss:$12 sps:$4 sm:$0xff]  }
 0x11c   : > { %2290 = vmatprep.subr.bf16.mxu1 %v4789_v1  ;;  %2247 = vmatprep.subr.bf16.mxu0 %v4622_v44  ;;  %v5791_v44 = vcombine.low %v5637_v51, %v5640_v52 }
 0x11d   : > { %v2752_v51 = vrot.slane %v2750_v41, 1 }
 0x11f   : > { %2291 = vmatpush1.bf16.msra.mxu1 %v4623_v45  ;;  %2248 = vmatpush1.bf16.msra.mxu0 %v4620_v54  ;;  %v5795_v45 = vcombine.low %v5643_v53, %v5643_v53  ;;  %v2755_v54 = vrot.slane %v2753_v42, 2  ;;  %v4675_v53 = vld [vmem:[%s6109_s1 + $0x7d0] ss:$12 sps:$4 sm:$0xff]  }
 0x120   : > { %2292 = vmatprep.subr.bf16.mxu1 %v4789_v1  ;;  %2249 = vmatprep.subr.bf16.mxu0 %v4626_v55  ;;  %v2382_v55 = vrot.slane %v5791_v44, 1 }
 0x121   : > { %v2383_v56 = vrot.slane %v5795_v45, 1  ;;  %v2756_v59 = vor.u32 %v2755_v54, %v2752_v51  ;;  %v4727_v51 = vld [vmem:[%s6109_s1 + $0x8f0] ss:$12 sps:$4 sm:$0xff]  }
 0x123   : > { %2293 = vmatpush1.bf16.msra.mxu1 %v4627_v48  ;;  %2250 = vmatpush1.bf16.msra.mxu0 %v4624_v60  ;;  %v4682_v48 = vld [vmem:[%s6109_s1 + $0x7e4] ss:$12 sps:$4 sm:$0xff]   ;;  %v2384_v60 = vsel %vm918_vm1, %v2382_v55, %v2383_v56  ;;  %v4724_v55 = vld [vmem:[%s6109_s1 + $0x8e8] ss:$12 sps:$4 sm:$0xff]  }
 0x124   : > { %2627 = vmatprep.subr.bf16.mxu1 %v4789_v1  ;;  %2584 = vmatprep.subr.bf16.mxu0 %v4630_v61  ;;  %v4683_v61 = vld [vmem:[%s6109_s1 + $0x7e8] ss:$12 sps:$4 sm:$0xff]   ;;  %v4730_v56 = vld [vmem:[%s6109_s1 + $0x904] ss:$12 sps:$4 sm:$0xff]  }
 0x126   : > { %2303 = vmatmul.mubr.bf16.vlgmr.msra.gmra.mrb[20].mxu1 %v2013_v0  ;;  %2260 = vmatmul.mubr.bf16.vlgmr.msra.gmra.mrb[0].mxu0 %v2013_v0  ;;  %v2757_v0 = vsel %vm2723_vm5, %v2748_v58, %v2756_v59  ;;  %v4731_v59 = vld [vmem:[%s6109_s1 + $0x908] ss:$12 sps:$4 sm:$0xff]  }
 0x127   : > { %2628 = vmatpush1.bf16.msra.mxu1 %v4631_v2  ;;  %2585 = vmatpush1.bf16.msra.mxu0 %v4628_v3  ;;  %v4687_v2 = vld [vmem:[%s6109_s1 + $0x800] ss:$12 sps:$4 sm:$0xff]   ;;  %v4684_v3 = vld [vmem:[%s6109_s1 + $0x7f8] ss:$12 sps:$4 sm:$0xff]  }
 0x128   : > { %2629 = vmatprep.subr.bf16.mxu1 %v4789_v1  ;;  %2586 = vmatprep.subr.bf16.mxu0 %v4634_v4  ;;  %v4690_v4 = vld [vmem:[%s6109_s1 + $0x814] ss:$12 sps:$4 sm:$0xff]  }
 0x129   : > { %4096 = vmatprep.mubr.msk.bf16.mxu1 %vm486_vm0, %v2387_v5  ;;  %4095 = vmatprep.mubr.msk.bf16.mxu0 %vm486_vm0, %v2387_v5  ;;  %v4691_v5 = vld [vmem:[%s6109_s1 + $0x818] ss:$12 sps:$4 sm:$0xff]  }
 0x12b   : > { %2630 = vmatpush1.bf16.msra.mxu1 %v4635_v6  ;;  %2587 = vmatpush1.bf16.msra.mxu0 %v4632_v7  ;;  %v4688_v6 = vld [vmem:[%s6109_s1 + $0x810] ss:$12 sps:$4 sm:$0xff]   ;;  %v4694_v7 = vld [vmem:[%s6109_s1 + $0x82c] ss:$12 sps:$4 sm:$0xff]  }
 0x12c   : > { %2631 = vmatprep.subr.bf16.mxu1 %v4789_v1  ;;  %2588 = vmatprep.subr.bf16.mxu0 %v4638_v8  ;;  %v4695_v8 = vld [vmem:[%s6109_s1 + $0x830] ss:$12 sps:$4 sm:$0xff]  }
 0x12f   : > { %2632 = vmatpush1.bf16.msra.mxu1 %v4639_v9  ;;  %2589 = vmatpush1.bf16.msra.mxu0 %v4636_v10  ;;  %v4692_v9 = vld [vmem:[%s6109_s1 + $0x828] ss:$12 sps:$4 sm:$0xff]   ;;  %v4698_v10 = vld [vmem:[%s6109_s1 + $0x844] ss:$12 sps:$4 sm:$0xff]  }
 0x130   : > { %2633 = vmatprep.subr.bf16.mxu1 %v4789_v1  ;;  %2590 = vmatprep.subr.bf16.mxu0 %v4642_v11  ;;  %v4699_v11 = vld [vmem:[%s6109_s1 + $0x848] ss:$12 sps:$4 sm:$0xff]  }
 0x133   : > { %2634 = vmatpush1.bf16.msra.mxu1 %v4643_v12  ;;  %2591 = vmatpush1.bf16.msra.mxu0 %v4640_v13  ;;  %v4696_v12 = vld [vmem:[%s6109_s1 + $0x840] ss:$12 sps:$4 sm:$0xff]   ;;  %v4702_v13 = vld [vmem:[%s6109_s1 + $0x85c] ss:$12 sps:$4 sm:$0xff]  }
 0x134   : > { %2635 = vmatprep.subr.bf16.mxu1 %v4789_v1  ;;  %2592 = vmatprep.subr.bf16.mxu0 %v4646_v14  ;;  %v4703_v14 = vld [vmem:[%s6109_s1 + $0x860] ss:$12 sps:$4 sm:$0xff]  }
 0x137   : > { %2636 = vmatpush1.bf16.msra.mxu1 %v4647_v26  ;;  %2593 = vmatpush1.bf16.msra.mxu0 %v4644_v15  ;;  %v4700_v26 = vld [vmem:[%s6109_s1 + $0x858] ss:$12 sps:$4 sm:$0xff]  }
 0x138   : > { %2637 = vmatprep.subr.bf16.mxu1 %v4789_v1  ;;  %2594 = vmatprep.subr.bf16.mxu0 %v4650_v16  ;;  %v4706_v16 = vld [vmem:[%s6109_s1 + $0x874] ss:$12 sps:$4 sm:$0xff]  }
 0x139   : > { %v846_v19 = vpop.f32.mrb[4].mxu1 }
 0x13a   : > { %v5737_v21 = vadd.f32 %v846_v19, %v5582_v23  ;;  %v848_v22 = vpop.f32.mrb[5].mxu1  ;;  %v4658_v23 = vld [vmem:[%s6109_s1 + $0x76c] ss:$12 sps:$4 sm:$0xff]  }
 0x13b   : > { %v849_v24 = vpop.f32.mrb[6].mxu1  ;;  %2638 = vmatpush1.bf16.msra.mxu1 %v4651_v17  ;;  %2595 = vmatpush1.bf16.msra.mxu0 %v4648_v18 }
 0x13c   : > { %v5743_v28 = vadd.f32 %v849_v24, %v5587_v27  ;;  %v851_v29 = vpop.f32.mrb[7].mxu1  ;;  %2639 = vmatprep.subr.bf16.mxu1 %v4789_v1  ;;  %2596 = vmatprep.subr.bf16.mxu0 %v4654_v20  ;;  %v4656_v27 = vld [vmem:[%s6109_s1 + $0x768] ss:$12 sps:$4 sm:$0xff]   ;;  %v4707_v20 = vld [vmem:[%s6109_s1 + $0x878] ss:$12 sps:$4 sm:$0xff]  }
 0x13d   : > { %v4711_v29 = vld [vmem:[%s6109_s1 + $0x890] ss:$12 sps:$4 sm:$0xff]  }
 0x13f   : > { %2640 = vmatpush1.bf16.msra.mxu1 %v4655_v25  ;;  %2597 = vmatpush1.bf16.msra.mxu0 %v4652_v30  ;;  %v4704_v25 = vld [vmem:[%s6109_s1 + $0x870] ss:$12 sps:$4 sm:$0xff]  }
 0x140   : > { %2641 = vmatprep.subr.bf16.mxu1 %v4789_v1  ;;  %2598 = vmatprep.subr.bf16.mxu0 %v4658_v23  ;;  %v4714_v30 = vld [vmem:[%s6109_s1 + $0x8a4] ss:$12 sps:$4 sm:$0xff]   ;;  %v4715_v23 = vld [vmem:[%s6109_s1 + $0x8a8] ss:$12 sps:$4 sm:$0xff]  }
 0x143   : > { %2642 = vmatpush1.bf16.msra.mxu1 %v4659_v31  ;;  %2599 = vmatpush1.bf16.msra.mxu0 %v4656_v27  ;;  %v4712_v31 = vld [vmem:[%s6109_s1 + $0x8a0] ss:$12 sps:$4 sm:$0xff]   ;;  %v4718_v27 = vld [vmem:[%s6109_s1 + $0x8bc] ss:$12 sps:$4 sm:$0xff]  }
 0x144   : > { %2643 = vmatprep.subr.bf16.mxu1 %v4789_v1  ;;  %2600 = vmatprep.subr.bf16.mxu0 %v4662_v32  ;;  %v2725_v32 = vshrl.u32 %v5791_v44, 16 }
 0x146   : > { %v2727_v40 = vrot.slane %v2725_v32, 1  ;;  %v4770_v32 = vld [vmem:[%s6109_s1 + $0x9f4] ss:$12 sps:$4 sm:$0xff]  }
 0x147   : > { %2644 = vmatpush1.bf16.msra.mxu1 %v4663_v33  ;;  %2601 = vmatpush1.bf16.msra.mxu0 %v4660_v34  ;;  %v2728_v33 = vshll.u32 %v5791_v44, 16  ;;  %v4719_v34 = vld [vmem:[%s6109_s1 + $0x8c0] ss:$12 sps:$4 sm:$0xff]  }
 0x148   : > { %2645 = vmatprep.subr.bf16.mxu1 %v4789_v1  ;;  %2602 = vmatprep.subr.bf16.mxu0 %v4666_v36  ;;  %v2733_v36 = vshrl.u32 %v5795_v45, 16  ;;  %v5934_v44 = vld [vmem:[%s4901_s9 + $0x8] sm:$0xcc] }
 0x149   : > { %v2730_v41 = vrot.slane %v2728_v33, 2  ;;  %v4232_v49 = vcombine.high %v5934_v44, %v5640_v52  ;;  %v4771_v33 = vld [vmem:[%s6109_s1 + $0x9f8] ss:$12 sps:$4 sm:$0xff]  }
 0x14a   : > { %v2735_v42 = vrot.slane %v2733_v36, 1 }
 0x14b   : > { %2646 = vmatpush1.bf16.msra.mxu1 %v4667_v37  ;;  %2603 = vmatpush1.bf16.msra.mxu0 %v4664_v35  ;;  %v2736_v37 = vshll.u32 %v5795_v45, 16  ;;  %v4716_v35 = vld [vmem:[%s6109_s1 + $0x8b8] ss:$12 sps:$4 sm:$0xff]   ;;  %v2731_v54 = vor.u32 %v2730_v41, %v2727_v40  ;;  %v4772_v40 = vld [vmem:[%s6109_s1 + $0xa08] ss:$12 sps:$4 sm:$0xff]  }
 0x14c   : > { %2647 = vmatprep.subr.bf16.mxu1 %v4789_v1  ;;  %2604 = vmatprep.subr.bf16.mxu0 %v4670_v38  ;;  %v4722_v38 = vld [vmem:[%s6109_s1 + $0x8d4] ss:$12 sps:$4 sm:$0xff]   ;;  %v5937_v45 = vld [vmem:[%s4901_s9 + $0x18] sm:$0x33] }
 0x14d   : > { %v4234_v50 = vcombine.high %v5937_v45, %v5937_v45  ;;  %v4233_v36 = vcombine.low %v5937_v45, %v5937_v45 }
 0x14f   : > { %2648 = vmatpush1.bf16.msra.mxu1 %v4671_v43  ;;  %2605 = vmatpush1.bf16.msra.mxu0 %v4668_v46  ;;  %v2738_v43 = vrot.slane %v2736_v37, 2  ;;  %v4720_v46 = vld [vmem:[%s6109_s1 + $0x8d0] ss:$12 sps:$4 sm:$0xff]  }
 0x150   : > { %2649 = vmatprep.subr.bf16.mxu1 %v4789_v1  ;;  %2606 = vmatprep.subr.bf16.mxu0 %v4674_v47  ;;  %v4726_v47 = vld [vmem:[%s6109_s1 + $0x8ec] ss:$12 sps:$4 sm:$0xff]   ;;  %v4768_v37 = vld [vmem:[%s6109_s1 + $0x9f0] ss:$12 sps:$4 sm:$0xff]  }
 0x153   : > { %2650 = vmatpush1.bf16.msra.mxu1 %v4675_v53  ;;  %2607 = vmatpush1.bf16.msra.mxu0 %v4672_v57  ;;  %v2739_v53 = vor.u32 %v2738_v43, %v2735_v42  ;;  %v3109_v57 = vrot.slane %v4232_v49, 2 }
 0x154   : > { %2997 = vmatprep.subr.bf16.mxu1 %v4789_v1  ;;  %2954 = vmatprep.subr.bf16.mxu0 %v4682_v48  ;;  %v3110_v48 = vrot.slane %v4234_v50, 2 }
 0x155   : > { %v2740_v58 = vsel %vm2723_vm5, %v2731_v54, %v2739_v53 }
 0x156   : > { %2660 = vmatmul.mubr.bf16.vlgmr.msra.gmra.mrb[24].mxu1 %v2384_v60  ;;  %2617 = vmatmul.mubr.bf16.vlgmr.msra.gmra.mrb[0].mxu0 %v2384_v60  ;;  %v4728_v60 = vld [vmem:[%s6109_s1 + $0x900] ss:$12 sps:$4 sm:$0xff]  }
 0x157   : > { %2998 = vmatpush1.bf16.msra.mxu1 %v4683_v61  ;;  %2955 = vmatpush1.bf16.msra.mxu0 %v4680_v62  ;;  %v4734_v61 = vld [vmem:[%s6109_s1 + $0x91c] ss:$12 sps:$4 sm:$0xff]   ;;  %v3111_v62 = vsel %vm3105_vm6, %v3109_v57, %v3110_v48 }
 0x158   : > { %2999 = vmatprep.subr.bf16.mxu1 %v4789_v1  ;;  %2956 = vmatprep.subr.bf16.mxu0 %v4686_v63  ;;  %v4735_v63 = vld [vmem:[%s6109_s1 + $0x920] ss:$12 sps:$4 sm:$0xff]  }
 0x159   : > { %4182 = vmatprep.mubr.msk.bf16.mxu1 %vm486_vm0, %v2757_v0  ;;  %4181 = vmatprep.mubr.msk.bf16.mxu0 %vm486_vm0, %v2757_v0  ;;  %v4732_v0 = vld [vmem:[%s6109_s1 + $0x918] ss:$12 sps:$4 sm:$0xff]  }
 0x15b   : > { %3000 = vmatpush1.bf16.msra.mxu1 %v4687_v2  ;;  %2957 = vmatpush1.bf16.msra.mxu0 %v4684_v3  ;;  %v4738_v2 = vld [vmem:[%s6109_s1 + $0x934] ss:$12 sps:$4 sm:$0xff]   ;;  %v4739_v3 = vld [vmem:[%s6109_s1 + $0x938] ss:$12 sps:$4 sm:$0xff]  }
 0x15c   : > { %3001 = vmatprep.subr.bf16.mxu1 %v4789_v1  ;;  %2958 = vmatprep.subr.bf16.mxu0 %v4690_v4  ;;  %v4736_v4 = vld [vmem:[%s6109_s1 + $0x930] ss:$12 sps:$4 sm:$0xff]  }
 0x15f   : > { %3002 = vmatpush1.bf16.msra.mxu1 %v4691_v5  ;;  %2959 = vmatpush1.bf16.msra.mxu0 %v4688_v6  ;;  %v4742_v5 = vld [vmem:[%s6109_s1 + $0x94c] ss:$12 sps:$4 sm:$0xff]   ;;  %v4743_v6 = vld [vmem:[%s6109_s1 + $0x950] ss:$12 sps:$4 sm:$0xff]  }
 0x160   : > { %3003 = vmatprep.subr.bf16.mxu1 %v4789_v1  ;;  %2960 = vmatprep.subr.bf16.mxu0 %v4694_v7  ;;  %v4740_v7 = vld [vmem:[%s6109_s1 + $0x948] ss:$12 sps:$4 sm:$0xff]  }
 0x163   : > { %3004 = vmatpush1.bf16.msra.mxu1 %v4695_v8  ;;  %2961 = vmatpush1.bf16.msra.mxu0 %v4692_v9  ;;  %v4746_v8 = vld [vmem:[%s6109_s1 + $0x964] ss:$12 sps:$4 sm:$0xff]   ;;  %v4747_v9 = vld [vmem:[%s6109_s1 + $0x968] ss:$12 sps:$4 sm:$0xff]  }
 0x164   : > { %3005 = vmatprep.subr.bf16.mxu1 %v4789_v1  ;;  %2962 = vmatprep.subr.bf16.mxu0 %v4698_v10  ;;  %v4744_v10 = vld [vmem:[%s6109_s1 + $0x960] ss:$12 sps:$4 sm:$0xff]  }
 0x167   : > { %3006 = vmatpush1.bf16.msra.mxu1 %v4699_v11  ;;  %2963 = vmatpush1.bf16.msra.mxu0 %v4696_v12  ;;  %v4750_v11 = vld [vmem:[%s6109_s1 + $0x97c] ss:$12 sps:$4 sm:$0xff]   ;;  %v4751_v12 = vld [vmem:[%s6109_s1 + $0x980] ss:$12 sps:$4 sm:$0xff]  }
 0x168   : > { %3007 = vmatprep.subr.bf16.mxu1 %v4789_v1  ;;  %2964 = vmatprep.subr.bf16.mxu0 %v4702_v13  ;;  %v4748_v13 = vld [vmem:[%s6109_s1 + $0x978] ss:$12 sps:$4 sm:$0xff]  }
 0x169   : > { %v1198_v15 = vpop.f32.mrb[8].mxu1 }
 0x16a   : > { %v5881_v17 = vadd.f32 %v1198_v15, %v5737_v21  ;;  %v1200_v18 = vpop.f32.mrb[9].mxu1  ;;  %v4710_v21 = vld [vmem:[%s6109_s1 + $0x88c] ss:$12 sps:$4 sm:$0xff]  }
 0x16b   : > { %v1201_v19 = vpop.f32.mrb[10].mxu1  ;;  %3008 = vmatpush1.bf16.msra.mxu1 %v4703_v14  ;;  %2965 = vmatpush1.bf16.msra.mxu0 %v4700_v26  ;;  %v4754_v26 = vld [vmem:[%s6109_s1 + $0x994] ss:$12 sps:$4 sm:$0xff]  }
 0x16c   : > { %v5887_v22 = vadd.f32 %v1201_v19, %v5743_v28  ;;  %v1203_v24 = vpop.f32.mrb[11].mxu1  ;;  %3009 = vmatprep.subr.bf16.mxu1 %v4789_v1  ;;  %2966 = vmatprep.subr.bf16.mxu0 %v4706_v16  ;;  %v4708_v28 = vld [vmem:[%s6109_s1 + $0x888] ss:$12 sps:$4 sm:$0xff]   ;;  %v4755_v19 = vld [vmem:[%s6109_s1 + $0x998] ss:$12 sps:$4 sm:$0xff]  }
 0x16f   : > { %3010 = vmatpush1.bf16.msra.mxu1 %v4707_v20  ;;  %2967 = vmatpush1.bf16.msra.mxu0 %v4704_v25  ;;  %v4752_v25 = vld [vmem:[%s6109_s1 + $0x990] ss:$12 sps:$4 sm:$0xff]  }
 0x170   : > { %3011 = vmatprep.subr.bf16.mxu1 %v4789_v1  ;;  %2968 = vmatprep.subr.bf16.mxu0 %v4710_v21  ;;  %v4759_v21 = vld [vmem:[%s6109_s1 + $0x9b0] ss:$12 sps:$4 sm:$0xff]  }
 0x173   : > { %3012 = vmatpush1.bf16.msra.mxu1 %v4711_v29  ;;  %2969 = vmatpush1.bf16.msra.mxu0 %v4708_v28  ;;  %v4762_v29 = vld [vmem:[%s6109_s1 + $0x9c4] ss:$12 sps:$4 sm:$0xff]   ;;  %v4763_v28 = vld [vmem:[%s6109_s1 + $0x9c8] ss:$12 sps:$4 sm:$0xff]  }
 0x174   : > { %3013 = vmatprep.subr.bf16.mxu1 %v4789_v1  ;;  %2970 = vmatprep.subr.bf16.mxu0 %v4714_v30  ;;  %v4760_v30 = vld [vmem:[%s6109_s1 + $0x9c0] ss:$12 sps:$4 sm:$0xff]  }
 0x177   : > { %3014 = vmatpush1.bf16.msra.mxu1 %v4715_v23  ;;  %2971 = vmatpush1.bf16.msra.mxu0 %v4712_v31  ;;  %v4766_v23 = vld [vmem:[%s6109_s1 + $0x9dc] ss:$12 sps:$4 sm:$0xff]   ;;  %v4767_v31 = vld [vmem:[%s6109_s1 + $0x9e0] ss:$12 sps:$4 sm:$0xff]  }
 0x178   : > { %3015 = vmatprep.subr.bf16.mxu1 %v4789_v1  ;;  %2972 = vmatprep.subr.bf16.mxu0 %v4718_v27  ;;  %v4764_v27 = vld [vmem:[%s6109_s1 + $0x9d8] ss:$12 sps:$4 sm:$0xff]  }
 0x17b   : > { %3016 = vmatpush1.bf16.msra.mxu1 %v4719_v34  ;;  %2973 = vmatpush1.bf16.msra.mxu0 %v4716_v35  ;;  %v4231_v34 = vcombine.low %v5934_v44, %v5640_v52  ;;  %v4774_v35 = vld [vmem:[%s6109_s1 + $0xa0c] ss:$12 sps:$4 sm:$0xff]   ;;  %v4775_v52 = vld [vmem:[%s6109_s1 + $0xa10] ss:$12 sps:$4 sm:$0xff]  }
 0x17c   : > { %3017 = vmatprep.subr.bf16.mxu1 %v4789_v1  ;;  %2974 = vmatprep.subr.bf16.mxu0 %v4722_v38 }
 0x17d   : > { %v3106_v38 = vrot.slane %v4231_v34, 2 }
 0x17f   : > { %3018 = vmatpush1.bf16.msra.mxu1 %v4723_v39  ;;  %2975 = vmatpush1.bf16.msra.mxu0 %v4720_v46  ;;  %v3107_v39 = vrot.slane %v4233_v36, 2 }
 0x180   : > { %3019 = vmatprep.subr.bf16.mxu1 %v4789_v1  ;;  %2976 = vmatprep.subr.bf16.mxu0 %v4726_v47 }
 0x181   : > { %v3108_v41 = vsel %vm3105_vm6, %v3106_v38, %v3107_v39 }
 0x183   : > { %3020 = vmatpush1.bf16.msra.mxu1 %v4727_v51  ;;  %2977 = vmatpush1.bf16.msra.mxu0 %v4724_v55 }
 0x184   : > { %3351 = vmatprep.subr.bf16.mxu1 %v4789_v1  ;;  %3308 = vmatprep.subr.bf16.mxu0 %v4730_v56 }
 0x186   : > { %3030 = vmatmul.mubr.bf16.vlgmr.msra.gmra.mrb[28].mxu1 %v2740_v58  ;;  %2987 = vmatmul.mubr.bf16.vlgmr.msra.gmra.mrb[0].mxu0 %v2740_v58 }
 0x187   : > { %3352 = vmatpush1.bf16.msra.mxu1 %v4731_v59  ;;  %3309 = vmatpush1.bf16.msra.mxu0 %v4728_v60 }
 0x188   : > { %3353 = vmatprep.subr.bf16.mxu1 %v4789_v1  ;;  %3310 = vmatprep.subr.bf16.mxu0 %v4734_v61 }
 0x189   : > { %4272 = vmatprep.mubr.msk.bf16.mxu1 %vm486_vm0, %v3111_v62  ;;  %4271 = vmatprep.mubr.msk.bf16.mxu0 %vm486_vm0, %v3111_v62 }
 0x18b   : > { %3354 = vmatpush1.bf16.msra.mxu1 %v4735_v63  ;;  %3311 = vmatpush1.bf16.msra.mxu0 %v4732_v0 }
 0x18c   : > { %3355 = vmatprep.subr.bf16.mxu1 %v4789_v1  ;;  %3312 = vmatprep.subr.bf16.mxu0 %v4738_v2 }
 0x18f   : > { %3356 = vmatpush1.bf16.msra.mxu1 %v4739_v3  ;;  %3313 = vmatpush1.bf16.msra.mxu0 %v4736_v4  ;;  %v3400_v3 = vlaneseq }
 0x190   : > { %3357 = vmatprep.subr.bf16.mxu1 %v4789_v1  ;;  %3314 = vmatprep.subr.bf16.mxu0 %v4742_v5 }
 0x191   : > { %v3401_v4 = vshrl.u32 %v3400_v3, 7 }
 0x193   : > { %3358 = vmatpush1.bf16.msra.mxu1 %v4743_v6  ;;  %3315 = vmatpush1.bf16.msra.mxu0 %v4740_v7  ;;  %v3402_v5 = vsub.s32 0, %v3401_v4  ;;  %v3398_v6 = vld [vmem:[%s6110_s2] sm:$0x7]  ;;  %v3410_v7 = vsub.s32 2, %v3401_v4 }
 0x194   : > { %3359 = vmatprep.subr.bf16.mxu1 %v4789_v1  ;;  %3316 = vmatprep.subr.bf16.mxu0 %v4746_v8  ;;  %v3406_v8 = vsub.s32 1, %v3401_v4 }
 0x197   : > { %3360 = vmatpush1.bf16.msra.mxu1 %v4747_v9  ;;  %3317 = vmatpush1.bf16.msra.mxu0 %v4744_v10  ;;  %v3403_v9 = vrot.slane %v3398_v6, %v3402_v5  ;;  %v3411_v10 = vrot.slane %v3398_v6, %v3410_v7 }
 0x198   : > { %3361 = vmatprep.subr.bf16.mxu1 %v4789_v1  ;;  %3318 = vmatprep.subr.bf16.mxu0 %v4750_v11  ;;  %v3407_v11 = vrot.slane %v3398_v6, %v3406_v8 }
 0x199   : > { %v1580_v14 = vpop.f32.mrb[12].mxu1 }
 0x19a   : > { %v1589_v15 = vadd.f32 %v1580_v14, %v5881_v17  ;;  %v1582_v16 = vpop.f32.mrb[13].mxu1  ;;  %v4758_v17 = vld [vmem:[%s6109_s1 + $0x9ac] ss:$12 sps:$4 sm:$0xff]  }
 0x19b   : > { %v1583_v18 = vpop.f32.mrb[14].mxu1  ;;  %3362 = vmatpush1.bf16.msra.mxu1 %v4751_v12  ;;  %3319 = vmatpush1.bf16.msra.mxu0 %v4748_v13 }
 0x19c   : > { %v1592_v20 = vadd.f32 %v1583_v18, %v5887_v22  ;;  %v1585_v24 = vpop.f32.mrb[15].mxu1  ;;  %3363 = vmatprep.subr.bf16.mxu1 %v4789_v1  ;;  %3320 = vmatprep.subr.bf16.mxu0 %v4754_v26  ;;  %v4756_v22 = vld [vmem:[%s6109_s1 + $0x9a8] ss:$12 sps:$4 sm:$0xff]  }
 0x19f   : > { %3364 = vmatpush1.bf16.msra.mxu1 %v4755_v19  ;;  %3321 = vmatpush1.bf16.msra.mxu0 %v4752_v25 }
 0x1a0   : > { %3365 = vmatprep.subr.bf16.mxu1 %v4789_v1  ;;  %3322 = vmatprep.subr.bf16.mxu0 %v4758_v17 }
 0x1a3   : > { %3366 = vmatpush1.bf16.msra.mxu1 %v4759_v21  ;;  %3323 = vmatpush1.bf16.msra.mxu0 %v4756_v22 }
 0x1a4   : > { %3367 = vmatprep.subr.bf16.mxu1 %v4789_v1  ;;  %3324 = vmatprep.subr.bf16.mxu0 %v4762_v29 }
 0x1a7   : > { %3368 = vmatpush1.bf16.msra.mxu1 %v4763_v28  ;;  %3325 = vmatpush1.bf16.msra.mxu0 %v4760_v30 }
 0x1a8   : > { %3369 = vmatprep.subr.bf16.mxu1 %v4789_v1  ;;  %3326 = vmatprep.subr.bf16.mxu0 %v4766_v23 }
 0x1ab   : > { %3370 = vmatpush1.bf16.msra.mxu1 %v4767_v31  ;;  %3327 = vmatpush1.bf16.msra.mxu0 %v4764_v27 }
 0x1ac   : > { %3371 = vmatprep.subr.bf16.mxu1 %v4789_v1  ;;  %3328 = vmatprep.subr.bf16.mxu0 %v4770_v32 }
 0x1af   : > { %3372 = vmatpush1.bf16.msra.mxu1 %v4771_v33  ;;  %3329 = vmatpush1.bf16.msra.mxu0 %v4768_v37 }
 0x1b0   : > { %3373 = vmatprep.subr.bf16.mxu1 %v4789_v1  ;;  %3330 = vmatprep.subr.bf16.mxu0 %v4774_v35  ;;  %v3459_v35 = vld [vmem:[%s170_s16 + $0x14] sm:$0xf] }
 0x1b3   : > { %3374 = vmatpush1.bf16.msra.mxu1 %v4775_v52  ;;  %3331 = vmatpush1.bf16.msra.mxu0 %v4772_v40  ;;  %v3456_v52 = vld [vmem:[%s170_s16 + $0xc] sm:$0xff] }
 0x1b6   : > { %3384 = vmatmul.mubr.bf16.vlgmr.msra.gmra.mrb[32].mxu1 %v3108_v41  ;;  %3341 = vmatmul.mubr.bf16.vlgmr.msra.gmra.mrb[0].mxu0 %v3108_v41 }
 0x1c9   : > { %v1934_v42 = vpop.f32.mrb[16].mxu1 }
 0x1ca   : > { %v1943_v43 = vadd.f32 %v1934_v42, %v1589_v15  ;;  %v1936_v44 = vpop.f32.mrb[17].mxu1 }
 0x1cb   : > { %v1937_v45 = vpop.f32.mrb[18].mxu1 }
 0x1cc   : > { %v1946_v46 = vadd.f32 %v1937_v45, %v1592_v20  ;;  %v1939_v47 = vpop.f32.mrb[19].mxu1 }
 0x1f9   : > { %v2304_v49 = vpop.f32.mrb[20].mxu1 }
 0x1fa   : > { %v2313_v50 = vadd.f32 %v2304_v49, %v1943_v43  ;;  %v2306_v1 = vpop.f32.mrb[21].mxu1 }
 0x1fb   : > { %v2307_v51 = vpop.f32.mrb[22].mxu1 }
 0x1fc   : > { %v2316_v54 = vadd.f32 %v2307_v51, %v1946_v46  ;;  %v2309_v53 = vpop.f32.mrb[23].mxu1 }
 0x229   : > { %v2661_v55 = vpop.f32.mrb[24].mxu1 }
 0x22a   : > { %v2670_v56 = vadd.f32 %v2661_v55, %v2313_v50  ;;  %v2663_v57 = vpop.f32.mrb[25].mxu1 }
 0x22b   : > { %v2664_v48 = vpop.f32.mrb[26].mxu1 }
 0x22c   : > { %v2673_v58 = vadd.f32 %v2664_v48, %v2316_v54  ;;  %v2666_v59 = vpop.f32.mrb[27].mxu1 }
 0x259   : > { %v3031_v60 = vpop.f32.mrb[28].mxu1 }
 0x25a   : > { %v3040_v61 = vadd.f32 %v3031_v60, %v2670_v56  ;;  %v3033_v62 = vpop.f32.mrb[29].mxu1 }
 0x25b   : > { %v3034_v63 = vpop.f32.mrb[30].mxu1 }
 0x25c   : > { %v3043_v0 = vadd.f32 %v3034_v63, %v2673_v58  ;;  %v3036_v2 = vpop.f32.mrb[31].mxu1 }
 0x289   : > { %v3385_v12 = vpop.f32.mrb[32].mxu1  ;;  %v3342_v14 = vpop.f32.mrb[0].mxu0 }
 0x28a   : > { %v3394_v13 = vadd.f32 %v3385_v12, %v3040_v61  ;;  %v3387_v26 = vpop.f32.mrb[33].mxu1  ;;  %v3415_v15 = vadd.f32 %v3403_v9, %v3342_v14  ;;  %v3344_v16 = vpop.f32.mrb[1].mxu0 }
 0x28b   : > { %v3388_v18 = vpop.f32.mrb[34].mxu1  ;;  %v3416_v20 = vadd.f32 %v3407_v11, %v3344_v16  ;;  %v3346_v25 = vpop.f32.mrb[2].mxu0 }
 0x28c   : > { %v3417_v19 = vadd.f32 %v3411_v10, %v3394_v13  ;;  %v3397_v24 = vadd.f32 %v3388_v18, %v3043_v0  ;;  %v3390_v17 = vpop.f32.mrb[35].mxu1  ;;  %v3421_v21 = vmax.f32 %v3415_v15, 0.0  ;;  %v3418_v29 = vadd.f32 %v3403_v9, %v3346_v25  ;;  %v3348_v28 = vpop.f32.mrb[3].mxu0 }
 0x28d   : > { %v3422_v23 = vmax.f32 %v3416_v20, 0.0  ;;  %v3419_v27 = vadd.f32 %v3407_v11, %v3348_v28 }
 0x28e   : > { %v3423_v30 = vmax.f32 %v3417_v19, 0.0  ;;  %v3420_v31 = vadd.f32 %v3411_v10, %v3397_v24  ;;  %v3424_v32 = vmax.f32 %v3418_v29, 0.0 }
 0x28f   : > { %v4280_v34 = vpack.c.bf16 %v3422_v23, %v3421_v21  ;;  %v3425_v37 = vmax.f32 %v3419_v27, 0.0 }
 0x290   : > { %v4281_v33 = vpack.c.bf16 %v3423_v30, %v3423_v30  ;;  %v3426_v36 = vmax.f32 %v3420_v31, 0.0 }
 0x291   : > { %3447 = vst [vmem:[%s170_s16] sm:$0xff] %v4280_v34  ;;  %v4282_v39 = vpack.c.bf16 %v3425_v37, %v3424_v32 }
 0x292   : > { %3448 = vst [vmem:[%s170_s16 + $0x8] sm:$0xf] %v4281_v33  ;;  %v4283_v38 = vpack.c.bf16 %v3426_v36, %v3426_v36 }
 0x293   : > { %v3457_v41 = vsel %vm3455_vm13, %v4282_v39, %v3456_v52 }
 0x294   : > { %v3460_v40 = vsel %vm6092_vm11, %v4283_v38, %v3459_v35  ;;  %3458 = vst [vmem:[%s170_s16 + $0xc] sm:$0xff] %v3457_v41 }
 0x295   : > { %3461 = vst [vmem:[%s170_s16 + $0x14] sm:$0xf] %v3460_v40 }
 0x296 PF: > { %s13_s12 = sadd.s32 1, %s4787_s12  }
 0x297   : > { %p10_p4 = scmp.ge.s32.totalorder %s13_s12, 4  }
 0x299   :  { %12 = sbr.rel (!%p10_p4) target bundleno = 1 (0x1), region = 70 }

// kernel: alexnet_features.13
= control target key start
LH: loop header
LB: loop body
LE: loop exit
PB: predicated region body
PF: predicated region fallthrough
CT: control target
= control target key end

     0   :  { %s5702_s12 = smov 0   ;;  %s7305_s0 = inlined_call_operand.vmem [shape: bf16[2,30,384], index: 0, kind: input, shape index: {}]   ;;  %s7306_s1 = inlined_call_operand.vmem [shape: bf16[9,384,256], index: 1, kind: input, shape index: {}]   ;;  %s7307_s2 = inlined_call_operand.vmem [shape: f32[1,256], index: 2, kind: input, shape index: {}]   ;;  %s7308_s3 = inlined_call_operand.vmem [shape: bf16[2,15,256], index: 3, kind: output, shape index: {}]  }
   0x1 LB: > { %s4046_s13 = sadd.s32 4294967295, %s5679_s12   ;;  %p4050_p0 = scmp.ge.s32.totalorder %s5679_s12, 1  ;;  %s5679_s12 = sphi %s5702_s12, %s13_s12  }
   0x2   : > { %p137_p1 = scmp.lt.s32.totalorder %s5679_s12, 3 }
   0x4   : > { %p138_p2 = pnand %p4050_p0, %p137_p1 }
   0x5   : > { %v4988_v0 = vld [vmem:[%s7306_s1 + $0x184] ss:$8 sps:$4 sm:$0xff] (!%p138_p2)   ;;  %v5681_v2 = vmov (!%p138_p2), 0   ;;  %v4992_v3 = vld [vmem:[%s7306_s1 + $0x180] ss:$8 sps:$4 sm:$0xff] (!%p138_p2)   ;;  %p161_p3 = scmp.lt.s32.totalorder (!%p138_p2), %s4046_s13, 1 }
   0x6   : > { %141 = sbr.rel (%p138_p2) target bundleno = 680 (0x2a8), region = 32  ;;  %v4990_v1 = vld [vmem:[%s7306_s1 + $0x104] ss:$8 sps:$4 sm:$0xff] (!%p138_p2)   ;;  %954 = vmatprep.mubr.bf16.mxu0 (!%p138_p2), %v5681_v2  ;;  %550 = vmatprep.subr.bf16.mxu1 (!%p138_p2), %v4988_v0  ;;  %v4993_v4 = vld [vmem:[%s7306_s1 + $0x100] ss:$8 sps:$4 sm:$0xff] (!%p138_p2)   ;;  %vm1041_vm0 = vcmask (!%p138_p2), 1046528  }
   0x7   : > { %922 = vmatprep.subr.bf16.mxu0 (!%p138_p2), %v4990_v1  ;;  %v4994_v5 = vld [vmem:[%s7306_s1 + $0x194] ss:$8 sps:$4 sm:$0xff] (!%p138_p2)   ;;  %551 = vmatpush1.bf16.msra.mxu1 (!%p138_p2), %v4992_v3  ;;  %v4998_v7 = vld [vmem:[%s7306_s1 + $0x190] ss:$8 sps:$4 sm:$0xff] (!%p138_p2)   ;;  %v5000_v9 = vld [vmem:[%s7306_s1 + $0x1a4] ss:$8 sps:$4 sm:$0xff] (!%p138_p2)  }
   0x8   : > { %923 = vmatpush1.bf16.msra.mxu0 (!%p138_p2), %v4993_v4  ;;  %v4996_v6 = vld [vmem:[%s7306_s1 + $0x114] ss:$8 sps:$4 sm:$0xff] (!%p138_p2)   ;;  %552 = vmatprep.subr.bf16.mxu1 (!%p138_p2), %v4994_v5  ;;  %v4999_v8 = vld [vmem:[%s7306_s1 + $0x110] ss:$8 sps:$4 sm:$0xff] (!%p138_p2)   ;;  %v5002_v10 = vld [vmem:[%s7306_s1 + $0x124] ss:$8 sps:$4 sm:$0xff] (!%p138_p2)  }
   0x9   : > { %924 = vmatprep.subr.bf16.mxu0 (!%p138_p2), %v4996_v6  ;;  %v5004_v11 = vld [vmem:[%s7306_s1 + $0x1a0] ss:$8 sps:$4 sm:$0xff] (!%p138_p2)   ;;  %v5006_v13 = vld [vmem:[%s7306_s1 + $0x1b4] ss:$8 sps:$4 sm:$0xff] (!%p138_p2)   ;;  %v5010_v15 = vld [vmem:[%s7306_s1 + $0x1b0] ss:$8 sps:$4 sm:$0xff] (!%p138_p2)  }
   0xa   : > { %v5005_v12 = vld [vmem:[%s7306_s1 + $0x120] ss:$8 sps:$4 sm:$0xff] (!%p138_p2)   ;;  %v5008_v14 = vld [vmem:[%s7306_s1 + $0x134] ss:$8 sps:$4 sm:$0xff] (!%p138_p2)   ;;  %v5011_v16 = vld [vmem:[%s7306_s1 + $0x130] ss:$8 sps:$4 sm:$0xff] (!%p138_p2)  }
   0xb   : > { %553 = vmatpush1.bf16.msra.mxu1 (!%p138_p2), %v4998_v7  ;;  %v5012_v17 = vld [vmem:[%s7306_s1 + $0x1c4] ss:$8 sps:$4 sm:$0xff] (!%p138_p2)   ;;  %v5016_v19 = vld [vmem:[%s7306_s1 + $0x1c0] ss:$8 sps:$4 sm:$0xff] (!%p138_p2)   ;;  %v5018_v21 = vld [vmem:[%s7306_s1 + $0x1d4] ss:$8 sps:$4 sm:$0xff] (!%p138_p2)  }
   0xc   : > { %925 = vmatpush1.bf16.msra.mxu0 (!%p138_p2), %v4999_v8  ;;  %554 = vmatprep.subr.bf16.mxu1 (!%p138_p2), %v5000_v9  ;;  %v5014_v18 = vld [vmem:[%s7306_s1 + $0x144] ss:$8 sps:$4 sm:$0xff] (!%p138_p2)   ;;  %v5017_v20 = vld [vmem:[%s7306_s1 + $0x140] ss:$8 sps:$4 sm:$0xff] (!%p138_p2)   ;;  %v5020_v22 = vld [vmem:[%s7306_s1 + $0x154] ss:$8 sps:$4 sm:$0xff] (!%p138_p2)  }
   0xd   : > { %926 = vmatprep.subr.bf16.mxu0 %v5002_v10  ;;  %s7310_s13 = smov (!%p161_p3, %s4046_s13), 1  ;;  %v5022_v23 = vld [vmem:[%s7306_s1 + $0x1d0] ss:$8 sps:$4 sm:$0xff]   ;;  %v5024_v25 = vld [vmem:[%s7306_s1 + $0x1e4] ss:$8 sps:$4 sm:$0xff]   ;;  %vm1907_vm2 = vcmask 1044480  }
   0xe   : > { %s4978_s6 = smul.u32 48, %s7310_s13  ;;  %v5023_v24 = vld [vmem:[%s7306_s1 + $0x150] ss:$8 sps:$4 sm:$0xff]   ;;  %v5026_v26 = vld [vmem:[%s7306_s1 + $0x164] ss:$8 sps:$4 sm:$0xff]   ;;  %vm3605_vm5 = vcmask 1045504  }
   0xf   : > { %555 = vmatpush1.bf16.msra.mxu1 %v5004_v11  ;;  %v5028_v27 = vld [vmem:[%s7306_s1 + $0x1e0] ss:$8 sps:$4 sm:$0xff]   ;;  %v5030_v29 = vld [vmem:[%s7306_s1 + $0x1f4] ss:$8 sps:$4 sm:$0xff]   ;;  %v5034_v31 = vld [vmem:[%s7306_s1 + $0x1f0] ss:$8 sps:$4 sm:$0xff]  }
  0x10   : > { %927 = vmatpush1.bf16.msra.mxu0 %v5005_v12  ;;  %556 = vmatprep.subr.bf16.mxu1 %v5006_v13  ;;  %s5799_s19 = scalar_lea.vmem %s7305_s0, %s4978_s6  ;;  %v5029_v28 = vld [vmem:[%s7306_s1 + $0x160] ss:$8 sps:$4 sm:$0xff]   ;;  %v5032_v30 = vld [vmem:[%s7306_s1 + $0x174] ss:$8 sps:$4 sm:$0xff]   ;;  %v5035_v32 = vld [vmem:[%s7306_s1 + $0x170] ss:$8 sps:$4 sm:$0xff]  }
  0x11   : > { %928 = vmatprep.subr.bf16.mxu0 %v5008_v14  ;;  %v5036_v33 = vld [vmem:[%s7306_s1 + $0x204] ss:$8 sps:$4 sm:$0xff]   ;;  %v5826_v35 = vld [vmem:[%s5799_s19 + $0x8] ss:$12 sps:$4 sm:$0xff]   ;;  %v5045_v40 = vld [vmem:[%s7306_s1 + $0x410] ss:$8 sps:$4 sm:$0xff]  }
  0x12   : > { %v5041_v34 = vld [vmem:[%s7306_s1 + $0x404] ss:$8 sps:$4 sm:$0xff]   ;;  %v5039_v36 = vld [vmem:[%s7306_s1 + $0x400] ss:$8 sps:$4 sm:$0xff]   ;;  %v5043_v38 = vld [vmem:[%s7306_s1 + $0x214] ss:$8 sps:$4 sm:$0xff]  }
  0x13   : > { %557 = vmatpush1.bf16.msra.mxu1 %v5010_v15  ;;  %v5042_v37 = vld [vmem:[%s7306_s1 + $0x200] ss:$8 sps:$4 sm:$0xff]   ;;  %v5047_v39 = vld [vmem:[%s7306_s1 + $0x414] ss:$8 sps:$4 sm:$0xff]   ;;  %v5048_v41 = vld [vmem:[%s7306_s1 + $0x210] ss:$8 sps:$4 sm:$0xff]  }
  0x14   : > { %929 = vmatpush1.bf16.msra.mxu0 %v5011_v16  ;;  %558 = vmatprep.subr.bf16.mxu1 %v5012_v17  ;;  %v5049_v42 = vld [vmem:[%s7306_s1 + $0x224] ss:$8 sps:$4 sm:$0xff]   ;;  %v5051_v44 = vld [vmem:[%s7306_s1 + $0x420] ss:$8 sps:$4 sm:$0xff]   ;;  %v5055_v46 = vld [vmem:[%s7306_s1 + $0x234] ss:$8 sps:$4 sm:$0xff]  }
  0x15   : > { %930 = vmatprep.subr.bf16.mxu0 %v5014_v18  ;;  %v5053_v43 = vld [vmem:[%s7306_s1 + $0x424] ss:$8 sps:$4 sm:$0xff]   ;;  %v5054_v45 = vld [vmem:[%s7306_s1 + $0x220] ss:$8 sps:$4 sm:$0xff]   ;;  %v5059_v47 = vld [vmem:[%s7306_s1 + $0x434] ss:$8 sps:$4 sm:$0xff]  }
  0x16   : > { %v5057_v48 = vld [vmem:[%s7306_s1 + $0x430] ss:$8 sps:$4 sm:$0xff]   ;;  %v5061_v50 = vld [vmem:[%s7306_s1 + $0x244] ss:$8 sps:$4 sm:$0xff]   ;;  %v5063_v55 = vld [vmem:[%s7306_s1 + $0x440] ss:$8 sps:$4 sm:$0xff]  }
  0x17   : > { %559 = vmatpush1.bf16.msra.mxu1 %v5016_v19  ;;  %v5060_v49 = vld [vmem:[%s7306_s1 + $0x230] ss:$8 sps:$4 sm:$0xff]   ;;  %v5065_v52 = vld [vmem:[%s7306_s1 + $0x444] ss:$8 sps:$4 sm:$0xff]   ;;  %v5066_v56 = vld [vmem:[%s7306_s1 + $0x240] ss:$8 sps:$4 sm:$0xff]  }
  0x18   : > { %931 = vmatpush1.bf16.msra.mxu0 %v5017_v20  ;;  %560 = vmatprep.subr.bf16.mxu1 %v5018_v21  ;;  %v5876_v51 = vld [vmem:[%s5799_s19 + $0x4] ss:$12 sps:$4 sm:$0xff]   ;;  %v5067_v58 = vld [vmem:[%s7306_s1 + $0x254] ss:$8 sps:$4 sm:$0xff]   ;;  %v5902_v63 = vld [vmem:[%s5799_s19] ss:$12 sps:$4 sm:$0xff]  }
  0x19   : > { %932 = vmatprep.subr.bf16.mxu0 %v5020_v22  ;;  %v294_v53 = vshrl.u32 %v5876_v51, 16  ;;  %v296_v54 = vshll.u32 %v5876_v51, 16  ;;  %v5071_v59 = vld [vmem:[%s7306_s1 + $0x454] ss:$8 sps:$4 sm:$0xff]   ;;  %v5069_v60 = vld [vmem:[%s7306_s1 + $0x450] ss:$8 sps:$4 sm:$0xff]  }
  0x1a   : > { %v5072_v61 = vld [vmem:[%s7306_s1 + $0x250] ss:$8 sps:$4 sm:$0xff]   ;;  %v5073_v0 = vld [vmem:[%s7306_s1 + $0x264] ss:$8 sps:$4 sm:$0xff]   ;;  %v966_v3 = vld [vmem:[%s5799_s19 + $0x8] sm:$0xe] }
  0x1b   : > { %561 = vmatpush1.bf16.msra.mxu1 %v5022_v23  ;;  %v298_v57 = vrot.slane %v296_v54, 1  ;;  %v5077_v1 = vld [vmem:[%s7306_s1 + $0x464] ss:$8 sps:$4 sm:$0xff]   ;;  %v5912_v4 = vld [vmem:[%s5799_s19 + $0x14] sm:$0xf]  ;;  %v289_v6 = vshll.u32 %v5902_v63, 16 }
  0x1c   : > { %933 = vmatpush1.bf16.msra.mxu0 %v5023_v24  ;;  %562 = vmatprep.subr.bf16.mxu1 %v5024_v25  ;;  %v5075_v5 = vld [vmem:[%s7306_s1 + $0x460] ss:$8 sps:$4 sm:$0xff]   ;;  %v4251_v8 = vcombine.low %v966_v3, %v5912_v4  ;;  %v5079_v10 = vld [vmem:[%s7306_s1 + $0x274] ss:$8 sps:$4 sm:$0xff]   ;;  %v5081_v12 = vld [vmem:[%s7306_s1 + $0x470] ss:$8 sps:$4 sm:$0xff]  }
  0x1d   : > { %934 = vmatprep.subr.bf16.mxu0 %v5026_v26  ;;  %v299_v62 = vor.u32 %v298_v57, %v294_v53  ;;  %v5078_v7 = vld [vmem:[%s7306_s1 + $0x260] ss:$8 sps:$4 sm:$0xff]   ;;  %v5083_v11 = vld [vmem:[%s7306_s1 + $0x474] ss:$8 sps:$4 sm:$0xff]   ;;  %v287_v13 = vshrl.u32 %v5902_v63, 16  ;;  %v291_v14 = vrot.slane %v289_v6, 1 }
  0x1e   : > { %v5092_v9 = vld [vmem:[%s5799_s19 + $0x20] ss:$0 sps:$4 sm:$0x11]   ;;  %v5084_v15 = vld [vmem:[%s7306_s1 + $0x270] ss:$8 sps:$4 sm:$0xff]   ;;  %v1048_v16 = vrot.slane %v4251_v8, 1 }
  0x1f   : > { %563 = vmatpush1.bf16.msra.mxu1 %v5028_v27  ;;  %582 = vmatprep.mubr.bf16.mxu1 %v299_v62  ;;  %v1049_v17 = vrot.slane %v5092_v9, 1  ;;  %v5090_v18 = vld [vmem:[%s7306_s1 + $0x284] ss:$8 sps:$4 sm:$0xff]   ;;  %v292_v20 = vor.u32 %v291_v14, %v287_v13  ;;  %v5088_v21 = vld [vmem:[%s7306_s1 + $0x280] ss:$8 sps:$4 sm:$0xff]   ;;  %vm3981_vm6 = vcmask 1043456  }
  0x20   : > { %935 = vmatpush1.bf16.msra.mxu0 %v5029_v28  ;;  %564 = vmatprep.subr.bf16.mxu1 %v5030_v29  ;;  %v5095_v19 = vld [vmem:[%s7306_s1 + $0x584] ss:$8 sps:$4 sm:$0xff]   ;;  %v5093_v23 = vld [vmem:[%s7306_s1 + $0x580] ss:$8 sps:$4 sm:$0xff]   ;;  %v5098_v24 = vld [vmem:[%s7306_s1 + $0x294] ss:$8 sps:$4 sm:$0xff]  }
  0x21   : > { %936 = vmatprep.subr.bf16.mxu0 %v5032_v30  ;;  %v1050_v22 = vsel %vm1041_vm0, %v1048_v16, %v1049_v17  ;;  %v5101_v25 = vld [vmem:[%s7306_s1 + $0x594] ss:$8 sps:$4 sm:$0xff]   ;;  %v5096_v26 = vld [vmem:[%s7306_s1 + $0x290] ss:$8 sps:$4 sm:$0xff]   ;;  %v5104_v28 = vld [vmem:[%s7306_s1 + $0x2a4] ss:$8 sps:$4 sm:$0xff]  }
  0x22   : > { %v5099_v27 = vld [vmem:[%s7306_s1 + $0x590] ss:$8 sps:$4 sm:$0xff]   ;;  %v5107_v29 = vld [vmem:[%s7306_s1 + $0x5a4] ss:$8 sps:$4 sm:$0xff]   ;;  %v5102_v30 = vld [vmem:[%s7306_s1 + $0x2a0] ss:$8 sps:$4 sm:$0xff]  }
  0x23   : > { %565 = vmatpush1.bf16.msra.mxu1 %v5034_v31  ;;  %v5105_v31 = vld [vmem:[%s7306_s1 + $0x5a0] ss:$8 sps:$4 sm:$0xff]   ;;  %v5128_v53 = vld [vmem:[%s7306_s1 + $0x2e4] ss:$8 sps:$4 sm:$0xff]   ;;  %v5134_v62 = vld [vmem:[%s7306_s1 + $0x2f4] ss:$8 sps:$4 sm:$0xff]  }
  0x24   : > { %937 = vmatpush1.bf16.msra.mxu0 %v5035_v32  ;;  %566 = vmatprep.subr.bf16.mxu1 %v5036_v33  ;;  %v5110_v32 = vld [vmem:[%s7306_s1 + $0x2b4] ss:$8 sps:$4 sm:$0xff]   ;;  %v5131_v54 = vld [vmem:[%s7306_s1 + $0x5e4] ss:$8 sps:$4 sm:$0xff]   ;;  %v5129_v57 = vld [vmem:[%s7306_s1 + $0x5e0] ss:$8 sps:$4 sm:$0xff]  }
  0x25   : > { %1337 = vmatprep.subr.bf16.mxu0 %v5041_v34  ;;  %v5113_v33 = vld [vmem:[%s7306_s1 + $0x5b4] ss:$8 sps:$4 sm:$0xff]   ;;  %v5108_v34 = vld [vmem:[%s7306_s1 + $0x2b0] ss:$8 sps:$4 sm:$0xff]   ;;  %v5140_v9 = vld [vmem:[%s7306_s1 + $0x4] ss:$8 sps:$4 sm:$0xff]  }
  0x26   : > { %v5135_v6 = vld [vmem:[%s7306_s1 + $0x5f0] ss:$8 sps:$4 sm:$0xff]   ;;  %vm1453_vm1 = vsmask.f32 5376  ;;  %v5148_v14 = vld [vmem:[%s7306_s1 + $0x14] ss:$8 sps:$4 sm:$0xff]  }
  0x27   : > { %955 = vmatmul.mubr.bf16.vlgmr.msra.gmra.mrb[0].mxu0 %v5826_v35  ;;  %567 = vmatpush1.bf16.msra.mxu1 %v5042_v37  ;;  %v5116_v37 = vld [vmem:[%s7306_s1 + $0x2c4] ss:$8 sps:$4 sm:$0xff]   ;;  %v5146_v16 = vld [vmem:[%s7306_s1 + $0x10] ss:$8 sps:$4 sm:$0xff]   ;;  %vm2299_vm3 = vsmask.f32 4352 }
  0x28   : > { %1338 = vmatpush1.bf16.msra.mxu0 %v5039_v36  ;;  %568 = vmatprep.subr.bf16.mxu1 %v5043_v38  ;;  %v5111_v36 = vld [vmem:[%s7306_s1 + $0x5b0] ss:$8 sps:$4 sm:$0xff]   ;;  %v5119_v38 = vld [vmem:[%s7306_s1 + $0x5c4] ss:$8 sps:$4 sm:$0xff]   ;;  %vm3151_vm4 = vsmask.f32 6400 }
  0x29   : > { %1339 = vmatprep.subr.bf16.mxu0 %v5047_v39  ;;  %1369 = vmatprep.mubr.bf16.mxu0 %v5681_v2  ;;  %v1385_v39 = vld [vmem:[%s5799_s19 + $0x8] sm:$0xc]  ;;  %v5149_v17 = vld [vmem:[%s7306_s1 + $0x710] ss:$8 sps:$4 sm:$0xff]   ;;  %vm3982_vm7 = vsmask.f32 3328 }
  0x2a   : > { %s4907_s16 = sshll.u32 %s7310_s13, 4  ;;  %vm3984_vm8 = vcmask 1047556   ;;  %vm3985_vm9 = vsmask.f32 7424  ;;  %vm3983_vm10 = vmand %vm3981_vm6, %vm3982_vm7 }
  0x2b   : > { %569 = vmatpush1.bf16.msra.mxu1 %v5048_v41  ;;  %v5117_v41 = vld [vmem:[%s7306_s1 + $0x5c0] ss:$8 sps:$4 sm:$0xff]   ;;  %s170_s20 = scalar_lea.vmem %s7308_s3, %s4907_s16  ;;  %vm3986_vm11 = vmand %vm3984_vm8, %vm3985_vm9 }
  0x2c   : > { %1340 = vmatpush1.bf16.msra.mxu0 %v5045_v40  ;;  %570 = vmatprep.subr.bf16.mxu1 %v5049_v42  ;;  %v5114_v40 = vld [vmem:[%s7306_s1 + $0x2c0] ss:$8 sps:$4 sm:$0xff]   ;;  %v4353_v42 = vcombine.low %v1385_v39, %v5912_v4  ;;  %v5184_v39 = vld [vmem:[%s7306_s1 + $0x74] ss:$8 sps:$4 sm:$0xff]   ;;  %vm3987_vm12 = vmor %vm3986_vm11, %vm3983_vm10 }
  0x2d   : > { %1341 = vmatprep.subr.bf16.mxu0 %v5053_v43  ;;  %v5142_v43 = vld [vmem:[%s5799_s19 + $0x20] ss:$0 sps:$4 sm:$0x33]  }
  0x2f   : > { %571 = vmatpush1.bf16.msra.mxu1 %v5054_v45  ;;  %v5125_v45 = vld [vmem:[%s7306_s1 + $0x5d4] ss:$8 sps:$4 sm:$0xff]  }
  0x30   : > { %1342 = vmatpush1.bf16.msra.mxu0 %v5051_v44  ;;  %572 = vmatprep.subr.bf16.mxu1 %v5055_v46  ;;  %v5122_v44 = vld [vmem:[%s7306_s1 + $0x2d4] ss:$8 sps:$4 sm:$0xff]   ;;  %v5120_v46 = vld [vmem:[%s7306_s1 + $0x2d0] ss:$8 sps:$4 sm:$0xff]  }
  0x31   : > { %1343 = vmatprep.subr.bf16.mxu0 %v5059_v47  ;;  %v5123_v47 = vld [vmem:[%s7306_s1 + $0x5d0] ss:$8 sps:$4 sm:$0xff]  }
  0x33   : > { %573 = vmatpush1.bf16.msra.mxu1 %v5060_v49  ;;  %v1492_v49 = vshll.u32 %v4353_v42, 16 }
  0x34   : > { %1344 = vmatpush1.bf16.msra.mxu0 %v5057_v48  ;;  %574 = vmatprep.subr.bf16.mxu1 %v5061_v50  ;;  %v1489_v48 = vshrl.u32 %v4353_v42, 16  ;;  %v1497_v50 = vshrl.u32 %v5142_v43, 16  ;;  %v5187_v42 = vld [vmem:[%s7306_s1 + $0x774] ss:$8 sps:$4 sm:$0xff]  }
  0x35   : > { %1345 = vmatprep.subr.bf16.mxu0 %v5065_v52  ;;  %v1500_v52 = vshll.u32 %v5142_v43, 16  ;;  %v5182_v43 = vld [vmem:[%s7306_s1 + $0x70] ss:$8 sps:$4 sm:$0xff]  }
  0x37   : > { %575 = vmatpush1.bf16.msra.mxu1 %v5066_v56  ;;  %v303_v56 = vshll.u32 %v5826_v35, 16 }
  0x38   : > { %1346 = vmatpush1.bf16.msra.mxu0 %v5063_v55  ;;  %576 = vmatprep.subr.bf16.mxu1 %v5067_v58  ;;  %v5126_v55 = vld [vmem:[%s7306_s1 + $0x2e0] ss:$8 sps:$4 sm:$0xff]   ;;  %v1491_v58 = vrot.slane %v1489_v48, 2 }
  0x39   : > { %1347 = vmatprep.subr.bf16.mxu0 %v5071_v59  ;;  %v1494_v59 = vrot.slane %v1492_v49, 3  ;;  %v305_v3 = vrot.slane %v303_v56, 1  ;;  %v5188_v48 = vld [vmem:[%s7306_s1 + $0x80] ss:$8 sps:$4 sm:$0xff]   ;;  %v5204_v56 = vld [vmem:[%s7306_s1 + $0xa4] ss:$8 sps:$4 sm:$0xff]  }
  0x3a   : > { %v5193_v49 = vld [vmem:[%s7306_s1 + $0x880] ss:$8 sps:$4 sm:$0xff]  }
  0x3b   : > { %577 = vmatpush1.bf16.msra.mxu1 %v5072_v61  ;;  %v1502_v61 = vrot.slane %v1500_v52, 3  ;;  %v5198_v52 = vld [vmem:[%s7306_s1 + $0x94] ss:$8 sps:$4 sm:$0xff]  }
  0x3c   : > { %1348 = vmatpush1.bf16.msra.mxu0 %v5069_v60  ;;  %578 = vmatprep.subr.bf16.mxu1 %v5073_v0  ;;  %v1499_v60 = vrot.slane %v1497_v50, 2  ;;  %v5137_v0 = vld [vmem:[%s7306_s1 + $0x5f4] ss:$8 sps:$4 sm:$0xff]  }
  0x3d   : > { %1349 = vmatprep.subr.bf16.mxu0 %v5077_v1  ;;  %v301_v1 = vshrl.u32 %v5826_v35, 16  ;;  %v5145_v35 = vld [vmem:[%s7306_s1 + $0x704] ss:$8 sps:$4 sm:$0xff]  }
  0x3e   : > { %v1503_v8 = vor.u32 %v1502_v61, %v1499_v60  ;;  %v5210_v60 = vld [vmem:[%s7306_s1 + $0xb4] ss:$8 sps:$4 sm:$0xff]  }
  0x3f   : > { %579 = vmatpush1.bf16.msra.mxu1 %v5078_v7  ;;  %v1495_v7 = vor.u32 %v1494_v59, %v1491_v58  ;;  %v5202_v58 = vld [vmem:[%s7306_s1 + $0xa0] ss:$8 sps:$4 sm:$0xff]   ;;  %v5213_v61 = vld [vmem:[%s7306_s1 + $0x8b4] ss:$8 sps:$4 sm:$0xff]  }
  0x40   : > { %1350 = vmatpush1.bf16.msra.mxu0 %v5075_v5  ;;  %580 = vmatprep.subr.bf16.mxu1 %v5079_v10  ;;  %v5132_v5 = vld [vmem:[%s7306_s1 + $0x2f0] ss:$8 sps:$4 sm:$0xff]   ;;  %v5138_v10 = vld [vmem:[%s7306_s1] ss:$8 sps:$4 sm:$0xff]  }
  0x41   : > { %1351 = vmatprep.subr.bf16.mxu0 %v5083_v11  ;;  %v5143_v11 = vld [vmem:[%s7306_s1 + $0x700] ss:$8 sps:$4 sm:$0xff]   ;;  %v1504_v13 = vsel %vm1453_vm1, %v1495_v7, %v1503_v8  ;;  %v5222_v7 = vld [vmem:[%s7306_s1 + $0xd4] ss:$8 sps:$4 sm:$0xff]  }
  0x42   : > { %v5205_v59 = vld [vmem:[%s7306_s1 + $0x8a0] ss:$8 sps:$4 sm:$0xff]   ;;  %v5225_v8 = vld [vmem:[%s7306_s1 + $0x8d4] ss:$8 sps:$4 sm:$0xff]  }
  0x43   : > { %581 = vmatpush1.bf16.msra.mxu1 %v5084_v15  ;;  %v5151_v15 = vld [vmem:[%s7306_s1 + $0x714] ss:$8 sps:$4 sm:$0xff]  }
  0x44   : > { %1352 = vmatpush1.bf16.msra.mxu0 %v5081_v12  ;;  %593 = vmatprep.subr.bf16.mxu1 %v5090_v18  ;;  %v306_v12 = vor.u32 %v305_v3, %v301_v1  ;;  %v5154_v18 = vld [vmem:[%s7306_s1 + $0x24] ss:$8 sps:$4 sm:$0xff]  }
  0x45   : > { %1791 = vmatprep.subr.bf16.mxu0 %v5095_v19  ;;  %v5157_v19 = vld [vmem:[%s7306_s1 + $0x724] ss:$8 sps:$4 sm:$0xff]  }
  0x46   : > { %583 = vmatmul.mubr.bf16.vlgmr.msra.gmra.mrb[0].mxu1 %v292_v20  ;;  %v5152_v20 = vld [vmem:[%s7306_s1 + $0x20] ss:$8 sps:$4 sm:$0xff]   ;;  %v5216_v1 = vld [vmem:[%s7306_s1 + $0xc4] ss:$8 sps:$4 sm:$0xff]  }
  0x47   : > { %1370 = vmatmul.mubr.bf16.vlgmr.msra.gmra.mrb[4].mxu0 %v1050_v22  ;;  %594 = vmatpush1.bf16.msra.mxu1 %v5088_v21  ;;  %v5155_v21 = vld [vmem:[%s7306_s1 + $0x720] ss:$8 sps:$4 sm:$0xff]   ;;  %v5160_v22 = vld [vmem:[%s7306_s1 + $0x34] ss:$8 sps:$4 sm:$0xff]   ;;  %v5219_v3 = vld [vmem:[%s7306_s1 + $0x8c4] ss:$8 sps:$4 sm:$0xff]  }
  0x48   : > { %1792 = vmatpush1.bf16.msra.mxu0 %v5093_v23  ;;  %595 = vmatprep.subr.bf16.mxu1 %v5098_v24  ;;  %v5158_v23 = vld [vmem:[%s7306_s1 + $0x30] ss:$8 sps:$4 sm:$0xff]  }
  0x49   : > { %1793 = vmatprep.subr.bf16.mxu0 %v5101_v25  ;;  %1823 = vmatprep.mubr.bf16.mxu0 %v5681_v2  ;;  %v5161_v24 = vld [vmem:[%s7306_s1 + $0x730] ss:$8 sps:$4 sm:$0xff]   ;;  %v5166_v25 = vld [vmem:[%s7306_s1 + $0x44] ss:$8 sps:$4 sm:$0xff]  }
  0x4a   : > { %625 = vmatprep.mubr.bf16.mxu1 %v5681_v2 }
  0x4b   : > { %596 = vmatpush1.bf16.msra.mxu1 %v5096_v26  ;;  %v5169_v26 = vld [vmem:[%s7306_s1 + $0x744] ss:$8 sps:$4 sm:$0xff]  }
  0x4c   : > { %1794 = vmatpush1.bf16.msra.mxu0 %v5099_v27  ;;  %597 = vmatprep.subr.bf16.mxu1 %v5104_v28  ;;  %v5164_v27 = vld [vmem:[%s7306_s1 + $0x40] ss:$8 sps:$4 sm:$0xff]  }
  0x4d   : > { %1795 = vmatprep.subr.bf16.mxu0 %v5107_v29  ;;  %v5167_v28 = vld [vmem:[%s7306_s1 + $0x740] ss:$8 sps:$4 sm:$0xff]   ;;  %v5172_v29 = vld [vmem:[%s7306_s1 + $0x54] ss:$8 sps:$4 sm:$0xff]  }
  0x4f   : > { %598 = vmatpush1.bf16.msra.mxu1 %v5102_v30  ;;  %v5175_v30 = vld [vmem:[%s7306_s1 + $0x754] ss:$8 sps:$4 sm:$0xff]  }
  0x50   : > { %1796 = vmatpush1.bf16.msra.mxu0 %v5105_v31  ;;  %599 = vmatprep.subr.bf16.mxu1 %v5110_v32  ;;  %v5170_v31 = vld [vmem:[%s7306_s1 + $0x50] ss:$8 sps:$4 sm:$0xff]  }
  0x51   : > { %1797 = vmatprep.subr.bf16.mxu0 %v5113_v33  ;;  %v5173_v32 = vld [vmem:[%s7306_s1 + $0x750] ss:$8 sps:$4 sm:$0xff]   ;;  %v5178_v33 = vld [vmem:[%s7306_s1 + $0x64] ss:$8 sps:$4 sm:$0xff]  }
  0x53   : > { %600 = vmatpush1.bf16.msra.mxu1 %v5108_v34  ;;  %v5181_v34 = vld [vmem:[%s7306_s1 + $0x764] ss:$8 sps:$4 sm:$0xff]  }
  0x54   : > { %1798 = vmatpush1.bf16.msra.mxu0 %v5111_v36  ;;  %601 = vmatprep.subr.bf16.mxu1 %v5116_v37  ;;  %v1839_v36 = vld [vmem:[%s5799_s19 + $0x8] sm:$0x8] }
  0x55   : > { %1799 = vmatprep.subr.bf16.mxu0 %v5119_v38  ;;  %v5176_v37 = vld [vmem:[%s7306_s1 + $0x60] ss:$8 sps:$4 sm:$0xff]  }
  0x56   : > { %v5179_v38 = vld [vmem:[%s7306_s1 + $0x760] ss:$8 sps:$4 sm:$0xff]  }
  0x57   : > { %602 = vmatpush1.bf16.msra.mxu1 %v5114_v40  ;;  %v6132_v40 = vcombine.low %v1839_v36, %v5912_v4  ;;  %v5190_v4 = vld [vmem:[%s7306_s1 + $0x84] ss:$8 sps:$4 sm:$0xff]   ;;  %v5246_v36 = vld [vmem:[%s7306_s1 + $0x314] ss:$8 sps:$4 sm:$0xff]  }
  0x58   : > { %1800 = vmatpush1.bf16.msra.mxu0 %v5117_v41  ;;  %603 = vmatprep.subr.bf16.mxu1 %v5122_v44  ;;  %v6135_v41 = vld [vmem:[%s5799_s19 + $0x20] ss:$0 sps:$4 sm:$0x77]   ;;  %v5185_v44 = vld [vmem:[%s7306_s1 + $0x770] ss:$8 sps:$4 sm:$0xff]  }
  0x59   : > { %1801 = vmatprep.subr.bf16.mxu0 %v5125_v45  ;;  %v1914_v45 = vrot.slane %v6132_v40, 3 }
  0x5b   : > { %604 = vmatpush1.bf16.msra.mxu1 %v5120_v46  ;;  %v1915_v46 = vrot.slane %v6135_v41, 3 }
  0x5c   : > { %1802 = vmatpush1.bf16.msra.mxu0 %v5123_v47  ;;  %605 = vmatprep.subr.bf16.mxu1 %v5128_v53  ;;  %v5195_v47 = vld [vmem:[%s7306_s1 + $0x884] ss:$8 sps:$4 sm:$0xff]   ;;  %v5201_v53 = vld [vmem:[%s7306_s1 + $0x894] ss:$8 sps:$4 sm:$0xff]  }
  0x5d   : > { %1803 = vmatprep.subr.bf16.mxu0 %v5131_v54  ;;  %v1916_v50 = vsel %vm1907_vm2, %v1914_v45, %v1915_v46  ;;  %v5196_v54 = vld [vmem:[%s7306_s1 + $0x90] ss:$8 sps:$4 sm:$0xff]  }
  0x5f   : > { %606 = vmatpush1.bf16.msra.mxu1 %v5126_v55  ;;  %v5199_v55 = vld [vmem:[%s7306_s1 + $0x890] ss:$8 sps:$4 sm:$0xff]  }
  0x60   : > { %1804 = vmatpush1.bf16.msra.mxu0 %v5129_v57  ;;  %607 = vmatprep.subr.bf16.mxu1 %v5134_v62  ;;  %v5207_v57 = vld [vmem:[%s7306_s1 + $0x8a4] ss:$8 sps:$4 sm:$0xff]   ;;  %v5208_v62 = vld [vmem:[%s7306_s1 + $0xb0] ss:$8 sps:$4 sm:$0xff]  }
  0x61   : > { %1805 = vmatprep.subr.bf16.mxu0 %v5137_v0  ;;  %v5211_v0 = vld [vmem:[%s7306_s1 + $0x8b0] ss:$8 sps:$4 sm:$0xff]  }
  0x63   : > { %608 = vmatpush1.bf16.msra.mxu1 %v5132_v5  ;;  %v5214_v5 = vld [vmem:[%s7306_s1 + $0xc0] ss:$8 sps:$4 sm:$0xff]  }
  0x64   : > { %1806 = vmatpush1.bf16.msra.mxu0 %v5135_v6  ;;  %879 = vmatprep.subr.bf16.mxu1 %v5140_v9  ;;  %v5217_v6 = vld [vmem:[%s7306_s1 + $0x8c0] ss:$8 sps:$4 sm:$0xff]   ;;  %v2335_v9 = vshrl.u32 %v6132_v40, 16 }
  0x65   : > { %2203 = vmatprep.subr.bf16.mxu0 %v5145_v35  ;;  %v5220_v35 = vld [vmem:[%s7306_s1 + $0xd0] ss:$8 sps:$4 sm:$0xff]  }
  0x66   : > { %626 = vmatmul.mubr.bf16.vlgmr.msra.gmra.mrb[0].mxu1 %v306_v12  ;;  %v5228_v12 = vld [vmem:[%s7306_s1 + $0xe4] ss:$8 sps:$4 sm:$0xff]  }
  0x67   : > { %1824 = vmatmul.mubr.bf16.vlgmr.msra.gmra.mrb[8].mxu0 %v1504_v13  ;;  %880 = vmatpush1.bf16.msra.mxu1 %v5138_v10  ;;  %v5223_v10 = vld [vmem:[%s7306_s1 + $0x8d0] ss:$8 sps:$4 sm:$0xff]   ;;  %v2343_v13 = vshrl.u32 %v6135_v41, 16 }
  0x68   : > { %2204 = vmatpush1.bf16.msra.mxu0 %v5143_v11  ;;  %881 = vmatprep.subr.bf16.mxu1 %v5148_v14  ;;  %v2338_v11 = vshll.u32 %v6132_v40, 16  ;;  %v2346_v14 = vshll.u32 %v6135_v41, 16  ;;  %v6283_v41 = vld [vmem:[%s5799_s19 + $0x18] sm:$0xff] }
  0x69   : > { %2205 = vmatprep.subr.bf16.mxu0 %v5151_v15  ;;  %2235 = vmatprep.mubr.bf16.mxu0 %v5681_v2  ;;  %v5231_v15 = vld [vmem:[%s7306_s1 + $0x8e4] ss:$8 sps:$4 sm:$0xff]  }
  0x6a   : > { %911 = vmatprep.mubr.bf16.mxu1 %v5876_v51  ;;  %v5163_v51 = vld [vmem:[%s7306_s1 + $0x734] ss:$8 sps:$4 sm:$0xff]  }
  0x6b   : > { %882 = vmatpush1.bf16.msra.mxu1 %v5146_v16  ;;  %v2337_v16 = vrot.slane %v2335_v9, 3  ;;  %v5274_v9 = vld [vmem:[%s7306_s1 + $0x360] ss:$8 sps:$4 sm:$0xff]  }
  0x6c   : > { %2206 = vmatpush1.bf16.msra.mxu0 %v5149_v17  ;;  %883 = vmatprep.subr.bf16.mxu1 %v5154_v18  ;;  %v5226_v17 = vld [vmem:[%s7306_s1 + $0xe0] ss:$8 sps:$4 sm:$0xff]  }
  0x6d   : > { %2207 = vmatprep.subr.bf16.mxu0 %v5157_v19  ;;  %v5229_v18 = vld [vmem:[%s7306_s1 + $0x8e0] ss:$8 sps:$4 sm:$0xff]   ;;  %v2340_v19 = vrot.slane %v2338_v11, 4  ;;  %v5285_v11 = vld [vmem:[%s7306_s1 + $0x974] ss:$8 sps:$4 sm:$0xff]  }
  0x6f   : > { %884 = vmatpush1.bf16.msra.mxu1 %v5152_v20  ;;  %v5234_v20 = vld [vmem:[%s7306_s1 + $0xf4] ss:$8 sps:$4 sm:$0xff]  }
  0x70   : > { %2208 = vmatpush1.bf16.msra.mxu0 %v5155_v21  ;;  %885 = vmatprep.subr.bf16.mxu1 %v5160_v22  ;;  %v2345_v21 = vrot.slane %v2343_v13, 3  ;;  %v2348_v22 = vrot.slane %v2346_v14, 4  ;;  %v5283_v13 = vld [vmem:[%s7306_s1 + $0x970] ss:$8 sps:$4 sm:$0xff]   ;;  %v5288_v14 = vld [vmem:[%s7306_s1 + $0x384] ss:$8 sps:$4 sm:$0xff]  }
  0x71   : > { %2209 = vmatprep.subr.bf16.mxu0 %v5163_v51  ;;  %v5237_v51 = vld [vmem:[%s7306_s1 + $0x8f4] ss:$8 sps:$4 sm:$0xff]  }
  0x73   : > { %886 = vmatpush1.bf16.msra.mxu1 %v5158_v23  ;;  %v5232_v23 = vld [vmem:[%s7306_s1 + $0xf0] ss:$8 sps:$4 sm:$0xff]  }
  0x74   : > { %2210 = vmatpush1.bf16.msra.mxu0 %v5161_v24  ;;  %887 = vmatprep.subr.bf16.mxu1 %v5166_v25  ;;  %v5235_v24 = vld [vmem:[%s7306_s1 + $0x8f0] ss:$8 sps:$4 sm:$0xff]   ;;  %v5240_v25 = vld [vmem:[%s7306_s1 + $0x304] ss:$8 sps:$4 sm:$0xff]  }
  0x75   : > { %2211 = vmatprep.subr.bf16.mxu0 %v5169_v26  ;;  %v2341_v26 = vor.u32 %v2340_v19, %v2337_v16 }
  0x77   : > { %888 = vmatpush1.bf16.msra.mxu1 %v5164_v27  ;;  %v2349_v27 = vor.u32 %v2348_v22, %v2345_v21  ;;  %v5286_v21 = vld [vmem:[%s7306_s1 + $0x380] ss:$8 sps:$4 sm:$0xff]  }
  0x78   : > { %2212 = vmatpush1.bf16.msra.mxu0 %v5167_v28  ;;  %889 = vmatprep.subr.bf16.mxu1 %v5172_v29  ;;  %v5243_v28 = vld [vmem:[%s7306_s1 + $0x904] ss:$8 sps:$4 sm:$0xff]   ;;  %v5289_v22 = vld [vmem:[%s7306_s1 + $0x980] ss:$8 sps:$4 sm:$0xff]  }
  0x79   : > { %2213 = vmatprep.subr.bf16.mxu0 %v5175_v30  ;;  %v6257_v29 = vld [vmem:[%s5799_s19] sm:$0xee]  ;;  %v6260_v30 = vld [vmem:[%s5799_s19 + $0xc] sm:$0xff] }
  0x7b   : > { %890 = vmatpush1.bf16.msra.mxu1 %v5170_v31  ;;  %v5238_v31 = vld [vmem:[%s7306_s1 + $0x300] ss:$8 sps:$4 sm:$0xff]  }
  0x7c   : > { %2214 = vmatpush1.bf16.msra.mxu0 %v5173_v32  ;;  %891 = vmatprep.subr.bf16.mxu1 %v5178_v33  ;;  %v6266_v32 = vld [vmem:[%s5799_s19 + $0x18] sm:$0x11]  ;;  %v4250_v33 = vcombine.high %v6257_v29, %v6260_v30 }
  0x7d   : > { %2215 = vmatprep.subr.bf16.mxu0 %v5181_v34  ;;  %v5241_v34 = vld [vmem:[%s7306_s1 + $0x900] ss:$8 sps:$4 sm:$0xff]  }
  0x7e   : > { %v1045_v40 = vrot.slane %v4250_v33, 1 }
  0x7f   : > { %892 = vmatpush1.bf16.msra.mxu1 %v5176_v37  ;;  %v4253_v37 = vcombine.high %v6266_v32, %v6266_v32 }
  0x80   : > { %2216 = vmatpush1.bf16.msra.mxu0 %v5179_v38  ;;  %893 = vmatprep.subr.bf16.mxu1 %v5184_v39  ;;  %v6279_v38 = vld [vmem:[%s5799_s19 + $0xc] sm:$0xee]  ;;  %v2350_v39 = vsel %vm2299_vm3, %v2341_v26, %v2349_v27  ;;  %v5297_v27 = vld [vmem:[%s7306_s1 + $0x994] ss:$8 sps:$4 sm:$0xff]  }
  0x81   : > { %2217 = vmatprep.subr.bf16.mxu0 %v5187_v42  ;;  %v6286_v42 = vld [vmem:[%s5799_s19 + $0x24] sm:$0x11] }
  0x82   : > { %v6297_v45 = vcombine.high %v6286_v42, %v6286_v42 }
  0x83   : > { %894 = vmatpush1.bf16.msra.mxu1 %v5182_v43  ;;  %v5249_v43 = vld [vmem:[%s7306_s1 + $0x914] ss:$8 sps:$4 sm:$0xff]  }
  0x84   : > { %2218 = vmatpush1.bf16.msra.mxu0 %v5185_v44  ;;  %895 = vmatprep.subr.bf16.mxu1 %v5190_v4  ;;  %v1046_v44 = vrot.slane %v4253_v37, 1  ;;  %v6293_v4 = vcombine.high %v6279_v38, %v6283_v41  ;;  %v3181_v19 = vshll.u32 %v6297_v45, 16  ;;  %v5295_v37 = vld [vmem:[%s7306_s1 + $0x990] ss:$8 sps:$4 sm:$0xff]  }
  0x85   : > { %2637 = vmatprep.subr.bf16.mxu0 %v5195_v47 }
  0x86   : > { %v1047_v46 = vsel %vm1041_vm0, %v1045_v40, %v1046_v44  ;;  %v2763_v47 = vrot.slane %v6293_v4, 1  ;;  %v3173_v16 = vshll.u32 %v6293_v4, 16  ;;  %v3183_v26 = vrot.slane %v3181_v19, 2  ;;  %v5331_v19 = vld [vmem:[%s7306_s1 + $0x9f0] ss:$8 sps:$4 sm:$0xff]  }
  0x87   : > { %2236 = vmatmul.mubr.bf16.vlgmr.msra.gmra.mrb[12].mxu0 %v1916_v50  ;;  %896 = vmatpush1.bf16.msra.mxu1 %v5188_v48  ;;  %v2764_v48 = vrot.slane %v6297_v45, 1  ;;  %v5247_v50 = vld [vmem:[%s7306_s1 + $0x910] ss:$8 sps:$4 sm:$0xff]  }
  0x88   : > { %2638 = vmatpush1.bf16.msra.mxu0 %v5193_v49  ;;  %897 = vmatprep.subr.bf16.mxu1 %v5198_v52  ;;  %v5244_v49 = vld [vmem:[%s7306_s1 + $0x310] ss:$8 sps:$4 sm:$0xff]   ;;  %v5255_v52 = vld [vmem:[%s7306_s1 + $0x924] ss:$8 sps:$4 sm:$0xff]  }
  0x89   : > { %2639 = vmatprep.subr.bf16.mxu0 %v5201_v53  ;;  %2669 = vmatprep.mubr.bf16.mxu0 %v5681_v2  ;;  %v2765_v53 = vsel %vm1041_vm0, %v2763_v47, %v2764_v48  ;;  %v5301_v47 = vld [vmem:[%s7306_s1 + $0x9a0] ss:$8 sps:$4 sm:$0xff]  }
  0x8b   : > { %898 = vmatpush1.bf16.msra.mxu1 %v5196_v54  ;;  %v5250_v54 = vld [vmem:[%s7306_s1 + $0x320] ss:$8 sps:$4 sm:$0xff]  }
  0x8c   : > { %2640 = vmatpush1.bf16.msra.mxu0 %v5199_v55  ;;  %899 = vmatprep.subr.bf16.mxu1 %v5204_v56  ;;  %v5253_v55 = vld [vmem:[%s7306_s1 + $0x920] ss:$8 sps:$4 sm:$0xff]   ;;  %v5258_v56 = vld [vmem:[%s7306_s1 + $0x334] ss:$8 sps:$4 sm:$0xff]  }
  0x8d   : > { %2641 = vmatprep.subr.bf16.mxu0 %v5207_v57  ;;  %v5261_v57 = vld [vmem:[%s7306_s1 + $0x934] ss:$8 sps:$4 sm:$0xff]  }
  0x8f   : > { %900 = vmatpush1.bf16.msra.mxu1 %v5202_v58  ;;  %v5256_v58 = vld [vmem:[%s7306_s1 + $0x330] ss:$8 sps:$4 sm:$0xff]  }
  0x90   : > { %2642 = vmatpush1.bf16.msra.mxu0 %v5205_v59  ;;  %901 = vmatprep.subr.bf16.mxu1 %v5210_v60  ;;  %v5259_v59 = vld [vmem:[%s7306_s1 + $0x930] ss:$8 sps:$4 sm:$0xff]   ;;  %v5264_v60 = vld [vmem:[%s7306_s1 + $0x344] ss:$8 sps:$4 sm:$0xff]  }
  0x91   : > { %2643 = vmatprep.subr.bf16.mxu0 %v5213_v61  ;;  %v5267_v61 = vld [vmem:[%s7306_s1 + $0x944] ss:$8 sps:$4 sm:$0xff]  }
  0x93   : > { %902 = vmatpush1.bf16.msra.mxu1 %v5208_v62  ;;  %v5262_v62 = vld [vmem:[%s7306_s1 + $0x340] ss:$8 sps:$4 sm:$0xff]  }
  0x94   : > { %2644 = vmatpush1.bf16.msra.mxu0 %v5211_v0  ;;  %903 = vmatprep.subr.bf16.mxu1 %v5216_v1  ;;  %v5265_v0 = vld [vmem:[%s7306_s1 + $0x940] ss:$8 sps:$4 sm:$0xff]   ;;  %v5270_v1 = vld [vmem:[%s7306_s1 + $0x354] ss:$8 sps:$4 sm:$0xff]  }
  0x95   : > { %2645 = vmatprep.subr.bf16.mxu0 %v5219_v3  ;;  %v5273_v3 = vld [vmem:[%s7306_s1 + $0x954] ss:$8 sps:$4 sm:$0xff]  }
  0x97   : > { %904 = vmatpush1.bf16.msra.mxu1 %v5214_v5  ;;  %v5268_v5 = vld [vmem:[%s7306_s1 + $0x350] ss:$8 sps:$4 sm:$0xff]  }
  0x98   : > { %2646 = vmatpush1.bf16.msra.mxu0 %v5217_v6  ;;  %905 = vmatprep.subr.bf16.mxu1 %v5222_v7  ;;  %v5271_v6 = vld [vmem:[%s7306_s1 + $0x950] ss:$8 sps:$4 sm:$0xff]   ;;  %v5276_v7 = vld [vmem:[%s7306_s1 + $0x364] ss:$8 sps:$4 sm:$0xff]  }
  0x99   : > { %2647 = vmatprep.subr.bf16.mxu0 %v5225_v8  ;;  %v5279_v8 = vld [vmem:[%s7306_s1 + $0x964] ss:$8 sps:$4 sm:$0xff]  }
  0x9b   : > { %906 = vmatpush1.bf16.msra.mxu1 %v5220_v35  ;;  %v5277_v35 = vld [vmem:[%s7306_s1 + $0x960] ss:$8 sps:$4 sm:$0xff]  }
  0x9c   : > { %2648 = vmatpush1.bf16.msra.mxu0 %v5223_v10  ;;  %907 = vmatprep.subr.bf16.mxu1 %v5228_v12  ;;  %v5282_v10 = vld [vmem:[%s7306_s1 + $0x374] ss:$8 sps:$4 sm:$0xff]   ;;  %v5280_v12 = vld [vmem:[%s7306_s1 + $0x370] ss:$8 sps:$4 sm:$0xff]  }
  0x9d   : > { %2649 = vmatprep.subr.bf16.mxu0 %v5231_v15  ;;  %v3170_v15 = vshrl.u32 %v6293_v4, 16 }
  0x9f   : > { %908 = vmatpush1.bf16.msra.mxu1 %v5226_v17  ;;  %v5291_v17 = vld [vmem:[%s7306_s1 + $0x984] ss:$8 sps:$4 sm:$0xff]  }
  0xa0   : > { %2650 = vmatpush1.bf16.msra.mxu0 %v5229_v18  ;;  %909 = vmatprep.subr.bf16.mxu1 %v5234_v20  ;;  %v3178_v18 = vshrl.u32 %v6297_v45, 16  ;;  %v3172_v20 = vrot.slane %v3170_v15, 1 }
  0xa1   : > { %2651 = vmatprep.subr.bf16.mxu0 %v5237_v51  ;;  %v3175_v51 = vrot.slane %v3173_v16, 2 }
  0xa3   : > { %910 = vmatpush1.bf16.msra.mxu1 %v5232_v23  ;;  %v5294_v23 = vld [vmem:[%s7306_s1 + $0x394] ss:$8 sps:$4 sm:$0xff]  }
  0xa4   : > { %2652 = vmatpush1.bf16.msra.mxu0 %v5235_v24  ;;  %1294 = vmatprep.subr.bf16.mxu1 %v5240_v25  ;;  %v6403_v24 = vcombine.low %v6279_v38, %v6283_v41  ;;  %v3180_v25 = vrot.slane %v3178_v18, 1  ;;  %v5328_v18 = vld [vmem:[%s7306_s1 + $0x3f0] ss:$8 sps:$4 sm:$0xff]  }
  0xa5   : > { %3012 = vmatprep.subr.bf16.mxu0 %v5243_v28  ;;  %v3176_v28 = vor.u32 %v3175_v51, %v3172_v20  ;;  %v5340_v51 = vld [vmem:[%s7306_s1 + $0x484] ss:$8 sps:$4 sm:$0xff]  }
  0xa6   : > { %912 = vmatmul.mubr.bf16.vlgmr.msra.gmra.mrb[0].mxu1 %v5902_v63  ;;  %v5252_v63 = vld [vmem:[%s7306_s1 + $0x324] ss:$8 sps:$4 sm:$0xff]   ;;  %v3184_v33 = vor.u32 %v3183_v26, %v3180_v25  ;;  %v3156_v38 = vshll.u32 %v6403_v24, 16 }
  0xa7   : > { %2670 = vmatmul.mubr.bf16.vlgmr.msra.gmra.mrb[16].mxu0 %v2350_v39  ;;  %1295 = vmatpush1.bf16.msra.mxu1 %v5238_v31  ;;  %v6410_v31 = vcombine.low %v6286_v42, %v6286_v42  ;;  %v5300_v39 = vld [vmem:[%s7306_s1 + $0x3a4] ss:$8 sps:$4 sm:$0xff]  }
  0xa8   : > { %3013 = vmatpush1.bf16.msra.mxu0 %v5241_v34  ;;  %1296 = vmatprep.subr.bf16.mxu1 %v5246_v36  ;;  %v3153_v34 = vshrl.u32 %v6403_v24, 16  ;;  %v5292_v36 = vld [vmem:[%s7306_s1 + $0x390] ss:$8 sps:$4 sm:$0xff]   ;;  %v6424_v40 = vsel %vm3151_vm4, %v3176_v28, %v3184_v33  ;;  %v3158_v44 = vrot.slane %v3156_v38, 2  ;;  %v5345_v28 = vld [vmem:[%s7306_s1 + $0xa04] ss:$8 sps:$4 sm:$0xff]  }
  0xa9   : > { %3014 = vmatprep.subr.bf16.mxu0 %v5249_v43  ;;  %1326 = vmatprep.mubr.bf16.mxu1 %v1047_v46  ;;  %v3161_v42 = vshrl.u32 %v6410_v31, 16  ;;  %v5303_v43 = vld [vmem:[%s7306_s1 + $0x9a4] ss:$8 sps:$4 sm:$0xff]   ;;  %v3164_v4 = vshll.u32 %v6410_v31, 16  ;;  %v5298_v46 = vld [vmem:[%s7306_s1 + $0x3a0] ss:$8 sps:$4 sm:$0xff]  }
  0xaa   : > { %3044 = vmatprep.mubr.bf16.mxu0 %v2765_v53  ;;  %v3155_v41 = vrot.slane %v3153_v34, 1  ;;  %v2760_v33 = vrot.slane %v6403_v24, 1  ;;  %v2761_v34 = vrot.slane %v6410_v31, 1  ;;  %v5343_v31 = vld [vmem:[%s7306_s1 + $0xa00] ss:$8 sps:$4 sm:$0xff]  }
  0xab   : > { %1297 = vmatpush1.bf16.msra.mxu1 %v5244_v49  ;;  %v3163_v45 = vrot.slane %v3161_v42, 1  ;;  %v3166_v49 = vrot.slane %v3164_v4, 2 }
  0xac   : > { %3015 = vmatpush1.bf16.msra.mxu0 %v5247_v50  ;;  %1298 = vmatprep.subr.bf16.mxu1 %v5252_v63  ;;  %v3159_v48 = vor.u32 %v3158_v44, %v3155_v41  ;;  %v5306_v50 = vld [vmem:[%s7306_s1 + $0x3b4] ss:$8 sps:$4 sm:$0xff]   ;;  %v2762_v4 = vsel %vm1041_vm0, %v2760_v33, %v2761_v34  ;;  %v5390_v33 = vld [vmem:[%s7306_s1 + $0x500] ss:$8 sps:$4 sm:$0xff]  }
  0xad   : > { %3016 = vmatprep.subr.bf16.mxu0 %v5255_v52  ;;  %v5309_v63 = vld [vmem:[%s7306_s1 + $0x9b4] ss:$8 sps:$4 sm:$0xff]   ;;  %v3167_v52 = vor.u32 %v3166_v49, %v3163_v45  ;;  %v5393_v34 = vld [vmem:[%s7306_s1 + $0xa80] ss:$8 sps:$4 sm:$0xff]  }
  0xaf   : > { %1299 = vmatpush1.bf16.msra.mxu1 %v5250_v54  ;;  %v6444_v53 = vsel %vm3151_vm4, %v3159_v48, %v3167_v52  ;;  %v5304_v54 = vld [vmem:[%s7306_s1 + $0x3b0] ss:$8 sps:$4 sm:$0xff]   ;;  %v5353_v48 = vld [vmem:[%s7306_s1 + $0xa14] ss:$8 sps:$4 sm:$0xff]  }
  0xb0   : > { %3017 = vmatpush1.bf16.msra.mxu0 %v5253_v55  ;;  %1300 = vmatprep.subr.bf16.mxu1 %v5258_v56  ;;  %v5307_v55 = vld [vmem:[%s7306_s1 + $0x9b0] ss:$8 sps:$4 sm:$0xff]   ;;  %v5312_v56 = vld [vmem:[%s7306_s1 + $0x3c4] ss:$8 sps:$4 sm:$0xff]  }
  0xb1   : > { %3018 = vmatprep.subr.bf16.mxu0 %v5261_v57  ;;  %v5315_v57 = vld [vmem:[%s7306_s1 + $0x9c4] ss:$8 sps:$4 sm:$0xff]   ;;  %v5348_v52 = vld [vmem:[%s7306_s1 + $0x490] ss:$8 sps:$4 sm:$0xff]  }
  0xb3   : > { %1301 = vmatpush1.bf16.msra.mxu1 %v5256_v58  ;;  %v5310_v58 = vld [vmem:[%s7306_s1 + $0x3c0] ss:$8 sps:$4 sm:$0xff]  }
  0xb4   : > { %3019 = vmatpush1.bf16.msra.mxu0 %v5259_v59  ;;  %1302 = vmatprep.subr.bf16.mxu1 %v5264_v60  ;;  %v5313_v59 = vld [vmem:[%s7306_s1 + $0x9c0] ss:$8 sps:$4 sm:$0xff]  }
  0xb5   : > { %3020 = vmatprep.subr.bf16.mxu0 %v5267_v61  ;;  %v6465_v60 = vld [vmem:[%s5799_s19] sm:$0xcc]  ;;  %v6468_v61 = vld [vmem:[%s5799_s19 + $0x18] sm:$0x33] }
  0xb7   : > { %1303 = vmatpush1.bf16.msra.mxu1 %v5262_v62  ;;  %v5318_v62 = vld [vmem:[%s7306_s1 + $0x3d4] ss:$8 sps:$4 sm:$0xff]  }
  0xb8   : > { %3021 = vmatpush1.bf16.msra.mxu0 %v5265_v0  ;;  %1304 = vmatprep.subr.bf16.mxu1 %v5270_v1  ;;  %v5321_v0 = vld [vmem:[%s7306_s1 + $0x9d4] ss:$8 sps:$4 sm:$0xff]   ;;  %v5316_v1 = vld [vmem:[%s7306_s1 + $0x3d0] ss:$8 sps:$4 sm:$0xff]  }
  0xb9   : > { %3022 = vmatprep.subr.bf16.mxu0 %v5273_v3  ;;  %v4352_v3 = vcombine.high %v6465_v60, %v6260_v30 }
  0xbb   : > { %1305 = vmatpush1.bf16.msra.mxu1 %v5268_v5  ;;  %v4355_v5 = vcombine.high %v6468_v61, %v6468_v61 }
  0xbc   : > { %3023 = vmatpush1.bf16.msra.mxu0 %v5271_v6  ;;  %1306 = vmatprep.subr.bf16.mxu1 %v5276_v7  ;;  %v5319_v6 = vld [vmem:[%s7306_s1 + $0x9d0] ss:$8 sps:$4 sm:$0xff]   ;;  %v5324_v7 = vld [vmem:[%s7306_s1 + $0x3e4] ss:$8 sps:$4 sm:$0xff]  }
  0xbd   : > { %3024 = vmatprep.subr.bf16.mxu0 %v5279_v8  ;;  %v5327_v8 = vld [vmem:[%s7306_s1 + $0x9e4] ss:$8 sps:$4 sm:$0xff]   ;;  %v1480_v15 = vshrl.u32 %v4355_v5, 16  ;;  %v1483_v16 = vshll.u32 %v4355_v5, 16  ;;  %v5360_v5 = vld [vmem:[%s7306_s1 + $0x4b0] ss:$8 sps:$4 sm:$0xff]  }
  0xbf   : > { %1307 = vmatpush1.bf16.msra.mxu1 %v5274_v9  ;;  %v5322_v9 = vld [vmem:[%s7306_s1 + $0x3e0] ss:$8 sps:$4 sm:$0xff]   ;;  %v1482_v26 = vrot.slane %v1480_v15, 2  ;;  %v5383_v15 = vld [vmem:[%s7306_s1 + $0xa64] ss:$8 sps:$4 sm:$0xff]  }
  0xc0   : > { %3025 = vmatpush1.bf16.msra.mxu0 %v5277_v35  ;;  %1308 = vmatprep.subr.bf16.mxu1 %v5282_v10  ;;  %v4249_v35 = vcombine.low %v6257_v29, %v6260_v30  ;;  %v4252_v10 = vcombine.low %v6266_v32, %v6266_v32  ;;  %v5330_v29 = vld [vmem:[%s7306_s1 + $0x3f4] ss:$8 sps:$4 sm:$0xff]  }
  0xc1   : > { %3026 = vmatprep.subr.bf16.mxu0 %v5285_v11  ;;  %v2685_v11 = vld [vmem:[%s5799_s19 + $0x14] sm:$0xe] }
  0xc2   : > { %v5333_v32 = vld [vmem:[%s7306_s1 + $0x9f4] ss:$8 sps:$4 sm:$0xff]   ;;  %v1042_v20 = vrot.slane %v4249_v35, 1  ;;  %v5369_v35 = vld [vmem:[%s7306_s1 + $0xa40] ss:$8 sps:$4 sm:$0xff]  }
  0xc3   : > { %1309 = vmatpush1.bf16.msra.mxu1 %v5280_v12  ;;  %v2687_v12 = vld [vmem:[%s5799_s19 + $0x20] sm:$0xf] }
  0xc4   : > { %3027 = vmatpush1.bf16.msra.mxu0 %v5283_v13  ;;  %1310 = vmatprep.subr.bf16.mxu1 %v5288_v14  ;;  %v1472_v13 = vshrl.u32 %v4352_v3, 16  ;;  %v1475_v14 = vshll.u32 %v4352_v3, 16  ;;  %v5365_v3 = vld [vmem:[%s7306_s1 + $0xa34] ss:$8 sps:$4 sm:$0xff]  }
  0xc5   : > { %3028 = vmatprep.subr.bf16.mxu0 %v5291_v17  ;;  %v5325_v17 = vld [vmem:[%s7306_s1 + $0x9e0] ss:$8 sps:$4 sm:$0xff]  }
  0xc6   : > { %v1477_v25 = vrot.slane %v1475_v14, 3  ;;  %v5380_v14 = vld [vmem:[%s7306_s1 + $0x4e4] ss:$8 sps:$4 sm:$0xff]  }
  0xc7   : > { %1311 = vmatpush1.bf16.msra.mxu1 %v5286_v21  ;;  %v1043_v21 = vrot.slane %v4252_v10, 1  ;;  %v5374_v10 = vld [vmem:[%s7306_s1 + $0x4d4] ss:$8 sps:$4 sm:$0xff]  }
  0xc8   : > { %3029 = vmatpush1.bf16.msra.mxu0 %v5289_v22  ;;  %1312 = vmatprep.subr.bf16.mxu1 %v5294_v23  ;;  %v6516_v22 = vcombine.low %v2685_v11, %v2687_v12  ;;  %v1474_v23 = vrot.slane %v1472_v13, 2  ;;  %v5377_v11 = vld [vmem:[%s7306_s1 + $0xa54] ss:$8 sps:$4 sm:$0xff]   ;;  %v5372_v12 = vld [vmem:[%s7306_s1 + $0x4d0] ss:$8 sps:$4 sm:$0xff]  }
  0xc9   : > { %3030 = vmatprep.subr.bf16.mxu0 %v5297_v27  ;;  %v1485_v27 = vrot.slane %v1483_v16, 3  ;;  %v1044_v24 = vsel %vm1041_vm0, %v1042_v20, %v1043_v21  ;;  %v5375_v13 = vld [vmem:[%s7306_s1 + $0xa50] ss:$8 sps:$4 sm:$0xff]   ;;  %v5386_v20 = vld [vmem:[%s7306_s1 + $0x4f4] ss:$8 sps:$4 sm:$0xff]  }
  0xca   : > { %v3190_v38 = vshll.u32 %v6516_v22, 16  ;;  %v1478_v41 = vor.u32 %v1477_v25, %v1474_v23  ;;  %v5389_v21 = vld [vmem:[%s7306_s1 + $0xa74] ss:$8 sps:$4 sm:$0xff]   ;;  %v5387_v23 = vld [vmem:[%s7306_s1 + $0xa70] ss:$8 sps:$4 sm:$0xff]  }
  0xcb   : > { %1313 = vmatpush1.bf16.msra.mxu1 %v5292_v36  ;;  %v6527_v36 = vld [vmem:[%s5799_s19 + $0x2c] ss:$0 sps:$4 sm:$0x11]   ;;  %v1486_v42 = vor.u32 %v1485_v27, %v1482_v26  ;;  %v2766_v26 = vrot.slane %v6516_v22, 1 }
  0xcc   : > { %3031 = vmatpush1.bf16.msra.mxu0 %v5295_v37  ;;  %1314 = vmatprep.subr.bf16.mxu1 %v5300_v39  ;;  %v3187_v37 = vshrl.u32 %v6516_v22, 16  ;;  %v5338_v39 = vld [vmem:[%s7306_s1 + $0x480] ss:$8 sps:$4 sm:$0xff]   ;;  %v3195_v44 = vshrl.u32 %v6527_v36, 16  ;;  %v3192_v45 = vrot.slane %v3190_v38, 2  ;;  %v2767_v27 = vrot.slane %v6527_v36, 1 }
  0xcd   : > { %3032 = vmatprep.subr.bf16.mxu0 %v5303_v43  ;;  %v5392_v25 = vld [vmem:[%s7306_s1 + $0x504] ss:$8 sps:$4 sm:$0xff]   ;;  %v5398_v38 = vld [vmem:[%s7306_s1 + $0x510] ss:$8 sps:$4 sm:$0xff]  }
  0xce   : > { %v3189_v43 = vrot.slane %v3187_v37, 1  ;;  %v3197_v49 = vrot.slane %v3195_v44, 1  ;;  %v2768_v22 = vsel %vm1041_vm0, %v2766_v26, %v2767_v27  ;;  %v5403_v37 = vld [vmem:[%s7306_s1 + $0xa94] ss:$8 sps:$4 sm:$0xff]   ;;  %v5407_v44 = vld [vmem:[%s7306_s1 + $0xaa0] ss:$8 sps:$4 sm:$0xff]  }
  0xcf   : > { %1315 = vmatpush1.bf16.msra.mxu1 %v5298_v46  ;;  %v3198_v46 = vshll.u32 %v6527_v36, 16  ;;  %v5400_v36 = vld [vmem:[%s7306_s1 + $0x514] ss:$8 sps:$4 sm:$0xff]   ;;  %v5444_v26 = vld [vmem:[%s7306_s1 + $0x600] ss:$8 sps:$4 sm:$0xff]  }
  0xd0   : > { %3033 = vmatpush1.bf16.msra.mxu0 %v5301_v47  ;;  %1316 = vmatprep.subr.bf16.mxu1 %v5306_v50  ;;  %v5350_v47 = vld [vmem:[%s7306_s1 + $0x494] ss:$8 sps:$4 sm:$0xff]   ;;  %v3193_v50 = vor.u32 %v3192_v45, %v3189_v43  ;;  %v5404_v43 = vld [vmem:[%s7306_s1 + $0x520] ss:$8 sps:$4 sm:$0xff]   ;;  %v5418_v45 = vld [vmem:[%s7306_s1 + $0x544] ss:$8 sps:$4 sm:$0xff]  }
  0xd1   : > { %3034 = vmatprep.subr.bf16.mxu0 %v5309_v63  ;;  %v3200_v63 = vrot.slane %v3198_v46, 2  ;;  %v5421_v46 = vld [vmem:[%s7306_s1 + $0xac4] ss:$8 sps:$4 sm:$0xff]   ;;  %v5447_v27 = vld [vmem:[%s7306_s1 + $0xb00] ss:$8 sps:$4 sm:$0xff]  }
  0xd3   : > { %1317 = vmatpush1.bf16.msra.mxu1 %v5304_v54  ;;  %v1487_v54 = vsel %vm1453_vm1, %v1478_v41, %v1486_v42  ;;  %v5406_v41 = vld [vmem:[%s7306_s1 + $0x524] ss:$8 sps:$4 sm:$0xff]  }
  0xd4   : > { %3035 = vmatpush1.bf16.msra.mxu0 %v5307_v55  ;;  %1318 = vmatprep.subr.bf16.mxu1 %v5312_v56  ;;  %v5351_v55 = vld [vmem:[%s7306_s1 + $0xa10] ss:$8 sps:$4 sm:$0xff]   ;;  %v3201_v56 = vor.u32 %v3200_v63, %v3197_v49  ;;  %v5409_v42 = vld [vmem:[%s7306_s1 + $0xaa4] ss:$8 sps:$4 sm:$0xff]   ;;  %v5419_v49 = vld [vmem:[%s7306_s1 + $0xac0] ss:$8 sps:$4 sm:$0xff]  }
  0xd5   : > { %3036 = vmatprep.subr.bf16.mxu0 %v5315_v57  ;;  %v5356_v57 = vld [vmem:[%s7306_s1 + $0x4a4] ss:$8 sps:$4 sm:$0xff]   ;;  %v5424_v63 = vld [vmem:[%s7306_s1 + $0x554] ss:$8 sps:$4 sm:$0xff]  }
  0xd7   : > { %1319 = vmatpush1.bf16.msra.mxu1 %v5310_v58  ;;  %v5359_v58 = vld [vmem:[%s7306_s1 + $0xa24] ss:$8 sps:$4 sm:$0xff]  }
  0xd8   : > { %3037 = vmatpush1.bf16.msra.mxu0 %v5313_v59  ;;  %1320 = vmatprep.subr.bf16.mxu1 %v5318_v62  ;;  %v6562_v59 = vsel %vm3151_vm4, %v3193_v50, %v3201_v56  ;;  %v5354_v62 = vld [vmem:[%s7306_s1 + $0x4a0] ss:$8 sps:$4 sm:$0xff]   ;;  %v4354_v50 = vcombine.low %v6468_v61, %v6468_v61  ;;  %v5425_v61 = vld [vmem:[%s7306_s1 + $0xad0] ss:$8 sps:$4 sm:$0xff]   ;;  %v5430_v56 = vld [vmem:[%s7306_s1 + $0x564] ss:$8 sps:$4 sm:$0xff]  }
  0xd9   : > { %3038 = vmatprep.subr.bf16.mxu0 %v5321_v0  ;;  %v5357_v0 = vld [vmem:[%s7306_s1 + $0xa20] ss:$8 sps:$4 sm:$0xff]  }
  0xdb   : > { %1321 = vmatpush1.bf16.msra.mxu1 %v5316_v1  ;;  %v5362_v1 = vld [vmem:[%s7306_s1 + $0x4b4] ss:$8 sps:$4 sm:$0xff]  }
  0xdc   : > { %3039 = vmatpush1.bf16.msra.mxu0 %v5319_v6  ;;  %1322 = vmatprep.subr.bf16.mxu1 %v5324_v7  ;;  %v5363_v6 = vld [vmem:[%s7306_s1 + $0xa30] ss:$8 sps:$4 sm:$0xff]   ;;  %v5368_v7 = vld [vmem:[%s7306_s1 + $0x4c4] ss:$8 sps:$4 sm:$0xff]  }
  0xdd   : > { %3040 = vmatprep.subr.bf16.mxu0 %v5327_v8  ;;  %v5371_v8 = vld [vmem:[%s7306_s1 + $0xa44] ss:$8 sps:$4 sm:$0xff]  }
  0xdf   : > { %1323 = vmatpush1.bf16.msra.mxu1 %v5322_v9  ;;  %v5366_v9 = vld [vmem:[%s7306_s1 + $0x4c0] ss:$8 sps:$4 sm:$0xff]  }
  0xe0   : > { %3041 = vmatpush1.bf16.msra.mxu0 %v5325_v17  ;;  %1324 = vmatprep.subr.bf16.mxu1 %v5330_v29  ;;  %v5378_v29 = vld [vmem:[%s7306_s1 + $0x4e0] ss:$8 sps:$4 sm:$0xff]  }
  0xe1   : > { %3042 = vmatprep.subr.bf16.mxu0 %v5333_v32 }
  0xe3   : > { %1325 = vmatpush1.bf16.msra.mxu1 %v5328_v18  ;;  %v5381_v18 = vld [vmem:[%s7306_s1 + $0xa60] ss:$8 sps:$4 sm:$0xff]  }
  0xe4   : > { %3043 = vmatpush1.bf16.msra.mxu0 %v5331_v19  ;;  %1748 = vmatprep.subr.bf16.mxu1 %v5340_v51  ;;  %v5384_v51 = vld [vmem:[%s7306_s1 + $0x4f0] ss:$8 sps:$4 sm:$0xff]  }
  0xe5   : > { %3055 = vmatprep.subr.bf16.mxu0 %v5345_v28  ;;  %v5395_v28 = vld [vmem:[%s7306_s1 + $0xa84] ss:$8 sps:$4 sm:$0xff]  }
  0xe6   : > { %1327 = vmatmul.mubr.bf16.vlgmr.msra.gmra.mrb[4].mxu1 %v1044_v24  ;;  %v5412_v24 = vld [vmem:[%s7306_s1 + $0x534] ss:$8 sps:$4 sm:$0xff]  }
  0xe7   : > { %3045 = vmatmul.mubr.bf16.vlgmr.msra.gmra.mrb[16].mxu0 %v2762_v4  ;;  %1749 = vmatpush1.bf16.msra.mxu1 %v5338_v39  ;;  %v5401_v39 = vld [vmem:[%s7306_s1 + $0xa90] ss:$8 sps:$4 sm:$0xff]  }
  0xe8   : > { %3056 = vmatpush1.bf16.msra.mxu0 %v5343_v31  ;;  %1750 = vmatprep.subr.bf16.mxu1 %v5350_v47  ;;  %v5410_v31 = vld [vmem:[%s7306_s1 + $0x530] ss:$8 sps:$4 sm:$0xff]   ;;  %v4351_v47 = vcombine.low %v6465_v60, %v6260_v30  ;;  %v5427_v30 = vld [vmem:[%s7306_s1 + $0xad4] ss:$8 sps:$4 sm:$0xff]  }
  0xe9   : > { %3057 = vmatprep.subr.bf16.mxu0 %v5353_v48  ;;  %3087 = vmatprep.mubr.bf16.mxu0 %v5681_v2  ;;  %v5413_v4 = vld [vmem:[%s7306_s1 + $0xab0] ss:$8 sps:$4 sm:$0xff]   ;;  %v5416_v48 = vld [vmem:[%s7306_s1 + $0x540] ss:$8 sps:$4 sm:$0xff]  }
  0xea   : > { %1780 = vmatprep.mubr.bf16.mxu1 %v1487_v54  ;;  %v5422_v60 = vld [vmem:[%s7306_s1 + $0x550] ss:$8 sps:$4 sm:$0xff]   ;;  %v1458_v54 = vshll.u32 %v4351_v47, 16 }
  0xeb   : > { %1751 = vmatpush1.bf16.msra.mxu1 %v5348_v52  ;;  %v1455_v52 = vshrl.u32 %v4351_v47, 16  ;;  %v5468_v47 = vld [vmem:[%s7306_s1 + $0x640] ss:$8 sps:$4 sm:$0xff]  }
  0xec   : > { %3058 = vmatpush1.bf16.msra.mxu0 %v5351_v55  ;;  %1752 = vmatprep.subr.bf16.mxu1 %v5356_v57  ;;  %v1463_v55 = vshrl.u32 %v4354_v50, 16  ;;  %v1466_v57 = vshll.u32 %v4354_v50, 16  ;;  %v5479_v50 = vld [vmem:[%s7306_s1 + $0xb54] ss:$8 sps:$4 sm:$0xff]  }
  0xed   : > { %3059 = vmatprep.subr.bf16.mxu0 %v5359_v58  ;;  %v5433_v58 = vld [vmem:[%s7306_s1 + $0xae4] ss:$8 sps:$4 sm:$0xff]  }
  0xef   : > { %1753 = vmatpush1.bf16.msra.mxu1 %v5354_v62 }
  0xf0   : > { %3060 = vmatpush1.bf16.msra.mxu0 %v5357_v0  ;;  %1754 = vmatprep.subr.bf16.mxu1 %v5362_v1  ;;  %v5428_v0 = vld [vmem:[%s7306_s1 + $0x560] ss:$8 sps:$4 sm:$0xff]  }
  0xf1   : > { %3061 = vmatprep.subr.bf16.mxu0 %v5365_v3  ;;  %v5431_v1 = vld [vmem:[%s7306_s1 + $0xae0] ss:$8 sps:$4 sm:$0xff]   ;;  %v1457_v3 = vrot.slane %v1455_v52, 2  ;;  %v5485_v52 = vld [vmem:[%s7306_s1 + $0xb64] ss:$8 sps:$4 sm:$0xff]  }
  0xf3   : > { %1755 = vmatpush1.bf16.msra.mxu1 %v5360_v5 }
  0xf4   : > { %3062 = vmatpush1.bf16.msra.mxu0 %v5363_v6  ;;  %1756 = vmatprep.subr.bf16.mxu1 %v5368_v7  ;;  %v5436_v6 = vld [vmem:[%s7306_s1 + $0x574] ss:$8 sps:$4 sm:$0xff]   ;;  %v1460_v7 = vrot.slane %v1458_v54, 3 }
  0xf5   : > { %3063 = vmatprep.subr.bf16.mxu0 %v5371_v8  ;;  %v1465_v8 = vrot.slane %v1463_v55, 2 }
  0xf7   : > { %1757 = vmatpush1.bf16.msra.mxu1 %v5366_v9  ;;  %v6738_v9 = vld [vmem:[%s5799_s19] sm:$0x88] }
  0xf8   : > { %3064 = vmatpush1.bf16.msra.mxu0 %v5369_v35  ;;  %1758 = vmatprep.subr.bf16.mxu1 %v5374_v10  ;;  %v1468_v10 = vrot.slane %v1466_v57, 3  ;;  %v5483_v57 = vld [vmem:[%s7306_s1 + $0xb60] ss:$8 sps:$4 sm:$0xff]  }
  0xf9   : > { %3065 = vmatprep.subr.bf16.mxu0 %v5377_v11  ;;  %v6743_v11 = vld [vmem:[%s5799_s19 + $0x18] sm:$0x77] }
  0xfa   : > { %v6612_v16 = vpop.f32.mrb[0].mxu0 }
  0xfb   : > { %v6614_v17 = vpop.f32.mrb[1].mxu0  ;;  %1759 = vmatpush1.bf16.msra.mxu1 %v5372_v12 }
  0xfc   : > { %v6619_v32 = vpop.f32.mrb[2].mxu0  ;;  %3066 = vmatpush1.bf16.msra.mxu0 %v5375_v13  ;;  %1760 = vmatprep.subr.bf16.mxu1 %v5380_v14  ;;  %v5439_v13 = vld [vmem:[%s7306_s1 + $0xaf4] ss:$8 sps:$4 sm:$0xff]   ;;  %v5434_v14 = vld [vmem:[%s7306_s1 + $0x570] ss:$8 sps:$4 sm:$0xff]  }
  0xfd   : > { %v6624_v19 = vpop.f32.mrb[3].mxu0  ;;  %3067 = vmatprep.subr.bf16.mxu0 %v5383_v15  ;;  %v5437_v15 = vld [vmem:[%s7306_s1 + $0xaf0] ss:$8 sps:$4 sm:$0xff]  }
  0xff   : > { %1761 = vmatpush1.bf16.msra.mxu1 %v5378_v29  ;;  %v6757_v29 = vld [vmem:[%s5799_s19 + $0xc] sm:$0xff] }
 0x100   : > { %3068 = vmatpush1.bf16.msra.mxu0 %v5381_v18  ;;  %1762 = vmatprep.subr.bf16.mxu1 %v5386_v20  ;;  %v6761_v18 = vcombine.high %v6738_v9, %v6757_v29  ;;  %v6765_v20 = vcombine.high %v6743_v11, %v6743_v11 }
 0x101   : > { %3069 = vmatprep.subr.bf16.mxu0 %v5389_v21  ;;  %v1461_v21 = vor.u32 %v1460_v7, %v1457_v3  ;;  %v5486_v3 = vld [vmem:[%s7306_s1 + $0x670] ss:$8 sps:$4 sm:$0xff]   ;;  %v5494_v7 = vld [vmem:[%s7306_s1 + $0x684] ss:$8 sps:$4 sm:$0xff]  }
 0x103   : > { %1763 = vmatpush1.bf16.msra.mxu1 %v5384_v51  ;;  %v1469_v51 = vor.u32 %v1468_v10, %v1465_v8  ;;  %v5497_v8 = vld [vmem:[%s7306_s1 + $0xb84] ss:$8 sps:$4 sm:$0xff]   ;;  %v5492_v10 = vld [vmem:[%s7306_s1 + $0x680] ss:$8 sps:$4 sm:$0xff]  }
 0x104   : > { %3070 = vmatpush1.bf16.msra.mxu0 %v5387_v23  ;;  %1764 = vmatprep.subr.bf16.mxu1 %v5392_v25  ;;  %v5446_v23 = vld [vmem:[%s7306_s1 + $0x604] ss:$8 sps:$4 sm:$0xff]  }
 0x105   : > { %3446 = vmatprep.subr.bf16.mxu0 %v5395_v28  ;;  %v5449_v25 = vld [vmem:[%s7306_s1 + $0xb04] ss:$8 sps:$4 sm:$0xff]   ;;  %v1911_v28 = vrot.slane %v6761_v18, 3 }
 0x107   : > { %3088 = vmatmul.mubr.bf16.vlgmr.msra.gmra.mrb[16].mxu0 %v2768_v22  ;;  %1765 = vmatpush1.bf16.msra.mxu1 %v5390_v33  ;;  %v1912_v33 = vrot.slane %v6765_v20, 3  ;;  %v5452_v22 = vld [vmem:[%s7306_s1 + $0x614] ss:$8 sps:$4 sm:$0xff]  }
 0x108   : > { %3447 = vmatpush1.bf16.msra.mxu0 %v5393_v34  ;;  %1766 = vmatprep.subr.bf16.mxu1 %v5400_v36  ;;  %v1470_v34 = vsel %vm1453_vm1, %v1461_v21, %v1469_v51  ;;  %v5455_v36 = vld [vmem:[%s7306_s1 + $0xb14] ss:$8 sps:$4 sm:$0xff]   ;;  %v5498_v21 = vld [vmem:[%s7306_s1 + $0x690] ss:$8 sps:$4 sm:$0xff]  }
 0x109   : > { %3448 = vmatprep.subr.bf16.mxu0 %v5403_v37  ;;  %3478 = vmatprep.mubr.bf16.mxu0 %v6424_v40  ;;  %v5415_v40 = vld [vmem:[%s7306_s1 + $0xab4] ss:$8 sps:$4 sm:$0xff]   ;;  %v5450_v37 = vld [vmem:[%s7306_s1 + $0x610] ss:$8 sps:$4 sm:$0xff]  }
 0x10a   : > { %v5501_v51 = vld [vmem:[%s7306_s1 + $0xb90] ss:$8 sps:$4 sm:$0xff]  }
 0x10b   : > { %1767 = vmatpush1.bf16.msra.mxu1 %v5398_v38  ;;  %v1913_v38 = vsel %vm1907_vm2, %v1911_v28, %v1912_v33  ;;  %v5515_v28 = vld [vmem:[%s7306_s1 + $0xbb4] ss:$8 sps:$4 sm:$0xff]   ;;  %v5510_v33 = vld [vmem:[%s7306_s1 + $0x6b0] ss:$8 sps:$4 sm:$0xff]  }
 0x10c   : > { %3449 = vmatpush1.bf16.msra.mxu0 %v5401_v39  ;;  %1768 = vmatprep.subr.bf16.mxu1 %v5406_v41  ;;  %v5453_v39 = vld [vmem:[%s7306_s1 + $0xb10] ss:$8 sps:$4 sm:$0xff]   ;;  %v5458_v41 = vld [vmem:[%s7306_s1 + $0x624] ss:$8 sps:$4 sm:$0xff]  }
 0x10d   : > { %3450 = vmatprep.subr.bf16.mxu0 %v5409_v42  ;;  %v5461_v42 = vld [vmem:[%s7306_s1 + $0xb24] ss:$8 sps:$4 sm:$0xff]  }
 0x10f   : > { %1769 = vmatpush1.bf16.msra.mxu1 %v5404_v43  ;;  %v5456_v43 = vld [vmem:[%s7306_s1 + $0x620] ss:$8 sps:$4 sm:$0xff]  }
 0x110   : > { %3451 = vmatpush1.bf16.msra.mxu0 %v5407_v44  ;;  %1770 = vmatprep.subr.bf16.mxu1 %v5412_v24  ;;  %v5459_v44 = vld [vmem:[%s7306_s1 + $0xb20] ss:$8 sps:$4 sm:$0xff]   ;;  %v5464_v24 = vld [vmem:[%s7306_s1 + $0x634] ss:$8 sps:$4 sm:$0xff]  }
 0x111   : > { %3452 = vmatprep.subr.bf16.mxu0 %v5415_v40  ;;  %v5467_v40 = vld [vmem:[%s7306_s1 + $0xb34] ss:$8 sps:$4 sm:$0xff]  }
 0x113   : > { %1771 = vmatpush1.bf16.msra.mxu1 %v5410_v31  ;;  %v5462_v31 = vld [vmem:[%s7306_s1 + $0x630] ss:$8 sps:$4 sm:$0xff]  }
 0x114   : > { %3453 = vmatpush1.bf16.msra.mxu0 %v5413_v4  ;;  %1772 = vmatprep.subr.bf16.mxu1 %v5418_v45  ;;  %v5465_v4 = vld [vmem:[%s7306_s1 + $0xb30] ss:$8 sps:$4 sm:$0xff]   ;;  %v5470_v45 = vld [vmem:[%s7306_s1 + $0x644] ss:$8 sps:$4 sm:$0xff]  }
 0x115   : > { %3454 = vmatprep.subr.bf16.mxu0 %v5421_v46  ;;  %v5473_v46 = vld [vmem:[%s7306_s1 + $0xb44] ss:$8 sps:$4 sm:$0xff]  }
 0x117   : > { %1773 = vmatpush1.bf16.msra.mxu1 %v5416_v48  ;;  %v5471_v48 = vld [vmem:[%s7306_s1 + $0xb40] ss:$8 sps:$4 sm:$0xff]  }
 0x118   : > { %3455 = vmatpush1.bf16.msra.mxu0 %v5419_v49  ;;  %1774 = vmatprep.subr.bf16.mxu1 %v5424_v63  ;;  %v5476_v49 = vld [vmem:[%s7306_s1 + $0x654] ss:$8 sps:$4 sm:$0xff]   ;;  %v5474_v63 = vld [vmem:[%s7306_s1 + $0x650] ss:$8 sps:$4 sm:$0xff]  }
 0x119   : > { %3456 = vmatprep.subr.bf16.mxu0 %v5427_v30  ;;  %v5477_v30 = vld [vmem:[%s7306_s1 + $0xb50] ss:$8 sps:$4 sm:$0xff]  }
 0x11a   : > { %v6724_v62 = vpop.f32.mrb[4].mxu0 }
 0x11b   : > { %v6732_v5 = vpop.f32.mrb[5].mxu0  ;;  %1775 = vmatpush1.bf16.msra.mxu1 %v5422_v60  ;;  %v5482_v60 = vld [vmem:[%s7306_s1 + $0x664] ss:$8 sps:$4 sm:$0xff]  }
 0x11c   : > { %v6740_v35 = vpop.f32.mrb[6].mxu0  ;;  %3457 = vmatpush1.bf16.msra.mxu0 %v5425_v61  ;;  %1776 = vmatprep.subr.bf16.mxu1 %v5430_v56  ;;  %v5480_v56 = vld [vmem:[%s7306_s1 + $0x660] ss:$8 sps:$4 sm:$0xff]  }
 0x11d   : > { %v6745_v12 = vpop.f32.mrb[7].mxu0  ;;  %3458 = vmatprep.subr.bf16.mxu0 %v5433_v58 }
 0x11f   : > { %1777 = vmatpush1.bf16.msra.mxu1 %v5428_v0  ;;  %v5488_v0 = vld [vmem:[%s7306_s1 + $0x674] ss:$8 sps:$4 sm:$0xff]  }
 0x120   : > { %3459 = vmatpush1.bf16.msra.mxu0 %v5431_v1  ;;  %1778 = vmatprep.subr.bf16.mxu1 %v5436_v6  ;;  %v5491_v1 = vld [vmem:[%s7306_s1 + $0xb74] ss:$8 sps:$4 sm:$0xff]   ;;  %v5489_v6 = vld [vmem:[%s7306_s1 + $0xb70] ss:$8 sps:$4 sm:$0xff]  }
 0x121   : > { %3460 = vmatprep.subr.bf16.mxu0 %v5439_v13  ;;  %v5495_v13 = vld [vmem:[%s7306_s1 + $0xb80] ss:$8 sps:$4 sm:$0xff]  }
 0x123   : > { %1779 = vmatpush1.bf16.msra.mxu1 %v5434_v14  ;;  %v5500_v14 = vld [vmem:[%s7306_s1 + $0x694] ss:$8 sps:$4 sm:$0xff]  }
 0x124   : > { %3461 = vmatpush1.bf16.msra.mxu0 %v5437_v15  ;;  %2160 = vmatprep.subr.bf16.mxu1 %v5446_v23  ;;  %v5503_v15 = vld [vmem:[%s7306_s1 + $0xb94] ss:$8 sps:$4 sm:$0xff]   ;;  %v5506_v23 = vld [vmem:[%s7306_s1 + $0x6a4] ss:$8 sps:$4 sm:$0xff]  }
 0x125   : > { %3462 = vmatprep.subr.bf16.mxu0 %v5449_v25  ;;  %v5504_v25 = vld [vmem:[%s7306_s1 + $0x6a0] ss:$8 sps:$4 sm:$0xff]  }
 0x126   : > { %1781 = vmatmul.mubr.bf16.vlgmr.msra.gmra.mrb[8].mxu1 %v1470_v34  ;;  %v5513_v34 = vld [vmem:[%s7306_s1 + $0xbb0] ss:$8 sps:$4 sm:$0xff]  }
 0x127   : > { %2161 = vmatpush1.bf16.msra.mxu1 %v5444_v26  ;;  %2192 = vmatprep.mubr.bf16.mxu1 %v1913_v38  ;;  %v5507_v26 = vld [vmem:[%s7306_s1 + $0xba0] ss:$8 sps:$4 sm:$0xff]  }
 0x128   : > { %3463 = vmatpush1.bf16.msra.mxu0 %v5447_v27  ;;  %2162 = vmatprep.subr.bf16.mxu1 %v5452_v22  ;;  %v5512_v27 = vld [vmem:[%s7306_s1 + $0x6b4] ss:$8 sps:$4 sm:$0xff]   ;;  %v5518_v22 = vld [vmem:[%s7306_s1 + $0x6c4] ss:$8 sps:$4 sm:$0xff]   ;;  %v5519_v38 = vld [vmem:[%s7306_s1 + $0xbc0] ss:$8 sps:$4 sm:$0xff]  }
 0x129   : > { %3464 = vmatprep.subr.bf16.mxu0 %v5455_v36  ;;  %v5521_v36 = vld [vmem:[%s7306_s1 + $0xbc4] ss:$8 sps:$4 sm:$0xff]  }
 0x12b   : > { %2163 = vmatpush1.bf16.msra.mxu1 %v5450_v37  ;;  %v5516_v37 = vld [vmem:[%s7306_s1 + $0x6c0] ss:$8 sps:$4 sm:$0xff]  }
 0x12c   : > { %3465 = vmatpush1.bf16.msra.mxu0 %v5453_v39  ;;  %2164 = vmatprep.subr.bf16.mxu1 %v5458_v41  ;;  %v5524_v39 = vld [vmem:[%s7306_s1 + $0x6d4] ss:$8 sps:$4 sm:$0xff]  }
 0x12d   : > { %3466 = vmatprep.subr.bf16.mxu0 %v5461_v42  ;;  %v5527_v41 = vld [vmem:[%s7306_s1 + $0xbd4] ss:$8 sps:$4 sm:$0xff]   ;;  %v5522_v42 = vld [vmem:[%s7306_s1 + $0x6d0] ss:$8 sps:$4 sm:$0xff]  }
 0x12f   : > { %2165 = vmatpush1.bf16.msra.mxu1 %v5456_v43  ;;  %v5525_v43 = vld [vmem:[%s7306_s1 + $0xbd0] ss:$8 sps:$4 sm:$0xff]  }
 0x130   : > { %3467 = vmatpush1.bf16.msra.mxu0 %v5459_v44  ;;  %2166 = vmatprep.subr.bf16.mxu1 %v5464_v24  ;;  %v5530_v44 = vld [vmem:[%s7306_s1 + $0x6e4] ss:$8 sps:$4 sm:$0xff]  }
 0x131   : > { %3468 = vmatprep.subr.bf16.mxu0 %v5467_v40  ;;  %v5533_v24 = vld [vmem:[%s7306_s1 + $0xbe4] ss:$8 sps:$4 sm:$0xff]  }
 0x133   : > { %2167 = vmatpush1.bf16.msra.mxu1 %v5462_v31  ;;  %v5528_v31 = vld [vmem:[%s7306_s1 + $0x6e0] ss:$8 sps:$4 sm:$0xff]  }
 0x134   : > { %3469 = vmatpush1.bf16.msra.mxu0 %v5465_v4  ;;  %2168 = vmatprep.subr.bf16.mxu1 %v5470_v45  ;;  %v2318_v4 = vshrl.u32 %v6761_v18, 16  ;;  %v2321_v45 = vshll.u32 %v6761_v18, 16  ;;  %v6977_v18 = vcombine.low %v6743_v11, %v6743_v11 }
 0x135   : > { %3470 = vmatprep.subr.bf16.mxu0 %v5473_v46 }
 0x137   : > { %2169 = vmatpush1.bf16.msra.mxu1 %v5468_v47  ;;  %v5531_v47 = vld [vmem:[%s7306_s1 + $0xbe0] ss:$8 sps:$4 sm:$0xff]  }
 0x138   : > { %3471 = vmatpush1.bf16.msra.mxu0 %v5471_v48  ;;  %2170 = vmatprep.subr.bf16.mxu1 %v5476_v49  ;;  %v2326_v48 = vshrl.u32 %v6765_v20, 16  ;;  %v2329_v49 = vshll.u32 %v6765_v20, 16  ;;  %v5536_v20 = vld [vmem:[%s7306_s1 + $0x6f4] ss:$8 sps:$4 sm:$0xff]  }
 0x139   : > { %3472 = vmatprep.subr.bf16.mxu0 %v5479_v50 }
 0x13a   : > { %v6849_v61 = vpop.f32.mrb[8].mxu0  ;;  %v2328_v11 = vrot.slane %v2326_v48, 3  ;;  %v5579_v48 = vld [vmem:[%s7306_s1 + $0xc54] ss:$8 sps:$4 sm:$0xff]  }
 0x13b   : > { %v6851_v54 = vpop.f32.mrb[9].mxu0  ;;  %2171 = vmatpush1.bf16.msra.mxu1 %v5474_v63  ;;  %v6973_v63 = vcombine.low %v6738_v9, %v6757_v29  ;;  %v5539_v9 = vld [vmem:[%s7306_s1 + $0xbf4] ss:$8 sps:$4 sm:$0xff]   ;;  %v2320_v29 = vrot.slane %v2318_v4, 3  ;;  %v5568_v4 = vld [vmem:[%s7306_s1 + $0x7c0] ss:$8 sps:$4 sm:$0xff]  }
 0x13c   : > { %v6853_v55 = vpop.f32.mrb[10].mxu0  ;;  %3473 = vmatpush1.bf16.msra.mxu0 %v5477_v30  ;;  %2172 = vmatprep.subr.bf16.mxu1 %v5482_v60  ;;  %v6980_v30 = vld [vmem:[%s5799_s19 + $0xc] sm:$0xcc]  ;;  %v6983_v60 = vld [vmem:[%s5799_s19 + $0x24] sm:$0x33] }
 0x13d   : > { %v6861_v58 = vpop.f32.mrb[11].mxu0  ;;  %3474 = vmatprep.subr.bf16.mxu0 %v5485_v52 }
 0x13f   : > { %2173 = vmatpush1.bf16.msra.mxu1 %v5480_v56  ;;  %v2323_v56 = vrot.slane %v2321_v45, 4  ;;  %v5571_v45 = vld [vmem:[%s7306_s1 + $0xc40] ss:$8 sps:$4 sm:$0xff]  }
 0x140   : > { %3475 = vmatpush1.bf16.msra.mxu0 %v5483_v57  ;;  %2174 = vmatprep.subr.bf16.mxu1 %v5488_v0  ;;  %v2331_v57 = vrot.slane %v2329_v49, 4  ;;  %v6994_v0 = vld [vmem:[%s5799_s19 + $0x18] sm:$0xff] }
 0x141   : > { %3476 = vmatprep.subr.bf16.mxu0 %v5491_v1  ;;  %v4850_v1 = vcombine.high %v6980_v30, %v6994_v0  ;;  %v5574_v49 = vld [vmem:[%s7306_s1 + $0x7d0] ss:$8 sps:$4 sm:$0xff]  }
 0x143   : > { %2175 = vmatpush1.bf16.msra.mxu1 %v5486_v3  ;;  %v4853_v3 = vcombine.high %v6983_v60, %v6983_v60 }
 0x144   : > { %3477 = vmatpush1.bf16.msra.mxu0 %v5489_v6  ;;  %2176 = vmatprep.subr.bf16.mxu1 %v5494_v7  ;;  %v5534_v6 = vld [vmem:[%s7306_s1 + $0x6f0] ss:$8 sps:$4 sm:$0xff]  }
 0x145   : > { %3489 = vmatprep.subr.bf16.mxu0 %v5497_v8  ;;  %v5537_v7 = vld [vmem:[%s7306_s1 + $0xbf0] ss:$8 sps:$4 sm:$0xff]   ;;  %v1908_v8 = vrot.slane %v6973_v63, 3 }
 0x147   : > { %3479 = vmatmul.mubr.bf16.vlgmr.msra.gmra.mrb[16].mxu0 %v6444_v53  ;;  %2177 = vmatpush1.bf16.msra.mxu1 %v5492_v10  ;;  %v5509_v53 = vld [vmem:[%s7306_s1 + $0xba4] ss:$8 sps:$4 sm:$0xff]   ;;  %v1909_v10 = vrot.slane %v6977_v18, 3 }
 0x148   : > { %3490 = vmatpush1.bf16.msra.mxu0 %v5495_v13  ;;  %2178 = vmatprep.subr.bf16.mxu1 %v5500_v14  ;;  %v5546_v13 = vld [vmem:[%s7306_s1 + $0x784] ss:$8 sps:$4 sm:$0xff]  }
 0x149   : > { %3491 = vmatprep.subr.bf16.mxu0 %v5503_v15  ;;  %3521 = vmatprep.mubr.bf16.mxu0 %v5681_v2  ;;  %v5549_v14 = vld [vmem:[%s7306_s1 + $0xc04] ss:$8 sps:$4 sm:$0xff]   ;;  %v2324_v15 = vor.u32 %v2323_v56, %v2320_v29 }
 0x14a   : > { %v5585_v29 = vld [vmem:[%s7306_s1 + $0xc64] ss:$8 sps:$4 sm:$0xff]  }
 0x14b   : > { %2179 = vmatpush1.bf16.msra.mxu1 %v5498_v21  ;;  %v2332_v21 = vor.u32 %v2331_v57, %v2328_v11 }
 0x14c   : > { %3492 = vmatpush1.bf16.msra.mxu0 %v5501_v51  ;;  %2180 = vmatprep.subr.bf16.mxu1 %v5506_v23  ;;  %v3609_v51 = vrot.slane %v4850_v1, 2  ;;  %v3610_v23 = vrot.slane %v4853_v3, 2 }
 0x14d   : > { %3493 = vmatprep.subr.bf16.mxu0 %v5509_v53  ;;  %v1910_v53 = vsel %vm1907_vm2, %v1908_v8, %v1909_v10  ;;  %v5591_v10 = vld [vmem:[%s7306_s1 + $0xc74] ss:$8 sps:$4 sm:$0xff]  }
 0x14f   : > { %2181 = vmatpush1.bf16.msra.mxu1 %v5504_v25  ;;  %v5544_v25 = vld [vmem:[%s7306_s1 + $0x780] ss:$8 sps:$4 sm:$0xff]  }
 0x150   : > { %3494 = vmatpush1.bf16.msra.mxu0 %v5507_v26  ;;  %2182 = vmatprep.subr.bf16.mxu1 %v5512_v27  ;;  %v5547_v26 = vld [vmem:[%s7306_s1 + $0xc00] ss:$8 sps:$4 sm:$0xff]   ;;  %v5552_v27 = vld [vmem:[%s7306_s1 + $0x794] ss:$8 sps:$4 sm:$0xff]  }
 0x151   : > { %3495 = vmatprep.subr.bf16.mxu0 %v5515_v28  ;;  %v5555_v28 = vld [vmem:[%s7306_s1 + $0xc14] ss:$8 sps:$4 sm:$0xff]  }
 0x153   : > { %2183 = vmatpush1.bf16.msra.mxu1 %v5510_v33  ;;  %v2333_v33 = vsel %vm2299_vm3, %v2324_v15, %v2332_v21  ;;  %v5594_v15 = vld [vmem:[%s7306_s1 + $0x804] ss:$8 sps:$4 sm:$0xff]   ;;  %v5592_v21 = vld [vmem:[%s7306_s1 + $0x800] ss:$8 sps:$4 sm:$0xff]  }
 0x154   : > { %3496 = vmatpush1.bf16.msra.mxu0 %v5513_v34  ;;  %2184 = vmatprep.subr.bf16.mxu1 %v5518_v22  ;;  %v3611_v34 = vsel %vm3605_vm5, %v3609_v51, %v3610_v23  ;;  %v5550_v22 = vld [vmem:[%s7306_s1 + $0x790] ss:$8 sps:$4 sm:$0xff]   ;;  %v5595_v51 = vld [vmem:[%s7306_s1 + $0xc80] ss:$8 sps:$4 sm:$0xff]   ;;  %v5600_v23 = vld [vmem:[%s7306_s1 + $0x814] ss:$8 sps:$4 sm:$0xff]  }
 0x155   : > { %3497 = vmatprep.subr.bf16.mxu0 %v5521_v36  ;;  %v5553_v36 = vld [vmem:[%s7306_s1 + $0xc10] ss:$8 sps:$4 sm:$0xff]  }
 0x157   : > { %2185 = vmatpush1.bf16.msra.mxu1 %v5516_v37  ;;  %v5561_v37 = vld [vmem:[%s7306_s1 + $0xc24] ss:$8 sps:$4 sm:$0xff]  }
 0x158   : > { %3498 = vmatpush1.bf16.msra.mxu0 %v5519_v38  ;;  %2186 = vmatprep.subr.bf16.mxu1 %v5524_v39  ;;  %v5556_v38 = vld [vmem:[%s7306_s1 + $0x7a0] ss:$8 sps:$4 sm:$0xff]  }
 0x159   : > { %3499 = vmatprep.subr.bf16.mxu0 %v5527_v41  ;;  %v5559_v39 = vld [vmem:[%s7306_s1 + $0xc20] ss:$8 sps:$4 sm:$0xff]   ;;  %v5564_v41 = vld [vmem:[%s7306_s1 + $0x7b4] ss:$8 sps:$4 sm:$0xff]  }
 0x15a   : > { %v6955_v40 = vpop.f32.mrb[12].mxu0 }
 0x15b   : > { %v6962_v46 = vpop.f32.mrb[13].mxu0  ;;  %2187 = vmatpush1.bf16.msra.mxu1 %v5522_v42  ;;  %v5567_v42 = vld [vmem:[%s7306_s1 + $0xc34] ss:$8 sps:$4 sm:$0xff]  }
 0x15c   : > { %v6969_v50 = vpop.f32.mrb[14].mxu0  ;;  %3500 = vmatpush1.bf16.msra.mxu0 %v5525_v43  ;;  %2188 = vmatprep.subr.bf16.mxu1 %v5530_v44  ;;  %v5562_v43 = vld [vmem:[%s7306_s1 + $0x7b0] ss:$8 sps:$4 sm:$0xff]  }
 0x15d   : > { %v6985_v52 = vpop.f32.mrb[15].mxu0  ;;  %3501 = vmatprep.subr.bf16.mxu0 %v5533_v24  ;;  %v5565_v44 = vld [vmem:[%s7306_s1 + $0xc30] ss:$8 sps:$4 sm:$0xff]   ;;  %v5570_v24 = vld [vmem:[%s7306_s1 + $0x7c4] ss:$8 sps:$4 sm:$0xff]  }
 0x15f   : > { %2189 = vmatpush1.bf16.msra.mxu1 %v5528_v31  ;;  %v5573_v31 = vld [vmem:[%s7306_s1 + $0xc44] ss:$8 sps:$4 sm:$0xff]  }
 0x160   : > { %3502 = vmatpush1.bf16.msra.mxu0 %v5531_v47  ;;  %2190 = vmatprep.subr.bf16.mxu1 %v5536_v20  ;;  %v5576_v47 = vld [vmem:[%s7306_s1 + $0x7d4] ss:$8 sps:$4 sm:$0xff]   ;;  %v5577_v20 = vld [vmem:[%s7306_s1 + $0xc50] ss:$8 sps:$4 sm:$0xff]  }
 0x161   : > { %3503 = vmatprep.subr.bf16.mxu0 %v5539_v9  ;;  %v5582_v9 = vld [vmem:[%s7306_s1 + $0x7e4] ss:$8 sps:$4 sm:$0xff]  }
 0x163   : > { %2191 = vmatpush1.bf16.msra.mxu1 %v5534_v6  ;;  %v5580_v6 = vld [vmem:[%s7306_s1 + $0x7e0] ss:$8 sps:$4 sm:$0xff]  }
 0x164   : > { %3504 = vmatpush1.bf16.msra.mxu0 %v5537_v7  ;;  %2594 = vmatprep.subr.bf16.mxu1 %v5546_v13  ;;  %v5583_v7 = vld [vmem:[%s7306_s1 + $0xc60] ss:$8 sps:$4 sm:$0xff]  }
 0x165   : > { %3858 = vmatprep.subr.bf16.mxu0 %v5549_v14  ;;  %v5589_v14 = vld [vmem:[%s7306_s1 + $0xc70] ss:$8 sps:$4 sm:$0xff]  }
 0x166   : > { %2193 = vmatmul.mubr.bf16.vlgmr.msra.gmra.mrb[12].mxu1 %v1910_v53  ;;  %v5603_v53 = vld [vmem:[%s7306_s1 + $0xc94] ss:$8 sps:$4 sm:$0xff]  }
 0x167   : > { %3522 = vmatmul.mubr.bf16.vlgmr.msra.gmra.mrb[16].mxu0 %v6562_v59  ;;  %2595 = vmatpush1.bf16.msra.mxu1 %v5544_v25  ;;  %v5558_v59 = vld [vmem:[%s7306_s1 + $0x7a4] ss:$8 sps:$4 sm:$0xff]   ;;  %v5598_v25 = vld [vmem:[%s7306_s1 + $0x810] ss:$8 sps:$4 sm:$0xff]  }
 0x168   : > { %3859 = vmatpush1.bf16.msra.mxu0 %v5547_v26  ;;  %2596 = vmatprep.subr.bf16.mxu1 %v5552_v27  ;;  %v5601_v26 = vld [vmem:[%s7306_s1 + $0xc90] ss:$8 sps:$4 sm:$0xff]   ;;  %v5606_v27 = vld [vmem:[%s7306_s1 + $0x824] ss:$8 sps:$4 sm:$0xff]  }
 0x169   : > { %3860 = vmatprep.subr.bf16.mxu0 %v5555_v28  ;;  %2626 = vmatprep.mubr.bf16.mxu1 %v2333_v33  ;;  %v5609_v28 = vld [vmem:[%s7306_s1 + $0xca4] ss:$8 sps:$4 sm:$0xff]   ;;  %v5604_v33 = vld [vmem:[%s7306_s1 + $0x820] ss:$8 sps:$4 sm:$0xff]  }
 0x16a   : > { %3890 = vmatprep.mubr.bf16.mxu0 %v3611_v34  ;;  %v5607_v34 = vld [vmem:[%s7306_s1 + $0xca0] ss:$8 sps:$4 sm:$0xff]  }
 0x16b   : > { %2597 = vmatpush1.bf16.msra.mxu1 %v5550_v22  ;;  %v5612_v22 = vld [vmem:[%s7306_s1 + $0x834] ss:$8 sps:$4 sm:$0xff]  }
 0x16c   : > { %3861 = vmatpush1.bf16.msra.mxu0 %v5553_v36  ;;  %2598 = vmatprep.subr.bf16.mxu1 %v5558_v59  ;;  %v5615_v36 = vld [vmem:[%s7306_s1 + $0xcb4] ss:$8 sps:$4 sm:$0xff]   ;;  %v5610_v59 = vld [vmem:[%s7306_s1 + $0x830] ss:$8 sps:$4 sm:$0xff]  }
 0x16d   : > { %3862 = vmatprep.subr.bf16.mxu0 %v5561_v37  ;;  %v5613_v37 = vld [vmem:[%s7306_s1 + $0xcb0] ss:$8 sps:$4 sm:$0xff]  }
 0x16f   : > { %2599 = vmatpush1.bf16.msra.mxu1 %v5556_v38  ;;  %v5618_v38 = vld [vmem:[%s7306_s1 + $0x844] ss:$8 sps:$4 sm:$0xff]  }
 0x170   : > { %3863 = vmatpush1.bf16.msra.mxu0 %v5559_v39  ;;  %2600 = vmatprep.subr.bf16.mxu1 %v5564_v41  ;;  %v5621_v39 = vld [vmem:[%s7306_s1 + $0xcc4] ss:$8 sps:$4 sm:$0xff]   ;;  %v5616_v41 = vld [vmem:[%s7306_s1 + $0x840] ss:$8 sps:$4 sm:$0xff]  }
 0x171   : > { %3864 = vmatprep.subr.bf16.mxu0 %v5567_v42  ;;  %v5619_v42 = vld [vmem:[%s7306_s1 + $0xcc0] ss:$8 sps:$4 sm:$0xff]  }
 0x173   : > { %2601 = vmatpush1.bf16.msra.mxu1 %v5562_v43  ;;  %v5624_v43 = vld [vmem:[%s7306_s1 + $0x854] ss:$8 sps:$4 sm:$0xff]  }
 0x174   : > { %3865 = vmatpush1.bf16.msra.mxu0 %v5565_v44  ;;  %2602 = vmatprep.subr.bf16.mxu1 %v5570_v24  ;;  %v5627_v44 = vld [vmem:[%s7306_s1 + $0xcd4] ss:$8 sps:$4 sm:$0xff]   ;;  %v2301_v24 = vshrl.u32 %v6973_v63, 16 }
 0x175   : > { %3866 = vmatprep.subr.bf16.mxu0 %v5573_v31  ;;  %v2304_v31 = vshll.u32 %v6973_v63, 16  ;;  %v5630_v63 = vld [vmem:[%s7306_s1 + $0x864] ss:$8 sps:$4 sm:$0xff]  }
 0x177   : > { %2603 = vmatpush1.bf16.msra.mxu1 %v5568_v4  ;;  %v5622_v4 = vld [vmem:[%s7306_s1 + $0x850] ss:$8 sps:$4 sm:$0xff]  }
 0x178   : > { %3867 = vmatpush1.bf16.msra.mxu0 %v5571_v45  ;;  %2604 = vmatprep.subr.bf16.mxu1 %v5576_v47  ;;  %v5625_v45 = vld [vmem:[%s7306_s1 + $0xcd0] ss:$8 sps:$4 sm:$0xff]   ;;  %v2309_v47 = vshrl.u32 %v6977_v18, 16 }
 0x179   : > { %3868 = vmatprep.subr.bf16.mxu0 %v5579_v48  ;;  %v913_v56 = vpop.f32.mrb[0].mxu1  ;;  %v2312_v48 = vshll.u32 %v6977_v18, 16  ;;  %v5631_v18 = vld [vmem:[%s7306_s1 + $0xce0] ss:$8 sps:$4 sm:$0xff]  }
 0x17a   : > { %v7091_v11 = vadd.f32 %v6612_v16, %v913_v56  ;;  %v915_v57 = vpop.f32.mrb[1].mxu1  ;;  %v2311_v56 = vrot.slane %v2309_v47, 3 }
 0x17b   : > { %v7094_v1 = vadd.f32 %v6614_v17, %v915_v57  ;;  %v917_v3 = vpop.f32.mrb[2].mxu1  ;;  %2605 = vmatpush1.bf16.msra.mxu1 %v5574_v49  ;;  %v5588_v17 = vld [vmem:[%s7306_s1 + $0x7f4] ss:$8 sps:$4 sm:$0xff]   ;;  %v5633_v49 = vld [vmem:[%s7306_s1 + $0xce4] ss:$8 sps:$4 sm:$0xff]   ;;  %v2314_v57 = vrot.slane %v2312_v48, 4 }
 0x17c   : > { %3869 = vmatpush1.bf16.msra.mxu0 %v5577_v20  ;;  %v7103_v8 = vadd.f32 %v6619_v32, %v917_v3  ;;  %v919_v16 = vpop.f32.mrb[3].mxu1  ;;  %2606 = vmatprep.subr.bf16.mxu1 %v5582_v9  ;;  %v5586_v32 = vld [vmem:[%s7306_s1 + $0x7f0] ss:$8 sps:$4 sm:$0xff]   ;;  %v2303_v20 = vrot.slane %v2301_v24, 3  ;;  %v2306_v9 = vrot.slane %v2304_v31, 4  ;;  %v4849_v3 = vcombine.low %v6980_v30, %v6994_v0 }
 0x17d   : > { %3870 = vmatprep.subr.bf16.mxu0 %v5585_v29  ;;  %v7112_v13 = vadd.f32 %v6624_v19, %v919_v16  ;;  %v5597_v19 = vld [vmem:[%s7306_s1 + $0xc84] ss:$8 sps:$4 sm:$0xff]   ;;  %v5628_v29 = vld [vmem:[%s7306_s1 + $0x860] ss:$8 sps:$4 sm:$0xff]   ;;  %v5639_v16 = vld [vmem:[%s7306_s1 + $0xcf4] ss:$8 sps:$4 sm:$0xff]   ;;  %v2315_v0 = vor.u32 %v2314_v57, %v2311_v56 }
 0x17e   : > { %v5637_v30 = vld [vmem:[%s7306_s1 + $0xcf0] ss:$8 sps:$4 sm:$0xff]   ;;  %v5669_v24 = vld [vmem:[%s5799_s19 + $0x2c] ss:$0 sps:$4 sm:$0x33]  }
 0x17f   : > { %2607 = vmatpush1.bf16.msra.mxu1 %v5580_v6  ;;  %v4852_v6 = vcombine.low %v6983_v60, %v6983_v60  ;;  %v2307_v60 = vor.u32 %v2306_v9, %v2303_v20 }
 0x180   : > { %3871 = vmatpush1.bf16.msra.mxu0 %v5583_v7  ;;  %2608 = vmatprep.subr.bf16.mxu1 %v5588_v17  ;;  %v5636_v7 = vld [vmem:[%s7306_s1 + $0x874] ss:$8 sps:$4 sm:$0xff]   ;;  %v5634_v17 = vld [vmem:[%s7306_s1 + $0x870] ss:$8 sps:$4 sm:$0xff]  }
 0x181   : > { %3872 = vmatprep.subr.bf16.mxu0 %v5591_v10  ;;  %v3606_v10 = vrot.slane %v4849_v3, 2 }
 0x183   : > { %2609 = vmatpush1.bf16.msra.mxu1 %v5586_v32  ;;  %v3607_v32 = vrot.slane %v4852_v6, 2 }
 0x184   : > { %3873 = vmatpush1.bf16.msra.mxu0 %v5589_v14  ;;  %2610 = vmatprep.subr.bf16.mxu1 %v5594_v15  ;;  %v5644_v14 = vld [vmem:[%s7306_s1 + $0xd04] ss:$8 sps:$4 sm:$0xff]   ;;  %v2316_v15 = vsel %vm2299_vm3, %v2307_v60, %v2315_v0 }
 0x185   : > { %3874 = vmatprep.subr.bf16.mxu0 %v5597_v19  ;;  %v5642_v19 = vld [vmem:[%s7306_s1 + $0xd00] ss:$8 sps:$4 sm:$0xff]  }
 0x187   : > { %2611 = vmatpush1.bf16.msra.mxu1 %v5592_v21  ;;  %v3608_v21 = vsel %vm3605_vm5, %v3606_v10, %v3607_v32 }
 0x188   : > { %3875 = vmatpush1.bf16.msra.mxu0 %v5595_v51  ;;  %2612 = vmatprep.subr.bf16.mxu1 %v5600_v23  ;;  %v5649_v51 = vld [vmem:[%s7306_s1 + $0xd14] ss:$8 sps:$4 sm:$0xff]   ;;  %v5647_v23 = vld [vmem:[%s7306_s1 + $0xd10] ss:$8 sps:$4 sm:$0xff]  }
 0x189   : > { %3876 = vmatprep.subr.bf16.mxu0 %v5603_v53  ;;  %v5652_v53 = vld [vmem:[%s7306_s1 + $0xd24] ss:$8 sps:$4 sm:$0xff]  }
 0x18b   : > { %2613 = vmatpush1.bf16.msra.mxu1 %v5598_v25  ;;  %v5650_v25 = vld [vmem:[%s7306_s1 + $0xd20] ss:$8 sps:$4 sm:$0xff]  }
 0x18c   : > { %3877 = vmatpush1.bf16.msra.mxu0 %v5601_v26  ;;  %2614 = vmatprep.subr.bf16.mxu1 %v5606_v27  ;;  %v5655_v26 = vld [vmem:[%s7306_s1 + $0xd34] ss:$8 sps:$4 sm:$0xff]   ;;  %v5658_v27 = vld [vmem:[%s7306_s1 + $0xd44] ss:$8 sps:$4 sm:$0xff]  }
 0x18d   : > { %3878 = vmatprep.subr.bf16.mxu0 %v5609_v28  ;;  %v5656_v28 = vld [vmem:[%s7306_s1 + $0xd40] ss:$8 sps:$4 sm:$0xff]  }
 0x18f   : > { %2615 = vmatpush1.bf16.msra.mxu1 %v5604_v33  ;;  %v5661_v33 = vld [vmem:[%s7306_s1 + $0xd54] ss:$8 sps:$4 sm:$0xff]  }
 0x190   : > { %3879 = vmatpush1.bf16.msra.mxu0 %v5607_v34  ;;  %2616 = vmatprep.subr.bf16.mxu1 %v5612_v22  ;;  %v5659_v34 = vld [vmem:[%s7306_s1 + $0xd50] ss:$8 sps:$4 sm:$0xff]   ;;  %v5664_v22 = vld [vmem:[%s7306_s1 + $0xd64] ss:$8 sps:$4 sm:$0xff]  }
 0x191   : > { %3880 = vmatprep.subr.bf16.mxu0 %v5615_v36  ;;  %v3537_v36 = vld [vmem:[%s5799_s19 + $0x14] sm:$0xc] }
 0x193   : > { %2617 = vmatpush1.bf16.msra.mxu1 %v5610_v59 }
 0x194   : > { %3881 = vmatpush1.bf16.msra.mxu0 %v5613_v37  ;;  %2618 = vmatprep.subr.bf16.mxu1 %v5618_v38 }
 0x195   : > { %3882 = vmatprep.subr.bf16.mxu0 %v5621_v39 }
 0x197   : > { %2619 = vmatpush1.bf16.msra.mxu1 %v5616_v41 }
 0x198   : > { %3883 = vmatpush1.bf16.msra.mxu0 %v5619_v42  ;;  %2620 = vmatprep.subr.bf16.mxu1 %v5624_v43  ;;  %v5662_v42 = vld [vmem:[%s7306_s1 + $0xd60] ss:$8 sps:$4 sm:$0xff]  }
 0x199   : > { %3884 = vmatprep.subr.bf16.mxu0 %v5627_v44  ;;  %v5672_v43 = vld [vmem:[%s5799_s19 + $0x20] sm:$0xf] }
 0x19a   : > { %v4851_v44 = vcombine.low %v3537_v36, %v5672_v43 }
 0x19b   : > { %2621 = vmatpush1.bf16.msra.mxu1 %v5622_v4 }
 0x19c   : > { %3885 = vmatpush1.bf16.msra.mxu0 %v5625_v45  ;;  %2622 = vmatprep.subr.bf16.mxu1 %v5630_v63  ;;  %v5665_v63 = vld [vmem:[%s7306_s1 + $0xd70] ss:$8 sps:$4 sm:$0xff]  }
 0x19d   : > { %3886 = vmatprep.subr.bf16.mxu0 %v5633_v49  ;;  %v3613_v49 = vrot.slane %v5669_v24, 2 }
 0x19f   : > { %2623 = vmatpush1.bf16.msra.mxu1 %v5628_v29 }
 0x1a0   : > { %3887 = vmatpush1.bf16.msra.mxu0 %v5631_v18  ;;  %2624 = vmatprep.subr.bf16.mxu1 %v5636_v7 }
 0x1a1   : > { %3888 = vmatprep.subr.bf16.mxu0 %v5639_v16 }
 0x1a3   : > { %2625 = vmatpush1.bf16.msra.mxu1 %v5634_v17 }
 0x1a4   : > { %3889 = vmatpush1.bf16.msra.mxu0 %v5637_v30 }
 0x1a5   : > { %3901 = vmatprep.subr.bf16.mxu0 %v5644_v14 }
 0x1a6   : > { %2627 = vmatmul.mubr.bf16.vlgmr.msra.gmra.mrb[16].mxu1 %v2316_v15 }
 0x1a7   : > { %3891 = vmatmul.mubr.bf16.vlgmr.msra.gmra.mrb[16].mxu0 %v3608_v21 }
 0x1a8   : > { %3902 = vmatpush1.bf16.msra.mxu0 %v5642_v19  ;;  %3933 = vmatprep.mubr.bf16.mxu0 %v5681_v2  ;;  %v5653_v2 = vld [vmem:[%s7306_s1 + $0xd30] ss:$8 sps:$4 sm:$0xff]  }
 0x1a9   : > { %3903 = vmatprep.subr.bf16.mxu0 %v5649_v51 }
 0x1ac   : > { %3904 = vmatpush1.bf16.msra.mxu0 %v5647_v23 }
 0x1ad   : > { %3905 = vmatprep.subr.bf16.mxu0 %v5652_v53 }
 0x1b0   : > { %3906 = vmatpush1.bf16.msra.mxu0 %v5650_v25 }
 0x1b1   : > { %3907 = vmatprep.subr.bf16.mxu0 %v5655_v26 }
 0x1b4   : > { %3908 = vmatpush1.bf16.msra.mxu0 %v5653_v2  ;;  %v3950_v2 = vlaneseq }
 0x1b5   : > { %3909 = vmatprep.subr.bf16.mxu0 %v5658_v27 }
 0x1b6   : > { %v3951_v27 = vshrl.u32 %v3950_v2, 7 }
 0x1b8   : > { %3910 = vmatpush1.bf16.msra.mxu0 %v5656_v28  ;;  %v3952_v28 = vsub.s32 0, %v3951_v27 }
 0x1b9   : > { %3911 = vmatprep.subr.bf16.mxu0 %v5661_v33  ;;  %v1328_v59 = vpop.f32.mrb[4].mxu1 }
 0x1ba   : > { %v4911_v37 = vadd.f32 %v7091_v11, %v1328_v59  ;;  %v1330_v38 = vpop.f32.mrb[5].mxu1  ;;  %v5667_v11 = vld [vmem:[%s7306_s1 + $0xd74] ss:$8 sps:$4 sm:$0xff]  }
 0x1bb   : > { %v4920_v39 = vadd.f32 %v7094_v1, %v1330_v38  ;;  %v1332_v41 = vpop.f32.mrb[6].mxu1 }
 0x1bc   : > { %3912 = vmatpush1.bf16.msra.mxu0 %v5659_v34  ;;  %v4929_v31 = vadd.f32 %v7103_v8, %v1332_v41  ;;  %v1334_v4 = vpop.f32.mrb[7].mxu1  ;;  %v4912_v45 = vadd.f32 %v4911_v37, %v6724_v62  ;;  %v3612_v8 = vrot.slane %v4851_v44, 2 }
 0x1bd   : > { %3913 = vmatprep.subr.bf16.mxu0 %v5664_v22  ;;  %v4938_v1 = vadd.f32 %v7112_v13, %v1334_v4  ;;  %v4921_v47 = vadd.f32 %v4920_v39, %v6732_v5 }
 0x1be   : > { %v4930_v48 = vadd.f32 %v4929_v31, %v6740_v35  ;;  %v3614_v9 = vsel %vm3605_vm5, %v3612_v8, %v3613_v49 }
 0x1bf   : > { %v4939_v20 = vadd.f32 %v4938_v1, %v6745_v12  ;;  %v3988_v1 = vld [vmem:[%s170_s20 + $0x8] sm:$0xff] }
 0x1c0   : > { %3914 = vmatpush1.bf16.msra.mxu0 %v5662_v42 }
 0x1c1   : > { %3915 = vmatprep.subr.bf16.mxu0 %v5667_v11 }
 0x1c4   : > { %3916 = vmatpush1.bf16.msra.mxu0 %v5665_v63 }
 0x1c7   : > { %3934 = vmatmul.mubr.bf16.vlgmr.msra.gmra.mrb[16].mxu0 %v3614_v9 }
 0x1f9   : > { %v1782_v62 = vpop.f32.mrb[8].mxu1 }
 0x1fa   : > { %v4913_v13 = vadd.f32 %v4912_v45, %v1782_v62  ;;  %v1784_v29 = vpop.f32.mrb[9].mxu1 }
 0x1fb   : > { %v4922_v5 = vadd.f32 %v4921_v47, %v1784_v29  ;;  %v1786_v18 = vpop.f32.mrb[10].mxu1 }
 0x1fc   : > { %v4931_v35 = vadd.f32 %v4930_v48, %v1786_v18  ;;  %v1788_v56 = vpop.f32.mrb[11].mxu1  ;;  %v4914_v57 = vadd.f32 %v4913_v13, %v6849_v61 }
 0x1fd   : > { %v4940_v3 = vadd.f32 %v4939_v20, %v1788_v56  ;;  %v4923_v6 = vadd.f32 %v4922_v5, %v6851_v54 }
 0x1fe   : > { %v4932_v7 = vadd.f32 %v4931_v35, %v6853_v55 }
 0x1ff   : > { %v4941_v12 = vadd.f32 %v4940_v3, %v6861_v58 }
 0x239   : > { %v2194_v16 = vpop.f32.mrb[12].mxu1 }
 0x23a   : > { %v4915_v17 = vadd.f32 %v4914_v57, %v2194_v16  ;;  %v2196_v30 = vpop.f32.mrb[13].mxu1 }
 0x23b   : > { %v4924_v60 = vadd.f32 %v4923_v6, %v2196_v30  ;;  %v2198_v0 = vpop.f32.mrb[14].mxu1 }
 0x23c   : > { %v4933_v10 = vadd.f32 %v4932_v7, %v2198_v0  ;;  %v2200_v32 = vpop.f32.mrb[15].mxu1  ;;  %v4916_v14 = vadd.f32 %v4915_v17, %v6955_v40  ;;  %v3948_v40 = vld [vmem:[%s7307_s2] sm:$0x3] }
 0x23d   : > { %v4942_v15 = vadd.f32 %v4941_v12, %v2200_v32  ;;  %v4925_v19 = vadd.f32 %v4924_v60, %v6962_v46  ;;  %v3956_v46 = vsub.s32 1, %v3951_v27 }
 0x23e   : > { %v4934_v61 = vadd.f32 %v4933_v10, %v6969_v50  ;;  %v3953_v50 = vrot.slane %v3948_v40, %v3952_v28 }
 0x23f   : > { %v4943_v54 = vadd.f32 %v4942_v15, %v6985_v52  ;;  %v3957_v52 = vrot.slane %v3948_v40, %v3956_v46 }
 0x279   : > { %v2628_v21 = vpop.f32.mrb[16].mxu1 }
 0x27a   : > { %v4917_v55 = vadd.f32 %v4916_v14, %v2628_v21  ;;  %v2630_v51 = vpop.f32.mrb[17].mxu1 }
 0x27b   : > { %v4926_v58 = vadd.f32 %v4925_v19, %v2630_v51  ;;  %v2632_v23 = vpop.f32.mrb[18].mxu1 }
 0x27c   : > { %v4935_v53 = vadd.f32 %v4934_v61, %v2632_v23  ;;  %v2634_v25 = vpop.f32.mrb[19].mxu1 }
 0x27d   : > { %v4944_v26 = vadd.f32 %v4943_v54, %v2634_v25 }
 0x29a   : > { %v3935_v33 = vpop.f32.mrb[16].mxu0 }
 0x29b   : > { %v4918_v34 = vadd.f32 %v4917_v55, %v3935_v33  ;;  %v3937_v22 = vpop.f32.mrb[17].mxu0 }
 0x29c   : > { %v4927_v36 = vadd.f32 %v4926_v58, %v3937_v22  ;;  %v3939_v59 = vpop.f32.mrb[18].mxu0 }
 0x29d   : > { %v3960_v37 = vadd.f32 %v4918_v34, %v3953_v50  ;;  %v4936_v38 = vadd.f32 %v4935_v53, %v3939_v59  ;;  %v3941_v39 = vpop.f32.mrb[19].mxu0 }
 0x29e   : > { %v3961_v41 = vadd.f32 %v4927_v36, %v3957_v52  ;;  %v4945_v42 = vadd.f32 %v4944_v26, %v3941_v39 }
 0x29f   : > { %v3964_v43 = vmax.f32 %v3960_v37, 0.0  ;;  %v3962_v44 = vadd.f32 %v4936_v38, %v3953_v50 }
 0x2a0   : > { %v3965_v24 = vmax.f32 %v3961_v41, 0.0  ;;  %v3963_v31 = vadd.f32 %v4945_v42, %v3957_v52 }
 0x2a1   : > { %v3966_v4 = vmax.f32 %v3962_v44, 0.0 }
 0x2a2   : > { %v4908_v11 = vpack.c.bf16 %v3965_v24, %v3964_v43  ;;  %v3967_v45 = vmax.f32 %v3963_v31, 0.0 }
 0x2a4   : > { %3980 = vst [vmem:[%s170_s20] sm:$0xff] %v4908_v11  ;;  %v4909_v47 = vpack.c.bf16 %v3967_v45, %v3966_v4 }
 0x2a6   : > { %v3989_v48 = vsel %vm3987_vm12, %v4909_v47, %v3988_v1 }
 0x2a7   : > { %3990 = vst [vmem:[%s170_s20 + $0x8] sm:$0xff] %v3989_v48 }
 0x2a8 PF: > { %s13_s12 = sadd.s32 1, %s5679_s12  }
 0x2a9   : > { %p10_p4 = scmp.ge.s32.totalorder %s13_s12, 4  }
 0x2ab   :  { %12 = sbr.rel (!%p10_p4) target bundleno = 1 (0x1), region = 70 }

// kernel: alexnet_features.15
= control target key start
LH: loop header
LB: loop body
LE: loop exit
PB: predicated region body
PF: predicated region fallthrough
CT: control target
= control target key end

     0   :  { %s431_s15 = smov 0   ;;  %s457_s0 = inlined_call_operand.vmem [shape: bf16[2,2,2,256], index: 0, kind: input, shape index: {}]   ;;  %s458_s1 = inlined_call_operand.vmem [shape: bf16[2,2,1,256], index: 1, kind: input, shape index: {}]   ;;  %s459_s2 = inlined_call_operand.vmem [shape: bf16[2,1,2,256], index: 2, kind: input, shape index: {}]   ;;  %s460_s3 = inlined_call_operand.vmem [shape: bf16[2,1,1,256], index: 3, kind: input, shape index: {}]   ;;  %s461_s4 = inlined_call_operand.vmem [shape: bf16[2,1,1,256], index: 4, kind: output, shape index: {}]  }
   0x1 LB: > { %s375_s16 = sadd.s32 4294967295, %s404_s15   ;;  %p379_p0 = scmp.ge.s32.totalorder %s404_s15, 1  ;;  %s404_s15 = sphi %s431_s15, %s14_s15  }
   0x2   : > { %p188_p1 = scmp.lt.s32.totalorder %s404_s15, 3 }
   0x4   : > { %p189_p2 = pnand %p379_p0, %p188_p1 }
   0x5   : > { %p224_p3 = scmp.lt.s32.totalorder (!%p189_p2), %s375_s16, 1  ;;  %vm276_vm0 = vcmask (!%p189_p2), 1040384   ;;  %vm277_vm1 = vsmask.f32 (!%p189_p2), 256  ;;  %vm279_vm2 = vcmask (!%p189_p2), 1041409  }
   0x6   : > { %192 = sbr.rel (%p189_p2) target bundleno = 31 (0x1f), region = 36  ;;  %vm280_vm3 = vsmask.f32 (!%p189_p2), 1280  ;;  %vm278_vm4 = vmand (!%p189_p2), %vm276_vm0, %vm277_vm1 }
   0x7   : > { %vm281_vm5 = vmand (!%p189_p2), %vm279_vm2, %vm280_vm3 }
   0x8   : > { %vm282_vm6 = vmor (!%p189_p2), %vm281_vm5, %vm278_vm4 }
   0xd   : > { %s463_s16 = smov (!%p224_p3, %s375_s16), 1 }
   0xe   : > { %s380_s17 = sshll.u32 %s463_s16, 2  ;;  %s382_s18 = sshll.u32 %s463_s16, 1 }
   0xf   : > { %s227_s21 = scalar_lea.vmem %s457_s0, %s380_s17  ;;  %s231_s24 = scalar_lea.vmem %s458_s1, %s380_s17 }
  0x10   : > { %s235_s27 = scalar_lea.vmem %s459_s2, %s382_s18  ;;  %v244_v0 = vld [vmem:[%s227_s21] sm:$0x3]  ;;  %v245_v1 = vld [vmem:[%s227_s21 + $0x2] sm:$0x3]  ;;  %s239_s30 = scalar_lea.vmem %s460_s3, %s382_s18 }
  0x11   : > { %v246_v2 = vld [vmem:[%s231_s24] sm:$0x3]  ;;  %v247_v3 = vld [vmem:[%s231_s24 + $0x2] sm:$0x3]  ;;  %v251_v5 = vshrl.u32 %v244_v0, 16  ;;  %v258_v6 = vshrl.u32 %v245_v1, 16  ;;  %s243_s7 = scalar_lea.vmem %s461_s4, %s382_s18 }
  0x12   : > { %v248_v4 = vld [vmem:[%s235_s27] sm:$0x3]  ;;  %v265_v10 = vmax.bf16 %v247_v3, %v246_v2 }
  0x13   : > { %v268_v7 = vshrl.u32 %v248_v4, 16  ;;  %v256_v8 = vmax.bf16 %v251_v5, %v244_v0  ;;  %v263_v9 = vmax.bf16 %v258_v6, %v245_v1  ;;  %v249_v14 = vld [vmem:[%s239_s30] sm:$0x3] }
  0x14   : > { %v283_v16 = vld [vmem:[%s243_s7] sm:$0x3] }
  0x15   : > { %v264_v11 = vmax.bf16 %v263_v9, %v256_v8  ;;  %v273_v12 = vmax.bf16 %v268_v7, %v248_v4 }
  0x17   : > { %v266_v13 = vmax.bf16 %v265_v10, %v264_v11 }
  0x19   : > { %v274_v15 = vmax.bf16 %v273_v12, %v266_v13 }
  0x1b   : > { %v275_v17 = vmax.bf16 %v274_v15, %v249_v14 }
  0x1d   : > { %v284_v18 = vsel %vm282_vm6, %v275_v17, %v283_v16 }
  0x1e   : > { %285 = vst [vmem:[%s243_s7] sm:$0x3] %v284_v18 }
  0x1f PF: > { %s14_s15 = sadd.s32 1, %s404_s15  }
  0x20   : > { %p11_p4 = scmp.ge.s32.totalorder %s14_s15, 4  }
  0x22   :  { %13 = sbr.rel (!%p11_p4) target bundleno = 1 (0x1), region = 75 }

// kernel: alexnet_features.14
= control target key start
LH: loop header
LB: loop body
LE: loop exit
PB: predicated region body
PF: predicated region fallthrough
CT: control target
= control target key end

     0   :  { %s3768_s12 = smov 0   ;;  %s4788_s0 = inlined_call_operand.vmem [shape: bf16[2,30,256], index: 0, kind: input, shape index: {}]   ;;  %s4789_s1 = inlined_call_operand.vmem [shape: bf16[9,256,256], index: 1, kind: input, shape index: {}]   ;;  %s4790_s2 = inlined_call_operand.vmem [shape: f32[1,256], index: 2, kind: input, shape index: {}]   ;;  %s4791_s3 = inlined_call_operand.vmem [shape: bf16[2,15,256], index: 3, kind: output, shape index: {}]  }
   0x1 LB: > { %s2662_s13 = sadd.s32 4294967295, %s3746_s12   ;;  %p2666_p0 = scmp.ge.s32.totalorder %s3746_s12, 1  ;;  %s3746_s12 = sphi %s3768_s12, %s13_s12  }
   0x2   : > { %p137_p1 = scmp.lt.s32.totalorder %s3746_s12, 3 }
   0x4   : > { %p138_p2 = pnand %p2666_p0, %p137_p1 }
   0x5   : > { %v3285_v0 = vld [vmem:[%s4789_s1 + $0x104] ss:$8 sps:$4 sm:$0xff] (!%p138_p2)   ;;  %v3289_v2 = vld [vmem:[%s4789_s1 + $0x100] ss:$8 sps:$4 sm:$0xff] (!%p138_p2)   ;;  %v3291_v4 = vld [vmem:[%s4789_s1 + $0x114] ss:$8 sps:$4 sm:$0xff] (!%p138_p2)  }
   0x6   : > { %141 = sbr.rel (%p138_p2) target bundleno = 552 (0x228), region = 32  ;;  %v3287_v1 = vld [vmem:[%s4789_s1 + $0x404] ss:$8 sps:$4 sm:$0xff] (!%p138_p2)   ;;  %422 = vmatprep.subr.bf16.mxu1 (!%p138_p2), %v3285_v0  ;;  %v3290_v3 = vld [vmem:[%s4789_s1 + $0x400] ss:$8 sps:$4 sm:$0xff] (!%p138_p2)   ;;  %p161_p3 = scmp.lt.s32.totalorder (!%p138_p2), %s2662_s13, 1 }
   0x7   : > { %1438 = vmatprep.subr.bf16.mxu0 (!%p138_p2), %v3287_v1  ;;  %423 = vmatpush1.bf16.msra.mxu1 (!%p138_p2), %v3289_v2  ;;  %v3293_v5 = vld [vmem:[%s4789_s1 + $0x414] ss:$8 sps:$4 sm:$0xff] (!%p138_p2)   ;;  %v3295_v6 = vld [vmem:[%s4789_s1 + $0x110] ss:$8 sps:$4 sm:$0xff] (!%p138_p2)   ;;  %v3297_v8 = vld [vmem:[%s4789_s1 + $0x124] ss:$8 sps:$4 sm:$0xff] (!%p138_p2)  }
   0x8   : > { %1439 = vmatpush1.bf16.msra.mxu0 (!%p138_p2), %v3290_v3  ;;  %424 = vmatprep.subr.bf16.mxu1 (!%p138_p2), %v3291_v4  ;;  %v3296_v7 = vld [vmem:[%s4789_s1 + $0x410] ss:$8 sps:$4 sm:$0xff] (!%p138_p2)   ;;  %v3299_v9 = vld [vmem:[%s4789_s1 + $0x424] ss:$8 sps:$4 sm:$0xff] (!%p138_p2)   ;;  %v3301_v10 = vld [vmem:[%s4789_s1 + $0x120] ss:$8 sps:$4 sm:$0xff] (!%p138_p2)  }
   0x9   : > { %1440 = vmatprep.subr.bf16.mxu0 (!%p138_p2), %v3293_v5  ;;  %v3302_v11 = vld [vmem:[%s4789_s1 + $0x420] ss:$8 sps:$4 sm:$0xff] (!%p138_p2)   ;;  %v3303_v12 = vld [vmem:[%s4789_s1 + $0x134] ss:$8 sps:$4 sm:$0xff] (!%p138_p2)   ;;  %v3307_v14 = vld [vmem:[%s4789_s1 + $0x130] ss:$8 sps:$4 sm:$0xff] (!%p138_p2)  }
   0xa   : > { %v3305_v13 = vld [vmem:[%s4789_s1 + $0x434] ss:$8 sps:$4 sm:$0xff] (!%p138_p2)   ;;  %v3308_v15 = vld [vmem:[%s4789_s1 + $0x430] ss:$8 sps:$4 sm:$0xff] (!%p138_p2)   ;;  %v3309_v16 = vld [vmem:[%s4789_s1 + $0x144] ss:$8 sps:$4 sm:$0xff] (!%p138_p2)  }
   0xb   : > { %425 = vmatpush1.bf16.msra.mxu1 (!%p138_p2), %v3295_v6  ;;  %v3311_v17 = vld [vmem:[%s4789_s1 + $0x444] ss:$8 sps:$4 sm:$0xff] (!%p138_p2)   ;;  %v3313_v18 = vld [vmem:[%s4789_s1 + $0x140] ss:$8 sps:$4 sm:$0xff] (!%p138_p2)   ;;  %v3315_v20 = vld [vmem:[%s4789_s1 + $0x154] ss:$8 sps:$4 sm:$0xff] (!%p138_p2)  }
   0xc   : > { %1441 = vmatpush1.bf16.msra.mxu0 (!%p138_p2), %v3296_v7  ;;  %426 = vmatprep.subr.bf16.mxu1 (!%p138_p2), %v3297_v8  ;;  %v3314_v19 = vld [vmem:[%s4789_s1 + $0x440] ss:$8 sps:$4 sm:$0xff] (!%p138_p2)   ;;  %v3317_v21 = vld [vmem:[%s4789_s1 + $0x454] ss:$8 sps:$4 sm:$0xff] (!%p138_p2)   ;;  %v3319_v22 = vld [vmem:[%s4789_s1 + $0x150] ss:$8 sps:$4 sm:$0xff] (!%p138_p2)  }
   0xd   : > { %1442 = vmatprep.subr.bf16.mxu0 %v3299_v9  ;;  %v3320_v23 = vld [vmem:[%s4789_s1 + $0x450] ss:$8 sps:$4 sm:$0xff]   ;;  %v3321_v24 = vld [vmem:[%s4789_s1 + $0x164] ss:$8 sps:$4 sm:$0xff]   ;;  %v3325_v26 = vld [vmem:[%s4789_s1 + $0x160] ss:$8 sps:$4 sm:$0xff]  }
   0xe   : > { %v3323_v25 = vld [vmem:[%s4789_s1 + $0x464] ss:$8 sps:$4 sm:$0xff]   ;;  %v3326_v27 = vld [vmem:[%s4789_s1 + $0x460] ss:$8 sps:$4 sm:$0xff]   ;;  %v3327_v28 = vld [vmem:[%s4789_s1 + $0x174] ss:$8 sps:$4 sm:$0xff]  }
   0xf   : > { %427 = vmatpush1.bf16.msra.mxu1 %v3301_v10  ;;  %v3329_v29 = vld [vmem:[%s4789_s1 + $0x474] ss:$8 sps:$4 sm:$0xff]   ;;  %v3331_v30 = vld [vmem:[%s4789_s1 + $0x170] ss:$8 sps:$4 sm:$0xff]   ;;  %v3333_v32 = vld [vmem:[%s4789_s1 + $0x184] ss:$8 sps:$4 sm:$0xff]  }
  0x10   : > { %1443 = vmatpush1.bf16.msra.mxu0 %v3302_v11  ;;  %428 = vmatprep.subr.bf16.mxu1 %v3303_v12  ;;  %v3332_v31 = vld [vmem:[%s4789_s1 + $0x470] ss:$8 sps:$4 sm:$0xff]   ;;  %v3335_v33 = vld [vmem:[%s4789_s1 + $0x484] ss:$8 sps:$4 sm:$0xff]   ;;  %v3337_v34 = vld [vmem:[%s4789_s1 + $0x180] ss:$8 sps:$4 sm:$0xff]  }
  0x11   : > { %1444 = vmatprep.subr.bf16.mxu0 %v3305_v13  ;;  %v3338_v35 = vld [vmem:[%s4789_s1 + $0x480] ss:$8 sps:$4 sm:$0xff]   ;;  %v3339_v36 = vld [vmem:[%s4789_s1 + $0x194] ss:$8 sps:$4 sm:$0xff]   ;;  %s4793_s13 = smov (!%p161_p3, %s2662_s13), 1  ;;  %vm1269_vm0 = vcmask 1044480  }
  0x12   : > { %v3341_v37 = vld [vmem:[%s4789_s1 + $0x494] ss:$8 sps:$4 sm:$0xff]   ;;  %v3343_v38 = vld [vmem:[%s4789_s1 + $0x190] ss:$8 sps:$4 sm:$0xff]   ;;  %v3345_v40 = vld [vmem:[%s4789_s1 + $0x1a4] ss:$8 sps:$4 sm:$0xff]  }
  0x13   : > { %429 = vmatpush1.bf16.msra.mxu1 %v3307_v14  ;;  %v3344_v39 = vld [vmem:[%s4789_s1 + $0x490] ss:$8 sps:$4 sm:$0xff]   ;;  %s3241_s21 = sshll.u32 %s4793_s13, 5  ;;  %v3347_v41 = vld [vmem:[%s4789_s1 + $0x4a4] ss:$8 sps:$4 sm:$0xff]   ;;  %vm719_vm2 = vcmask 1046528  }
  0x14   : > { %1445 = vmatpush1.bf16.msra.mxu0 %v3308_v15  ;;  %430 = vmatprep.subr.bf16.mxu1 %v3309_v16  ;;  %v3349_v42 = vld [vmem:[%s4789_s1 + $0x1a0] ss:$8 sps:$4 sm:$0xff]   ;;  %s3918_s30 = scalar_lea.vmem %s4788_s0, %s3241_s21  ;;  %v3351_v44 = vld [vmem:[%s4789_s1 + $0x1b4] ss:$8 sps:$4 sm:$0xff]   ;;  %v3355_v46 = vld [vmem:[%s4789_s1 + $0x1b0] ss:$8 sps:$4 sm:$0xff]  }
  0x15   : > { %1446 = vmatprep.subr.bf16.mxu0 %v3311_v17  ;;  %v3350_v43 = vld [vmem:[%s4789_s1 + $0x4a0] ss:$8 sps:$4 sm:$0xff]   ;;  %v3353_v45 = vld [vmem:[%s4789_s1 + $0x4b4] ss:$8 sps:$4 sm:$0xff]   ;;  %v3356_v47 = vld [vmem:[%s4789_s1 + $0x4b0] ss:$8 sps:$4 sm:$0xff]  }
  0x16   : > { %v171_v48 = vld [vmem:[%s3918_s30] sm:$0xff]  ;;  %v3934_v49 = vld [vmem:[%s3918_s30 + $0x8] sm:$0xff]  ;;  %v1225_v54 = vld [vmem:[%s3918_s30 + $0x10] sm:$0x77]  ;;  %vm1518_vm1 = vsmask.f32 4352 }
  0x17   : > { %431 = vmatpush1.bf16.msra.mxu1 %v3313_v18  ;;  %v3357_v50 = vld [vmem:[%s4789_s1 + $0x1c4] ss:$8 sps:$4 sm:$0xff]   ;;  %v3943_v52 = vcombine.high %v171_v48, %v3934_v49  ;;  %v2940_v58 = vcombine.high %v1225_v54, %v1225_v54  ;;  %v3361_v59 = vld [vmem:[%s4789_s1 + $0x1c0] ss:$8 sps:$4 sm:$0xff]   ;;  %v3363_v0 = vld [vmem:[%s4789_s1 + $0x1d4] ss:$8 sps:$4 sm:$0xff]   ;;  %v3963_v2 = vcombine.low %v171_v48, %v3934_v49  ;;  %v3991_v18 = vcombine.low %v1225_v54, %v1225_v54 }
  0x18   : > { %1447 = vmatpush1.bf16.msra.mxu0 %v3314_v19  ;;  %432 = vmatprep.subr.bf16.mxu1 %v3315_v20  ;;  %v3359_v51 = vld [vmem:[%s4789_s1 + $0x4c4] ss:$8 sps:$4 sm:$0xff]   ;;  %v3362_v61 = vld [vmem:[%s4789_s1 + $0x4c0] ss:$8 sps:$4 sm:$0xff]   ;;  %v3365_v1 = vld [vmem:[%s4789_s1 + $0x4d4] ss:$8 sps:$4 sm:$0xff]  }
  0x19   : > { %1448 = vmatprep.subr.bf16.mxu0 %v3317_v21  ;;  %v1224_v53 = vld [vmem:[%s3918_s30] sm:$0x88]  ;;  %v254_v56 = vshrl.u32 %v3943_v52, 16  ;;  %v256_v57 = vshll.u32 %v3943_v52, 16  ;;  %v1274_v63 = vrot.slane %v2940_v58, 3  ;;  %v249_v10 = vshll.u32 %v3963_v2, 16 }
  0x1a   : > { %v2938_v55 = vcombine.high %v1224_v53, %v3934_v49  ;;  %v3367_v5 = vld [vmem:[%s4789_s1 + $0x1d0] ss:$8 sps:$4 sm:$0xff]   ;;  %v3369_v7 = vld [vmem:[%s4789_s1 + $0x1e4] ss:$8 sps:$4 sm:$0xff]   ;;  %v3373_v9 = vld [vmem:[%s4789_s1 + $0x1e0] ss:$8 sps:$4 sm:$0xff]   ;;  %v3989_v17 = vcombine.low %v1224_v53, %v3934_v49 }
  0x1b   : > { %433 = vmatpush1.bf16.msra.mxu1 %v3319_v22  ;;  %v258_v62 = vrot.slane %v256_v57, 1  ;;  %v3368_v6 = vld [vmem:[%s4789_s1 + $0x4d0] ss:$8 sps:$4 sm:$0xff]   ;;  %v3371_v8 = vld [vmem:[%s4789_s1 + $0x4e4] ss:$8 sps:$4 sm:$0xff]   ;;  %v1545_v13 = vshrl.u32 %v2940_v58, 16 }
  0x1c   : > { %1449 = vmatpush1.bf16.msra.mxu0 %v3320_v23  ;;  %434 = vmatprep.subr.bf16.mxu1 %v3321_v24  ;;  %v1273_v60 = vrot.slane %v2938_v55, 3  ;;  %v1537_v11 = vshrl.u32 %v2938_v55, 16  ;;  %v1540_v12 = vshll.u32 %v2938_v55, 16  ;;  %v1548_v14 = vshll.u32 %v2940_v58, 16  ;;  %v3374_v15 = vld [vmem:[%s4789_s1 + $0x4e0] ss:$8 sps:$4 sm:$0xff]  }
  0x1d   : > { %1450 = vmatprep.subr.bf16.mxu0 %v3323_v25  ;;  %v259_v3 = vor.u32 %v258_v62, %v254_v56  ;;  %v3375_v16 = vld [vmem:[%s4789_s1 + $0x1f4] ss:$8 sps:$4 sm:$0xff]   ;;  %v3379_v20 = vld [vmem:[%s4789_s1 + $0x1f0] ss:$8 sps:$4 sm:$0xff]   ;;  %v247_v22 = vshrl.u32 %v3963_v2, 16  ;;  %v251_v23 = vrot.slane %v249_v10, 1 }
  0x1e   : > { %v1275_v4 = vsel %vm1269_vm0, %v1273_v60, %v1274_v63  ;;  %v3377_v19 = vld [vmem:[%s4789_s1 + $0x4f4] ss:$8 sps:$4 sm:$0xff]   ;;  %v3380_v21 = vld [vmem:[%s4789_s1 + $0x4f0] ss:$8 sps:$4 sm:$0xff]   ;;  %v1539_v24 = vrot.slane %v1537_v11, 3  ;;  %v1542_v25 = vrot.slane %v1540_v12, 4 }
  0x1f   : > { %435 = vmatpush1.bf16.msra.mxu1 %v3325_v26  ;;  %1470 = vmatprep.mubr.bf16.mxu0 %v1275_v4  ;;  %v1547_v26 = vrot.slane %v1545_v13, 3  ;;  %v3410_v48 = vld [vmem:[%s4789_s1 + $0x534] ss:$8 sps:$4 sm:$0xff]   ;;  %v3416_v53 = vld [vmem:[%s4789_s1 + $0x544] ss:$8 sps:$4 sm:$0xff]   ;;  %vm2348_vm5 = vcmask 1045504  }
  0x20   : > { %1451 = vmatpush1.bf16.msra.mxu0 %v3326_v27  ;;  %436 = vmatprep.subr.bf16.mxu1 %v3327_v28  ;;  %v1550_v27 = vrot.slane %v1548_v14, 4  ;;  %v3385_v28 = vld [vmem:[%s4789_s1 + $0x4] ss:$8 sps:$4 sm:$0xff]   ;;  %v3411_v54 = vld [vmem:[%s4789_s1 + $0x40] ss:$8 sps:$4 sm:$0xff]   ;;  %vm2597_vm6 = vcmask 1043456  }
  0x21   : > { %1452 = vmatprep.subr.bf16.mxu0 %v3329_v29  ;;  %454 = vmatprep.mubr.bf16.mxu1 %v259_v3  ;;  %v1270_v29 = vrot.slane %v3989_v17, 3  ;;  %v3414_v55 = vld [vmem:[%s4789_s1 + $0x540] ss:$8 sps:$4 sm:$0xff]   ;;  %v3419_v56 = vld [vmem:[%s4789_s1 + $0x54] ss:$8 sps:$4 sm:$0xff]   ;;  %s3242_s11 = sshll.u32 %s4793_s13, 4 }
  0x22   : > { %v3422_v57 = vld [vmem:[%s4789_s1 + $0x554] ss:$8 sps:$4 sm:$0xff]   ;;  %v3417_v58 = vld [vmem:[%s4789_s1 + $0x50] ss:$8 sps:$4 sm:$0xff]   ;;  %v3425_v60 = vld [vmem:[%s4789_s1 + $0x64] ss:$8 sps:$4 sm:$0xff]   ;;  %s170_s15 = scalar_lea.vmem %s4791_s3, %s3242_s11 }
  0x23   : > { %437 = vmatpush1.bf16.msra.mxu1 %v3331_v30  ;;  %v1271_v30 = vrot.slane %v3991_v18, 3  ;;  %v3423_v62 = vld [vmem:[%s4789_s1 + $0x60] ss:$8 sps:$4 sm:$0xff]   ;;  %v3429_v3 = vld [vmem:[%s4789_s1 + $0x70] ss:$8 sps:$4 sm:$0xff]   ;;  %vm2600_vm8 = vcmask 1047556  }
  0x24   : > { %1453 = vmatpush1.bf16.msra.mxu0 %v3332_v31  ;;  %438 = vmatprep.subr.bf16.mxu1 %v3333_v32  ;;  %v3390_v31 = vld [vmem:[%s4789_s1 + $0x504] ss:$8 sps:$4 sm:$0xff]   ;;  %v3383_v32 = vld [vmem:[%s4789_s1] ss:$8 sps:$4 sm:$0xff]   ;;  %v3432_v4 = vld [vmem:[%s4789_s1 + $0x570] ss:$8 sps:$4 sm:$0xff]  }
  0x25   : > { %1454 = vmatprep.subr.bf16.mxu0 %v3335_v33  ;;  %v252_v33 = vor.u32 %v251_v23, %v247_v22  ;;  %v3426_v63 = vld [vmem:[%s4789_s1 + $0x560] ss:$8 sps:$4 sm:$0xff]   ;;  %v3446_v10 = vld [vmem:[%s4789_s1 + $0x594] ss:$8 sps:$4 sm:$0xff]   ;;  %v3441_v11 = vld [vmem:[%s4789_s1 + $0x90] ss:$8 sps:$4 sm:$0xff]  }
  0x26   : > { %v3444_v12 = vld [vmem:[%s4789_s1 + $0x590] ss:$8 sps:$4 sm:$0xff]   ;;  %v3449_v13 = vld [vmem:[%s4789_s1 + $0xa4] ss:$8 sps:$4 sm:$0xff]   ;;  %vm980_vm3 = vsmask.f32 5376 }
  0x27   : > { %439 = vmatpush1.bf16.msra.mxu1 %v3337_v34  ;;  %v1543_v34 = vor.u32 %v1542_v25, %v1539_v24  ;;  %v3452_v14 = vld [vmem:[%s4789_s1 + $0x5a4] ss:$8 sps:$4 sm:$0xff]   ;;  %v3456_v22 = vld [vmem:[%s4789_s1 + $0x5b0] ss:$8 sps:$4 sm:$0xff]   ;;  %v3459_v25 = vld [vmem:[%s4789_s1 + $0xc0] ss:$8 sps:$4 sm:$0xff]  }
  0x28   : > { %1455 = vmatpush1.bf16.msra.mxu0 %v3338_v35  ;;  %440 = vmatprep.subr.bf16.mxu1 %v3339_v36  ;;  %v1551_v35 = vor.u32 %v1550_v27, %v1547_v26  ;;  %v3388_v36 = vld [vmem:[%s4789_s1 + $0x500] ss:$8 sps:$4 sm:$0xff]   ;;  %v3461_v23 = vld [vmem:[%s4789_s1 + $0xc4] ss:$8 sps:$4 sm:$0xff]   ;;  %v3467_v27 = vld [vmem:[%s4789_s1 + $0xd4] ss:$8 sps:$4 sm:$0xff]  }
  0x29   : > { %1456 = vmatprep.subr.bf16.mxu0 %v3341_v37  ;;  %v1272_v37 = vsel %vm1269_vm0, %v1270_v29, %v1271_v30  ;;  %v3464_v24 = vld [vmem:[%s4789_s1 + $0x5c4] ss:$8 sps:$4 sm:$0xff]   ;;  %v3462_v26 = vld [vmem:[%s4789_s1 + $0x5c0] ss:$8 sps:$4 sm:$0xff]   ;;  %v3465_v29 = vld [vmem:[%s4789_s1 + $0xd0] ss:$8 sps:$4 sm:$0xff]  }
  0x2a   : > { %v1520_v30 = vshrl.u32 %v3989_v17, 16  ;;  %vm2059_vm4 = vsmask.f32 6400  ;;  %vm2598_vm7 = vsmask.f32 3328 }
  0x2b   : > { %441 = vmatpush1.bf16.msra.mxu1 %v3343_v38  ;;  %v3395_v38 = vld [vmem:[%s4789_s1 + $0x14] ss:$8 sps:$4 sm:$0xff]   ;;  %vm2601_vm9 = vsmask.f32 7424  ;;  %vm2599_vm10 = vmand %vm2597_vm6, %vm2598_vm7 }
  0x2c   : > { %1457 = vmatpush1.bf16.msra.mxu0 %v3344_v39  ;;  %442 = vmatprep.subr.bf16.mxu1 %v3345_v40  ;;  %v3398_v39 = vld [vmem:[%s4789_s1 + $0x514] ss:$8 sps:$4 sm:$0xff]   ;;  %v3393_v40 = vld [vmem:[%s4789_s1 + $0x10] ss:$8 sps:$4 sm:$0xff]   ;;  %vm2602_vm11 = vmand %vm2600_vm8, %vm2601_vm9 }
  0x2d   : > { %1458 = vmatprep.subr.bf16.mxu0 %v3347_v41  ;;  %v1552_v41 = vsel %vm1518_vm1, %v1543_v34, %v1551_v35  ;;  %v3473_v34 = vld [vmem:[%s4789_s1 + $0xe4] ss:$8 sps:$4 sm:$0xff]   ;;  %v1531_v35 = vshll.u32 %v3991_v18, 16  ;;  %vm2603_vm12 = vmor %vm2602_vm11, %vm2599_vm10 }
  0x2f   : > { %443 = vmatpush1.bf16.msra.mxu1 %v3349_v42  ;;  %v3396_v42 = vld [vmem:[%s4789_s1 + $0x510] ss:$8 sps:$4 sm:$0xff]  }
  0x30   : > { %1459 = vmatpush1.bf16.msra.mxu0 %v3350_v43  ;;  %444 = vmatprep.subr.bf16.mxu1 %v3351_v44  ;;  %v3401_v43 = vld [vmem:[%s4789_s1 + $0x24] ss:$8 sps:$4 sm:$0xff]  }
  0x31   : > { %1460 = vmatprep.subr.bf16.mxu0 %v3353_v45  ;;  %v3404_v44 = vld [vmem:[%s4789_s1 + $0x524] ss:$8 sps:$4 sm:$0xff]   ;;  %v3399_v45 = vld [vmem:[%s4789_s1 + $0x20] ss:$8 sps:$4 sm:$0xff]  }
  0x33   : > { %445 = vmatpush1.bf16.msra.mxu1 %v3355_v46  ;;  %v3402_v46 = vld [vmem:[%s4789_s1 + $0x520] ss:$8 sps:$4 sm:$0xff]  }
  0x34   : > { %1461 = vmatpush1.bf16.msra.mxu0 %v3356_v47  ;;  %446 = vmatprep.subr.bf16.mxu1 %v3357_v50  ;;  %v3407_v47 = vld [vmem:[%s4789_s1 + $0x34] ss:$8 sps:$4 sm:$0xff]   ;;  %v3405_v50 = vld [vmem:[%s4789_s1 + $0x30] ss:$8 sps:$4 sm:$0xff]  }
  0x35   : > { %1462 = vmatprep.subr.bf16.mxu0 %v3359_v51  ;;  %v3408_v51 = vld [vmem:[%s4789_s1 + $0x530] ss:$8 sps:$4 sm:$0xff]  }
  0x37   : > { %447 = vmatpush1.bf16.msra.mxu1 %v3361_v59  ;;  %v3420_v59 = vld [vmem:[%s4789_s1 + $0x550] ss:$8 sps:$4 sm:$0xff]  }
  0x38   : > { %1463 = vmatpush1.bf16.msra.mxu0 %v3362_v61  ;;  %448 = vmatprep.subr.bf16.mxu1 %v3363_v0  ;;  %v3428_v61 = vld [vmem:[%s4789_s1 + $0x564] ss:$8 sps:$4 sm:$0xff]   ;;  %v3431_v0 = vld [vmem:[%s4789_s1 + $0x74] ss:$8 sps:$4 sm:$0xff]  }
  0x39   : > { %1464 = vmatprep.subr.bf16.mxu0 %v3365_v1  ;;  %v3434_v1 = vld [vmem:[%s4789_s1 + $0x574] ss:$8 sps:$4 sm:$0xff]  }
  0x3b   : > { %449 = vmatpush1.bf16.msra.mxu1 %v3367_v5  ;;  %v3437_v5 = vld [vmem:[%s4789_s1 + $0x84] ss:$8 sps:$4 sm:$0xff]  }
  0x3c   : > { %1465 = vmatpush1.bf16.msra.mxu0 %v3368_v6  ;;  %450 = vmatprep.subr.bf16.mxu1 %v3369_v7  ;;  %v3440_v6 = vld [vmem:[%s4789_s1 + $0x584] ss:$8 sps:$4 sm:$0xff]   ;;  %v3435_v7 = vld [vmem:[%s4789_s1 + $0x80] ss:$8 sps:$4 sm:$0xff]  }
  0x3d   : > { %1466 = vmatprep.subr.bf16.mxu0 %v3371_v8  ;;  %v3438_v8 = vld [vmem:[%s4789_s1 + $0x580] ss:$8 sps:$4 sm:$0xff]  }
  0x3f   : > { %451 = vmatpush1.bf16.msra.mxu1 %v3373_v9  ;;  %v3443_v9 = vld [vmem:[%s4789_s1 + $0x94] ss:$8 sps:$4 sm:$0xff]  }
  0x40   : > { %1467 = vmatpush1.bf16.msra.mxu0 %v3374_v15  ;;  %452 = vmatprep.subr.bf16.mxu1 %v3375_v16  ;;  %v3447_v15 = vld [vmem:[%s4789_s1 + $0xa0] ss:$8 sps:$4 sm:$0xff]  }
  0x41   : > { %1468 = vmatprep.subr.bf16.mxu0 %v3377_v19  ;;  %v3450_v16 = vld [vmem:[%s4789_s1 + $0x5a0] ss:$8 sps:$4 sm:$0xff]   ;;  %v3455_v19 = vld [vmem:[%s4789_s1 + $0xb4] ss:$8 sps:$4 sm:$0xff]  }
  0x43   : > { %453 = vmatpush1.bf16.msra.mxu1 %v3379_v20  ;;  %v3458_v20 = vld [vmem:[%s4789_s1 + $0x5b4] ss:$8 sps:$4 sm:$0xff]  }
  0x44   : > { %1469 = vmatpush1.bf16.msra.mxu0 %v3380_v21  ;;  %627 = vmatprep.subr.bf16.mxu1 %v3385_v28  ;;  %v3453_v21 = vld [vmem:[%s4789_s1 + $0xb0] ss:$8 sps:$4 sm:$0xff]   ;;  %v3470_v28 = vld [vmem:[%s4789_s1 + $0x5d4] ss:$8 sps:$4 sm:$0xff]  }
  0x45   : > { %1715 = vmatprep.subr.bf16.mxu0 %v3390_v31  ;;  %v1523_v31 = vshll.u32 %v3989_v17, 16  ;;  %v3476_v17 = vld [vmem:[%s4789_s1 + $0x5e4] ss:$8 sps:$4 sm:$0xff]  }
  0x46   : > { %455 = vmatmul.mubr.bf16.vlgmr.msra.gmra.mrb[0].mxu1 %v252_v33  ;;  %v3468_v33 = vld [vmem:[%s4789_s1 + $0x5d0] ss:$8 sps:$4 sm:$0xff]  }
  0x47   : > { %1471 = vmatmul.mubr.bf16.vlgmr.msra.gmra.mrb[0].mxu0 %v1272_v37  ;;  %628 = vmatpush1.bf16.msra.mxu1 %v3383_v32  ;;  %v1528_v32 = vshrl.u32 %v3991_v18, 16  ;;  %v1522_v37 = vrot.slane %v1520_v30, 3  ;;  %v3479_v18 = vld [vmem:[%s4789_s1 + $0xf4] ss:$8 sps:$4 sm:$0xff]  }
  0x48   : > { %1716 = vmatpush1.bf16.msra.mxu0 %v3388_v36  ;;  %629 = vmatprep.subr.bf16.mxu1 %v3395_v38  ;;  %v3471_v36 = vld [vmem:[%s4789_s1 + $0xe0] ss:$8 sps:$4 sm:$0xff]   ;;  %v1525_v38 = vrot.slane %v1523_v31, 4  ;;  %v3530_v30 = vld [vmem:[%s4789_s1 + $0x674] ss:$8 sps:$4 sm:$0xff]  }
  0x49   : > { %1717 = vmatprep.subr.bf16.mxu0 %v3398_v39  ;;  %659 = vmatprep.mubr.bf16.mxu1 %v3943_v52  ;;  %v3413_v52 = vld [vmem:[%s4789_s1 + $0x44] ss:$8 sps:$4 sm:$0xff]   ;;  %v1530_v39 = vrot.slane %v1528_v32, 3  ;;  %v3525_v31 = vld [vmem:[%s4789_s1 + $0x270] ss:$8 sps:$4 sm:$0xff]  }
  0x4a   : > { %1747 = vmatprep.mubr.bf16.mxu0 %v1552_v41  ;;  %v1533_v41 = vrot.slane %v1531_v35, 4  ;;  %v3528_v32 = vld [vmem:[%s4789_s1 + $0x670] ss:$8 sps:$4 sm:$0xff]   ;;  %v3531_v35 = vld [vmem:[%s4789_s1 + $0x280] ss:$8 sps:$4 sm:$0xff]  }
  0x4b   : > { %630 = vmatpush1.bf16.msra.mxu1 %v3393_v40  ;;  %v3474_v40 = vld [vmem:[%s4789_s1 + $0x5e0] ss:$8 sps:$4 sm:$0xff]  }
  0x4c   : > { %1718 = vmatpush1.bf16.msra.mxu0 %v3396_v42  ;;  %631 = vmatprep.subr.bf16.mxu1 %v3401_v43  ;;  %v3482_v42 = vld [vmem:[%s4789_s1 + $0x5f4] ss:$8 sps:$4 sm:$0xff]   ;;  %v3477_v43 = vld [vmem:[%s4789_s1 + $0xf0] ss:$8 sps:$4 sm:$0xff]  }
  0x4d   : > { %1719 = vmatprep.subr.bf16.mxu0 %v3404_v44  ;;  %v3480_v44 = vld [vmem:[%s4789_s1 + $0x5f0] ss:$8 sps:$4 sm:$0xff]  }
  0x4f   : > { %632 = vmatpush1.bf16.msra.mxu1 %v3399_v45  ;;  %v3485_v45 = vld [vmem:[%s4789_s1 + $0x204] ss:$8 sps:$4 sm:$0xff]  }
  0x50   : > { %1720 = vmatpush1.bf16.msra.mxu0 %v3402_v46  ;;  %633 = vmatprep.subr.bf16.mxu1 %v3407_v47  ;;  %v1526_v46 = vor.u32 %v1525_v38, %v1522_v37  ;;  %v1534_v47 = vor.u32 %v1533_v41, %v1530_v39  ;;  %v3542_v37 = vld [vmem:[%s4789_s1 + $0x694] ss:$8 sps:$4 sm:$0xff]   ;;  %v3537_v38 = vld [vmem:[%s4789_s1 + $0x290] ss:$8 sps:$4 sm:$0xff]   ;;  %v3543_v41 = vld [vmem:[%s4789_s1 + $0x2a0] ss:$8 sps:$4 sm:$0xff]  }
  0x51   : > { %1721 = vmatprep.subr.bf16.mxu0 %v3410_v48  ;;  %v3488_v48 = vld [vmem:[%s4789_s1 + $0x604] ss:$8 sps:$4 sm:$0xff]   ;;  %v3540_v39 = vld [vmem:[%s4789_s1 + $0x690] ss:$8 sps:$4 sm:$0xff]  }
  0x53   : > { %634 = vmatpush1.bf16.msra.mxu1 %v3405_v50  ;;  %v3483_v50 = vld [vmem:[%s4789_s1 + $0x200] ss:$8 sps:$4 sm:$0xff]  }
  0x54   : > { %1722 = vmatpush1.bf16.msra.mxu0 %v3408_v51  ;;  %635 = vmatprep.subr.bf16.mxu1 %v3413_v52  ;;  %v3486_v51 = vld [vmem:[%s4789_s1 + $0x600] ss:$8 sps:$4 sm:$0xff]   ;;  %v1535_v52 = vsel %vm1518_vm1, %v1526_v46, %v1534_v47  ;;  %v3552_v46 = vld [vmem:[%s4789_s1 + $0x6b0] ss:$8 sps:$4 sm:$0xff]   ;;  %v3557_v47 = vld [vmem:[%s4789_s1 + $0x2c4] ss:$8 sps:$4 sm:$0xff]  }
  0x55   : > { %1723 = vmatprep.subr.bf16.mxu0 %v3416_v53  ;;  %v3491_v53 = vld [vmem:[%s4789_s1 + $0x214] ss:$8 sps:$4 sm:$0xff]  }
  0x57   : > { %636 = vmatpush1.bf16.msra.mxu1 %v3411_v54  ;;  %v3494_v54 = vld [vmem:[%s4789_s1 + $0x614] ss:$8 sps:$4 sm:$0xff]  }
  0x58   : > { %1724 = vmatpush1.bf16.msra.mxu0 %v3414_v55  ;;  %637 = vmatprep.subr.bf16.mxu1 %v3419_v56  ;;  %v3489_v55 = vld [vmem:[%s4789_s1 + $0x210] ss:$8 sps:$4 sm:$0xff]  }
  0x59   : > { %1725 = vmatprep.subr.bf16.mxu0 %v3422_v57  ;;  %v3492_v56 = vld [vmem:[%s4789_s1 + $0x610] ss:$8 sps:$4 sm:$0xff]   ;;  %v4230_v57 = vld [vmem:[%s3918_s30] sm:$0xee] }
  0x5b   : > { %638 = vmatpush1.bf16.msra.mxu1 %v3417_v58  ;;  %v4233_v58 = vld [vmem:[%s3918_s30 + $0x10] sm:$0x11] }
  0x5c   : > { %1726 = vmatpush1.bf16.msra.mxu0 %v3420_v59  ;;  %639 = vmatprep.subr.bf16.mxu1 %v3425_v60  ;;  %v3497_v59 = vld [vmem:[%s4789_s1 + $0x224] ss:$8 sps:$4 sm:$0xff]   ;;  %v2802_v60 = vcombine.high %v4230_v57, %v3934_v49 }
  0x5d   : > { %1727 = vmatprep.subr.bf16.mxu0 %v3428_v61  ;;  %v2804_v61 = vcombine.high %v4233_v58, %v4233_v58 }
  0x5f   : > { %640 = vmatpush1.bf16.msra.mxu1 %v3423_v62  ;;  %v3500_v62 = vld [vmem:[%s4789_s1 + $0x624] ss:$8 sps:$4 sm:$0xff]  }
  0x60   : > { %1728 = vmatpush1.bf16.msra.mxu0 %v3426_v63  ;;  %641 = vmatprep.subr.bf16.mxu1 %v3431_v0  ;;  %v4247_v63 = vld [vmem:[%s3918_s30 + $0x8] sm:$0xee]  ;;  %v723_v0 = vrot.slane %v2802_v60, 1 }
  0x61   : > { %1729 = vmatprep.subr.bf16.mxu0 %v3434_v1  ;;  %v724_v1 = vrot.slane %v2804_v61, 1  ;;  %v3561_v61 = vld [vmem:[%s4789_s1 + $0x2d0] ss:$8 sps:$4 sm:$0xff]  }
  0x63   : > { %642 = vmatpush1.bf16.msra.mxu1 %v3429_v3  ;;  %v4253_v3 = vld [vmem:[%s3918_s30 + $0x18] sm:$0x11] }
  0x64   : > { %1730 = vmatpush1.bf16.msra.mxu0 %v3432_v4  ;;  %643 = vmatprep.subr.bf16.mxu1 %v3437_v5  ;;  %v4261_v4 = vcombine.high %v4253_v3, %v4253_v3  ;;  %v3495_v5 = vld [vmem:[%s4789_s1 + $0x220] ss:$8 sps:$4 sm:$0xff]  }
  0x65   : > { %1731 = vmatprep.subr.bf16.mxu0 %v3440_v6  ;;  %v725_v6 = vsel %vm719_vm2, %v723_v0, %v724_v1  ;;  %v3569_v0 = vld [vmem:[%s4789_s1 + $0x2e4] ss:$8 sps:$4 sm:$0xff]  }
  0x66   : > { %v3572_v1 = vld [vmem:[%s4789_s1 + $0x6e4] ss:$8 sps:$4 sm:$0xff]  }
  0x67   : > { %644 = vmatpush1.bf16.msra.mxu1 %v3435_v7 }
  0x68   : > { %1732 = vmatpush1.bf16.msra.mxu0 %v3438_v8  ;;  %645 = vmatprep.subr.bf16.mxu1 %v3443_v9  ;;  %v3498_v8 = vld [vmem:[%s4789_s1 + $0x620] ss:$8 sps:$4 sm:$0xff]   ;;  %v1815_v9 = vrot.slane %v4261_v4, 1 }
  0x69   : > { %1733 = vmatprep.subr.bf16.mxu0 %v3446_v10  ;;  %v3503_v10 = vld [vmem:[%s4789_s1 + $0x234] ss:$8 sps:$4 sm:$0xff]  }
  0x6b   : > { %646 = vmatpush1.bf16.msra.mxu1 %v3441_v11  ;;  %v3506_v11 = vld [vmem:[%s4789_s1 + $0x634] ss:$8 sps:$4 sm:$0xff]  }
  0x6c   : > { %1734 = vmatpush1.bf16.msra.mxu0 %v3444_v12  ;;  %647 = vmatprep.subr.bf16.mxu1 %v3449_v13  ;;  %v3501_v13 = vld [vmem:[%s4789_s1 + $0x230] ss:$8 sps:$4 sm:$0xff]  }
  0x6d   : > { %1735 = vmatprep.subr.bf16.mxu0 %v3452_v14  ;;  %v3504_v14 = vld [vmem:[%s4789_s1 + $0x630] ss:$8 sps:$4 sm:$0xff]  }
  0x6f   : > { %648 = vmatpush1.bf16.msra.mxu1 %v3447_v15  ;;  %v3509_v15 = vld [vmem:[%s4789_s1 + $0x244] ss:$8 sps:$4 sm:$0xff]  }
  0x70   : > { %1736 = vmatpush1.bf16.msra.mxu0 %v3450_v16  ;;  %649 = vmatprep.subr.bf16.mxu1 %v3455_v19  ;;  %v3512_v16 = vld [vmem:[%s4789_s1 + $0x644] ss:$8 sps:$4 sm:$0xff]   ;;  %v3507_v19 = vld [vmem:[%s4789_s1 + $0x240] ss:$8 sps:$4 sm:$0xff]  }
  0x71   : > { %1737 = vmatprep.subr.bf16.mxu0 %v3458_v20  ;;  %v3510_v20 = vld [vmem:[%s4789_s1 + $0x640] ss:$8 sps:$4 sm:$0xff]  }
  0x73   : > { %650 = vmatpush1.bf16.msra.mxu1 %v3453_v21  ;;  %v3515_v21 = vld [vmem:[%s4789_s1 + $0x254] ss:$8 sps:$4 sm:$0xff]  }
  0x74   : > { %1738 = vmatpush1.bf16.msra.mxu0 %v3456_v22  ;;  %651 = vmatprep.subr.bf16.mxu1 %v3461_v23  ;;  %v3518_v22 = vld [vmem:[%s4789_s1 + $0x654] ss:$8 sps:$4 sm:$0xff]   ;;  %v3513_v23 = vld [vmem:[%s4789_s1 + $0x250] ss:$8 sps:$4 sm:$0xff]  }
  0x75   : > { %1739 = vmatprep.subr.bf16.mxu0 %v3464_v24  ;;  %v3516_v24 = vld [vmem:[%s4789_s1 + $0x650] ss:$8 sps:$4 sm:$0xff]  }
  0x77   : > { %652 = vmatpush1.bf16.msra.mxu1 %v3459_v25  ;;  %v3521_v25 = vld [vmem:[%s4789_s1 + $0x264] ss:$8 sps:$4 sm:$0xff]  }
  0x78   : > { %1740 = vmatpush1.bf16.msra.mxu0 %v3462_v26  ;;  %653 = vmatprep.subr.bf16.mxu1 %v3467_v27  ;;  %v3524_v26 = vld [vmem:[%s4789_s1 + $0x664] ss:$8 sps:$4 sm:$0xff]   ;;  %v3519_v27 = vld [vmem:[%s4789_s1 + $0x260] ss:$8 sps:$4 sm:$0xff]  }
  0x79   : > { %1741 = vmatprep.subr.bf16.mxu0 %v3470_v28  ;;  %v3522_v28 = vld [vmem:[%s4789_s1 + $0x660] ss:$8 sps:$4 sm:$0xff]  }
  0x7b   : > { %654 = vmatpush1.bf16.msra.mxu1 %v3465_v29  ;;  %v3527_v29 = vld [vmem:[%s4789_s1 + $0x274] ss:$8 sps:$4 sm:$0xff]  }
  0x7c   : > { %1742 = vmatpush1.bf16.msra.mxu0 %v3468_v33  ;;  %655 = vmatprep.subr.bf16.mxu1 %v3473_v34  ;;  %v3533_v33 = vld [vmem:[%s4789_s1 + $0x284] ss:$8 sps:$4 sm:$0xff]  }
  0x7d   : > { %1743 = vmatprep.subr.bf16.mxu0 %v3476_v17  ;;  %v3536_v34 = vld [vmem:[%s4789_s1 + $0x684] ss:$8 sps:$4 sm:$0xff]   ;;  %v3534_v17 = vld [vmem:[%s4789_s1 + $0x680] ss:$8 sps:$4 sm:$0xff]  }
  0x7f   : > { %656 = vmatpush1.bf16.msra.mxu1 %v3471_v36  ;;  %v3539_v36 = vld [vmem:[%s4789_s1 + $0x294] ss:$8 sps:$4 sm:$0xff]  }
  0x80   : > { %1744 = vmatpush1.bf16.msra.mxu0 %v3474_v40  ;;  %657 = vmatprep.subr.bf16.mxu1 %v3479_v18  ;;  %v3545_v40 = vld [vmem:[%s4789_s1 + $0x2a4] ss:$8 sps:$4 sm:$0xff]  }
  0x81   : > { %1745 = vmatprep.subr.bf16.mxu0 %v3482_v42  ;;  %v3548_v18 = vld [vmem:[%s4789_s1 + $0x6a4] ss:$8 sps:$4 sm:$0xff]   ;;  %v3546_v42 = vld [vmem:[%s4789_s1 + $0x6a0] ss:$8 sps:$4 sm:$0xff]  }
  0x83   : > { %658 = vmatpush1.bf16.msra.mxu1 %v3477_v43  ;;  %v3551_v43 = vld [vmem:[%s4789_s1 + $0x2b4] ss:$8 sps:$4 sm:$0xff]  }
  0x84   : > { %1746 = vmatpush1.bf16.msra.mxu0 %v3480_v44  ;;  %888 = vmatprep.subr.bf16.mxu1 %v3485_v45  ;;  %v3554_v44 = vld [vmem:[%s4789_s1 + $0x6b4] ss:$8 sps:$4 sm:$0xff]   ;;  %v3549_v45 = vld [vmem:[%s4789_s1 + $0x2b0] ss:$8 sps:$4 sm:$0xff]  }
  0x85   : > { %1979 = vmatprep.subr.bf16.mxu0 %v3488_v48  ;;  %v3560_v48 = vld [vmem:[%s4789_s1 + $0x6c4] ss:$8 sps:$4 sm:$0xff]  }
  0x86   : > { %660 = vmatmul.mubr.bf16.vlgmr.msra.gmra.mrb[0].mxu1 %v3963_v2  ;;  %v4250_v2 = vld [vmem:[%s3918_s30 + $0x10] sm:$0xff] }
  0x87   : > { %1748 = vmatmul.mubr.bf16.vlgmr.msra.gmra.mrb[0].mxu0 %v1535_v52  ;;  %889 = vmatpush1.bf16.msra.mxu1 %v3483_v50  ;;  %v4257_v49 = vcombine.high %v4247_v63, %v4250_v2  ;;  %v3555_v50 = vld [vmem:[%s4789_s1 + $0x2c0] ss:$8 sps:$4 sm:$0xff]   ;;  %v3563_v52 = vld [vmem:[%s4789_s1 + $0x2d4] ss:$8 sps:$4 sm:$0xff]  }
  0x88   : > { %1980 = vmatpush1.bf16.msra.mxu0 %v3486_v51  ;;  %890 = vmatprep.subr.bf16.mxu1 %v3491_v53  ;;  %v3558_v51 = vld [vmem:[%s4789_s1 + $0x6c0] ss:$8 sps:$4 sm:$0xff]  }
  0x89   : > { %1981 = vmatprep.subr.bf16.mxu0 %v3494_v54  ;;  %v1814_v7 = vrot.slane %v4257_v49, 1  ;;  %920 = vmatprep.mubr.bf16.mxu1 %v725_v6  ;;  %v4397_v53 = vld [vmem:[%s3918_s30] sm:$0xcc]  ;;  %v4400_v54 = vld [vmem:[%s3918_s30 + $0x10] sm:$0x33]  ;;  %v2078_v6 = vshrl.u32 %v4257_v49, 16 }
  0x8a   : > { %v2872_v60 = vcombine.high %v4400_v54, %v4400_v54 }
  0x8b   : > { %891 = vmatpush1.bf16.msra.mxu1 %v3489_v55  ;;  %v1816_v12 = vsel %vm719_vm2, %v1814_v7, %v1815_v9  ;;  %v3566_v55 = vld [vmem:[%s4789_s1 + $0x6d4] ss:$8 sps:$4 sm:$0xff]   ;;  %v2081_v7 = vshll.u32 %v4257_v49, 16  ;;  %v2089_v9 = vshll.u32 %v4261_v4, 16  ;;  %v2803_v49 = vcombine.low %v4233_v58, %v4233_v58  ;;  %v3573_v58 = vld [vmem:[%s4789_s1 + $0x2f0] ss:$8 sps:$4 sm:$0xff]  }
  0x8c   : > { %1982 = vmatpush1.bf16.msra.mxu0 %v3492_v56  ;;  %892 = vmatprep.subr.bf16.mxu1 %v3497_v59  ;;  %v4406_v56 = vld [vmem:[%s3918_s30 + $0x8] sm:$0xff] }
  0x8d   : > { %1983 = vmatprep.subr.bf16.mxu0 %v3500_v62  ;;  %2011 = vmatprep.mubr.bf16.mxu0 %v1816_v12  ;;  %v2870_v59 = vcombine.high %v4397_v53, %v4406_v56  ;;  %v3564_v62 = vld [vmem:[%s4789_s1 + $0x6d0] ss:$8 sps:$4 sm:$0xff]   ;;  %v1007_v12 = vshrl.u32 %v2872_v60, 16 }
  0x8f   : > { %893 = vmatpush1.bf16.msra.mxu1 %v3495_v5  ;;  %v2801_v5 = vcombine.low %v4230_v57, %v4406_v56  ;;  %v3570_v57 = vld [vmem:[%s4789_s1 + $0x6e0] ss:$8 sps:$4 sm:$0xff]  }
  0x90   : > { %1984 = vmatpush1.bf16.msra.mxu0 %v3498_v8  ;;  %894 = vmatprep.subr.bf16.mxu1 %v3503_v10  ;;  %v2086_v8 = vshrl.u32 %v4261_v4, 16  ;;  %v999_v10 = vshrl.u32 %v2870_v59, 16  ;;  %v4440_v4 = vcombine.low %v4247_v63, %v4250_v2  ;;  %v3576_v63 = vld [vmem:[%s4789_s1 + $0x6f0] ss:$8 sps:$4 sm:$0xff]  }
  0x91   : > { %1985 = vmatprep.subr.bf16.mxu0 %v3506_v11  ;;  %v1002_v11 = vshll.u32 %v2870_v59, 16  ;;  %v3613_v59 = vld [vmem:[%s4789_s1 + $0x344] ss:$8 sps:$4 sm:$0xff]  }
  0x93   : > { %895 = vmatpush1.bf16.msra.mxu1 %v3501_v13  ;;  %v1010_v13 = vshll.u32 %v2872_v60, 16  ;;  %v3616_v60 = vld [vmem:[%s4789_s1 + $0x744] ss:$8 sps:$4 sm:$0xff]  }
  0x94   : > { %1986 = vmatpush1.bf16.msra.mxu0 %v3504_v14  ;;  %896 = vmatprep.subr.bf16.mxu1 %v3509_v15  ;;  %v3567_v14 = vld [vmem:[%s4789_s1 + $0x2e0] ss:$8 sps:$4 sm:$0xff]   ;;  %v4444_v15 = vcombine.low %v4253_v3, %v4253_v3  ;;  %v2080_v3 = vrot.slane %v2078_v6, 1  ;;  %v3620_v6 = vld [vmem:[%s4789_s1 + $0x750] ss:$8 sps:$4 sm:$0xff]  }
  0x95   : > { %1987 = vmatprep.subr.bf16.mxu0 %v3512_v16  ;;  %v3575_v16 = vld [vmem:[%s4789_s1 + $0x2f4] ss:$8 sps:$4 sm:$0xff]  }
  0x97   : > { %897 = vmatpush1.bf16.msra.mxu1 %v3507_v19  ;;  %v3578_v19 = vld [vmem:[%s4789_s1 + $0x6f4] ss:$8 sps:$4 sm:$0xff]  }
  0x98   : > { %1988 = vmatpush1.bf16.msra.mxu0 %v3510_v20  ;;  %898 = vmatprep.subr.bf16.mxu1 %v3515_v21  ;;  %v2083_v20 = vrot.slane %v2081_v7, 2  ;;  %v2088_v21 = vrot.slane %v2086_v8, 1  ;;  %v3625_v7 = vld [vmem:[%s4789_s1 + $0x364] ss:$8 sps:$4 sm:$0xff]  }
  0x99   : > { %1989 = vmatprep.subr.bf16.mxu0 %v3518_v22  ;;  %v2091_v22 = vrot.slane %v2089_v9, 2  ;;  %v3628_v8 = vld [vmem:[%s4789_s1 + $0x764] ss:$8 sps:$4 sm:$0xff]   ;;  %v3623_v9 = vld [vmem:[%s4789_s1 + $0x360] ss:$8 sps:$4 sm:$0xff]  }
  0x9b   : > { %899 = vmatpush1.bf16.msra.mxu1 %v3513_v23  ;;  %v1001_v23 = vrot.slane %v999_v10, 2  ;;  %v3626_v10 = vld [vmem:[%s4789_s1 + $0x760] ss:$8 sps:$4 sm:$0xff]  }
  0x9c   : > { %1990 = vmatpush1.bf16.msra.mxu0 %v3516_v24  ;;  %900 = vmatprep.subr.bf16.mxu1 %v3521_v25  ;;  %v1004_v24 = vrot.slane %v1002_v11, 3  ;;  %v1009_v25 = vrot.slane %v1007_v12, 2  ;;  %v3631_v11 = vld [vmem:[%s4789_s1 + $0x374] ss:$8 sps:$4 sm:$0xff]  }
  0x9d   : > { %1991 = vmatprep.subr.bf16.mxu0 %v3524_v26  ;;  %v1012_v26 = vrot.slane %v1010_v13, 3  ;;  %v3634_v12 = vld [vmem:[%s4789_s1 + $0x774] ss:$8 sps:$4 sm:$0xff]   ;;  %v3629_v13 = vld [vmem:[%s4789_s1 + $0x370] ss:$8 sps:$4 sm:$0xff]  }
  0x9f   : > { %901 = vmatpush1.bf16.msra.mxu1 %v3519_v27  ;;  %v720_v27 = vrot.slane %v2801_v5, 1  ;;  %v3617_v5 = vld [vmem:[%s4789_s1 + $0x350] ss:$8 sps:$4 sm:$0xff]  }
  0xa0   : > { %1992 = vmatpush1.bf16.msra.mxu0 %v3522_v28  ;;  %902 = vmatprep.subr.bf16.mxu1 %v3527_v29  ;;  %v721_v28 = vrot.slane %v2803_v49, 1  ;;  %v1811_v29 = vrot.slane %v4440_v4, 1  ;;  %v3640_v49 = vld [vmem:[%s4789_s1 + $0x784] ss:$8 sps:$4 sm:$0xff]  }
  0xa1   : > { %1993 = vmatprep.subr.bf16.mxu0 %v3530_v30  ;;  %v1812_v30 = vrot.slane %v4444_v15, 1 }
  0xa3   : > { %903 = vmatpush1.bf16.msra.mxu1 %v3525_v31  ;;  %v3583_v31 = vld [vmem:[%s4789_s1 + $0x304] ss:$8 sps:$4 sm:$0xff]  }
  0xa4   : > { %1994 = vmatpush1.bf16.msra.mxu0 %v3528_v32  ;;  %904 = vmatprep.subr.bf16.mxu1 %v3533_v33  ;;  %v3588_v32 = vld [vmem:[%s4789_s1 + $0x704] ss:$8 sps:$4 sm:$0xff]   ;;  %v3581_v33 = vld [vmem:[%s4789_s1 + $0x300] ss:$8 sps:$4 sm:$0xff]  }
  0xa5   : > { %1995 = vmatprep.subr.bf16.mxu0 %v3536_v34  ;;  %v1005_v34 = vor.u32 %v1004_v24, %v1001_v23  ;;  %v3647_v23 = vld [vmem:[%s4789_s1 + $0x3a0] ss:$8 sps:$4 sm:$0xff]  }
  0xa6   : > { %v3650_v24 = vld [vmem:[%s4789_s1 + $0x7a0] ss:$8 sps:$4 sm:$0xff]  }
  0xa7   : > { %905 = vmatpush1.bf16.msra.mxu1 %v3531_v35  ;;  %v1013_v35 = vor.u32 %v1012_v26, %v1009_v25  ;;  %v3655_v25 = vld [vmem:[%s4789_s1 + $0x3b4] ss:$8 sps:$4 sm:$0xff]  }
  0xa8   : > { %1996 = vmatpush1.bf16.msra.mxu0 %v3534_v17  ;;  %906 = vmatprep.subr.bf16.mxu1 %v3539_v36  ;;  %v2084_v17 = vor.u32 %v2083_v20, %v2080_v3  ;;  %v2092_v36 = vor.u32 %v2091_v22, %v2088_v21  ;;  %v3641_v3 = vld [vmem:[%s4789_s1 + $0x390] ss:$8 sps:$4 sm:$0xff]   ;;  %v3649_v21 = vld [vmem:[%s4789_s1 + $0x3a4] ss:$8 sps:$4 sm:$0xff]   ;;  %v3658_v26 = vld [vmem:[%s4789_s1 + $0x7b4] ss:$8 sps:$4 sm:$0xff]  }
  0xa9   : > { %1997 = vmatprep.subr.bf16.mxu0 %v3542_v37  ;;  %v3586_v37 = vld [vmem:[%s4789_s1 + $0x700] ss:$8 sps:$4 sm:$0xff]   ;;  %v3644_v20 = vld [vmem:[%s4789_s1 + $0x790] ss:$8 sps:$4 sm:$0xff]   ;;  %v3652_v22 = vld [vmem:[%s4789_s1 + $0x7a4] ss:$8 sps:$4 sm:$0xff]  }
  0xab   : > { %907 = vmatpush1.bf16.msra.mxu1 %v3537_v38  ;;  %v722_v38 = vsel %vm719_vm2, %v720_v27, %v721_v28  ;;  %v3653_v27 = vld [vmem:[%s4789_s1 + $0x3b0] ss:$8 sps:$4 sm:$0xff]  }
  0xac   : > { %1998 = vmatpush1.bf16.msra.mxu0 %v3540_v39  ;;  %908 = vmatprep.subr.bf16.mxu1 %v3545_v40  ;;  %v1813_v39 = vsel %vm719_vm2, %v1811_v29, %v1812_v30  ;;  %v3595_v40 = vld [vmem:[%s4789_s1 + $0x314] ss:$8 sps:$4 sm:$0xff]   ;;  %v3656_v28 = vld [vmem:[%s4789_s1 + $0x7b0] ss:$8 sps:$4 sm:$0xff]   ;;  %v3661_v29 = vld [vmem:[%s4789_s1 + $0x3c4] ss:$8 sps:$4 sm:$0xff]  }
  0xad   : > { %1999 = vmatprep.subr.bf16.mxu0 %v3548_v18  ;;  %v3598_v18 = vld [vmem:[%s4789_s1 + $0x714] ss:$8 sps:$4 sm:$0xff]   ;;  %v3664_v30 = vld [vmem:[%s4789_s1 + $0x7c4] ss:$8 sps:$4 sm:$0xff]  }
  0xaf   : > { %909 = vmatpush1.bf16.msra.mxu1 %v3543_v41  ;;  %v1014_v41 = vsel %vm980_vm3, %v1005_v34, %v1013_v35  ;;  %v2871_v34 = vcombine.low %v4400_v54, %v4400_v54  ;;  %v3667_v35 = vld [vmem:[%s4789_s1 + $0x3d4] ss:$8 sps:$4 sm:$0xff]   ;;  %v2064_v54 = vshll.u32 %v4440_v4, 16 }
  0xb0   : > { %2000 = vmatpush1.bf16.msra.mxu0 %v3546_v42  ;;  %910 = vmatprep.subr.bf16.mxu1 %v3551_v43  ;;  %v2093_v42 = vsel %vm2059_vm4, %v2084_v17, %v2092_v36  ;;  %v3593_v43 = vld [vmem:[%s4789_s1 + $0x310] ss:$8 sps:$4 sm:$0xff]   ;;  %v3670_v17 = vld [vmem:[%s4789_s1 + $0x7d4] ss:$8 sps:$4 sm:$0xff]  }
  0xb1   : > { %2001 = vmatprep.subr.bf16.mxu0 %v3554_v44  ;;  %v3596_v44 = vld [vmem:[%s4789_s1 + $0x710] ss:$8 sps:$4 sm:$0xff]  }
  0xb2   : > { %v3665_v36 = vld [vmem:[%s4789_s1 + $0x3d0] ss:$8 sps:$4 sm:$0xff]  }
  0xb3   : > { %911 = vmatpush1.bf16.msra.mxu1 %v3549_v45  ;;  %v3601_v45 = vld [vmem:[%s4789_s1 + $0x324] ss:$8 sps:$4 sm:$0xff]  }
  0xb4   : > { %2002 = vmatpush1.bf16.msra.mxu0 %v3552_v46  ;;  %912 = vmatprep.subr.bf16.mxu1 %v3557_v47  ;;  %v3604_v46 = vld [vmem:[%s4789_s1 + $0x724] ss:$8 sps:$4 sm:$0xff]   ;;  %v3599_v47 = vld [vmem:[%s4789_s1 + $0x320] ss:$8 sps:$4 sm:$0xff]  }
  0xb5   : > { %2003 = vmatprep.subr.bf16.mxu0 %v3560_v48  ;;  %v3602_v48 = vld [vmem:[%s4789_s1 + $0x720] ss:$8 sps:$4 sm:$0xff]  }
  0xb7   : > { %913 = vmatpush1.bf16.msra.mxu1 %v3555_v50  ;;  %v3607_v50 = vld [vmem:[%s4789_s1 + $0x334] ss:$8 sps:$4 sm:$0xff]  }
  0xb8   : > { %2004 = vmatpush1.bf16.msra.mxu0 %v3558_v51  ;;  %914 = vmatprep.subr.bf16.mxu1 %v3563_v52  ;;  %v3610_v51 = vld [vmem:[%s4789_s1 + $0x734] ss:$8 sps:$4 sm:$0xff]   ;;  %v3605_v52 = vld [vmem:[%s4789_s1 + $0x330] ss:$8 sps:$4 sm:$0xff]  }
  0xb9   : > { %2005 = vmatprep.subr.bf16.mxu0 %v3566_v55  ;;  %v3608_v55 = vld [vmem:[%s4789_s1 + $0x730] ss:$8 sps:$4 sm:$0xff]  }
  0xbb   : > { %915 = vmatpush1.bf16.msra.mxu1 %v3561_v61  ;;  %v3611_v61 = vld [vmem:[%s4789_s1 + $0x340] ss:$8 sps:$4 sm:$0xff]  }
  0xbc   : > { %2006 = vmatpush1.bf16.msra.mxu0 %v3564_v62  ;;  %916 = vmatprep.subr.bf16.mxu1 %v3569_v0  ;;  %v3614_v62 = vld [vmem:[%s4789_s1 + $0x740] ss:$8 sps:$4 sm:$0xff]   ;;  %v3619_v0 = vld [vmem:[%s4789_s1 + $0x354] ss:$8 sps:$4 sm:$0xff]  }
  0xbd   : > { %2007 = vmatprep.subr.bf16.mxu0 %v3572_v1  ;;  %v3622_v1 = vld [vmem:[%s4789_s1 + $0x754] ss:$8 sps:$4 sm:$0xff]  }
  0xbf   : > { %917 = vmatpush1.bf16.msra.mxu1 %v3567_v14  ;;  %v3632_v14 = vld [vmem:[%s4789_s1 + $0x770] ss:$8 sps:$4 sm:$0xff]  }
  0xc0   : > { %2008 = vmatpush1.bf16.msra.mxu0 %v3570_v57  ;;  %918 = vmatprep.subr.bf16.mxu1 %v3575_v16  ;;  %v3637_v57 = vld [vmem:[%s4789_s1 + $0x384] ss:$8 sps:$4 sm:$0xff]   ;;  %v3635_v16 = vld [vmem:[%s4789_s1 + $0x380] ss:$8 sps:$4 sm:$0xff]  }
  0xc1   : > { %2009 = vmatprep.subr.bf16.mxu0 %v3578_v19  ;;  %v3638_v19 = vld [vmem:[%s4789_s1 + $0x780] ss:$8 sps:$4 sm:$0xff]  }
  0xc3   : > { %919 = vmatpush1.bf16.msra.mxu1 %v3573_v58  ;;  %v3643_v58 = vld [vmem:[%s4789_s1 + $0x394] ss:$8 sps:$4 sm:$0xff]  }
  0xc4   : > { %2010 = vmatpush1.bf16.msra.mxu0 %v3576_v63  ;;  %1177 = vmatprep.subr.bf16.mxu1 %v3583_v31  ;;  %v3646_v63 = vld [vmem:[%s4789_s1 + $0x794] ss:$8 sps:$4 sm:$0xff]   ;;  %v3659_v31 = vld [vmem:[%s4789_s1 + $0x3c0] ss:$8 sps:$4 sm:$0xff]  }
  0xc5   : > { %2256 = vmatprep.subr.bf16.mxu0 %v3588_v32  ;;  %v3662_v32 = vld [vmem:[%s4789_s1 + $0x7c0] ss:$8 sps:$4 sm:$0xff]  }
  0xc6   : > { %921 = vmatmul.mubr.bf16.vlgmr.msra.gmra.mrb[0].mxu1 %v722_v38  ;;  %v3668_v38 = vld [vmem:[%s4789_s1 + $0x7d0] ss:$8 sps:$4 sm:$0xff]  }
  0xc7   : > { %2012 = vmatmul.mubr.bf16.vlgmr.msra.gmra.mrb[0].mxu0 %v1813_v39  ;;  %1178 = vmatpush1.bf16.msra.mxu1 %v3581_v33  ;;  %v2869_v33 = vcombine.low %v4397_v53, %v4406_v56  ;;  %v2061_v53 = vshrl.u32 %v4440_v4, 16  ;;  %v2069_v56 = vshrl.u32 %v4444_v15, 16  ;;  %v3673_v4 = vld [vmem:[%s4789_s1 + $0x3e4] ss:$8 sps:$4 sm:$0xff]  }
  0xc8   : > { %2257 = vmatpush1.bf16.msra.mxu0 %v3586_v37  ;;  %1179 = vmatprep.subr.bf16.mxu1 %v3595_v40  ;;  %v2072_v37 = vshll.u32 %v4444_v15, 16  ;;  %v3676_v15 = vld [vmem:[%s4789_s1 + $0x7e4] ss:$8 sps:$4 sm:$0xff]  }
  0xc9   : > { %2258 = vmatprep.subr.bf16.mxu0 %v3598_v18  ;;  %1209 = vmatprep.mubr.bf16.mxu1 %v1014_v41  ;;  %v982_v39 = vshrl.u32 %v2869_v33, 16  ;;  %v985_v40 = vshll.u32 %v2869_v33, 16  ;;  %v990_v18 = vshrl.u32 %v2871_v34, 16  ;;  %v993_v41 = vshll.u32 %v2871_v34, 16  ;;  %v3719_v33 = vld [vmem:[%s4789_s1 + $0x8a4] ss:$8 sps:$4 sm:$0xff]  }
  0xca   : > { %2288 = vmatprep.mubr.bf16.mxu0 %v2093_v42  ;;  %v4647_v42 = vld [vmem:[%s3918_s30 + $0x8] sm:$0xcc] }
  0xcb   : > { %1180 = vmatpush1.bf16.msra.mxu1 %v3593_v43  ;;  %v4650_v43 = vld [vmem:[%s3918_s30 + $0x18] sm:$0x33]  ;;  %v3717_v34 = vld [vmem:[%s4789_s1 + $0x8a0] ss:$8 sps:$4 sm:$0xff]  }
  0xcc   : > { %2259 = vmatpush1.bf16.msra.mxu0 %v3596_v44  ;;  %1181 = vmatprep.subr.bf16.mxu1 %v3601_v45  ;;  %v3671_v44 = vld [vmem:[%s4789_s1 + $0x3e0] ss:$8 sps:$4 sm:$0xff]   ;;  %v2063_v45 = vrot.slane %v2061_v53, 1 }
  0xcd   : > { %2260 = vmatprep.subr.bf16.mxu0 %v3604_v46  ;;  %v2066_v46 = vrot.slane %v2064_v54, 2  ;;  %v3723_v53 = vld [vmem:[%s4789_s1 + $0x8c0] ss:$8 sps:$4 sm:$0xff]   ;;  %v3728_v54 = vld [vmem:[%s4789_s1 + $0x8d4] ss:$8 sps:$4 sm:$0xff]  }
  0xcf   : > { %1182 = vmatpush1.bf16.msra.mxu1 %v3599_v47  ;;  %v2071_v47 = vrot.slane %v2069_v56, 1  ;;  %v3726_v56 = vld [vmem:[%s4789_s1 + $0x8d0] ss:$8 sps:$4 sm:$0xff]  }
  0xd0   : > { %2261 = vmatpush1.bf16.msra.mxu0 %v3602_v48  ;;  %1183 = vmatprep.subr.bf16.mxu1 %v3607_v50  ;;  %v2074_v48 = vrot.slane %v2072_v37, 2  ;;  %v3674_v50 = vld [vmem:[%s4789_s1 + $0x7e0] ss:$8 sps:$4 sm:$0xff]   ;;  %v3731_v37 = vld [vmem:[%s4789_s1 + $0x8e4] ss:$8 sps:$4 sm:$0xff]  }
  0xd1   : > { %2262 = vmatprep.subr.bf16.mxu0 %v3610_v51  ;;  %v984_v51 = vrot.slane %v982_v39, 2  ;;  %v3201_v39 = vcombine.low %v4647_v42, %v4250_v2 }
  0xd3   : > { %1184 = vmatpush1.bf16.msra.mxu1 %v3605_v52  ;;  %v987_v52 = vrot.slane %v985_v40, 3  ;;  %v3203_v40 = vcombine.low %v4650_v43, %v4650_v43 }
  0xd4   : > { %2263 = vmatpush1.bf16.msra.mxu0 %v3608_v55  ;;  %1185 = vmatprep.subr.bf16.mxu1 %v3613_v59  ;;  %v992_v55 = vrot.slane %v990_v18, 2  ;;  %v995_v59 = vrot.slane %v993_v41, 3  ;;  %v3734_v18 = vld [vmem:[%s4789_s1 + $0x8f4] ss:$8 sps:$4 sm:$0xff]   ;;  %v3732_v41 = vld [vmem:[%s4789_s1 + $0x8f0] ss:$8 sps:$4 sm:$0xff]  }
  0xd5   : > { %2264 = vmatprep.subr.bf16.mxu0 %v3616_v60  ;;  %v3679_v60 = vld [vmem:[%s4789_s1 + $0x3f4] ss:$8 sps:$4 sm:$0xff]  }
  0xd7   : > { %1186 = vmatpush1.bf16.msra.mxu1 %v3611_v61  ;;  %v3682_v61 = vld [vmem:[%s4789_s1 + $0x7f4] ss:$8 sps:$4 sm:$0xff]  }
  0xd8   : > { %2265 = vmatpush1.bf16.msra.mxu0 %v3614_v62  ;;  %1187 = vmatprep.subr.bf16.mxu1 %v3619_v0  ;;  %v3202_v62 = vcombine.high %v4647_v42, %v4250_v2  ;;  %v3204_v0 = vcombine.high %v4650_v43, %v4650_v43 }
  0xd9   : > { %2266 = vmatprep.subr.bf16.mxu0 %v3622_v1  ;;  %v2067_v1 = vor.u32 %v2066_v46, %v2063_v45  ;;  %v2566_v46 = vlaneseq }
  0xdb   : > { %1188 = vmatpush1.bf16.msra.mxu1 %v3617_v5  ;;  %v3677_v5 = vld [vmem:[%s4789_s1 + $0x3f0] ss:$8 sps:$4 sm:$0xff]  }
  0xdc   : > { %2267 = vmatpush1.bf16.msra.mxu0 %v3620_v6  ;;  %1189 = vmatprep.subr.bf16.mxu1 %v3625_v7  ;;  %v3680_v6 = vld [vmem:[%s4789_s1 + $0x7f0] ss:$8 sps:$4 sm:$0xff]   ;;  %v988_v7 = vor.u32 %v987_v52, %v984_v51 }
  0xdd   : > { %2268 = vmatprep.subr.bf16.mxu0 %v3628_v8  ;;  %v996_v8 = vor.u32 %v995_v59, %v992_v55 }
  0xdf   : > { %1190 = vmatpush1.bf16.msra.mxu1 %v3623_v9  ;;  %v2075_v9 = vor.u32 %v2074_v48, %v2071_v47  ;;  %v2567_v47 = vshrl.u32 %v2566_v46, 7 }
  0xe0   : > { %2269 = vmatpush1.bf16.msra.mxu0 %v3626_v10  ;;  %1191 = vmatprep.subr.bf16.mxu1 %v3631_v11  ;;  %v3689_v10 = vld [vmem:[%s4789_s1 + $0x804] ss:$8 sps:$4 sm:$0xff]   ;;  %v2352_v11 = vrot.slane %v3202_v62, 2 }
  0xe1   : > { %2270 = vmatprep.subr.bf16.mxu0 %v3634_v12  ;;  %v2353_v12 = vrot.slane %v3204_v0, 2  ;;  %v2568_v48 = vsub.s32 0, %v2567_v47  ;;  %v2572_v51 = vsub.s32 1, %v2567_v47 }
  0xe3   : > { %1192 = vmatpush1.bf16.msra.mxu1 %v3629_v13  ;;  %v997_v13 = vsel %vm980_vm3, %v988_v7, %v996_v8 }
  0xe4   : > { %2271 = vmatpush1.bf16.msra.mxu0 %v3632_v14  ;;  %1193 = vmatprep.subr.bf16.mxu1 %v3637_v57  ;;  %v3687_v14 = vld [vmem:[%s4789_s1 + $0x800] ss:$8 sps:$4 sm:$0xff]   ;;  %v2076_v57 = vsel %vm2059_vm4, %v2067_v1, %v2075_v9 }
  0xe5   : > { %2272 = vmatprep.subr.bf16.mxu0 %v3640_v49  ;;  %v3692_v49 = vld [vmem:[%s4789_s1 + $0x814] ss:$8 sps:$4 sm:$0xff]  }
  0xe7   : > { %1194 = vmatpush1.bf16.msra.mxu1 %v3635_v16  ;;  %v2354_v16 = vsel %vm2348_vm5, %v2352_v11, %v2353_v12 }
  0xe8   : > { %2273 = vmatpush1.bf16.msra.mxu0 %v3638_v19  ;;  %1195 = vmatprep.subr.bf16.mxu1 %v3643_v58  ;;  %v3690_v19 = vld [vmem:[%s4789_s1 + $0x810] ss:$8 sps:$4 sm:$0xff]   ;;  %v3695_v58 = vld [vmem:[%s4789_s1 + $0x824] ss:$8 sps:$4 sm:$0xff]  }
  0xe9   : > { %2274 = vmatprep.subr.bf16.mxu0 %v3646_v63  ;;  %v3693_v63 = vld [vmem:[%s4789_s1 + $0x820] ss:$8 sps:$4 sm:$0xff]  }
  0xeb   : > { %1196 = vmatpush1.bf16.msra.mxu1 %v3641_v3  ;;  %v3698_v3 = vld [vmem:[%s4789_s1 + $0x834] ss:$8 sps:$4 sm:$0xff]  }
  0xec   : > { %2275 = vmatpush1.bf16.msra.mxu0 %v3644_v20  ;;  %1197 = vmatprep.subr.bf16.mxu1 %v3649_v21  ;;  %v3696_v20 = vld [vmem:[%s4789_s1 + $0x830] ss:$8 sps:$4 sm:$0xff]   ;;  %v3701_v21 = vld [vmem:[%s4789_s1 + $0x844] ss:$8 sps:$4 sm:$0xff]  }
  0xed   : > { %2276 = vmatprep.subr.bf16.mxu0 %v3652_v22  ;;  %v3699_v22 = vld [vmem:[%s4789_s1 + $0x840] ss:$8 sps:$4 sm:$0xff]  }
  0xef   : > { %1198 = vmatpush1.bf16.msra.mxu1 %v3647_v23  ;;  %v3704_v23 = vld [vmem:[%s4789_s1 + $0x854] ss:$8 sps:$4 sm:$0xff]  }
  0xf0   : > { %2277 = vmatpush1.bf16.msra.mxu0 %v3650_v24  ;;  %1199 = vmatprep.subr.bf16.mxu1 %v3655_v25  ;;  %v3702_v24 = vld [vmem:[%s4789_s1 + $0x850] ss:$8 sps:$4 sm:$0xff]   ;;  %v3707_v25 = vld [vmem:[%s4789_s1 + $0x864] ss:$8 sps:$4 sm:$0xff]  }
  0xf1   : > { %2278 = vmatprep.subr.bf16.mxu0 %v3658_v26  ;;  %v3705_v26 = vld [vmem:[%s4789_s1 + $0x860] ss:$8 sps:$4 sm:$0xff]  }
  0xf3   : > { %1200 = vmatpush1.bf16.msra.mxu1 %v3653_v27  ;;  %v3710_v27 = vld [vmem:[%s4789_s1 + $0x874] ss:$8 sps:$4 sm:$0xff]  }
  0xf4   : > { %2279 = vmatpush1.bf16.msra.mxu0 %v3656_v28  ;;  %1201 = vmatprep.subr.bf16.mxu1 %v3661_v29  ;;  %v3708_v28 = vld [vmem:[%s4789_s1 + $0x870] ss:$8 sps:$4 sm:$0xff]   ;;  %v3713_v29 = vld [vmem:[%s4789_s1 + $0x884] ss:$8 sps:$4 sm:$0xff]  }
  0xf5   : > { %2280 = vmatprep.subr.bf16.mxu0 %v3664_v30  ;;  %v3711_v30 = vld [vmem:[%s4789_s1 + $0x880] ss:$8 sps:$4 sm:$0xff]  }
  0xf7   : > { %1202 = vmatpush1.bf16.msra.mxu1 %v3659_v31  ;;  %v3716_v31 = vld [vmem:[%s4789_s1 + $0x894] ss:$8 sps:$4 sm:$0xff]  }
  0xf8   : > { %2281 = vmatpush1.bf16.msra.mxu0 %v3662_v32  ;;  %1203 = vmatprep.subr.bf16.mxu1 %v3667_v35  ;;  %v3714_v32 = vld [vmem:[%s4789_s1 + $0x890] ss:$8 sps:$4 sm:$0xff]   ;;  %v3722_v35 = vld [vmem:[%s4789_s1 + $0x8b4] ss:$8 sps:$4 sm:$0xff]  }
  0xf9   : > { %2282 = vmatprep.subr.bf16.mxu0 %v3670_v17  ;;  %v3720_v17 = vld [vmem:[%s4789_s1 + $0x8b0] ss:$8 sps:$4 sm:$0xff]  }
  0xfb   : > { %1204 = vmatpush1.bf16.msra.mxu1 %v3665_v36  ;;  %v3725_v36 = vld [vmem:[%s4789_s1 + $0x8c4] ss:$8 sps:$4 sm:$0xff]  }
  0xfc   : > { %2283 = vmatpush1.bf16.msra.mxu0 %v3668_v38  ;;  %1205 = vmatprep.subr.bf16.mxu1 %v3673_v4  ;;  %v3729_v38 = vld [vmem:[%s4789_s1 + $0x8e0] ss:$8 sps:$4 sm:$0xff]   ;;  %v2349_v4 = vrot.slane %v3201_v39, 2 }
  0xfd   : > { %2284 = vmatprep.subr.bf16.mxu0 %v3676_v15  ;;  %v2350_v15 = vrot.slane %v3203_v40, 2 }
  0xff   : > { %1206 = vmatpush1.bf16.msra.mxu1 %v3671_v44  ;;  %v2351_v44 = vsel %vm2348_vm5, %v2349_v4, %v2350_v15 }
 0x100   : > { %2285 = vmatpush1.bf16.msra.mxu0 %v3674_v50  ;;  %1207 = vmatprep.subr.bf16.mxu1 %v3679_v60  ;;  %v2564_v50 = vld [vmem:[%s4790_s2] sm:$0x3] }
 0x101   : > { %2286 = vmatprep.subr.bf16.mxu0 %v3682_v61  ;;  %v2569_v52 = vrot.slane %v2564_v50, %v2568_v48  ;;  %v2573_v59 = vrot.slane %v2564_v50, %v2572_v51 }
 0x103   : > { %1208 = vmatpush1.bf16.msra.mxu1 %v3677_v5 }
 0x104   : > { %2287 = vmatpush1.bf16.msra.mxu0 %v3680_v6 }
 0x105   : > { %2517 = vmatprep.subr.bf16.mxu0 %v3689_v10 }
 0x106   : > { %1210 = vmatmul.mubr.bf16.vlgmr.msra.gmra.mrb[0].mxu1 %v997_v13 }
 0x107   : > { %2289 = vmatmul.mubr.bf16.vlgmr.msra.gmra.mrb[0].mxu0 %v2076_v57 }
 0x108   : > { %2518 = vmatpush1.bf16.msra.mxu0 %v3687_v14  ;;  %2549 = vmatprep.mubr.bf16.mxu0 %v2354_v16 }
 0x109   : > { %2519 = vmatprep.subr.bf16.mxu0 %v3692_v49  ;;  %v2604_v49 = vld [vmem:[%s170_s15 + $0x8] sm:$0xff] }
 0x10c   : > { %2520 = vmatpush1.bf16.msra.mxu0 %v3690_v19 }
 0x10d   : > { %2521 = vmatprep.subr.bf16.mxu0 %v3695_v58 }
 0x110   : > { %2522 = vmatpush1.bf16.msra.mxu0 %v3693_v63 }
 0x111   : > { %2523 = vmatprep.subr.bf16.mxu0 %v3698_v3 }
 0x114   : > { %2524 = vmatpush1.bf16.msra.mxu0 %v3696_v20 }
 0x115   : > { %2525 = vmatprep.subr.bf16.mxu0 %v3701_v21 }
 0x118   : > { %2526 = vmatpush1.bf16.msra.mxu0 %v3699_v22 }
 0x119   : > { %2527 = vmatprep.subr.bf16.mxu0 %v3704_v23 }
 0x11c   : > { %2528 = vmatpush1.bf16.msra.mxu0 %v3702_v24 }
 0x11d   : > { %2529 = vmatprep.subr.bf16.mxu0 %v3707_v25 }
 0x120   : > { %2530 = vmatpush1.bf16.msra.mxu0 %v3705_v26 }
 0x121   : > { %2531 = vmatprep.subr.bf16.mxu0 %v3710_v27 }
 0x124   : > { %2532 = vmatpush1.bf16.msra.mxu0 %v3708_v28 }
 0x125   : > { %2533 = vmatprep.subr.bf16.mxu0 %v3713_v29 }
 0x128   : > { %2534 = vmatpush1.bf16.msra.mxu0 %v3711_v30 }
 0x129   : > { %2535 = vmatprep.subr.bf16.mxu0 %v3716_v31 }
 0x12c   : > { %2536 = vmatpush1.bf16.msra.mxu0 %v3714_v32 }
 0x12d   : > { %2537 = vmatprep.subr.bf16.mxu0 %v3719_v33 }
 0x130   : > { %2538 = vmatpush1.bf16.msra.mxu0 %v3717_v34 }
 0x131   : > { %2539 = vmatprep.subr.bf16.mxu0 %v3722_v35 }
 0x134   : > { %2540 = vmatpush1.bf16.msra.mxu0 %v3720_v17 }
 0x135   : > { %2541 = vmatprep.subr.bf16.mxu0 %v3725_v36 }
 0x138   : > { %2542 = vmatpush1.bf16.msra.mxu0 %v3723_v53 }
 0x139   : > { %2543 = vmatprep.subr.bf16.mxu0 %v3728_v54 }
 0x13c   : > { %2544 = vmatpush1.bf16.msra.mxu0 %v3726_v56 }
 0x13d   : > { %2545 = vmatprep.subr.bf16.mxu0 %v3731_v37 }
 0x140   : > { %2546 = vmatpush1.bf16.msra.mxu0 %v3729_v38 }
 0x141   : > { %2547 = vmatprep.subr.bf16.mxu0 %v3734_v18 }
 0x144   : > { %2548 = vmatpush1.bf16.msra.mxu0 %v3732_v41 }
 0x147   : > { %2550 = vmatmul.mubr.bf16.vlgmr.msra.gmra.mrb[0].mxu0 %v2351_v44 }
 0x1d9   : > { %v1211_v2 = vpop.f32.mrb[0].mxu1 }
 0x1da   : > { %v1213_v42 = vpop.f32.mrb[1].mxu1 }
 0x1db   : > { %v1215_v43 = vpop.f32.mrb[2].mxu1 }
 0x1dc   : > { %v1217_v45 = vpop.f32.mrb[3].mxu1 }
 0x21a   : > { %v2551_v55 = vpop.f32.mrb[0].mxu0 }
 0x21b   : > { %v3245_v60 = vadd.f32 %v2551_v55, %v1211_v2  ;;  %v2553_v61 = vpop.f32.mrb[1].mxu0 }
 0x21c   : > { %v3246_v62 = vadd.f32 %v2553_v61, %v1213_v42  ;;  %v2555_v0 = vpop.f32.mrb[2].mxu0 }
 0x21d   : > { %v2576_v1 = vadd.f32 %v3245_v60, %v2569_v52  ;;  %v3247_v5 = vadd.f32 %v2555_v0, %v1215_v43  ;;  %v2557_v6 = vpop.f32.mrb[3].mxu0 }
 0x21e   : > { %v2577_v7 = vadd.f32 %v3246_v62, %v2573_v59  ;;  %v3248_v8 = vadd.f32 %v2557_v6, %v1217_v45 }
 0x21f   : > { %v2580_v9 = vmax.f32 %v2576_v1, 0.0  ;;  %v2578_v10 = vadd.f32 %v3247_v5, %v2569_v52 }
 0x220   : > { %v2581_v11 = vmax.f32 %v2577_v7, 0.0  ;;  %v2579_v12 = vadd.f32 %v3248_v8, %v2573_v59 }
 0x221   : > { %v2582_v13 = vmax.f32 %v2578_v10, 0.0 }
 0x222   : > { %v3243_v14 = vpack.c.bf16 %v2581_v11, %v2580_v9  ;;  %v2583_v57 = vmax.f32 %v2579_v12, 0.0 }
 0x224   : > { %2596 = vst [vmem:[%s170_s15] sm:$0xff] %v3243_v14  ;;  %v3244_v16 = vpack.c.bf16 %v2583_v57, %v2582_v13 }
 0x226   : > { %v2605_v19 = vsel %vm2603_vm12, %v3244_v16, %v2604_v49 }
 0x227   : > { %2606 = vst [vmem:[%s170_s15 + $0x8] sm:$0xff] %v2605_v19 }
 0x228 PF: > { %s13_s12 = sadd.s32 1, %s3746_s12  }
 0x229   : > { %p10_p4 = scmp.ge.s32.totalorder %s13_s12, 4  }
 0x22b   :  { %12 = sbr.rel (!%p10_p4) target bundleno = 1 (0x1), region = 70 }

</bundles_post_ra>
